<compile_context>
chip_gen: v7x
topology: tpu7x:2x2x1
jax: 0.10.0
libtpu: 0.0.40
codegen_flags: <defaults>
</compile_context>

<pallas_src>
import functools

import jax
import jax.numpy as jnp
from jax.experimental import pallas as pl
from jax.experimental.pallas import tpu as pltpu


# ------------------------------ small helpers ------------------------------ #
def _round_up(x, m):
    return ((x + m - 1) // m) * m


def _cdiv(a, b):
    return -(-a // b)


def _choose_tiles(m, min_tile=128, max_tile=4096):
    """Lane-tile size (multiple of 128) for a flattened spatial axis of length m."""
    m128 = _round_up(m, 128)
    cap = max(max_tile, min_tile)
    if m128 <= cap:
        if m128 >= 2 * max(min_tile, 128):
            # split in two so the 'parallel' grid axis can shard across v7x's 2 TCs
            tile = max(_round_up(_cdiv(m, 2), 128), min_tile)
            return tile, _cdiv(m, tile)
        return max(m128, min_tile), 1
    n = _cdiv(m128, cap)
    tile = max(_round_up(_cdiv(m, n), 128), min_tile)
    return tile, _cdiv(m, tile)


def _elu(y):
    # ELU(alpha=1). exp() is clamped so the discarded branch never produces inf.
    # TODO(synk): use jnp.expm1 once its Mosaic lowering is confirmed; the cancellation
    # for tiny negative y is far below the test tolerance.
    return jnp.where(y > 0.0, y, jnp.exp(jnp.minimum(y, 0.0)) - 1.0)


def bn_affine(gamma, beta, running_mean, running_var, eps=1e-5):
    scale = gamma / jnp.sqrt(running_var + eps)
    bias = beta - running_mean * scale
    return scale, bias


# ------------------------------ Pallas kernel ------------------------------ #
def _stencil_kernel(*refs, offsets, tile_m, halo, apply_elu, has_mask, has_last):
    """out = epilogue( sum_t W[t] @ shift_t(X) ) with a lane-dense output block.

    refs (in order): w (T, rows, Ci) bf16, bias (rows, 1) f32, x (Ci, tile_m) bf16,
                     [lh (Ci, g) bf16, rh (Ci, g) bf16],
                     [mask (1, tile_m) f32],
                     [w_last (1, rows) f32, b_last (1,) f32 in SMEM],
                     out (out_rows, tile_m)
    """
    w_ref, b_ref, x_ref = refs[0], refs[1], refs[2]
    idx = 3
    lh_ref = rh_ref = m_ref = wl_ref = bl_ref = None
    if halo:
        lh_ref, rh_ref = refs[idx], refs[idx + 1]
        idx += 2
    if has_mask:
        m_ref = refs[idx]
        idx += 1
    if has_last:
        wl_ref, bl_ref = refs[idx], refs[idx + 1]
        idx += 2
    o_ref = refs[idx]

    if halo:
        # lane-aligned (128-multiple) concat: [left halo | main block | right halo]
        xw = jnp.concatenate([lh_ref[...], x_ref[...], rh_ref[...]], axis=1)
    else:
        xw = x_ref[...]

    acc = None
    for t, off in enumerate(offsets):          # static, unrolled tap loop (27 or 1 taps)
        if off == 0 and xw.shape[1] == tile_m:
            opnd = xw
        else:
            opnd = xw[:, off:off + tile_m]     # pre-matmul bf16 slice; static lane offset
        part = jnp.dot(w_ref[t], opnd, preferred_element_type=jnp.float32)  # (rows, tile_m)
        acc = part if acc is None else acc + part

    y = acc + b_ref[...]                       # BN bias (scale already folded into W)
    if apply_elu:
        y = _elu(y)
    if has_mask:
        y = y * m_ref[...]                     # zero the spatial padding ring exactly
    if has_last:                               # fused 1x1x1 conv (+ scalar bias) epilogue
        y = jnp.dot(wl_ref[...], y, preferred_element_type=jnp.float32) + bl_ref[0]
    o_ref[...] = y.astype(o_ref.dtype)


def _stencil_matmul(w_taps, x_flat, bias, *, rel_offsets, guard, apply_elu,
                    mask=None, w_last=None, b_last=None, out_dtype=jnp.float32):
    """act((sum_t W_t @ shift_t(X)) + bias) [* mask] [-> fused 1x1 conv + bias].

    x_flat: (Ci, mp) activation, flattened (already zero-padded) spatial volume in lanes.
    Returns (rows, mp); rows = Co, or 1 when the 1x1x1 conv is fused.
    """
    T, rows_mm, ci = w_taps.shape
    _, mp = x_flat.shape
    halo = guard > 0
    g = _round_up(guard, 128) if halo else 0
    tile_m, n_tiles = _choose_tiles(mp, min_tile=max(g, 128))
    Mt = tile_m * n_tiles

    x_bf = x_flat.astype(jnp.bfloat16)
    w_bf = w_taps.astype(jnp.bfloat16)
    offsets = tuple(int(g + r) for r in rel_offsets)

    has_mask = mask is not None
    has_last = w_last is not None
    out_rows = 1 if has_last else rows_mm

    in_specs = [
        pl.BlockSpec((T, rows_mm, ci), lambda i: (0, 0, 0)),   # weight taps, resident
        pl.BlockSpec((rows_mm, 1), lambda i: (0, 0)),          # BN bias per row
    ]
    args = [w_bf, bias.reshape(rows_mm, 1).astype(jnp.float32)]

    if halo:
        # One zero block on each side so the halos of edge tiles read genuine zeros.
        xg = jnp.pad(x_bf, ((0, 0), (tile_m, Mt + tile_m - mp)))
        in_specs.append(pl.BlockSpec((ci, tile_m), lambda i: (0, i + 1)))
        args.append(xg)
        # Small 128-aligned halo side-arrays (no duplicated full windows).
        xr = xg.reshape(ci, n_tiles + 2, tile_m)
        lh = xr[:, 0:n_tiles, tile_m - g:].reshape(ci, n_tiles * g)
        rh = xr[:, 2:n_tiles + 2, :g].reshape(ci, n_tiles * g)
        in_specs.append(pl.BlockSpec((ci, g), lambda i: (0, i)))
        in_specs.append(pl.BlockSpec((ci, g), lambda i: (0, i)))
        args.extend([lh, rh])
    else:
        xg = jnp.pad(x_bf, ((0, 0), (0, Mt - mp)))
        in_specs.append(pl.BlockSpec((ci, tile_m), lambda i: (0, i)))
        args.append(xg)

    if has_mask:
        maskp = jnp.pad(mask.astype(jnp.float32), ((0, 0), (0, Mt - mp)))
        in_specs.append(pl.BlockSpec((1, tile_m), lambda i: (0, i)))
        args.append(maskp)
    if has_last:
        in_specs.append(pl.BlockSpec((1, rows_mm), lambda i: (0, 0)))
        in_specs.append(pl.BlockSpec(memory_space=pltpu.MemorySpace.SMEM))  # scalar bias
        args.append(jnp.asarray(w_last, jnp.float32).reshape(1, rows_mm))
        args.append(jnp.asarray(b_last, jnp.float32).reshape(1,))

    kernel = functools.partial(
        _stencil_kernel, offsets=offsets, tile_m=tile_m, halo=halo,
        apply_elu=apply_elu, has_mask=has_mask, has_last=has_last)

    out = pl.pallas_call(
        kernel,
        out_shape=jax.ShapeDtypeStruct((out_rows, Mt), out_dtype),
        grid=(n_tiles,),
        in_specs=in_specs,
        out_specs=pl.BlockSpec((out_rows, tile_m), lambda i: (0, i)),
        compiler_params=pltpu.CompilerParams(dimension_semantics=("parallel",)),
    )(*args)
    return out[:, :mp]


# ------------------------------ Module forward ----------------------------- #
def last_conv_block_elu(params, x_ncdhw, x_first_ncdhw):
    """Forward of LastConvBlockELU.

    x_ncdhw:       (N, in_channel,             D,  H,  W)
    x_first_ncdhw: (N, in_channel-out_channel, 2D, 2H, 2W)
    returns:       (N, 1, 2D, 2H, 2W) float32
    """
    n, cin, d, h, w = x_ncdhw.shape
    cout = params["w1"].shape[0]
    d2, h2, w2 = 2 * d, 2 * h, 2 * w

    # bf16 activations from the start: halves every wrapper-side transpose/concat/pad pass.
    xb = x_ncdhw.astype(jnp.bfloat16)
    xfb = x_first_ncdhw.astype(jnp.bfloat16)

    # ---- conv_up (ConvTranspose3d k=2 s=2) + BN_up + ELU: one fused matmul ----
    s_up, c_up = bn_affine(*params["bn_up"])
    w_up_mat = params["w_up"] * s_up[None, :, None, None, None]          # (Cin,Cout,2,2,2)
    w_up_mat = jnp.transpose(w_up_mat, (2, 3, 4, 1, 0)).reshape(1, 8 * cout, cin)
    b_up = jnp.tile(c_up, 8)                                             # rows = (kd,kh,kw,co)
    x_cf = jnp.transpose(xb, (1, 0, 2, 3, 4)).reshape(cin, n * d * h * w)
    up = _stencil_matmul(w_up_mat, x_cf, b_up, rel_offsets=(0,), guard=0,
                         apply_elu=True, out_dtype=jnp.bfloat16)
    up = up.reshape(2, 2, 2, cout, n, d, h, w)
    up = jnp.transpose(up, (3, 4, 5, 0, 6, 1, 7, 2)).reshape(cout, n, d2, h2, w2)

    # ---- channel concat (torch.cat dim=1) + one shared zero pad for both 3x3 convs ----
    xf_cf = jnp.transpose(xfb, (1, 0, 2, 3, 4))
    cat = jnp.concatenate([up, xf_cf], axis=0)                           # (Cin, n, D2, H2, W2)
    catp = jnp.pad(cat, ((0, 0), (0, 0), (1, 1), (1, 1), (1, 1)))
    dp, hp, wp = d2 + 2, h2 + 2, w2 + 2
    mp = n * dp * hp * wp
    guard = hp * wp + wp + 1
    rel = tuple((kd - 1) * hp * wp + (kh - 1) * wp + (kw - 1)
                for kd in range(3) for kh in range(3) for kw in range(3))
    # 1 on real voxels, 0 on the 1-voxel padding ring (padded-grid layout).
    ring = jnp.pad(jnp.ones((1, n, d2, h2, w2), jnp.float32),
                   ((0, 0), (0, 0), (1, 1), (1, 1), (1, 1))).reshape(1, mp)

    # ---- conv1 (3x3x3, pad 1) + BN1 + ELU; output stays padded with its ring zeroed ----
    s1, c1 = bn_affine(*params["bn1"])
    w1_taps = jnp.transpose(params["w1"], (2, 3, 4, 0, 1)).reshape(27, cout, cin) \
        * s1[None, :, None]
    y1 = _stencil_matmul(w1_taps, catp.reshape(cin, mp), c1, rel_offsets=rel, guard=guard,
                         apply_elu=True, mask=ring, out_dtype=jnp.bfloat16)

    # ---- conv2 (3x3x3) + BN2 + ELU + last (1x1x1 conv, bias) fused in one kernel ----
    s2, c2 = bn_affine(*params["bn2"])
    w2_taps = jnp.transpose(params["w2"], (2, 3, 4, 0, 1)).reshape(27, cout, cout) \
        * s2[None, :, None]
    y2 = _stencil_matmul(w2_taps, y1, c2, rel_offsets=rel, guard=guard, apply_elu=True,
                         w_last=params["w_last"].reshape(1, cout),
                         b_last=params["b_last"], out_dtype=jnp.float32)

    out = y2.reshape(1, n, dp, hp, wp)[:, :, 1:1 + d2, 1:1 + h2, 1:1 + w2]
    return jnp.transpose(out, (1, 0, 2, 3, 4))


# --------------------------- pure-JAX reference ---------------------------- #
def _reference_forward(params, x, x_first):
    s_up, c_up = bn_affine(*params["bn_up"])
    # ConvTranspose3d(k=2,s=2): out[n,o,2d+i,2h+j,2w+k] = sum_c x[n,c,d,h,w]*W[c,o,i,j,k]
    up = jnp.einsum("ncdhw,coijk->nodihjwk", x, params["w_up"])
    nb, co, D, _, H, _, W, _ = up.shape
    up = up.reshape(nb, co, 2 * D, 2 * H, 2 * W)
    up = jax.nn.elu(up * s_up[None, :, None, None, None] + c_up[None, :, None, None, None])
    cat = jnp.concatenate([up, x_first], axis=1)

    def conv3(x_, w_):
        return jax.lax.conv_general_dilated(
            x_, w_, window_strides=(1, 1, 1), padding=[(1, 1)] * 3,
            dimension_numbers=("NCDHW", "OIDHW", "NCDHW"))

    s1, c1 = bn_affine(*params["bn1"])
    y = jax.nn.elu(conv3(cat, params["w1"]) * s1[None, :, None, None, None]
                   + c1[None, :, None, None, None])
    s2, c2 = bn_affine(*params["bn2"])
    y = jax.nn.elu(conv3(y, params["w2"]) * s2[None, :, None, None, None]
                   + c2[None, :, None, None, None])
    y = jnp.einsum("ncdhw,oc->nodhw", y, params["w_last"].reshape(1, -1)) \
        + params["b_last"].reshape(1, 1, 1, 1, 1)
    return y


# --------------------------------- params ---------------------------------- #
def make_params(key, in_channel, out_channel):
    ks = jax.random.split(key, 8)

    def bn_params(k, c):
        k1, k2, k3, k4 = jax.random.split(k, 4)
        gamma = 1.0 + 0.1 * jax.random.normal(k1, (c,), jnp.float32)
        beta = 0.1 * jax.random.normal(k2, (c,), jnp.float32)
        running_mean = 0.1 * jax.random.normal(k3, (c,), jnp.float32)
        running_var = jax.random.uniform(k4, (c,), jnp.float32, 0.5, 1.5)
        return (gamma, beta, running_mean, running_var)

    return {
        # ConvTranspose3d weight: (in_channel, out_channel, 2, 2, 2)
        "w_up": 0.1 * jax.random.normal(ks[0], (in_channel, out_channel, 2, 2, 2), jnp.float32),
        "bn_up": bn_params(ks[1], out_channel),
        # Conv3d weights: (out_channels, in_channels, kD, kH, kW)
        "w1": 0.1 * jax.random.normal(ks[2], (out_channel, in_channel, 3, 3, 3), jnp.float32),
        "bn1": bn_params(ks[3], out_channel),
        "w2": 0.1 * jax.random.normal(ks[4], (out_channel, out_channel, 3, 3, 3), jnp.float32),
        "bn2": bn_params(ks[5], out_channel),
        "w_last": 0.1 * jax.random.normal(ks[6], (1, out_channel, 1, 1, 1), jnp.float32),
        "b_last": 0.1 * jax.random.normal(ks[7], (1,), jnp.float32),
    }


if __name__ == "__main__":
    key = jax.random.PRNGKey(0)
    in_channel, out_channel = 8, 4
    n, d0, h0, w0 = 2, 4, 4, 4

    k_x, k_xf, k_p = jax.random.split(key, 3)
    # PyTorch-style NCDHW inputs
    x = jax.random.normal(k_x, (n, in_channel, d0, h0, w0), jnp.float32)
    x_first = jax.random.normal(
        k_xf, (n, in_channel - out_channel, 2 * d0, 2 * h0, 2 * w0), jnp.float32)
    params = make_params(k_p, in_channel, out_channel)

    fwd = jax.jit(last_conv_block_elu)
    out = jax.block_until_ready(fwd(params, x, x_first))

    assert out.shape == (n, 1, 2 * d0, 2 * h0, 2 * w0), out.shape
    assert bool(jnp.all(jnp.isfinite(out)))

    # Correctness check against a pure-JAX (f32) reference; tolerance covers the
    # intentional bf16 MXU operands / bf16 carried activations in the Pallas path.
    ref = jax.jit(_reference_forward)(params, x, x_first)
    assert bool(jnp.allclose(out, ref, rtol=0.1, atol=0.1)), \
        float(jnp.max(jnp.abs(out - ref)))

    print("KERNEL_OK")
</pallas_src>

<mosaic_0001>
module attributes {stable_mosaic.version = 11 : i64} {
  func.func @_stencil_kernel(%arg0: i32, %arg1: memref<1x32x8xbf16, #tpu.memory_space<vmem>>, %arg2: memref<32x1xf32, #tpu.memory_space<vmem>>, %arg3: memref<8x128xbf16, #tpu.memory_space<vmem>>, %arg4: memref<32x128xbf16, #tpu.memory_space<vmem>>) attributes {dimension_semantics = [#tpu.dimension_semantics<parallel>], iteration_bounds = array<i64: 1>, scalar_prefetch = 0 : i64, scratch_operands = 0 : i64, tpu.core_type = #tpu.core_type<tc>, window_params = [{pipeline_mode = #tpu.pipeline_mode<synchronous>, transform_indices = @transform_0, window_bounds = array<i64: 1, 32, 8>}, {pipeline_mode = #tpu.pipeline_mode<synchronous>, transform_indices = @transform_1, window_bounds = array<i64: 32, 1>}, {transform_indices = @transform_2, window_bounds = array<i64: 8, 128>}, {transform_indices = @transform_3, window_bounds = array<i64: 32, 128>}]} {
    %c0 = arith.constant 0 : index
    %c0_0 = arith.constant 0 : index
    %0 = vector.load %arg3[%c0, %c0_0] : memref<8x128xbf16, #tpu.memory_space<vmem>>, vector<8x128xbf16>
    %c0_1 = arith.constant 0 : index
    %c0_2 = arith.constant 0 : index
    %c0_3 = arith.constant 0 : index
    %1 = vector.load %arg1[%c0_1, %c0_2, %c0_3] : memref<1x32x8xbf16, #tpu.memory_space<vmem>>, vector<1x32x8xbf16>
    %2 = vector.shape_cast %1 : vector<1x32x8xbf16> to vector<32x8xbf16>
    %cst = arith.constant dense<0.000000e+00> : vector<32x128xf32>
    %3 = tpu.matmul %2, %0, %cst {dimension_numbers = #tpu.dot_dimension_numbers<[1], [0], [0], [1], [0, 0, 1, 1], [], []>} : vector<32x8xbf16>, vector<8x128xbf16>, vector<32x128xf32> -> vector<32x128xf32>
    %c0_4 = arith.constant 0 : index
    %c0_5 = arith.constant 0 : index
    %4 = vector.load %arg2[%c0_4, %c0_5] : memref<32x1xf32, #tpu.memory_space<vmem>>, vector<32x1xf32>
    %5 = vector.broadcast %4 : vector<32x1xf32> to vector<32x128xf32>
    %6 = arith.addf %3, %5 : vector<32x128xf32>
    %cst_6 = arith.constant 0.000000e+00 : f32
    %7 = vector.broadcast %cst_6 : f32 to vector<32x128xf32>
    %8 = arith.cmpf ogt, %6, %7 : vector<32x128xf32>
    %cst_7 = arith.constant 0.000000e+00 : f32
    %9 = vector.broadcast %cst_7 : f32 to vector<32x128xf32>
    %10 = arith.minimumf %6, %9 : vector<32x128xf32>
    %11 = math.exp %10 : vector<32x128xf32>
    %cst_8 = arith.constant 1.000000e+00 : f32
    %12 = vector.broadcast %cst_8 : f32 to vector<32x128xf32>
    %13 = arith.subf %11, %12 : vector<32x128xf32>
    %14 = arith.select %8, %6, %13 : vector<32x128xi1>, vector<32x128xf32>
    %15 = arith.truncf %14 : vector<32x128xf32> to vector<32x128xbf16>
    %c0_9 = arith.constant 0 : index
    %c0_10 = arith.constant 0 : index
    %16 = vector.load %arg4[%c0_9, %c0_10] : memref<32x128xbf16, #tpu.memory_space<vmem>>, vector<32x128xbf16>
    tpu.vector_store %arg4[%c0_9, %c0_10], %15 {strides = array<i32>} : memref<32x128xbf16, #tpu.memory_space<vmem>>, vector<32x128xbf16>,
    return
  }
  func.func @transform_0(%arg0: i32) -> (i32, i32, i32) {
    %c0_i32 = arith.constant 0 : i32
    %c0_i32_0 = arith.constant 0 : i32
    %c0_i32_1 = arith.constant 0 : i32
    %c0_i32_2 = arith.constant 0 : i32
    return %c0_i32, %c0_i32_0, %c0_i32_1 : i32, i32, i32
  }
  func.func @transform_1(%arg0: i32) -> (i32, i32) {
    %c0_i32 = arith.constant 0 : i32
    %c0_i32_0 = arith.constant 0 : i32
    %c0_i32_1 = arith.constant 0 : i32
    return %c0_i32, %c0_i32_0 : i32, i32
  }
  func.func @transform_2(%arg0: i32) -> (i32, i32) {
    %c0_i32 = arith.constant 0 : i32
    %c0_i32_0 = arith.constant 0 : i32
    return %c0_i32, %arg0 : i32, i32
  }
  func.func @transform_3(%arg0: i32) -> (i32, i32) {
    %c0_i32 = arith.constant 0 : i32
    %c0_i32_0 = arith.constant 0 : i32
    return %c0_i32, %arg0 : i32, i32
  }
}

module attributes {stable_mosaic.version = 11 : i64} {
  func.func @_stencil_kernel(%arg0: i32, %arg1: memref<27x4x8xbf16, #tpu.memory_space<vmem>>, %arg2: memref<4x1xf32, #tpu.memory_space<vmem>>, %arg3: memref<8x1024xbf16, #tpu.memory_space<vmem>>, %arg4: memref<8x128xbf16, #tpu.memory_space<vmem>>, %arg5: memref<8x128xbf16, #tpu.memory_space<vmem>>, %arg6: memref<1x1024xf32, #tpu.memory_space<vmem>>, %arg7: memref<4x1024xbf16, #tpu.memory_space<vmem>>) attributes {dimension_semantics = [#tpu.dimension_semantics<parallel>], iteration_bounds = array<i64: 2>, scalar_prefetch = 0 : i64, scratch_operands = 0 : i64, tpu.core_type = #tpu.core_type<tc>, window_params = [{pipeline_mode = #tpu.pipeline_mode<synchronous>, transform_indices = @transform_0, window_bounds = array<i64: 27, 4, 8>}, {pipeline_mode = #tpu.pipeline_mode<synchronous>, transform_indices = @transform_1, window_bounds = array<i64: 4, 1>}, {transform_indices = @transform_2, window_bounds = array<i64: 8, 1024>}, {transform_indices = @transform_3, window_bounds = array<i64: 8, 128>}, {transform_indices = @transform_4, window_bounds = array<i64: 8, 128>}, {transform_indices = @transform_5, window_bounds = array<i64: 1, 1024>}, {transform_indices = @transform_6, window_bounds = array<i64: 4, 1024>}]} {
    %c0 = arith.constant 0 : index
    %c0_0 = arith.constant 0 : index
    %0 = vector.load %arg4[%c0, %c0_0] : memref<8x128xbf16, #tpu.memory_space<vmem>>, vector<8x128xbf16>
    %c0_1 = arith.constant 0 : index
    %c0_2 = arith.constant 0 : index
    %1 = vector.load %arg3[%c0_1, %c0_2] : memref<8x1024xbf16, #tpu.memory_space<vmem>>, vector<8x1024xbf16>
    %c0_3 = arith.constant 0 : index
    %c0_4 = arith.constant 0 : index
    %2 = vector.load %arg5[%c0_3, %c0_4] : memref<8x128xbf16, #tpu.memory_space<vmem>>, vector<8x128xbf16>
    %3 = tpu.concatenate %0, %1, %2 in 1 : vector<8x128xbf16>, vector<8x1024xbf16>, vector<8x128xbf16> -> vector<8x1280xbf16>
    %4 = vector.extract_strided_slice %3 {offsets = [0, 17], sizes = [8, 1024], strides = [1, 1]} : vector<8x1280xbf16> to vector<8x1024xbf16>
    %c0_5 = arith.constant 0 : index
    %c0_6 = arith.constant 0 : index
    %c0_7 = arith.constant 0 : index
    %5 = vector.load %arg1[%c0_5, %c0_6, %c0_7] : memref<27x4x8xbf16, #tpu.memory_space<vmem>>, vector<1x4x8xbf16>
    %6 = vector.shape_cast %5 : vector<1x4x8xbf16> to vector<4x8xbf16>
    %cst = arith.constant dense<0.000000e+00> : vector<4x1024xf32>
    %7 = tpu.matmul %6, %4, %cst {dimension_numbers = #tpu.dot_dimension_numbers<[1], [0], [0], [1], [0, 0, 1, 1], [], []>} : vector<4x8xbf16>, vector<8x1024xbf16>, vector<4x1024xf32> -> vector<4x1024xf32>
    %8 = vector.extract_strided_slice %3 {offsets = [0, 18], sizes = [8, 1024], strides = [1, 1]} : vector<8x1280xbf16> to vector<8x1024xbf16>
    %c1 = arith.constant 1 : index
    %c0_8 = arith.constant 0 : index
    %c0_9 = arith.constant 0 : index
    %9 = vector.load %arg1[%c1, %c0_8, %c0_9] : memref<27x4x8xbf16, #tpu.memory_space<vmem>>, vector<1x4x8xbf16>
    %10 = vector.shape_cast %9 : vector<1x4x8xbf16> to vector<4x8xbf16>
    %cst_10 = arith.constant dense<0.000000e+00> : vector<4x1024xf32>
    %11 = tpu.matmul %10, %8, %cst_10 {dimension_numbers = #tpu.dot_dimension_numbers<[1], [0], [0], [1], [0, 0, 1, 1], [], []>} : vector<4x8xbf16>, vector<8x1024xbf16>, vector<4x1024xf32> -> vector<4x1024xf32>
    %12 = arith.addf %7, %11 : vector<4x1024xf32>
    %13 = vector.extract_strided_slice %3 {offsets = [0, 19], sizes = [8, 1024], strides = [1, 1]} : vector<8x1280xbf16> to vector<8x1024xbf16>
    %c2 = arith.constant 2 : index
    %c0_11 = arith.constant 0 : index
    %c0_12 = arith.constant 0 : index
    %14 = vector.load %arg1[%c2, %c0_11, %c0_12] : memref<27x4x8xbf16, #tpu.memory_space<vmem>>, vector<1x4x8xbf16>
    %15 = vector.shape_cast %14 : vector<1x4x8xbf16> to vector<4x8xbf16>
    %cst_13 = arith.constant dense<0.000000e+00> : vector<4x1024xf32>
    %16 = tpu.matmul %15, %13, %cst_13 {dimension_numbers = #tpu.dot_dimension_numbers<[1], [0], [0], [1], [0, 0, 1, 1], [], []>} : vector<4x8xbf16>, vector<8x1024xbf16>, vector<4x1024xf32> -> vector<4x1024xf32>
    %17 = arith.addf %12, %16 : vector<4x1024xf32>
    %18 = vector.extract_strided_slice %3 {offsets = [0, 27], sizes = [8, 1024], strides = [1, 1]} : vector<8x1280xbf16> to vector<8x1024xbf16>
    %c3 = arith.constant 3 : index
    %c0_14 = arith.constant 0 : index
    %c0_15 = arith.constant 0 : index
    %19 = vector.load %arg1[%c3, %c0_14, %c0_15] : memref<27x4x8xbf16, #tpu.memory_space<vmem>>, vector<1x4x8xbf16>
    %20 = vector.shape_cast %19 : vector<1x4x8xbf16> to vector<4x8xbf16>
    %cst_16 = arith.constant dense<0.000000e+00> : vector<4x1024xf32>
    %21 = tpu.matmul %20, %18, %cst_16 {dimension_numbers = #tpu.dot_dimension_numbers<[1], [0], [0], [1], [0, 0, 1, 1], [], []>} : vector<4x8xbf16>, vector<8x1024xbf16>, vector<4x1024xf32> -> vector<4x1024xf32>
    %22 = arith.addf %17, %21 : vector<4x1024xf32>
    %23 = vector.extract_strided_slice %3 {offsets = [0, 28], sizes = [8, 1024], strides = [1, 1]} : vector<8x1280xbf16> to vector<8x1024xbf16>
    %c4 = arith.constant 4 : index
    %c0_17 = arith.constant 0 : index
    %c0_18 = arith.constant 0 : index
    %24 = vector.load %arg1[%c4, %c0_17, %c0_18] : memref<27x4x8xbf16, #tpu.memory_space<vmem>>, vector<1x4x8xbf16>
    %25 = vector.shape_cast %24 : vector<1x4x8xbf16> to vector<4x8xbf16>
    %cst_19 = arith.constant dense<0.000000e+00> : vector<4x1024xf32>
    %26 = tpu.matmul %25, %23, %cst_19 {dimension_numbers = #tpu.dot_dimension_numbers<[1], [0], [0], [1], [0, 0, 1, 1], [], []>} : vector<4x8xbf16>, vector<8x1024xbf16>, vector<4x1024xf32> -> vector<4x1024xf32>
    %27 = arith.addf %22, %26 : vector<4x1024xf32>
    %28 = vector.extract_strided_slice %3 {offsets = [0, 29], sizes = [8, 1024], strides = [1, 1]} : vector<8x1280xbf16> to vector<8x1024xbf16>
    %c5 = arith.constant 5 : index
    %c0_20 = arith.constant 0 : index
    %c0_21 = arith.constant 0 : index
    %29 = vector.load %arg1[%c5, %c0_20, %c0_21] : memref<27x4x8xbf16, #tpu.memory_space<vmem>>, vector<1x4x8xbf16>
    %30 = vector.shape_cast %29 : vector<1x4x8xbf16> to vector<4x8xbf16>
    %cst_22 = arith.constant dense<0.000000e+00> : vector<4x1024xf32>
    %31 = tpu.matmul %30, %28, %cst_22 {dimension_numbers = #tpu.dot_dimension_numbers<[1], [0], [0], [1], [0, 0, 1, 1], [], []>} : vector<4x8xbf16>, vector<8x1024xbf16>, vector<4x1024xf32> -> vector<4x1024xf32>
    %32 = arith.addf %27, %31 : vector<4x1024xf32>
    %33 = vector.extract_strided_slice %3 {offsets = [0, 37], sizes = [8, 1024], strides = [1, 1]} : vector<8x1280xbf16> to vector<8x1024xbf16>
    %c6 = arith.constant 6 : index
    %c0_23 = arith.constant 0 : index
    %c0_24 = arith.constant 0 : index
    %34 = vector.load %arg1[%c6, %c0_23, %c0_24] : memref<27x4x8xbf16, #tpu.memory_space<vmem>>, vector<1x4x8xbf16>
    %35 = vector.shape_cast %34 : vector<1x4x8xbf16> to vector<4x8xbf16>
    %cst_25 = arith.constant dense<0.000000e+00> : vector<4x1024xf32>
    %36 = tpu.matmul %35, %33, %cst_25 {dimension_numbers = #tpu.dot_dimension_numbers<[1], [0], [0], [1], [0, 0, 1, 1], [], []>} : vector<4x8xbf16>, vector<8x1024xbf16>, vector<4x1024xf32> -> vector<4x1024xf32>
    %37 = arith.addf %32, %36 : vector<4x1024xf32>
    %38 = vector.extract_strided_slice %3 {offsets = [0, 38], sizes = [8, 1024], strides = [1, 1]} : vector<8x1280xbf16> to vector<8x1024xbf16>
    %c7 = arith.constant 7 : index
    %c0_26 = arith.constant 0 : index
    %c0_27 = arith.constant 0 : index
    %39 = vector.load %arg1[%c7, %c0_26, %c0_27] : memref<27x4x8xbf16, #tpu.memory_space<vmem>>, vector<1x4x8xbf16>
    %40 = vector.shape_cast %39 : vector<1x4x8xbf16> to vector<4x8xbf16>
    %cst_28 = arith.constant dense<0.000000e+00> : vector<4x1024xf32>
    %41 = tpu.matmul %40, %38, %cst_28 {dimension_numbers = #tpu.dot_dimension_numbers<[1], [0], [0], [1], [0, 0, 1, 1], [], []>} : vector<4x8xbf16>, vector<8x1024xbf16>, vector<4x1024xf32> -> vector<4x1024xf32>
    %42 = arith.addf %37, %41 : vector<4x1024xf32>
    %43 = vector.extract_strided_slice %3 {offsets = [0, 39], sizes = [8, 1024], strides = [1, 1]} : vector<8x1280xbf16> to vector<8x1024xbf16>
    %c8 = arith.constant 8 : index
    %c0_29 = arith.constant 0 : index
    %c0_30 = arith.constant 0 : index
    %44 = vector.load %arg1[%c8, %c0_29, %c0_30] : memref<27x4x8xbf16, #tpu.memory_space<vmem>>, vector<1x4x8xbf16>
    %45 = vector.shape_cast %44 : vector<1x4x8xbf16> to vector<4x8xbf16>
    %cst_31 = arith.constant dense<0.000000e+00> : vector<4x1024xf32>
    %46 = tpu.matmul %45, %43, %cst_31 {dimension_numbers = #tpu.dot_dimension_numbers<[1], [0], [0], [1], [0, 0, 1, 1], [], []>} : vector<4x8xbf16>, vector<8x1024xbf16>, vector<4x1024xf32> -> vector<4x1024xf32>
    %47 = arith.addf %42, %46 : vector<4x1024xf32>
    %48 = vector.extract_strided_slice %3 {offsets = [0, 117], sizes = [8, 1024], strides = [1, 1]} : vector<8x1280xbf16> to vector<8x1024xbf16>
    %c9 = arith.constant 9 : index
    %c0_32 = arith.constant 0 : index
    %c0_33 = arith.constant 0 : index
    %49 = vector.load %arg1[%c9, %c0_32, %c0_33] : memref<27x4x8xbf16, #tpu.memory_space<vmem>>, vector<1x4x8xbf16>
    %50 = vector.shape_cast %49 : vector<1x4x8xbf16> to vector<4x8xbf16>
    %cst_34 = arith.constant dense<0.000000e+00> : vector<4x1024xf32>
    %51 = tpu.matmul %50, %48, %cst_34 {dimension_numbers = #tpu.dot_dimension_numbers<[1], [0], [0], [1], [0, 0, 1, 1], [], []>} : vector<4x8xbf16>, vector<8x1024xbf16>, vector<4x1024xf32> -> vector<4x1024xf32>
    %52 = arith.addf %47, %51 : vector<4x1024xf32>
    %53 = vector.extract_strided_slice %3 {offsets = [0, 118], sizes = [8, 1024], strides = [1, 1]} : vector<8x1280xbf16> to vector<8x1024xbf16>
    %c10 = arith.constant 10 : index
    %c0_35 = arith.constant 0 : index
    %c0_36 = arith.constant 0 : index
    %54 = vector.load %arg1[%c10, %c0_35, %c0_36] : memref<27x4x8xbf16, #tpu.memory_space<vmem>>, vector<1x4x8xbf16>
    %55 = vector.shape_cast %54 : vector<1x4x8xbf16> to vector<4x8xbf16>
    %cst_37 = arith.constant dense<0.000000e+00> : vector<4x1024xf32>
    %56 = tpu.matmul %55, %53, %cst_37 {dimension_numbers = #tpu.dot_dimension_numbers<[1], [0], [0], [1], [0, 0, 1, 1], [], []>} : vector<4x8xbf16>, vector<8x1024xbf16>, vector<4x1024xf32> -> vector<4x1024xf32>
    %57 = arith.addf %52, %56 : vector<4x1024xf32>
    %58 = vector.extract_strided_slice %3 {offsets = [0, 119], sizes = [8, 1024], strides = [1, 1]} : vector<8x1280xbf16> to vector<8x1024xbf16>
    %c11 = arith.constant 11 : index
    %c0_38 = arith.constant 0 : index
    %c0_39 = arith.constant 0 : index
    %59 = vector.load %arg1[%c11, %c0_38, %c0_39] : memref<27x4x8xbf16, #tpu.memory_space<vmem>>, vector<1x4x8xbf16>
    %60 = vector.shape_cast %59 : vector<1x4x8xbf16> to vector<4x8xbf16>
    %cst_40 = arith.constant dense<0.000000e+00> : vector<4x1024xf32>
    %61 = tpu.matmul %60, %58, %cst_40 {dimension_numbers = #tpu.dot_dimension_numbers<[1], [0], [0], [1], [0, 0, 1, 1], [], []>} : vector<4x8xbf16>, vector<8x1024xbf16>, vector<4x1024xf32> -> vector<4x1024xf32>
    %62 = arith.addf %57, %61 : vector<4x1024xf32>
    %63 = vector.extract_strided_slice %3 {offsets = [0, 127], sizes = [8, 1024], strides = [1, 1]} : vector<8x1280xbf16> to vector<8x1024xbf16>
    %c12 = arith.constant 12 : index
    %c0_41 = arith.constant 0 : index
    %c0_42 = arith.constant 0 : index
    %64 = vector.load %arg1[%c12, %c0_41, %c0_42] : memref<27x4x8xbf16, #tpu.memory_space<vmem>>, vector<1x4x8xbf16>
    %65 = vector.shape_cast %64 : vector<1x4x8xbf16> to vector<4x8xbf16>
    %cst_43 = arith.constant dense<0.000000e+00> : vector<4x1024xf32>
    %66 = tpu.matmul %65, %63, %cst_43 {dimension_numbers = #tpu.dot_dimension_numbers<[1], [0], [0], [1], [0, 0, 1, 1], [], []>} : vector<4x8xbf16>, vector<8x1024xbf16>, vector<4x1024xf32> -> vector<4x1024xf32>
    %67 = arith.addf %62, %66 : vector<4x1024xf32>
    %68 = vector.extract_strided_slice %3 {offsets = [0, 128], sizes = [8, 1024], strides = [1, 1]} : vector<8x1280xbf16> to vector<8x1024xbf16>
    %c13 = arith.constant 13 : index
    %c0_44 = arith.constant 0 : index
    %c0_45 = arith.constant 0 : index
    %69 = vector.load %arg1[%c13, %c0_44, %c0_45] : memref<27x4x8xbf16, #tpu.memory_space<vmem>>, vector<1x4x8xbf16>
    %70 = vector.shape_cast %69 : vector<1x4x8xbf16> to vector<4x8xbf16>
    %cst_46 = arith.constant dense<0.000000e+00> : vector<4x1024xf32>
    %71 = tpu.matmul %70, %68, %cst_46 {dimension_numbers = #tpu.dot_dimension_numbers<[1], [0], [0], [1], [0, 0, 1, 1], [], []>} : vector<4x8xbf16>, vector<8x1024xbf16>, vector<4x1024xf32> -> vector<4x1024xf32>
    %72 = arith.addf %67, %71 : vector<4x1024xf32>
    %73 = vector.extract_strided_slice %3 {offsets = [0, 129], sizes = [8, 1024], strides = [1, 1]} : vector<8x1280xbf16> to vector<8x1024xbf16>
    %c14 = arith.constant 14 : index
    %c0_47 = arith.constant 0 : index
    %c0_48 = arith.constant 0 : index
    %74 = vector.load %arg1[%c14, %c0_47, %c0_48] : memref<27x4x8xbf16, #tpu.memory_space<vmem>>, vector<1x4x8xbf16>
    %75 = vector.shape_cast %74 : vector<1x4x8xbf16> to vector<4x8xbf16>
    %cst_49 = arith.constant dense<0.000000e+00> : vector<4x1024xf32>
    %76 = tpu.matmul %75, %73, %cst_49 {dimension_numbers = #tpu.dot_dimension_numbers<[1], [0], [0], [1], [0, 0, 1, 1], [], []>} : vector<4x8xbf16>, vector<8x1024xbf16>, vector<4x1024xf32> -> vector<4x1024xf32>
    %77 = arith.addf %72, %76 : vector<4x1024xf32>
    %78 = vector.extract_strided_slice %3 {offsets = [0, 137], sizes = [8, 1024], strides = [1, 1]} : vector<8x1280xbf16> to vector<8x1024xbf16>
    %c15 = arith.constant 15 : index
    %c0_50 = arith.constant 0 : index
    %c0_51 = arith.constant 0 : index
    %79 = vector.load %arg1[%c15, %c0_50, %c0_51] : memref<27x4x8xbf16, #tpu.memory_space<vmem>>, vector<1x4x8xbf16>
    %80 = vector.shape_cast %79 : vector<1x4x8xbf16> to vector<4x8xbf16>
    %cst_52 = arith.constant dense<0.000000e+00> : vector<4x1024xf32>
    %81 = tpu.matmul %80, %78, %cst_52 {dimension_numbers = #tpu.dot_dimension_numbers<[1], [0], [0], [1], [0, 0, 1, 1], [], []>} : vector<4x8xbf16>, vector<8x1024xbf16>, vector<4x1024xf32> -> vector<4x1024xf32>
    %82 = arith.addf %77, %81 : vector<4x1024xf32>
    %83 = vector.extract_strided_slice %3 {offsets = [0, 138], sizes = [8, 1024], strides = [1, 1]} : vector<8x1280xbf16> to vector<8x1024xbf16>
    %c16 = arith.constant 16 : index
    %c0_53 = arith.constant 0 : index
    %c0_54 = arith.constant 0 : index
    %84 = vector.load %arg1[%c16, %c0_53, %c0_54] : memref<27x4x8xbf16, #tpu.memory_space<vmem>>, vector<1x4x8xbf16>
    %85 = vector.shape_cast %84 : vector<1x4x8xbf16> to vector<4x8xbf16>
    %cst_55 = arith.constant dense<0.000000e+00> : vector<4x1024xf32>
    %86 = tpu.matmul %85, %83, %cst_55 {dimension_numbers = #tpu.dot_dimension_numbers<[1], [0], [0], [1], [0, 0, 1, 1], [], []>} : vector<4x8xbf16>, vector<8x1024xbf16>, vector<4x1024xf32> -> vector<4x1024xf32>
    %87 = arith.addf %82, %86 : vector<4x1024xf32>
    %88 = vector.extract_strided_slice %3 {offsets = [0, 139], sizes = [8, 1024], strides = [1, 1]} : vector<8x1280xbf16> to vector<8x1024xbf16>
    %c17 = arith.constant 17 : index
    %c0_56 = arith.constant 0 : index
    %c0_57 = arith.constant 0 : index
    %89 = vector.load %arg1[%c17, %c0_56, %c0_57] : memref<27x4x8xbf16, #tpu.memory_space<vmem>>, vector<1x4x8xbf16>
    %90 = vector.shape_cast %89 : vector<1x4x8xbf16> to vector<4x8xbf16>
    %cst_58 = arith.constant dense<0.000000e+00> : vector<4x1024xf32>
    %91 = tpu.matmul %90, %88, %cst_58 {dimension_numbers = #tpu.dot_dimension_numbers<[1], [0], [0], [1], [0, 0, 1, 1], [], []>} : vector<4x8xbf16>, vector<8x1024xbf16>, vector<4x1024xf32> -> vector<4x1024xf32>
    %92 = arith.addf %87, %91 : vector<4x1024xf32>
    %93 = vector.extract_strided_slice %3 {offsets = [0, 217], sizes = [8, 1024], strides = [1, 1]} : vector<8x1280xbf16> to vector<8x1024xbf16>
    %c18 = arith.constant 18 : index
    %c0_59 = arith.constant 0 : index
    %c0_60 = arith.constant 0 : index
    %94 = vector.load %arg1[%c18, %c0_59, %c0_60] : memref<27x4x8xbf16, #tpu.memory_space<vmem>>, vector<1x4x8xbf16>
    %95 = vector.shape_cast %94 : vector<1x4x8xbf16> to vector<4x8xbf16>
    %cst_61 = arith.constant dense<0.000000e+00> : vector<4x1024xf32>
    %96 = tpu.matmul %95, %93, %cst_61 {dimension_numbers = #tpu.dot_dimension_numbers<[1], [0], [0], [1], [0, 0, 1, 1], [], []>} : vector<4x8xbf16>, vector<8x1024xbf16>, vector<4x1024xf32> -> vector<4x1024xf32>
    %97 = arith.addf %92, %96 : vector<4x1024xf32>
    %98 = vector.extract_strided_slice %3 {offsets = [0, 218], sizes = [8, 1024], strides = [1, 1]} : vector<8x1280xbf16> to vector<8x1024xbf16>
    %c19 = arith.constant 19 : index
    %c0_62 = arith.constant 0 : index
    %c0_63 = arith.constant 0 : index
    %99 = vector.load %arg1[%c19, %c0_62, %c0_63] : memref<27x4x8xbf16, #tpu.memory_space<vmem>>, vector<1x4x8xbf16>
    %100 = vector.shape_cast %99 : vector<1x4x8xbf16> to vector<4x8xbf16>
    %cst_64 = arith.constant dense<0.000000e+00> : vector<4x1024xf32>
    %101 = tpu.matmul %100, %98, %cst_64 {dimension_numbers = #tpu.dot_dimension_numbers<[1], [0], [0], [1], [0, 0, 1, 1], [], []>} : vector<4x8xbf16>, vector<8x1024xbf16>, vector<4x1024xf32> -> vector<4x1024xf32>
    %102 = arith.addf %97, %101 : vector<4x1024xf32>
    %103 = vector.extract_strided_slice %3 {offsets = [0, 219], sizes = [8, 1024], strides = [1, 1]} : vector<8x1280xbf16> to vector<8x1024xbf16>
    %c20 = arith.constant 20 : index
    %c0_65 = arith.constant 0 : index
    %c0_66 = arith.constant 0 : index
    %104 = vector.load %arg1[%c20, %c0_65, %c0_66] : memref<27x4x8xbf16, #tpu.memory_space<vmem>>, vector<1x4x8xbf16>
    %105 = vector.shape_cast %104 : vector<1x4x8xbf16> to vector<4x8xbf16>
    %cst_67 = arith.constant dense<0.000000e+00> : vector<4x1024xf32>
    %106 = tpu.matmul %105, %103, %cst_67 {dimension_numbers = #tpu.dot_dimension_numbers<[1], [0], [0], [1], [0, 0, 1, 1], [], []>} : vector<4x8xbf16>, vector<8x1024xbf16>, vector<4x1024xf32> -> vector<4x1024xf32>
    %107 = arith.addf %102, %106 : vector<4x1024xf32>
    %108 = vector.extract_strided_slice %3 {offsets = [0, 227], sizes = [8, 1024], strides = [1, 1]} : vector<8x1280xbf16> to vector<8x1024xbf16>
    %c21 = arith.constant 21 : index
    %c0_68 = arith.constant 0 : index
    %c0_69 = arith.constant 0 : index
    %109 = vector.load %arg1[%c21, %c0_68, %c0_69] : memref<27x4x8xbf16, #tpu.memory_space<vmem>>, vector<1x4x8xbf16>
    %110 = vector.shape_cast %109 : vector<1x4x8xbf16> to vector<4x8xbf16>
    %cst_70 = arith.constant dense<0.000000e+00> : vector<4x1024xf32>
    %111 = tpu.matmul %110, %108, %cst_70 {dimension_numbers = #tpu.dot_dimension_numbers<[1], [0], [0], [1], [0, 0, 1, 1], [], []>} : vector<4x8xbf16>, vector<8x1024xbf16>, vector<4x1024xf32> -> vector<4x1024xf32>
    %112 = arith.addf %107, %111 : vector<4x1024xf32>
    %113 = vector.extract_strided_slice %3 {offsets = [0, 228], sizes = [8, 1024], strides = [1, 1]} : vector<8x1280xbf16> to vector<8x1024xbf16>
    %c22 = arith.constant 22 : index
    %c0_71 = arith.constant 0 : index
    %c0_72 = arith.constant 0 : index
    %114 = vector.load %arg1[%c22, %c0_71, %c0_72] : memref<27x4x8xbf16, #tpu.memory_space<vmem>>, vector<1x4x8xbf16>
    %115 = vector.shape_cast %114 : vector<1x4x8xbf16> to vector<4x8xbf16>
    %cst_73 = arith.constant dense<0.000000e+00> : vector<4x1024xf32>
    %116 = tpu.matmul %115, %113, %cst_73 {dimension_numbers = #tpu.dot_dimension_numbers<[1], [0], [0], [1], [0, 0, 1, 1], [], []>} : vector<4x8xbf16>, vector<8x1024xbf16>, vector<4x1024xf32> -> vector<4x1024xf32>
    %117 = arith.addf %112, %116 : vector<4x1024xf32>
    %118 = vector.extract_strided_slice %3 {offsets = [0, 229], sizes = [8, 1024], strides = [1, 1]} : vector<8x1280xbf16> to vector<8x1024xbf16>
    %c23 = arith.constant 23 : index
    %c0_74 = arith.constant 0 : index
    %c0_75 = arith.constant 0 : index
    %119 = vector.load %arg1[%c23, %c0_74, %c0_75] : memref<27x4x8xbf16, #tpu.memory_space<vmem>>, vector<1x4x8xbf16>
    %120 = vector.shape_cast %119 : vector<1x4x8xbf16> to vector<4x8xbf16>
    %cst_76 = arith.constant dense<0.000000e+00> : vector<4x1024xf32>
    %121 = tpu.matmul %120, %118, %cst_76 {dimension_numbers = #tpu.dot_dimension_numbers<[1], [0], [0], [1], [0, 0, 1, 1], [], []>} : vector<4x8xbf16>, vector<8x1024xbf16>, vector<4x1024xf32> -> vector<4x1024xf32>
    %122 = arith.addf %117, %121 : vector<4x1024xf32>
    %123 = vector.extract_strided_slice %3 {offsets = [0, 237], sizes = [8, 1024], strides = [1, 1]} : vector<8x1280xbf16> to vector<8x1024xbf16>
    %c24 = arith.constant 24 : index
    %c0_77 = arith.constant 0 : index
    %c0_78 = arith.constant 0 : index
    %124 = vector.load %arg1[%c24, %c0_77, %c0_78] : memref<27x4x8xbf16, #tpu.memory_space<vmem>>, vector<1x4x8xbf16>
    %125 = vector.shape_cast %124 : vector<1x4x8xbf16> to vector<4x8xbf16>
    %cst_79 = arith.constant dense<0.000000e+00> : vector<4x1024xf32>
    %126 = tpu.matmul %125, %123, %cst_79 {dimension_numbers = #tpu.dot_dimension_numbers<[1], [0], [0], [1], [0, 0, 1, 1], [], []>} : vector<4x8xbf16>, vector<8x1024xbf16>, vector<4x1024xf32> -> vector<4x1024xf32>
    %127 = arith.addf %122, %126 : vector<4x1024xf32>
    %128 = vector.extract_strided_slice %3 {offsets = [0, 238], sizes = [8, 1024], strides = [1, 1]} : vector<8x1280xbf16> to vector<8x1024xbf16>
    %c25 = arith.constant 25 : index
    %c0_80 = arith.constant 0 : index
    %c0_81 = arith.constant 0 : index
    %129 = vector.load %arg1[%c25, %c0_80, %c0_81] : memref<27x4x8xbf16, #tpu.memory_space<vmem>>, vector<1x4x8xbf16>
    %130 = vector.shape_cast %129 : vector<1x4x8xbf16> to vector<4x8xbf16>
    %cst_82 = arith.constant dense<0.000000e+00> : vector<4x1024xf32>
    %131 = tpu.matmul %130, %128, %cst_82 {dimension_numbers = #tpu.dot_dimension_numbers<[1], [0], [0], [1], [0, 0, 1, 1], [], []>} : vector<4x8xbf16>, vector<8x1024xbf16>, vector<4x1024xf32> -> vector<4x1024xf32>
    %132 = arith.addf %127, %131 : vector<4x1024xf32>
    %133 = vector.extract_strided_slice %3 {offsets = [0, 239], sizes = [8, 1024], strides = [1, 1]} : vector<8x1280xbf16> to vector<8x1024xbf16>
    %c26 = arith.constant 26 : index
    %c0_83 = arith.constant 0 : index
    %c0_84 = arith.constant 0 : index
    %134 = vector.load %arg1[%c26, %c0_83, %c0_84] : memref<27x4x8xbf16, #tpu.memory_space<vmem>>, vector<1x4x8xbf16>
    %135 = vector.shape_cast %134 : vector<1x4x8xbf16> to vector<4x8xbf16>
    %cst_85 = arith.constant dense<0.000000e+00> : vector<4x1024xf32>
    %136 = tpu.matmul %135, %133, %cst_85 {dimension_numbers = #tpu.dot_dimension_numbers<[1], [0], [0], [1], [0, 0, 1, 1], [], []>} : vector<4x8xbf16>, vector<8x1024xbf16>, vector<4x1024xf32> -> vector<4x1024xf32>
    %137 = arith.addf %132, %136 : vector<4x1024xf32>
    %c0_86 = arith.constant 0 : index
    %c0_87 = arith.constant 0 : index
    %138 = vector.load %arg2[%c0_86, %c0_87] : memref<4x1xf32, #tpu.memory_space<vmem>>, vector<4x1xf32>
    %139 = vector.broadcast %138 : vector<4x1xf32> to vector<4x1024xf32>
    %140 = arith.addf %137, %139 : vector<4x1024xf32>
    %cst_88 = arith.constant 0.000000e+00 : f32
    %141 = vector.broadcast %cst_88 : f32 to vector<4x1024xf32>
    %142 = arith.cmpf ogt, %140, %141 : vector<4x1024xf32>
    %cst_89 = arith.constant 0.000000e+00 : f32
    %143 = vector.broadcast %cst_89 : f32 to vector<4x1024xf32>
    %144 = arith.minimumf %140, %143 : vector<4x1024xf32>
    %145 = math.exp %144 : vector<4x1024xf32>
    %cst_90 = arith.constant 1.000000e+00 : f32
    %146 = vector.broadcast %cst_90 : f32 to vector<4x1024xf32>
    %147 = arith.subf %145, %146 : vector<4x1024xf32>
    %148 = arith.select %142, %140, %147 : vector<4x1024xi1>, vector<4x1024xf32>
    %c0_91 = arith.constant 0 : index
    %c0_92 = arith.constant 0 : index
    %149 = vector.load %arg6[%c0_91, %c0_92] : memref<1x1024xf32, #tpu.memory_space<vmem>>, vector<1x1024xf32>
    %150 = vector.broadcast %149 : vector<1x1024xf32> to vector<4x1024xf32>
    %151 = arith.mulf %148, %150 : vector<4x1024xf32>
    %152 = arith.truncf %151 : vector<4x1024xf32> to vector<4x1024xbf16>
    %c0_93 = arith.constant 0 : index
    %c0_94 = arith.constant 0 : index
    %153 = vector.load %arg7[%c0_93, %c0_94] : memref<4x1024xbf16, #tpu.memory_space<vmem>>, vector<4x1024xbf16>
    tpu.vector_store %arg7[%c0_93, %c0_94], %152 {strides = array<i32>} : memref<4x1024xbf16, #tpu.memory_space<vmem>>, vector<4x1024xbf16>,
    return
  }
  func.func @transform_0(%arg0: i32) -> (i32, i32, i32) {
    %c0_i32 = arith.constant 0 : i32
    %c0_i32_0 = arith.constant 0 : i32
    %c0_i32_1 = arith.constant 0 : i32
    %c0_i32_2 = arith.constant 0 : i32
    return %c0_i32, %c0_i32_0, %c0_i32_1 : i32, i32, i32
  }
  func.func @transform_1(%arg0: i32) -> (i32, i32) {
    %c0_i32 = arith.constant 0 : i32
    %c0_i32_0 = arith.constant 0 : i32
    %c0_i32_1 = arith.constant 0 : i32
    return %c0_i32, %c0_i32_0 : i32, i32
  }
  func.func @transform_2(%arg0: i32) -> (i32, i32) {
    %c1_i32 = arith.constant 1 : i32
    %0 = arith.addi %arg0, %c1_i32 : i32
    %c0_i32 = arith.constant 0 : i32
    %c0_i32_0 = arith.constant 0 : i32
    return %c0_i32, %0 : i32, i32
  }
  func.func @transform_3(%arg0: i32) -> (i32, i32) {
    %c0_i32 = arith.constant 0 : i32
    %c0_i32_0 = arith.constant 0 : i32
    return %c0_i32, %arg0 : i32, i32
  }
  func.func @transform_4(%arg0: i32) -> (i32, i32) {
    %c0_i32 = arith.constant 0 : i32
    %c0_i32_0 = arith.constant 0 : i32
    return %c0_i32, %arg0 : i32, i32
  }
  func.func @transform_5(%arg0: i32) -> (i32, i32) {
    %c0_i32 = arith.constant 0 : i32
    %c0_i32_0 = arith.constant 0 : i32
    return %c0_i32, %arg0 : i32, i32
  }
  func.func @transform_6(%arg0: i32) -> (i32, i32) {
    %c0_i32 = arith.constant 0 : i32
    %c0_i32_0 = arith.constant 0 : i32
    return %c0_i32, %arg0 : i32, i32
  }
}

module attributes {stable_mosaic.version = 11 : i64} {
  func.func @_stencil_kernel(%arg0: i32, %arg1: memref<27x4x4xbf16, #tpu.memory_space<vmem>>, %arg2: memref<4x1xf32, #tpu.memory_space<vmem>>, %arg3: memref<4x1024xbf16, #tpu.memory_space<vmem>>, %arg4: memref<4x128xbf16, #tpu.memory_space<vmem>>, %arg5: memref<4x128xbf16, #tpu.memory_space<vmem>>, %arg6: memref<1x4xf32, #tpu.memory_space<vmem>>, %arg7: memref<1xf32, #tpu.memory_space<smem>>, %arg8: memref<1x1024xf32, #tpu.memory_space<vmem>>) attributes {dimension_semantics = [#tpu.dimension_semantics<parallel>], iteration_bounds = array<i64: 2>, scalar_prefetch = 0 : i64, scratch_operands = 0 : i64, tpu.core_type = #tpu.core_type<tc>, window_params = [{pipeline_mode = #tpu.pipeline_mode<synchronous>, transform_indices = @transform_0, window_bounds = array<i64: 27, 4, 4>}, {pipeline_mode = #tpu.pipeline_mode<synchronous>, transform_indices = @transform_1, window_bounds = array<i64: 4, 1>}, {transform_indices = @transform_2, window_bounds = array<i64: 4, 1024>}, {transform_indices = @transform_3, window_bounds = array<i64: 4, 128>}, {transform_indices = @transform_4, window_bounds = array<i64: 4, 128>}, {pipeline_mode = #tpu.pipeline_mode<synchronous>, transform_indices = @transform_5, window_bounds = array<i64: 1, 4>}, {transform_indices = @transform_6, window_bounds = array<i64: 1>}, {transform_indices = @transform_7, window_bounds = array<i64: 1, 1024>}]} {
    %c0 = arith.constant 0 : index
    %c0_0 = arith.constant 0 : index
    %0 = vector.load %arg4[%c0, %c0_0] : memref<4x128xbf16, #tpu.memory_space<vmem>>, vector<4x128xbf16>
    %c0_1 = arith.constant 0 : index
    %c0_2 = arith.constant 0 : index
    %1 = vector.load %arg3[%c0_1, %c0_2] : memref<4x1024xbf16, #tpu.memory_space<vmem>>, vector<4x1024xbf16>
    %c0_3 = arith.constant 0 : index
    %c0_4 = arith.constant 0 : index
    %2 = vector.load %arg5[%c0_3, %c0_4] : memref<4x128xbf16, #tpu.memory_space<vmem>>, vector<4x128xbf16>
    %3 = tpu.concatenate %0, %1, %2 in 1 : vector<4x128xbf16>, vector<4x1024xbf16>, vector<4x128xbf16> -> vector<4x1280xbf16>
    %4 = vector.extract_strided_slice %3 {offsets = [0, 17], sizes = [4, 1024], strides = [1, 1]} : vector<4x1280xbf16> to vector<4x1024xbf16>
    %c0_5 = arith.constant 0 : index
    %c0_6 = arith.constant 0 : index
    %c0_7 = arith.constant 0 : index
    %5 = vector.load %arg1[%c0_5, %c0_6, %c0_7] : memref<27x4x4xbf16, #tpu.memory_space<vmem>>, vector<1x4x4xbf16>
    %6 = vector.shape_cast %5 : vector<1x4x4xbf16> to vector<4x4xbf16>
    %cst = arith.constant dense<0.000000e+00> : vector<4x1024xf32>
    %7 = tpu.matmul %6, %4, %cst {dimension_numbers = #tpu.dot_dimension_numbers<[1], [0], [0], [1], [0, 0, 1, 1], [], []>} : vector<4x4xbf16>, vector<4x1024xbf16>, vector<4x1024xf32> -> vector<4x1024xf32>
    %8 = vector.extract_strided_slice %3 {offsets = [0, 18], sizes = [4, 1024], strides = [1, 1]} : vector<4x1280xbf16> to vector<4x1024xbf16>
    %c1 = arith.constant 1 : index
    %c0_8 = arith.constant 0 : index
    %c0_9 = arith.constant 0 : index
    %9 = vector.load %arg1[%c1, %c0_8, %c0_9] : memref<27x4x4xbf16, #tpu.memory_space<vmem>>, vector<1x4x4xbf16>
    %10 = vector.shape_cast %9 : vector<1x4x4xbf16> to vector<4x4xbf16>
    %cst_10 = arith.constant dense<0.000000e+00> : vector<4x1024xf32>
    %11 = tpu.matmul %10, %8, %cst_10 {dimension_numbers = #tpu.dot_dimension_numbers<[1], [0], [0], [1], [0, 0, 1, 1], [], []>} : vector<4x4xbf16>, vector<4x1024xbf16>, vector<4x1024xf32> -> vector<4x1024xf32>
    %12 = arith.addf %7, %11 : vector<4x1024xf32>
    %13 = vector.extract_strided_slice %3 {offsets = [0, 19], sizes = [4, 1024], strides = [1, 1]} : vector<4x1280xbf16> to vector<4x1024xbf16>
    %c2 = arith.constant 2 : index
    %c0_11 = arith.constant 0 : index
    %c0_12 = arith.constant 0 : index
    %14 = vector.load %arg1[%c2, %c0_11, %c0_12] : memref<27x4x4xbf16, #tpu.memory_space<vmem>>, vector<1x4x4xbf16>
    %15 = vector.shape_cast %14 : vector<1x4x4xbf16> to vector<4x4xbf16>
    %cst_13 = arith.constant dense<0.000000e+00> : vector<4x1024xf32>
    %16 = tpu.matmul %15, %13, %cst_13 {dimension_numbers = #tpu.dot_dimension_numbers<[1], [0], [0], [1], [0, 0, 1, 1], [], []>} : vector<4x4xbf16>, vector<4x1024xbf16>, vector<4x1024xf32> -> vector<4x1024xf32>
    %17 = arith.addf %12, %16 : vector<4x1024xf32>
    %18 = vector.extract_strided_slice %3 {offsets = [0, 27], sizes = [4, 1024], strides = [1, 1]} : vector<4x1280xbf16> to vector<4x1024xbf16>
    %c3 = arith.constant 3 : index
    %c0_14 = arith.constant 0 : index
    %c0_15 = arith.constant 0 : index
    %19 = vector.load %arg1[%c3, %c0_14, %c0_15] : memref<27x4x4xbf16, #tpu.memory_space<vmem>>, vector<1x4x4xbf16>
    %20 = vector.shape_cast %19 : vector<1x4x4xbf16> to vector<4x4xbf16>
    %cst_16 = arith.constant dense<0.000000e+00> : vector<4x1024xf32>
    %21 = tpu.matmul %20, %18, %cst_16 {dimension_numbers = #tpu.dot_dimension_numbers<[1], [0], [0], [1], [0, 0, 1, 1], [], []>} : vector<4x4xbf16>, vector<4x1024xbf16>, vector<4x1024xf32> -> vector<4x1024xf32>
    %22 = arith.addf %17, %21 : vector<4x1024xf32>
    %23 = vector.extract_strided_slice %3 {offsets = [0, 28], sizes = [4, 1024], strides = [1, 1]} : vector<4x1280xbf16> to vector<4x1024xbf16>
    %c4 = arith.constant 4 : index
    %c0_17 = arith.constant 0 : index
    %c0_18 = arith.constant 0 : index
    %24 = vector.load %arg1[%c4, %c0_17, %c0_18] : memref<27x4x4xbf16, #tpu.memory_space<vmem>>, vector<1x4x4xbf16>
    %25 = vector.shape_cast %24 : vector<1x4x4xbf16> to vector<4x4xbf16>
    %cst_19 = arith.constant dense<0.000000e+00> : vector<4x1024xf32>
    %26 = tpu.matmul %25, %23, %cst_19 {dimension_numbers = #tpu.dot_dimension_numbers<[1], [0], [0], [1], [0, 0, 1, 1], [], []>} : vector<4x4xbf16>, vector<4x1024xbf16>, vector<4x1024xf32> -> vector<4x1024xf32>
    %27 = arith.addf %22, %26 : vector<4x1024xf32>
    %28 = vector.extract_strided_slice %3 {offsets = [0, 29], sizes = [4, 1024], strides = [1, 1]} : vector<4x1280xbf16> to vector<4x1024xbf16>
    %c5 = arith.constant 5 : index
    %c0_20 = arith.constant 0 : index
    %c0_21 = arith.constant 0 : index
    %29 = vector.load %arg1[%c5, %c0_20, %c0_21] : memref<27x4x4xbf16, #tpu.memory_space<vmem>>, vector<1x4x4xbf16>
    %30 = vector.shape_cast %29 : vector<1x4x4xbf16> to vector<4x4xbf16>
    %cst_22 = arith.constant dense<0.000000e+00> : vector<4x1024xf32>
    %31 = tpu.matmul %30, %28, %cst_22 {dimension_numbers = #tpu.dot_dimension_numbers<[1], [0], [0], [1], [0, 0, 1, 1], [], []>} : vector<4x4xbf16>, vector<4x1024xbf16>, vector<4x1024xf32> -> vector<4x1024xf32>
    %32 = arith.addf %27, %31 : vector<4x1024xf32>
    %33 = vector.extract_strided_slice %3 {offsets = [0, 37], sizes = [4, 1024], strides = [1, 1]} : vector<4x1280xbf16> to vector<4x1024xbf16>
    %c6 = arith.constant 6 : index
    %c0_23 = arith.constant 0 : index
    %c0_24 = arith.constant 0 : index
    %34 = vector.load %arg1[%c6, %c0_23, %c0_24] : memref<27x4x4xbf16, #tpu.memory_space<vmem>>, vector<1x4x4xbf16>
    %35 = vector.shape_cast %34 : vector<1x4x4xbf16> to vector<4x4xbf16>
    %cst_25 = arith.constant dense<0.000000e+00> : vector<4x1024xf32>
    %36 = tpu.matmul %35, %33, %cst_25 {dimension_numbers = #tpu.dot_dimension_numbers<[1], [0], [0], [1], [0, 0, 1, 1], [], []>} : vector<4x4xbf16>, vector<4x1024xbf16>, vector<4x1024xf32> -> vector<4x1024xf32>
    %37 = arith.addf %32, %36 : vector<4x1024xf32>
    %38 = vector.extract_strided_slice %3 {offsets = [0, 38], sizes = [4, 1024], strides = [1, 1]} : vector<4x1280xbf16> to vector<4x1024xbf16>
    %c7 = arith.constant 7 : index
    %c0_26 = arith.constant 0 : index
    %c0_27 = arith.constant 0 : index
    %39 = vector.load %arg1[%c7, %c0_26, %c0_27] : memref<27x4x4xbf16, #tpu.memory_space<vmem>>, vector<1x4x4xbf16>
    %40 = vector.shape_cast %39 : vector<1x4x4xbf16> to vector<4x4xbf16>
    %cst_28 = arith.constant dense<0.000000e+00> : vector<4x1024xf32>
    %41 = tpu.matmul %40, %38, %cst_28 {dimension_numbers = #tpu.dot_dimension_numbers<[1], [0], [0], [1], [0, 0, 1, 1], [], []>} : vector<4x4xbf16>, vector<4x1024xbf16>, vector<4x1024xf32> -> vector<4x1024xf32>
    %42 = arith.addf %37, %41 : vector<4x1024xf32>
    %43 = vector.extract_strided_slice %3 {offsets = [0, 39], sizes = [4, 1024], strides = [1, 1]} : vector<4x1280xbf16> to vector<4x1024xbf16>
    %c8 = arith.constant 8 : index
    %c0_29 = arith.constant 0 : index
    %c0_30 = arith.constant 0 : index
    %44 = vector.load %arg1[%c8, %c0_29, %c0_30] : memref<27x4x4xbf16, #tpu.memory_space<vmem>>, vector<1x4x4xbf16>
    %45 = vector.shape_cast %44 : vector<1x4x4xbf16> to vector<4x4xbf16>
    %cst_31 = arith.constant dense<0.000000e+00> : vector<4x1024xf32>
    %46 = tpu.matmul %45, %43, %cst_31 {dimension_numbers = #tpu.dot_dimension_numbers<[1], [0], [0], [1], [0, 0, 1, 1], [], []>} : vector<4x4xbf16>, vector<4x1024xbf16>, vector<4x1024xf32> -> vector<4x1024xf32>
    %47 = arith.addf %42, %46 : vector<4x1024xf32>
    %48 = vector.extract_strided_slice %3 {offsets = [0, 117], sizes = [4, 1024], strides = [1, 1]} : vector<4x1280xbf16> to vector<4x1024xbf16>
    %c9 = arith.constant 9 : index
    %c0_32 = arith.constant 0 : index
    %c0_33 = arith.constant 0 : index
    %49 = vector.load %arg1[%c9, %c0_32, %c0_33] : memref<27x4x4xbf16, #tpu.memory_space<vmem>>, vector<1x4x4xbf16>
    %50 = vector.shape_cast %49 : vector<1x4x4xbf16> to vector<4x4xbf16>
    %cst_34 = arith.constant dense<0.000000e+00> : vector<4x1024xf32>
    %51 = tpu.matmul %50, %48, %cst_34 {dimension_numbers = #tpu.dot_dimension_numbers<[1], [0], [0], [1], [0, 0, 1, 1], [], []>} : vector<4x4xbf16>, vector<4x1024xbf16>, vector<4x1024xf32> -> vector<4x1024xf32>
    %52 = arith.addf %47, %51 : vector<4x1024xf32>
    %53 = vector.extract_strided_slice %3 {offsets = [0, 118], sizes = [4, 1024], strides = [1, 1]} : vector<4x1280xbf16> to vector<4x1024xbf16>
    %c10 = arith.constant 10 : index
    %c0_35 = arith.constant 0 : index
    %c0_36 = arith.constant 0 : index
    %54 = vector.load %arg1[%c10, %c0_35, %c0_36] : memref<27x4x4xbf16, #tpu.memory_space<vmem>>, vector<1x4x4xbf16>
    %55 = vector.shape_cast %54 : vector<1x4x4xbf16> to vector<4x4xbf16>
    %cst_37 = arith.constant dense<0.000000e+00> : vector<4x1024xf32>
    %56 = tpu.matmul %55, %53, %cst_37 {dimension_numbers = #tpu.dot_dimension_numbers<[1], [0], [0], [1], [0, 0, 1, 1], [], []>} : vector<4x4xbf16>, vector<4x1024xbf16>, vector<4x1024xf32> -> vector<4x1024xf32>
    %57 = arith.addf %52, %56 : vector<4x1024xf32>
    %58 = vector.extract_strided_slice %3 {offsets = [0, 119], sizes = [4, 1024], strides = [1, 1]} : vector<4x1280xbf16> to vector<4x1024xbf16>
    %c11 = arith.constant 11 : index
    %c0_38 = arith.constant 0 : index
    %c0_39 = arith.constant 0 : index
    %59 = vector.load %arg1[%c11, %c0_38, %c0_39] : memref<27x4x4xbf16, #tpu.memory_space<vmem>>, vector<1x4x4xbf16>
    %60 = vector.shape_cast %59 : vector<1x4x4xbf16> to vector<4x4xbf16>
    %cst_40 = arith.constant dense<0.000000e+00> : vector<4x1024xf32>
    %61 = tpu.matmul %60, %58, %cst_40 {dimension_numbers = #tpu.dot_dimension_numbers<[1], [0], [0], [1], [0, 0, 1, 1], [], []>} : vector<4x4xbf16>, vector<4x1024xbf16>, vector<4x1024xf32> -> vector<4x1024xf32>
    %62 = arith.addf %57, %61 : vector<4x1024xf32>
    %63 = vector.extract_strided_slice %3 {offsets = [0, 127], sizes = [4, 1024], strides = [1, 1]} : vector<4x1280xbf16> to vector<4x1024xbf16>
    %c12 = arith.constant 12 : index
    %c0_41 = arith.constant 0 : index
    %c0_42 = arith.constant 0 : index
    %64 = vector.load %arg1[%c12, %c0_41, %c0_42] : memref<27x4x4xbf16, #tpu.memory_space<vmem>>, vector<1x4x4xbf16>
    %65 = vector.shape_cast %64 : vector<1x4x4xbf16> to vector<4x4xbf16>
    %cst_43 = arith.constant dense<0.000000e+00> : vector<4x1024xf32>
    %66 = tpu.matmul %65, %63, %cst_43 {dimension_numbers = #tpu.dot_dimension_numbers<[1], [0], [0], [1], [0, 0, 1, 1], [], []>} : vector<4x4xbf16>, vector<4x1024xbf16>, vector<4x1024xf32> -> vector<4x1024xf32>
    %67 = arith.addf %62, %66 : vector<4x1024xf32>
    %68 = vector.extract_strided_slice %3 {offsets = [0, 128], sizes = [4, 1024], strides = [1, 1]} : vector<4x1280xbf16> to vector<4x1024xbf16>
    %c13 = arith.constant 13 : index
    %c0_44 = arith.constant 0 : index
    %c0_45 = arith.constant 0 : index
    %69 = vector.load %arg1[%c13, %c0_44, %c0_45] : memref<27x4x4xbf16, #tpu.memory_space<vmem>>, vector<1x4x4xbf16>
    %70 = vector.shape_cast %69 : vector<1x4x4xbf16> to vector<4x4xbf16>
    %cst_46 = arith.constant dense<0.000000e+00> : vector<4x1024xf32>
    %71 = tpu.matmul %70, %68, %cst_46 {dimension_numbers = #tpu.dot_dimension_numbers<[1], [0], [0], [1], [0, 0, 1, 1], [], []>} : vector<4x4xbf16>, vector<4x1024xbf16>, vector<4x1024xf32> -> vector<4x1024xf32>
    %72 = arith.addf %67, %71 : vector<4x1024xf32>
    %73 = vector.extract_strided_slice %3 {offsets = [0, 129], sizes = [4, 1024], strides = [1, 1]} : vector<4x1280xbf16> to vector<4x1024xbf16>
    %c14 = arith.constant 14 : index
    %c0_47 = arith.constant 0 : index
    %c0_48 = arith.constant 0 : index
    %74 = vector.load %arg1[%c14, %c0_47, %c0_48] : memref<27x4x4xbf16, #tpu.memory_space<vmem>>, vector<1x4x4xbf16>
    %75 = vector.shape_cast %74 : vector<1x4x4xbf16> to vector<4x4xbf16>
    %cst_49 = arith.constant dense<0.000000e+00> : vector<4x1024xf32>
    %76 = tpu.matmul %75, %73, %cst_49 {dimension_numbers = #tpu.dot_dimension_numbers<[1], [0], [0], [1], [0, 0, 1, 1], [], []>} : vector<4x4xbf16>, vector<4x1024xbf16>, vector<4x1024xf32> -> vector<4x1024xf32>
    %77 = arith.addf %72, %76 : vector<4x1024xf32>
    %78 = vector.extract_strided_slice %3 {offsets = [0, 137], sizes = [4, 1024], strides = [1, 1]} : vector<4x1280xbf16> to vector<4x1024xbf16>
    %c15 = arith.constant 15 : index
    %c0_50 = arith.constant 0 : index
    %c0_51 = arith.constant 0 : index
    %79 = vector.load %arg1[%c15, %c0_50, %c0_51] : memref<27x4x4xbf16, #tpu.memory_space<vmem>>, vector<1x4x4xbf16>
    %80 = vector.shape_cast %79 : vector<1x4x4xbf16> to vector<4x4xbf16>
    %cst_52 = arith.constant dense<0.000000e+00> : vector<4x1024xf32>
    %81 = tpu.matmul %80, %78, %cst_52 {dimension_numbers = #tpu.dot_dimension_numbers<[1], [0], [0], [1], [0, 0, 1, 1], [], []>} : vector<4x4xbf16>, vector<4x1024xbf16>, vector<4x1024xf32> -> vector<4x1024xf32>
    %82 = arith.addf %77, %81 : vector<4x1024xf32>
    %83 = vector.extract_strided_slice %3 {offsets = [0, 138], sizes = [4, 1024], strides = [1, 1]} : vector<4x1280xbf16> to vector<4x1024xbf16>
    %c16 = arith.constant 16 : index
    %c0_53 = arith.constant 0 : index
    %c0_54 = arith.constant 0 : index
    %84 = vector.load %arg1[%c16, %c0_53, %c0_54] : memref<27x4x4xbf16, #tpu.memory_space<vmem>>, vector<1x4x4xbf16>
    %85 = vector.shape_cast %84 : vector<1x4x4xbf16> to vector<4x4xbf16>
    %cst_55 = arith.constant dense<0.000000e+00> : vector<4x1024xf32>
    %86 = tpu.matmul %85, %83, %cst_55 {dimension_numbers = #tpu.dot_dimension_numbers<[1], [0], [0], [1], [0, 0, 1, 1], [], []>} : vector<4x4xbf16>, vector<4x1024xbf16>, vector<4x1024xf32> -> vector<4x1024xf32>
    %87 = arith.addf %82, %86 : vector<4x1024xf32>
    %88 = vector.extract_strided_slice %3 {offsets = [0, 139], sizes = [4, 1024], strides = [1, 1]} : vector<4x1280xbf16> to vector<4x1024xbf16>
    %c17 = arith.constant 17 : index
    %c0_56 = arith.constant 0 : index
    %c0_57 = arith.constant 0 : index
    %89 = vector.load %arg1[%c17, %c0_56, %c0_57] : memref<27x4x4xbf16, #tpu.memory_space<vmem>>, vector<1x4x4xbf16>
    %90 = vector.shape_cast %89 : vector<1x4x4xbf16> to vector<4x4xbf16>
    %cst_58 = arith.constant dense<0.000000e+00> : vector<4x1024xf32>
    %91 = tpu.matmul %90, %88, %cst_58 {dimension_numbers = #tpu.dot_dimension_numbers<[1], [0], [0], [1], [0, 0, 1, 1], [], []>} : vector<4x4xbf16>, vector<4x1024xbf16>, vector<4x1024xf32> -> vector<4x1024xf32>
    %92 = arith.addf %87, %91 : vector<4x1024xf32>
    %93 = vector.extract_strided_slice %3 {offsets = [0, 217], sizes = [4, 1024], strides = [1, 1]} : vector<4x1280xbf16> to vector<4x1024xbf16>
    %c18 = arith.constant 18 : index
    %c0_59 = arith.constant 0 : index
    %c0_60 = arith.constant 0 : index
    %94 = vector.load %arg1[%c18, %c0_59, %c0_60] : memref<27x4x4xbf16, #tpu.memory_space<vmem>>, vector<1x4x4xbf16>
    %95 = vector.shape_cast %94 : vector<1x4x4xbf16> to vector<4x4xbf16>
    %cst_61 = arith.constant dense<0.000000e+00> : vector<4x1024xf32>
    %96 = tpu.matmul %95, %93, %cst_61 {dimension_numbers = #tpu.dot_dimension_numbers<[1], [0], [0], [1], [0, 0, 1, 1], [], []>} : vector<4x4xbf16>, vector<4x1024xbf16>, vector<4x1024xf32> -> vector<4x1024xf32>
    %97 = arith.addf %92, %96 : vector<4x1024xf32>
    %98 = vector.extract_strided_slice %3 {offsets = [0, 218], sizes = [4, 1024], strides = [1, 1]} : vector<4x1280xbf16> to vector<4x1024xbf16>
    %c19 = arith.constant 19 : index
    %c0_62 = arith.constant 0 : index
    %c0_63 = arith.constant 0 : index
    %99 = vector.load %arg1[%c19, %c0_62, %c0_63] : memref<27x4x4xbf16, #tpu.memory_space<vmem>>, vector<1x4x4xbf16>
    %100 = vector.shape_cast %99 : vector<1x4x4xbf16> to vector<4x4xbf16>
    %cst_64 = arith.constant dense<0.000000e+00> : vector<4x1024xf32>
    %101 = tpu.matmul %100, %98, %cst_64 {dimension_numbers = #tpu.dot_dimension_numbers<[1], [0], [0], [1], [0, 0, 1, 1], [], []>} : vector<4x4xbf16>, vector<4x1024xbf16>, vector<4x1024xf32> -> vector<4x1024xf32>
    %102 = arith.addf %97, %101 : vector<4x1024xf32>
    %103 = vector.extract_strided_slice %3 {offsets = [0, 219], sizes = [4, 1024], strides = [1, 1]} : vector<4x1280xbf16> to vector<4x1024xbf16>
    %c20 = arith.constant 20 : index
    %c0_65 = arith.constant 0 : index
    %c0_66 = arith.constant 0 : index
    %104 = vector.load %arg1[%c20, %c0_65, %c0_66] : memref<27x4x4xbf16, #tpu.memory_space<vmem>>, vector<1x4x4xbf16>
    %105 = vector.shape_cast %104 : vector<1x4x4xbf16> to vector<4x4xbf16>
    %cst_67 = arith.constant dense<0.000000e+00> : vector<4x1024xf32>
    %106 = tpu.matmul %105, %103, %cst_67 {dimension_numbers = #tpu.dot_dimension_numbers<[1], [0], [0], [1], [0, 0, 1, 1], [], []>} : vector<4x4xbf16>, vector<4x1024xbf16>, vector<4x1024xf32> -> vector<4x1024xf32>
    %107 = arith.addf %102, %106 : vector<4x1024xf32>
    %108 = vector.extract_strided_slice %3 {offsets = [0, 227], sizes = [4, 1024], strides = [1, 1]} : vector<4x1280xbf16> to vector<4x1024xbf16>
    %c21 = arith.constant 21 : index
    %c0_68 = arith.constant 0 : index
    %c0_69 = arith.constant 0 : index
    %109 = vector.load %arg1[%c21, %c0_68, %c0_69] : memref<27x4x4xbf16, #tpu.memory_space<vmem>>, vector<1x4x4xbf16>
    %110 = vector.shape_cast %109 : vector<1x4x4xbf16> to vector<4x4xbf16>
    %cst_70 = arith.constant dense<0.000000e+00> : vector<4x1024xf32>
    %111 = tpu.matmul %110, %108, %cst_70 {dimension_numbers = #tpu.dot_dimension_numbers<[1], [0], [0], [1], [0, 0, 1, 1], [], []>} : vector<4x4xbf16>, vector<4x1024xbf16>, vector<4x1024xf32> -> vector<4x1024xf32>
    %112 = arith.addf %107, %111 : vector<4x1024xf32>
    %113 = vector.extract_strided_slice %3 {offsets = [0, 228], sizes = [4, 1024], strides = [1, 1]} : vector<4x1280xbf16> to vector<4x1024xbf16>
    %c22 = arith.constant 22 : index
    %c0_71 = arith.constant 0 : index
    %c0_72 = arith.constant 0 : index
    %114 = vector.load %arg1[%c22, %c0_71, %c0_72] : memref<27x4x4xbf16, #tpu.memory_space<vmem>>, vector<1x4x4xbf16>
    %115 = vector.shape_cast %114 : vector<1x4x4xbf16> to vector<4x4xbf16>
    %cst_73 = arith.constant dense<0.000000e+00> : vector<4x1024xf32>
    %116 = tpu.matmul %115, %113, %cst_73 {dimension_numbers = #tpu.dot_dimension_numbers<[1], [0], [0], [1], [0, 0, 1, 1], [], []>} : vector<4x4xbf16>, vector<4x1024xbf16>, vector<4x1024xf32> -> vector<4x1024xf32>
    %117 = arith.addf %112, %116 : vector<4x1024xf32>
    %118 = vector.extract_strided_slice %3 {offsets = [0, 229], sizes = [4, 1024], strides = [1, 1]} : vector<4x1280xbf16> to vector<4x1024xbf16>
    %c23 = arith.constant 23 : index
    %c0_74 = arith.constant 0 : index
    %c0_75 = arith.constant 0 : index
    %119 = vector.load %arg1[%c23, %c0_74, %c0_75] : memref<27x4x4xbf16, #tpu.memory_space<vmem>>, vector<1x4x4xbf16>
    %120 = vector.shape_cast %119 : vector<1x4x4xbf16> to vector<4x4xbf16>
    %cst_76 = arith.constant dense<0.000000e+00> : vector<4x1024xf32>
    %121 = tpu.matmul %120, %118, %cst_76 {dimension_numbers = #tpu.dot_dimension_numbers<[1], [0], [0], [1], [0, 0, 1, 1], [], []>} : vector<4x4xbf16>, vector<4x1024xbf16>, vector<4x1024xf32> -> vector<4x1024xf32>
    %122 = arith.addf %117, %121 : vector<4x1024xf32>
    %123 = vector.extract_strided_slice %3 {offsets = [0, 237], sizes = [4, 1024], strides = [1, 1]} : vector<4x1280xbf16> to vector<4x1024xbf16>
    %c24 = arith.constant 24 : index
    %c0_77 = arith.constant 0 : index
    %c0_78 = arith.constant 0 : index
    %124 = vector.load %arg1[%c24, %c0_77, %c0_78] : memref<27x4x4xbf16, #tpu.memory_space<vmem>>, vector<1x4x4xbf16>
    %125 = vector.shape_cast %124 : vector<1x4x4xbf16> to vector<4x4xbf16>
    %cst_79 = arith.constant dense<0.000000e+00> : vector<4x1024xf32>
    %126 = tpu.matmul %125, %123, %cst_79 {dimension_numbers = #tpu.dot_dimension_numbers<[1], [0], [0], [1], [0, 0, 1, 1], [], []>} : vector<4x4xbf16>, vector<4x1024xbf16>, vector<4x1024xf32> -> vector<4x1024xf32>
    %127 = arith.addf %122, %126 : vector<4x1024xf32>
    %128 = vector.extract_strided_slice %3 {offsets = [0, 238], sizes = [4, 1024], strides = [1, 1]} : vector<4x1280xbf16> to vector<4x1024xbf16>
    %c25 = arith.constant 25 : index
    %c0_80 = arith.constant 0 : index
    %c0_81 = arith.constant 0 : index
    %129 = vector.load %arg1[%c25, %c0_80, %c0_81] : memref<27x4x4xbf16, #tpu.memory_space<vmem>>, vector<1x4x4xbf16>
    %130 = vector.shape_cast %129 : vector<1x4x4xbf16> to vector<4x4xbf16>
    %cst_82 = arith.constant dense<0.000000e+00> : vector<4x1024xf32>
    %131 = tpu.matmul %130, %128, %cst_82 {dimension_numbers = #tpu.dot_dimension_numbers<[1], [0], [0], [1], [0, 0, 1, 1], [], []>} : vector<4x4xbf16>, vector<4x1024xbf16>, vector<4x1024xf32> -> vector<4x1024xf32>
    %132 = arith.addf %127, %131 : vector<4x1024xf32>
    %133 = vector.extract_strided_slice %3 {offsets = [0, 239], sizes = [4, 1024], strides = [1, 1]} : vector<4x1280xbf16> to vector<4x1024xbf16>
    %c26 = arith.constant 26 : index
    %c0_83 = arith.constant 0 : index
    %c0_84 = arith.constant 0 : index
    %134 = vector.load %arg1[%c26, %c0_83, %c0_84] : memref<27x4x4xbf16, #tpu.memory_space<vmem>>, vector<1x4x4xbf16>
    %135 = vector.shape_cast %134 : vector<1x4x4xbf16> to vector<4x4xbf16>
    %cst_85 = arith.constant dense<0.000000e+00> : vector<4x1024xf32>
    %136 = tpu.matmul %135, %133, %cst_85 {dimension_numbers = #tpu.dot_dimension_numbers<[1], [0], [0], [1], [0, 0, 1, 1], [], []>} : vector<4x4xbf16>, vector<4x1024xbf16>, vector<4x1024xf32> -> vector<4x1024xf32>
    %137 = arith.addf %132, %136 : vector<4x1024xf32>
    %c0_86 = arith.constant 0 : index
    %c0_87 = arith.constant 0 : index
    %138 = vector.load %arg2[%c0_86, %c0_87] : memref<4x1xf32, #tpu.memory_space<vmem>>, vector<4x1xf32>
    %139 = vector.broadcast %138 : vector<4x1xf32> to vector<4x1024xf32>
    %140 = arith.addf %137, %139 : vector<4x1024xf32>
    %cst_88 = arith.constant 0.000000e+00 : f32
    %141 = vector.broadcast %cst_88 : f32 to vector<4x1024xf32>
    %142 = arith.cmpf ogt, %140, %141 : vector<4x1024xf32>
    %cst_89 = arith.constant 0.000000e+00 : f32
    %143 = vector.broadcast %cst_89 : f32 to vector<4x1024xf32>
    %144 = arith.minimumf %140, %143 : vector<4x1024xf32>
    %145 = math.exp %144 : vector<4x1024xf32>
    %cst_90 = arith.constant 1.000000e+00 : f32
    %146 = vector.broadcast %cst_90 : f32 to vector<4x1024xf32>
    %147 = arith.subf %145, %146 : vector<4x1024xf32>
    %148 = arith.select %142, %140, %147 : vector<4x1024xi1>, vector<4x1024xf32>
    %c0_91 = arith.constant 0 : index
    %c0_92 = arith.constant 0 : index
    %149 = vector.load %arg6[%c0_91, %c0_92] : memref<1x4xf32, #tpu.memory_space<vmem>>, vector<1x4xf32>
    %cst_93 = arith.constant dense<0.000000e+00> : vector<1x1024xf32>
    %150 = tpu.matmul %149, %148, %cst_93 {dimension_numbers = #tpu.dot_dimension_numbers<[1], [0], [0], [1], [0, 0, 1, 1], [], []>} : vector<1x4xf32>, vector<4x1024xf32>, vector<1x1024xf32> -> vector<1x1024xf32>
    %c0_94 = arith.constant 0 : index
    %151 = memref.load %arg7[%c0_94] : memref<1xf32, #tpu.memory_space<smem>>
    %152 = vector.broadcast %151 : f32 to vector<1x1024xf32>
    %153 = arith.addf %150, %152 : vector<1x1024xf32>
    %c0_95 = arith.constant 0 : index
    %c0_96 = arith.constant 0 : index
    %154 = vector.load %arg8[%c0_95, %c0_96] : memref<1x1024xf32, #tpu.memory_space<vmem>>, vector<1x1024xf32>
    tpu.vector_store %arg8[%c0_95, %c0_96], %153 {strides = array<i32>} : memref<1x1024xf32, #tpu.memory_space<vmem>>, vector<1x1024xf32>,
    return
  }
  func.func @transform_0(%arg0: i32) -> (i32, i32, i32) {
    %c0_i32 = arith.constant 0 : i32
    %c0_i32_0 = arith.constant 0 : i32
    %c0_i32_1 = arith.constant 0 : i32
    %c0_i32_2 = arith.constant 0 : i32
    return %c0_i32, %c0_i32_0, %c0_i32_1 : i32, i32, i32
  }
  func.func @transform_1(%arg0: i32) -> (i32, i32) {
    %c0_i32 = arith.constant 0 : i32
    %c0_i32_0 = arith.constant 0 : i32
    %c0_i32_1 = arith.constant 0 : i32
    return %c0_i32, %c0_i32_0 : i32, i32
  }
  func.func @transform_2(%arg0: i32) -> (i32, i32) {
    %c1_i32 = arith.constant 1 : i32
    %0 = arith.addi %arg0, %c1_i32 : i32
    %c0_i32 = arith.constant 0 : i32
    %c0_i32_0 = arith.constant 0 : i32
    return %c0_i32, %0 : i32, i32
  }
  func.func @transform_3(%arg0: i32) -> (i32, i32) {
    %c0_i32 = arith.constant 0 : i32
    %c0_i32_0 = arith.constant 0 : i32
    return %c0_i32, %arg0 : i32, i32
  }
  func.func @transform_4(%arg0: i32) -> (i32, i32) {
    %c0_i32 = arith.constant 0 : i32
    %c0_i32_0 = arith.constant 0 : i32
    return %c0_i32, %arg0 : i32, i32
  }
  func.func @transform_5(%arg0: i32) -> (i32, i32) {
    %c0_i32 = arith.constant 0 : i32
    %c0_i32_0 = arith.constant 0 : i32
    %c0_i32_1 = arith.constant 0 : i32
    return %c0_i32, %c0_i32_0 : i32, i32
  }
  func.func @transform_6(%arg0: i32) -> i32 {
    %c0_i32 = arith.constant 0 : i32
    %c0_i32_0 = arith.constant 0 : i32
    return %c0_i32 : i32
  }
  func.func @transform_7(%arg0: i32) -> (i32, i32) {
    %c0_i32 = arith.constant 0 : i32
    %c0_i32_0 = arith.constant 0 : i32
    return %c0_i32, %arg0 : i32, i32
  }
}

</mosaic_0001>

<bundles_post_ra>
// kernel: tile.0
= control target key start
LH: loop header
LB: loop body
LE: loop exit
PB: predicated region body
PF: predicated region fallthrough
CT: control target
= control target key end

     0   :  { %vm3_vm0 = vcmask 7168   ;;  %s30_s8 = smov 125   ;;  %s31_s11 = smov 126   ;;  %s57_s0 = inlined_call_operand.vmem [shape: f32[8,4], index: 0, kind: input, shape index: {}]   ;;  %s58_s1 = inlined_call_operand.vmem [shape: f32[32,1], index: 1, kind: output, shape index: {}]  }
   0x1   :  { %v5_v0 = vld [vmem:[%s57_s0] sm:$0xff]   ;;  %s29_s0 = smov 127  }
   0x2   :  { %6 = vrot.lane.b32.xlu0 %v5_v0, %s29_s0  ;;  %18 = vrot.lane.b32.xlu1 %v5_v0, %s30_s8  ;;  %4 = vst.msk [vmem:[%s58_s1] ss:$4 sm:$0xff] %vm3_vm0, %v5_v0  }
   0x6   :  { %12 = vrot.lane.b32.xlu0 %v5_v0, %s31_s11 }
  0x74   :  { %v7_v1 = vpop.permute.xlu0 %6   ;;  %v19_v2 = vpop.permute.xlu1 %18  }
  0x75   :  { %23 = vst.msk [vmem:[%s58_s1 + $0x1] ss:$4 sm:$0xff] %vm3_vm0, %v7_v1   ;;  %25 = vst.msk [vmem:[%s58_s1 + $0x3] ss:$4 sm:$0xff] %vm3_vm0, %v19_v2  }
  0x78   :  { %v13_v3 = vpop.permute.xlu0 %12  }
  0x79   :  { %24 = vst.msk [vmem:[%s58_s1 + $0x2] ss:$4 sm:$0xff] %vm3_vm0, %v13_v3  }

// kernel: tile.8
= control target key start
LH: loop header
LB: loop body
LE: loop exit
PB: predicated region body
PF: predicated region fallthrough
CT: control target
= control target key end

     0   :  { %s22_s0 = inlined_call_operand.vmem [shape: f32[4], index: 0, kind: input, shape index: {}]   ;;  %s23_s1 = inlined_call_operand.vmem [shape: f32[8,4], index: 1, kind: output, shape index: {}]  }
   0x1   :  { %v4_v0 = vld [vmem:[%s22_s0] ss:$0 sm:$0xff] }
   0x2   :  { %5 = vst [vmem:[%s23_s1] sm:$0xff] %v4_v0 }

// kernel: last_conv_block_elu.3
= control target key start
LH: loop header
LB: loop body
LE: loop exit
PB: predicated region body
PF: predicated region fallthrough
CT: control target
= control target key end

     0   :  { %vm61_vm0 = vcmask 1043456   ;;  %vm54_vm1 = vcmask 64512   ;;  %v212_v1 = vmov 0   ;;  %s262_s2 = inlined_call_operand.vmem [shape: bf16[8,128], index: 2, kind: input, shape index: {}]   ;;  %s263_s0 = inlined_call_operand.vmem [shape: bf16[1,32,8], index: 0, kind: input, shape index: {}]   ;;  %s264_s1 = inlined_call_operand.vmem [shape: f32[32,1], index: 1, kind: input, shape index: {}]   ;;  %s265_s3 = inlined_call_operand.vmem [shape: bf16[32,128], index: 3, kind: output, shape index: {}]  }
   0x1   :  { %v15_v0 = vld [vmem:[%s262_s2] sm:$0xf]  ;;  %201 = vset.pattern.permute.xlu1 %v212_v1  ;;  %200 = vset.pattern.permute.xlu0 %v212_v1  ;;  %v203_v4 = vld [vmem:[%s263_s0 + $0x8] sm:$0xff]   ;;  %v22_v5 = vld [vmem:[%s264_s1 + $0x10] sm:$0xff] }
   0x2   :  { %198 = vmatprep.subr.msk.bf16.mxu0 %vm61_vm0, %v15_v0  ;;  %v63_v2 = vsel %vm61_vm0, %v15_v0, 0  ;;  %v202_v3 = vld [vmem:[%s263_s0] sm:$0xff]   ;;  %36 = vperm.xlu1 %201, %v22_v5   ;;  %v23_v7 = vld [vmem:[%s264_s1 + $0x18] sm:$0xff]  ;;  %v21_v8 = vld [vmem:[%s264_s1 + $0x8] sm:$0xff] }
   0x3   :  { %193 = vmatpush3.bf16.msra.mxu0 %v63_v2  ;;  %v20_v6 = vld [vmem:[%s264_s1] sm:$0xff]  ;;  %194 = vmatprep.mubr.msk.bf16.mxu0 %vm54_vm1, %v202_v3 }
   0x4   :  { %26 = vperm.xlu0 %200, %v20_v6  }
   0x6   :  { %195 = vmatmul.mubr.msk.bf16.vlgmr.msra.gmra.mrb[0].mxu0 %vm54_vm1, %v203_v4  ;;  %41 = vperm.xlu1 %201, %v23_v7  }
   0x8   :  { %31 = vperm.xlu0 %200, %v21_v8  }
  0x81   :  { %v37_v9 = vpop.permute.xlu1 %36 }
  0x83   :  { %v27_v10 = vpop.permute.xlu0 %26 }
  0x85   :  { %v42_v14 = vpop.permute.xlu1 %41 }
  0x87   :  { %v32_v17 = vpop.permute.xlu0 %31 }
  0xd9   :  { %v196_v11 = vpop.f32.mrb[0].mxu0 }
  0xda   :  { %v108_v12 = vadd.f32 %v196_v11, %v37_v9  ;;  %v99_v13 = vpop.f32.mrb[1].mxu0 }
  0xdb   :  { %v100_v15 = vadd.f32 %v99_v13, %v27_v10  ;;  %v197_v16 = vpop.f32.mrb[2].mxu0 }
  0xdc   :  { %v120_v18 = vmin.f32 %v108_v12, 0.0  ;;  %v111_v19 = vadd.f32 %v197_v16, %v42_v14  ;;  %v102_v20 = vpop.f32.mrb[3].mxu0  ;;  %vm116_vm2 = vcmp.gt.f32.partialorder %v108_v12, 0.0 }
  0xdd   :  { %v118_v21 = vmin.f32 %v100_v15, 0.0  ;;  %v103_v22 = vadd.f32 %v102_v20, %v32_v17  ;;  %vm114_vm4 = vcmp.gt.f32.partialorder %v100_v15, 0.0 }
  0xde   :  { %v126_v23 = vmul.f32 1.442695, %v120_v18  ;;  %v121_v24 = vmin.f32 %v111_v19, 0.0  ;;  %vm117_vm3 = vcmp.gt.f32.partialorder %v111_v19, 0.0 }
  0xdf   :  { %v122_v25 = vmul.f32 1.442695, %v118_v21  ;;  %v119_v26 = vmin.f32 %v103_v22, 0.0  ;;  %vm115_vm5 = vcmp.gt.f32.partialorder %v103_v22, 0.0 }
  0xe0   :  { %204 = vpow2.f32 %v126_v23  ;;  %v128_v27 = vmul.f32 1.442695, %v121_v24 }
  0xe1   :  { %206 = vpow2.f32 %v122_v25  ;;  %v124_v28 = vmul.f32 1.442695, %v119_v26 }
  0xe2   :  { %208 = vpow2.f32 %v128_v27 }
  0xe3   :  { %210 = vpow2.f32 %v124_v28 }
  0xea   :  { %v205_v29 = vpop.eup %204 }
  0xeb   :  { %v207_v30 = vpop.eup %206  ;;  %v168_v31 = vadd.f32 -1.0, %v205_v29 }
  0xec   :  { %v209_v32 = vpop.eup %208  ;;  %v166_v33 = vadd.f32 -1.0, %v207_v30 }
  0xed   :  { %v211_v34 = vpop.eup %210  ;;  %v169_v35 = vadd.f32 -1.0, %v209_v32  ;;  %v136_v37 = vsel %vm116_vm2, %v108_v12, %v168_v31 }
  0xee   :  { %v167_v36 = vadd.f32 -1.0, %v211_v34  ;;  %v134_v39 = vsel %vm114_vm4, %v100_v15, %v166_v33 }
  0xef   :  { %v137_v38 = vsel %vm117_vm3, %v111_v19, %v169_v35 }
  0xf0   :  { %v186_v40 = vpack.c.bf16 %v137_v38, %v136_v37  ;;  %v135_v41 = vsel %vm115_vm5, %v103_v22, %v167_v36 }
  0xf1   :  { %v181_v42 = vpack.c.bf16 %v135_v41, %v134_v39 }
  0xf2   :  { %188 = vst [vmem:[%s265_s3 + $0x8] sm:$0xff] %v186_v40  }
  0xf3   :  { %182 = vst [vmem:[%s265_s3] sm:$0xff] %v181_v42  }

// kernel: last_conv_block_elu.4
= control target key start
LH: loop header
LB: loop body
LE: loop exit
PB: predicated region body
PF: predicated region fallthrough
CT: control target
= control target key end

     0   :  { %s7124_s21 = smov 0   ;;  %s8617_s0 = inlined_call_operand.vmem [shape: bf16[27,4,8], index: 0, kind: input, shape index: {}]   ;;  %s8618_s1 = inlined_call_operand.vmem [shape: f32[4,1], index: 1, kind: input, shape index: {}]   ;;  %s8619_s2 = inlined_call_operand.vmem [shape: bf16[8,4096], index: 2, kind: input, shape index: {}]   ;;  %s8620_s3 = inlined_call_operand.vmem [shape: bf16[8,256], index: 3, kind: input, shape index: {}]   ;;  %s8621_s4 = inlined_call_operand.vmem [shape: bf16[8,256], index: 4, kind: input, shape index: {}]   ;;  %s8622_s5 = inlined_call_operand.vmem [shape: f32[1,2048], index: 5, kind: input, shape index: {}]   ;;  %s8623_s6 = inlined_call_operand.vmem [shape: bf16[4,2048], index: 6, kind: output, shape index: {}]  }
   0x1 LB: > { %s6713_s22 = sadd.s32 4294967295, %s7059_s21   ;;  %p6717_p0 = scmp.ge.s32.totalorder %s7059_s21, 1  ;;  %s7059_s21 = sphi %s7124_s21, %s16_s21  }
   0x2   : > { %p245_p1 = scmp.lt.s32.totalorder %s7059_s21, 3 }
   0x4   : > { %p246_p2 = pnand %p6717_p0, %p245_p1 }
   0x5   : > { %p296_p3 = scmp.lt.s32.totalorder (!%p246_p2), %s6713_s22, 1  ;;  %s7132_s23 = sshll.u32 (!%p246_p2), %s6713_s22, 3  ;;  %v7062_v1 = vmov (!%p246_p2), 0   ;;  %vm364_vm0 = vcmask (!%p246_p2), 900096   ;;  %vm377_vm1 = vcmask (!%p246_p2), 1043456   ;;  %vm373_vm2 = vcmask (!%p246_p2), 64512  }
   0x6   : > { %249 = sbr.rel (%p246_p2) target bundleno = 848 (0x350), region = 44  ;;  %s6990_s24 = sadd.s32 (!%p246_p2), 8, %s7132_s23  ;;  %434 = vmatprep.mubr.bf16.mxu0 (!%p246_p2), %v7062_v1  ;;  %475 = vmatprep.mubr.bf16.mxu1 (!%p246_p2), %v7062_v1  ;;  %v6733_v22 = vld [vmem:[%s8617_s0 + $0x2] sm:$0x3] (!%p246_p2)  ;;  %vm584_vm3 = vcmask (!%p246_p2), 908288   ;;  %vm804_vm4 = vcmask (!%p246_p2), 891904  }
   0x7   : > { %p290_p4 = scmp.lt.s32.totalorder (!%p246_p2), %s6990_s24, 31  ;;  %s7061_s29 = smov (!%p246_p2), 110   ;;  %7027 = vset.pattern.permute.xlu0 (!%p246_p2), %v7062_v1  ;;  %v342_v46 = vld [vmem:[%s8617_s0] sm:$0x3] (!%p246_p2)  ;;  %vm1032_vm5 = vcmask (!%p246_p2), 826368   ;;  %vm1260_vm6 = vcmask (!%p246_p2), 818176  }
   0x8   : > { %s7063_s10 = smov (!%p246_p2), 111   ;;  %s7064_s11 = smov (!%p246_p2), 109   ;;  %vm1488_vm7 = vcmask (!%p246_p2), 809984   ;;  %vm1716_vm8 = vcmask (!%p246_p2), 744448   ;;  %vm1944_vm9 = vcmask (!%p246_p2), 736256   ;;  %vm2172_vm10 = vcmask (!%p246_p2), 728064  }
   0x9   : > { %s7065_s12 = smov (!%p246_p2), 101   ;;  %s7066_s13 = smov (!%p246_p2), 100   ;;  %vm2400_vm11 = vcmask (!%p246_p2), 89088   ;;  %vm2628_vm12 = vcmask (!%p246_p2), 80896   ;;  %vm2856_vm13 = vcmask (!%p246_p2), 72704   ;;  %vm3084_vm14 = vcmask (!%p246_p2), 7168  }
   0xa   : > { %s7067_s14 = smov (!%p246_p2), 99   ;;  %s7068_s15 = smov (!%p246_p2), 91   ;;  %vm3514_vm15 = vcmask (!%p246_p2), 1039360  }
   0xb   : > { %s7069_s18 = smov (!%p246_p2), 90   ;;  %s7072_s7 = smov (!%p246_p2), 10  }
   0xc   : > { %s7075_s16 = smov (!%p246_p2), 127   ;;  %s7076_s20 = smov (!%p246_p2), 119  }
   0xd   : > { %s8625_s22 = smov (!%p296_p3, %s6713_s22), 1  ;;  %s8627_s24 = smov (!%p290_p4, %s6990_s24), 31 }
   0xe   : > { %s6720_s25 = sshll.u32 %s8625_s22, 2  ;;  %s6719_s30 = sshll.u32 %s8627_s24, 2 }
   0xf   : > { %s299_s28 = scalar_lea.vmem %s8620_s3, %s6720_s25  ;;  %s293_s9 = scalar_lea.vmem %s8619_s2, %s6719_s30 }
  0x10   : > { %v7143_v0 = vld [vmem:[%s299_s28] sm:$0xf]  ;;  %v318_v3 = vld [vmem:[%s293_s9 + $0x8] sm:$0xff]  ;;  %v319_v8 = vld [vmem:[%s293_s9 + $0x10] sm:$0xff]  ;;  %s7070_s24 = smov 89   ;;  %s7071_s28 = smov 11  }
  0x11   : > { %346 = vrot.lane.b32.xlu0 %v7143_v0, %s7061_s29  ;;  %v317_v2 = vld [vmem:[%s293_s9] sm:$0xff]  ;;  %v7158_v6 = vcombine.low %v318_v3, %v318_v3  ;;  %v7160_v7 = vcombine.high %v318_v3, %v318_v3  ;;  %v7164_v9 = vcombine.low %v319_v8, %v319_v8  ;;  %v7166_v10 = vcombine.high %v319_v8, %v319_v8  ;;  %v320_v11 = vld [vmem:[%s293_s9 + $0x18] sm:$0xff]  ;;  %s7544_s19 = scalar_lea.vmem %s8621_s4, %s6720_s25  ;;  %s7077_s27 = smov 118  }
  0x12   : > { %v7152_v4 = vcombine.high %v317_v2, %v317_v2  ;;  %v7154_v5 = vcombine.low %v317_v2, %v317_v2  ;;  %v7170_v12 = vcombine.low %v320_v11, %v320_v11  ;;  %v7172_v13 = vcombine.high %v320_v11, %v320_v11  ;;  %v6750_v8 = vld [vmem:[%s8617_s0 + $0x4] sm:$0x3]  ;;  %s7078_s30 = smov 117   ;;  %s7079_s9 = smov 39  }
  0x13   : > { %s7086_s8 = smov 18   ;;  %p305_p5 = scmp.lt.s32.totalorder %s7132_s23, 15 }
  0x14   : > { %350 = vrot.lane.b32.xlu1 %v7152_v4, %s7061_s29 }
  0x15   : > { %348 = vrot.lane.b32.xlu0 %v7154_v5, %s7061_s29  ;;  %s8629_s23 = smov (!%p305_p5, %s7132_s23), 15 }
  0x18   : > { %352 = vrot.lane.b32.xlu1 %v7158_v6, %s7061_s29 }
  0x19   : > { %354 = vrot.lane.b32.xlu0 %v7160_v7, %s7061_s29 }
  0x1c   : > { %356 = vrot.lane.b32.xlu1 %v7164_v9, %s7061_s29 }
  0x1d   : > { %358 = vrot.lane.b32.xlu0 %v7166_v10, %s7061_s29 }
  0x20   : > { %360 = vrot.lane.b32.xlu1 %v7170_v12, %s7061_s29 }
  0x21   : > { %362 = vrot.lane.b32.xlu0 %v7172_v13, %s7061_s29 }
  0x24   : > { %566 = vrot.lane.b32.xlu1 %v7143_v0, %s7063_s10 }
  0x25   : > { %568 = vrot.lane.b32.xlu0 %v7154_v5, %s7063_s10 }
  0x28   : > { %570 = vrot.lane.b32.xlu1 %v7152_v4, %s7063_s10 }
  0x29   : > { %572 = vrot.lane.b32.xlu0 %v7158_v6, %s7063_s10 }
  0x2c   : > { %574 = vrot.lane.b32.xlu1 %v7160_v7, %s7063_s10 }
  0x2d   : > { %576 = vrot.lane.b32.xlu0 %v7164_v9, %s7063_s10 }
  0x30   : > { %578 = vrot.lane.b32.xlu1 %v7166_v10, %s7063_s10 }
  0x31   : > { %580 = vrot.lane.b32.xlu0 %v7170_v12, %s7063_s10 }
  0x34   : > { %582 = vrot.lane.b32.xlu1 %v7172_v13, %s7063_s10  ;;  %s7073_s10 = smov 9  }
  0x35   : > { %786 = vrot.lane.b32.xlu0 %v7143_v0, %s7064_s11 }
  0x38   : > { %788 = vrot.lane.b32.xlu1 %v7154_v5, %s7064_s11 }
  0x39   : > { %790 = vrot.lane.b32.xlu0 %v7152_v4, %s7064_s11 }
  0x3c   : > { %792 = vrot.lane.b32.xlu1 %v7158_v6, %s7064_s11 }
  0x3d   : > { %794 = vrot.lane.b32.xlu0 %v7160_v7, %s7064_s11 }
  0x40   : > { %796 = vrot.lane.b32.xlu1 %v7164_v9, %s7064_s11 }
  0x41   : > { %798 = vrot.lane.b32.xlu0 %v7166_v10, %s7064_s11 }
  0x44   : > { %800 = vrot.lane.b32.xlu1 %v7170_v12, %s7064_s11 }
  0x45   : > { %802 = vrot.lane.b32.xlu0 %v7172_v13, %s7064_s11  ;;  %s6724_s11 = sshll.u32 %s8629_s23, 1 }
  0x48   : > { %1014 = vrot.lane.b32.xlu1 %v7143_v0, %s7065_s12 }
  0x49   : > { %1016 = vrot.lane.b32.xlu0 %v7154_v5, %s7065_s12 }
  0x4c   : > { %1018 = vrot.lane.b32.xlu1 %v7152_v4, %s7065_s12 }
  0x4d   : > { %1020 = vrot.lane.b32.xlu0 %v7158_v6, %s7065_s12 }
  0x50   : > { %1022 = vrot.lane.b32.xlu1 %v7160_v7, %s7065_s12 }
  0x51   : > { %1024 = vrot.lane.b32.xlu0 %v7164_v9, %s7065_s12 }
  0x54   : > { %1026 = vrot.lane.b32.xlu1 %v7166_v10, %s7065_s12 }
  0x55   : > { %1028 = vrot.lane.b32.xlu0 %v7170_v12, %s7065_s12 }
  0x58   : > { %1030 = vrot.lane.b32.xlu1 %v7172_v13, %s7065_s12  ;;  %s7080_s12 = smov 38  }
  0x59   : > { %1242 = vrot.lane.b32.xlu0 %v7143_v0, %s7066_s13 }
  0x5c   : > { %1244 = vrot.lane.b32.xlu1 %v7154_v5, %s7066_s13 }
  0x5d   : > { %1246 = vrot.lane.b32.xlu0 %v7152_v4, %s7066_s13 }
  0x60   : > { %1248 = vrot.lane.b32.xlu1 %v7158_v6, %s7066_s13 }
  0x61   : > { %1250 = vrot.lane.b32.xlu0 %v7160_v7, %s7066_s13 }
  0x64   : > { %1252 = vrot.lane.b32.xlu1 %v7164_v9, %s7066_s13 }
  0x65   : > { %1254 = vrot.lane.b32.xlu0 %v7166_v10, %s7066_s13 }
  0x68   : > { %1256 = vrot.lane.b32.xlu1 %v7170_v12, %s7066_s13 }
  0x69   : > { %1258 = vrot.lane.b32.xlu0 %v7172_v13, %s7066_s13  ;;  %s7074_s13 = smov 1  }
  0x6c   : > { %1470 = vrot.lane.b32.xlu1 %v7143_v0, %s7067_s14 }
  0x6d   : > { %1472 = vrot.lane.b32.xlu0 %v7154_v5, %s7067_s14 }
  0x70   : > { %1474 = vrot.lane.b32.xlu1 %v7152_v4, %s7067_s14 }
  0x71   : > { %1476 = vrot.lane.b32.xlu0 %v7158_v6, %s7067_s14 }
  0x74   : > { %1478 = vrot.lane.b32.xlu1 %v7160_v7, %s7067_s14 }
  0x75   : > { %1480 = vrot.lane.b32.xlu0 %v7164_v9, %s7067_s14 }
  0x78   : > { %1482 = vrot.lane.b32.xlu1 %v7166_v10, %s7067_s14 }
  0x79   : > { %1484 = vrot.lane.b32.xlu0 %v7170_v12, %s7067_s14 }
  0x7c   : > { %1486 = vrot.lane.b32.xlu1 %v7172_v13, %s7067_s14 }
  0x7d   : > { %1698 = vrot.lane.b32.xlu0 %v7143_v0, %s7068_s15 }
  0x80   : > { %1700 = vrot.lane.b32.xlu1 %v7154_v5, %s7068_s15 }
  0x81   : > { %1702 = vrot.lane.b32.xlu0 %v7152_v4, %s7068_s15 }
  0x83   : > { %v347_v14 = vpop.permute.xlu0 %346 }
  0x84   : > { %1704 = vrot.lane.b32.xlu1 %v7158_v6, %s7068_s15 }
  0x85   : > { %1706 = vrot.lane.b32.xlu0 %v7160_v7, %s7068_s15 }
  0x86   : > { %v351_v15 = vpop.permute.xlu1 %350 }
  0x87   : > { %v349_v16 = vpop.permute.xlu0 %348 }
  0x88   : > { %v366_v17 = vsel %vm364_vm0, %v349_v16, %v351_v15  ;;  %v365_v18 = vsel %vm364_vm0, %v347_v14, %v349_v16  ;;  %1708 = vrot.lane.b32.xlu1 %v7164_v9, %s7068_s15 }
  0x89   : > { %1710 = vrot.lane.b32.xlu0 %v7166_v10, %s7068_s15  ;;  %v379_v19 = vsel %vm377_vm1, %v365_v18, 0  ;;  %6734 = vmatprep.subr.msk.bf16.mxu0 %vm377_vm1, %v366_v17 }
  0x8a   : > { %403 = vmatpush1.bf16.msra.mxu0 %v379_v19  ;;  %v353_v20 = vpop.permute.xlu1 %352 }
  0x8b   : > { %v355_v21 = vpop.permute.xlu0 %354  ;;  %v367_v24 = vsel %vm364_vm0, %v351_v15, %v353_v20 }
  0x8c   : > { %v368_v23 = vsel %vm364_vm0, %v353_v20, %v355_v21  ;;  %1712 = vrot.lane.b32.xlu1 %v7170_v12, %s7068_s15  ;;  %v385_v25 = vsel %vm377_vm1, %v367_v24, 0 }
  0x8d   : > { %1714 = vrot.lane.b32.xlu0 %v7172_v13, %s7068_s15  ;;  %6736 = vmatprep.subr.msk.bf16.mxu1 %vm377_vm1, %v368_v23  ;;  %s7081_s15 = smov 37  }
  0x8e   : > { %6735 = vmatmul.mubr.msk.bf16.vlgmr.msra.gmra.mrb[0].mxu0 %vm373_vm2, %v6733_v22  ;;  %444 = vmatpush1.bf16.msra.mxu1 %v385_v25  ;;  %v357_v26 = vpop.permute.xlu1 %356 }
  0x8f   : > { %v359_v27 = vpop.permute.xlu0 %358  ;;  %516 = vmatprep.mubr.bf16.mxu0 %v7062_v1  ;;  %v369_v28 = vsel %vm364_vm0, %v355_v21, %v357_v26 }
  0x90   : > { %v370_v29 = vsel %vm364_vm0, %v357_v26, %v359_v27  ;;  %1926 = vrot.lane.b32.xlu1 %v7143_v0, %s7069_s18  ;;  %v391_v30 = vsel %vm377_vm1, %v369_v28, 0 }
  0x91   : > { %1928 = vrot.lane.b32.xlu0 %v7154_v5, %s7069_s18  ;;  %6738 = vmatprep.subr.msk.bf16.mxu0 %vm377_vm1, %v370_v29 }
  0x92   : > { %6737 = vmatmul.mubr.msk.bf16.vlgmr.msra.gmra.mrb[0].mxu1 %vm373_vm2, %v6733_v22  ;;  %485 = vmatpush1.bf16.msra.mxu0 %v391_v30  ;;  %v361_v31 = vpop.permute.xlu1 %360 }
  0x93   : > { %v363_v32 = vpop.permute.xlu0 %362  ;;  %557 = vmatprep.mubr.bf16.mxu1 %v7062_v1  ;;  %v371_v33 = vsel %vm364_vm0, %v359_v27, %v361_v31 }
  0x94   : > { %v372_v34 = vsel %vm364_vm0, %v361_v31, %v363_v32  ;;  %1930 = vrot.lane.b32.xlu1 %v7152_v4, %s7069_s18  ;;  %v397_v35 = vsel %vm377_vm1, %v371_v33, 0  ;;  %vm3742_vm0 = vcmask 973824  }
  0x95   : > { %1932 = vrot.lane.b32.xlu0 %v7158_v6, %s7069_s18  ;;  %6740 = vmatprep.subr.msk.bf16.mxu1 %vm377_vm1, %v372_v34 }
  0x96   : > { %6739 = vmatmul.mubr.msk.bf16.vlgmr.msra.gmra.mrb[4].mxu0 %vm373_vm2, %v6733_v22  ;;  %526 = vmatpush1.bf16.msra.mxu1 %v397_v35  ;;  %v567_v36 = vpop.permute.xlu1 %566 }
  0x97   : > { %v569_v37 = vpop.permute.xlu0 %568  ;;  %652 = vmatprep.mubr.bf16.mxu0 %v7062_v1 }
  0x98   : > { %1934 = vrot.lane.b32.xlu1 %v7160_v7, %s7069_s18  ;;  %v585_v38 = vsel %vm584_vm3, %v567_v36, %v569_v37  ;;  %v6759_v36 = vld [vmem:[%s8617_s0 + $0x6] sm:$0x3] }
  0x99   : > { %1936 = vrot.lane.b32.xlu0 %v7164_v9, %s7069_s18  ;;  %v597_v42 = vsel %vm377_vm1, %v585_v38, 0 }
  0x9a   : > { %6741 = vmatmul.mubr.msk.bf16.vlgmr.msra.gmra.mrb[4].mxu1 %vm373_vm2, %v6733_v22  ;;  %v571_v39 = vpop.permute.xlu1 %570 }
  0x9b   : > { %v573_v40 = vpop.permute.xlu0 %572  ;;  %693 = vmatprep.mubr.bf16.mxu1 %v7062_v1  ;;  %v586_v41 = vsel %vm584_vm3, %v569_v37, %v571_v39 }
  0x9c   : > { %1938 = vrot.lane.b32.xlu1 %v7166_v10, %s7069_s18  ;;  %6742 = vmatprep.subr.msk.bf16.mxu0 %vm377_vm1, %v586_v41  ;;  %v587_v43 = vsel %vm584_vm3, %v571_v39, %v573_v40 }
  0x9d   : > { %1940 = vrot.lane.b32.xlu0 %v7170_v12, %s7069_s18  ;;  %621 = vmatpush1.bf16.msra.mxu0 %v597_v42  ;;  %v603_v48 = vsel %vm377_vm1, %v587_v43, 0 }
  0x9e   : > { %v575_v44 = vpop.permute.xlu1 %574 }
  0x9f   : > { %v577_v45 = vpop.permute.xlu0 %576  ;;  %v588_v47 = vsel %vm584_vm3, %v573_v40, %v575_v44 }
  0xa0   : > { %1942 = vrot.lane.b32.xlu1 %v7172_v13, %s7069_s18  ;;  %6744 = vmatprep.subr.msk.bf16.mxu1 %vm377_vm1, %v588_v47  ;;  %v589_v49 = vsel %vm584_vm3, %v575_v44, %v577_v45  ;;  %s7082_s18 = smov 29  }
  0xa1   : > { %2154 = vrot.lane.b32.xlu0 %v7143_v0, %s7070_s24  ;;  %6743 = vmatmul.mubr.msk.bf16.vlgmr.msra.gmra.mrb[8].mxu0 %vm373_vm2, %v342_v46  ;;  %v609_v53 = vsel %vm377_vm1, %v589_v49, 0 }
  0xa2   : > { %662 = vmatpush1.bf16.msra.mxu1 %v603_v48  ;;  %v579_v50 = vpop.permute.xlu1 %578  ;;  %734 = vmatprep.mubr.bf16.mxu0 %v7062_v1 }
  0xa3   : > { %v581_v51 = vpop.permute.xlu0 %580  ;;  %v590_v52 = vsel %vm584_vm3, %v577_v45, %v579_v50 }
  0xa4   : > { %2156 = vrot.lane.b32.xlu1 %v7154_v5, %s7070_s24  ;;  %6746 = vmatprep.subr.msk.bf16.mxu0 %vm377_vm1, %v590_v52  ;;  %v591_v54 = vsel %vm584_vm3, %v579_v50, %v581_v51 }
  0xa5   : > { %2158 = vrot.lane.b32.xlu0 %v7152_v4, %s7070_s24  ;;  %6745 = vmatmul.mubr.msk.bf16.vlgmr.msra.gmra.mrb[8].mxu1 %vm373_vm2, %v342_v46  ;;  %v615_v58 = vsel %vm377_vm1, %v591_v54, 0 }
  0xa6   : > { %703 = vmatpush1.bf16.msra.mxu0 %v609_v53  ;;  %v583_v55 = vpop.permute.xlu1 %582  ;;  %775 = vmatprep.mubr.bf16.mxu1 %v7062_v1 }
  0xa7   : > { %v787_v56 = vpop.permute.xlu0 %786  ;;  %v592_v57 = vsel %vm584_vm3, %v581_v51, %v583_v55  ;;  %vm3970_vm3 = vcmask 965632  }
  0xa8   : > { %2160 = vrot.lane.b32.xlu1 %v7158_v6, %s7070_s24  ;;  %6748 = vmatprep.subr.msk.bf16.mxu1 %vm377_vm1, %v592_v57 }
  0xa9   : > { %2162 = vrot.lane.b32.xlu0 %v7160_v7, %s7070_s24  ;;  %6747 = vmatmul.mubr.msk.bf16.vlgmr.msra.gmra.mrb[12].mxu0 %vm373_vm2, %v342_v46 }
  0xaa   : > { %744 = vmatpush1.bf16.msra.mxu1 %v615_v58  ;;  %v789_v59 = vpop.permute.xlu1 %788  ;;  %872 = vmatprep.mubr.bf16.mxu0 %v7062_v1 }
  0xab   : > { %v791_v60 = vpop.permute.xlu0 %790  ;;  %v805_v61 = vsel %vm804_vm4, %v787_v56, %v789_v59  ;;  %v6768_v56 = vld [vmem:[%s8617_s0 + $0x8] sm:$0x3] }
  0xac   : > { %v806_v62 = vsel %vm804_vm4, %v789_v59, %v791_v60  ;;  %2164 = vrot.lane.b32.xlu1 %v7164_v9, %s7070_s24  ;;  %v817_v63 = vsel %vm377_vm1, %v805_v61, 0 }
  0xad   : > { %2166 = vrot.lane.b32.xlu0 %v7166_v10, %s7070_s24  ;;  %6751 = vmatprep.subr.msk.bf16.mxu0 %vm377_vm1, %v806_v62 }
  0xae   : > { %6749 = vmatmul.mubr.msk.bf16.vlgmr.msra.gmra.mrb[12].mxu1 %vm373_vm2, %v342_v46  ;;  %841 = vmatpush1.bf16.msra.mxu0 %v817_v63  ;;  %v793_v2 = vpop.permute.xlu1 %792 }
  0xaf   : > { %v795_v3 = vpop.permute.xlu0 %794  ;;  %913 = vmatprep.mubr.bf16.mxu1 %v7062_v1  ;;  %v807_v11 = vsel %vm804_vm4, %v791_v60, %v793_v2 }
  0xb0   : > { %v808_v14 = vsel %vm804_vm4, %v793_v2, %v795_v3  ;;  %2168 = vrot.lane.b32.xlu1 %v7170_v12, %s7070_s24  ;;  %v823_v15 = vsel %vm377_vm1, %v807_v11, 0 }
  0xb1   : > { %2170 = vrot.lane.b32.xlu0 %v7172_v13, %s7070_s24  ;;  %6753 = vmatprep.subr.msk.bf16.mxu1 %vm377_vm1, %v808_v14 }
  0xb2   : > { %6752 = vmatmul.mubr.msk.bf16.vlgmr.msra.gmra.mrb[16].mxu0 %vm373_vm2, %v6750_v8  ;;  %882 = vmatpush1.bf16.msra.mxu1 %v823_v15  ;;  %v797_v16 = vpop.permute.xlu1 %796 }
  0xb3   : > { %v799_v17 = vpop.permute.xlu0 %798  ;;  %954 = vmatprep.mubr.bf16.mxu0 %v7062_v1  ;;  %v809_v18 = vsel %vm804_vm4, %v795_v3, %v797_v16 }
  0xb4   : > { %v810_v19 = vsel %vm804_vm4, %v797_v16, %v799_v17  ;;  %2382 = vrot.lane.b32.xlu1 %v7143_v0, %s7071_s28  ;;  %v829_v20 = vsel %vm377_vm1, %v809_v18, 0 }
  0xb5   : > { %2384 = vrot.lane.b32.xlu0 %v7154_v5, %s7071_s28  ;;  %6755 = vmatprep.subr.msk.bf16.mxu0 %vm377_vm1, %v810_v19 }
  0xb6   : > { %6754 = vmatmul.mubr.msk.bf16.vlgmr.msra.gmra.mrb[16].mxu1 %vm373_vm2, %v6750_v8  ;;  %923 = vmatpush1.bf16.msra.mxu0 %v829_v20  ;;  %v801_v21 = vpop.permute.xlu1 %800 }
  0xb7   : > { %v803_v22 = vpop.permute.xlu0 %802  ;;  %995 = vmatprep.mubr.bf16.mxu1 %v7062_v1  ;;  %v811_v23 = vsel %vm804_vm4, %v799_v17, %v801_v21 }
  0xb8   : > { %v812_v24 = vsel %vm804_vm4, %v801_v21, %v803_v22  ;;  %2386 = vrot.lane.b32.xlu1 %v7152_v4, %s7071_s28  ;;  %v835_v25 = vsel %vm377_vm1, %v811_v23, 0  ;;  %vm4198_vm4 = vcmask 957440  }
  0xb9   : > { %2388 = vrot.lane.b32.xlu0 %v7158_v6, %s7071_s28  ;;  %6757 = vmatprep.subr.msk.bf16.mxu1 %vm377_vm1, %v812_v24 }
  0xba   : > { %6756 = vmatmul.mubr.msk.bf16.vlgmr.msra.gmra.mrb[20].mxu0 %vm373_vm2, %v6750_v8  ;;  %964 = vmatpush1.bf16.msra.mxu1 %v835_v25  ;;  %v1015_v26 = vpop.permute.xlu1 %1014 }
  0xbb   : > { %v1017_v27 = vpop.permute.xlu0 %1016  ;;  %1100 = vmatprep.mubr.bf16.mxu0 %v7062_v1 }
  0xbc   : > { %2390 = vrot.lane.b32.xlu1 %v7160_v7, %s7071_s28  ;;  %v1033_v28 = vsel %vm1032_vm5, %v1015_v26, %v1017_v27  ;;  %v6777_v26 = vld [vmem:[%s8617_s0 + $0xa] sm:$0x3] }
  0xbd   : > { %2392 = vrot.lane.b32.xlu0 %v7164_v9, %s7071_s28  ;;  %v1045_v32 = vsel %vm377_vm1, %v1033_v28, 0 }
  0xbe   : > { %6758 = vmatmul.mubr.msk.bf16.vlgmr.msra.gmra.mrb[20].mxu1 %vm373_vm2, %v6750_v8  ;;  %v1019_v29 = vpop.permute.xlu1 %1018 }
  0xbf   : > { %v1021_v30 = vpop.permute.xlu0 %1020  ;;  %1141 = vmatprep.mubr.bf16.mxu1 %v7062_v1  ;;  %v1034_v31 = vsel %vm1032_vm5, %v1017_v27, %v1019_v29 }
  0xc0   : > { %2394 = vrot.lane.b32.xlu1 %v7166_v10, %s7071_s28  ;;  %6760 = vmatprep.subr.msk.bf16.mxu0 %vm377_vm1, %v1034_v31  ;;  %v1035_v33 = vsel %vm1032_vm5, %v1019_v29, %v1021_v30 }
  0xc1   : > { %2396 = vrot.lane.b32.xlu0 %v7170_v12, %s7071_s28  ;;  %1069 = vmatpush1.bf16.msra.mxu0 %v1045_v32  ;;  %v1051_v38 = vsel %vm377_vm1, %v1035_v33, 0 }
  0xc2   : > { %v1023_v34 = vpop.permute.xlu1 %1022 }
  0xc3   : > { %v1025_v35 = vpop.permute.xlu0 %1024  ;;  %v1036_v37 = vsel %vm1032_vm5, %v1021_v30, %v1023_v34 }
  0xc4   : > { %2398 = vrot.lane.b32.xlu1 %v7172_v13, %s7071_s28  ;;  %6761 = vmatmul.mubr.msk.bf16.vlgmr.msra.gmra.mrb[24].mxu0 %vm373_vm2, %v6759_v36  ;;  %v1037_v39 = vsel %vm1032_vm5, %v1023_v34, %v1025_v35 }
  0xc5   : > { %2610 = vrot.lane.b32.xlu0 %v7143_v0, %s7072_s7  ;;  %6762 = vmatprep.subr.msk.bf16.mxu1 %vm377_vm1, %v1036_v37  ;;  %v1057_v43 = vsel %vm377_vm1, %v1037_v39, 0 }
  0xc6   : > { %1110 = vmatpush1.bf16.msra.mxu1 %v1051_v38  ;;  %v1027_v40 = vpop.permute.xlu1 %1026  ;;  %1182 = vmatprep.mubr.bf16.mxu0 %v7062_v1 }
  0xc7   : > { %v1029_v41 = vpop.permute.xlu0 %1028  ;;  %v1038_v42 = vsel %vm1032_vm5, %v1025_v35, %v1027_v40 }
  0xc8   : > { %2612 = vrot.lane.b32.xlu1 %v7154_v5, %s7072_s7  ;;  %6764 = vmatprep.subr.msk.bf16.mxu0 %vm377_vm1, %v1038_v42  ;;  %v1039_v44 = vsel %vm1032_vm5, %v1027_v40, %v1029_v41 }
  0xc9   : > { %2614 = vrot.lane.b32.xlu0 %v7152_v4, %s7072_s7  ;;  %6763 = vmatmul.mubr.msk.bf16.vlgmr.msra.gmra.mrb[24].mxu1 %vm373_vm2, %v6759_v36  ;;  %v1063_v48 = vsel %vm377_vm1, %v1039_v44, 0 }
  0xca   : > { %1151 = vmatpush1.bf16.msra.mxu0 %v1057_v43  ;;  %v1031_v45 = vpop.permute.xlu1 %1030  ;;  %1223 = vmatprep.mubr.bf16.mxu1 %v7062_v1 }
  0xcb   : > { %v1243_v46 = vpop.permute.xlu0 %1242  ;;  %v1040_v47 = vsel %vm1032_vm5, %v1029_v41, %v1031_v45  ;;  %v6786_v45 = vld [vmem:[%s8617_s0 + $0xc] sm:$0x3]  ;;  %vm4426_vm5 = vcmask 318464  }
  0xcc   : > { %2616 = vrot.lane.b32.xlu1 %v7158_v6, %s7072_s7  ;;  %6766 = vmatprep.subr.msk.bf16.mxu1 %vm377_vm1, %v1040_v47 }
  0xcd   : > { %2618 = vrot.lane.b32.xlu0 %v7160_v7, %s7072_s7  ;;  %6765 = vmatmul.mubr.msk.bf16.vlgmr.msra.gmra.mrb[28].mxu0 %vm373_vm2, %v6759_v36 }
  0xce   : > { %1192 = vmatpush1.bf16.msra.mxu1 %v1063_v48  ;;  %v1245_v49 = vpop.permute.xlu1 %1244  ;;  %1328 = vmatprep.mubr.bf16.mxu0 %v7062_v1 }
  0xcf   : > { %v1247_v50 = vpop.permute.xlu0 %1246  ;;  %v1261_v51 = vsel %vm1260_vm6, %v1243_v46, %v1245_v49 }
  0xd0   : > { %v1262_v52 = vsel %vm1260_vm6, %v1245_v49, %v1247_v50  ;;  %2620 = vrot.lane.b32.xlu1 %v7164_v9, %s7072_s7  ;;  %v1273_v53 = vsel %vm377_vm1, %v1261_v51, 0 }
  0xd1   : > { %2622 = vrot.lane.b32.xlu0 %v7166_v10, %s7072_s7  ;;  %6767 = vmatmul.mubr.msk.bf16.vlgmr.msra.gmra.mrb[28].mxu1 %vm373_vm2, %v6759_v36 }
  0xd2   : > { %6769 = vmatprep.subr.msk.bf16.mxu0 %vm377_vm1, %v1262_v52  ;;  %v1249_v54 = vpop.permute.xlu1 %1248  ;;  %1369 = vmatprep.mubr.bf16.mxu1 %v7062_v1 }
  0xd3   : > { %1297 = vmatpush1.bf16.msra.mxu0 %v1273_v53  ;;  %v1251_v55 = vpop.permute.xlu0 %1250  ;;  %v1263_v57 = vsel %vm1260_vm6, %v1247_v50, %v1249_v54 }
  0xd4   : > { %v1264_v58 = vsel %vm1260_vm6, %v1249_v54, %v1251_v55  ;;  %2624 = vrot.lane.b32.xlu1 %v7170_v12, %s7072_s7  ;;  %v1279_v59 = vsel %vm377_vm1, %v1263_v57, 0 }
  0xd5   : > { %2626 = vrot.lane.b32.xlu0 %v7172_v13, %s7072_s7  ;;  %6771 = vmatprep.subr.msk.bf16.mxu1 %vm377_vm1, %v1264_v58 }
  0xd6   : > { %6770 = vmatmul.mubr.msk.bf16.vlgmr.msra.gmra.mrb[32].mxu0 %vm373_vm2, %v6768_v56  ;;  %1338 = vmatpush1.bf16.msra.mxu1 %v1279_v59  ;;  %v1253_v60 = vpop.permute.xlu1 %1252 }
  0xd7   : > { %v1255_v61 = vpop.permute.xlu0 %1254  ;;  %1410 = vmatprep.mubr.bf16.mxu0 %v7062_v1  ;;  %v1265_v62 = vsel %vm1260_vm6, %v1251_v55, %v1253_v60 }
  0xd8   : > { %v1266_v63 = vsel %vm1260_vm6, %v1253_v60, %v1255_v61  ;;  %2838 = vrot.lane.b32.xlu1 %v7143_v0, %s7073_s10  ;;  %v1285_v2 = vsel %vm377_vm1, %v1265_v62, 0 }
  0xd9   : > { %2840 = vrot.lane.b32.xlu0 %v7154_v5, %s7073_s10  ;;  %6772 = vmatmul.mubr.msk.bf16.vlgmr.msra.gmra.mrb[32].mxu1 %vm373_vm2, %v6768_v56 }
  0xda   : > { %6773 = vmatprep.subr.msk.bf16.mxu0 %vm377_vm1, %v1266_v63  ;;  %v1257_v3 = vpop.permute.xlu1 %1256  ;;  %1451 = vmatprep.mubr.bf16.mxu1 %v7062_v1 }
  0xdb   : > { %1379 = vmatpush1.bf16.msra.mxu0 %v1285_v2  ;;  %v1259_v8 = vpop.permute.xlu0 %1258  ;;  %v1267_v11 = vsel %vm1260_vm6, %v1255_v61, %v1257_v3 }
  0xdc   : > { %v1268_v14 = vsel %vm1260_vm6, %v1257_v3, %v1259_v8  ;;  %2842 = vrot.lane.b32.xlu1 %v7152_v4, %s7073_s10  ;;  %v1291_v15 = vsel %vm377_vm1, %v1267_v11, 0  ;;  %v7555_v8 = vld [vmem:[%s7544_s19] sm:$0xf]  ;;  %vm4654_vm6 = vcmask 310272  }
  0xdd   : > { %2844 = vrot.lane.b32.xlu0 %v7158_v6, %s7073_s10  ;;  %6775 = vmatprep.subr.msk.bf16.mxu1 %vm377_vm1, %v1268_v14 }
  0xde   : > { %6774 = vmatmul.mubr.msk.bf16.vlgmr.msra.gmra.mrb[36].mxu0 %vm373_vm2, %v6768_v56  ;;  %1420 = vmatpush1.bf16.msra.mxu1 %v1291_v15  ;;  %v1471_v16 = vpop.permute.xlu1 %1470 }
  0xdf   : > { %v1473_v17 = vpop.permute.xlu0 %1472  ;;  %1556 = vmatprep.mubr.bf16.mxu0 %v7062_v1 }
  0xe0   : > { %2846 = vrot.lane.b32.xlu1 %v7160_v7, %s7073_s10  ;;  %v1489_v18 = vsel %vm1488_vm7, %v1471_v16, %v1473_v17  ;;  %v6795_v16 = vld [vmem:[%s8617_s0 + $0xe] sm:$0x3] }
  0xe1   : > { %2848 = vrot.lane.b32.xlu0 %v7164_v9, %s7073_s10  ;;  %6776 = vmatmul.mubr.msk.bf16.vlgmr.msra.gmra.mrb[36].mxu1 %vm373_vm2, %v6768_v56  ;;  %v1501_v22 = vsel %vm377_vm1, %v1489_v18, 0 }
  0xe2   : > { %v1475_v19 = vpop.permute.xlu1 %1474  ;;  %1597 = vmatprep.mubr.bf16.mxu1 %v7062_v1 }
  0xe3   : > { %v1477_v20 = vpop.permute.xlu0 %1476  ;;  %v1490_v21 = vsel %vm1488_vm7, %v1473_v17, %v1475_v19 }
  0xe4   : > { %2850 = vrot.lane.b32.xlu1 %v7166_v10, %s7073_s10  ;;  %6778 = vmatprep.subr.msk.bf16.mxu0 %vm377_vm1, %v1490_v21  ;;  %v1491_v23 = vsel %vm1488_vm7, %v1475_v19, %v1477_v20 }
  0xe5   : > { %2852 = vrot.lane.b32.xlu0 %v7170_v12, %s7073_s10  ;;  %1525 = vmatpush1.bf16.msra.mxu0 %v1501_v22  ;;  %v1507_v28 = vsel %vm377_vm1, %v1491_v23, 0 }
  0xe6   : > { %v1479_v24 = vpop.permute.xlu1 %1478 }
  0xe7   : > { %v1481_v25 = vpop.permute.xlu0 %1480  ;;  %v1492_v27 = vsel %vm1488_vm7, %v1477_v20, %v1479_v24 }
  0xe8   : > { %2854 = vrot.lane.b32.xlu1 %v7172_v13, %s7073_s10  ;;  %6779 = vmatmul.mubr.msk.bf16.vlgmr.msra.gmra.mrb[40].mxu0 %vm373_vm2, %v6777_v26  ;;  %v1493_v29 = vsel %vm1488_vm7, %v1479_v24, %v1481_v25  ;;  %s307_s10 = scalar_lea.vmem %s8622_s5, %s8629_s23  ;;  %s313_s23 = scalar_lea.vmem %s8623_s6, %s6724_s11 }
  0xe9   : > { %3066 = vrot.lane.b32.xlu0 %v7143_v0, %s7074_s13  ;;  %6780 = vmatprep.subr.msk.bf16.mxu1 %vm377_vm1, %v1492_v27  ;;  %v1513_v0 = vsel %vm377_vm1, %v1493_v29, 0 }
  0xea   : > { %1566 = vmatpush1.bf16.msra.mxu1 %v1507_v28  ;;  %v1483_v30 = vpop.permute.xlu1 %1482  ;;  %1638 = vmatprep.mubr.bf16.mxu0 %v7062_v1 }
  0xeb   : > { %v1485_v31 = vpop.permute.xlu0 %1484  ;;  %v1494_v32 = vsel %vm1488_vm7, %v1481_v25, %v1483_v30 }
  0xec   : > { %3068 = vrot.lane.b32.xlu1 %v7154_v5, %s7074_s13  ;;  %6782 = vmatprep.subr.msk.bf16.mxu0 %vm377_vm1, %v1494_v32  ;;  %v1495_v33 = vsel %vm1488_vm7, %v1483_v30, %v1485_v31 }
  0xed   : > { %3070 = vrot.lane.b32.xlu0 %v7152_v4, %s7074_s13  ;;  %6781 = vmatmul.mubr.msk.bf16.vlgmr.msra.gmra.mrb[40].mxu1 %vm373_vm2, %v6777_v26  ;;  %v1519_v37 = vsel %vm377_vm1, %v1495_v33, 0 }
  0xee   : > { %1607 = vmatpush1.bf16.msra.mxu0 %v1513_v0  ;;  %v1487_v34 = vpop.permute.xlu1 %1486  ;;  %1679 = vmatprep.mubr.bf16.mxu1 %v7062_v1 }
  0xef   : > { %v1699_v35 = vpop.permute.xlu0 %1698  ;;  %v1496_v36 = vsel %vm1488_vm7, %v1485_v31, %v1487_v34  ;;  %vm4882_vm7 = vcmask 302080  }
  0xf0   : > { %3072 = vrot.lane.b32.xlu1 %v7158_v6, %s7074_s13  ;;  %6784 = vmatprep.subr.msk.bf16.mxu1 %vm377_vm1, %v1496_v36 }
  0xf1   : > { %3074 = vrot.lane.b32.xlu0 %v7160_v7, %s7074_s13  ;;  %6783 = vmatmul.mubr.msk.bf16.vlgmr.msra.gmra.mrb[44].mxu0 %vm373_vm2, %v6777_v26 }
  0xf2   : > { %1648 = vmatpush1.bf16.msra.mxu1 %v1519_v37  ;;  %v1701_v38 = vpop.permute.xlu1 %1700  ;;  %1784 = vmatprep.mubr.bf16.mxu0 %v7062_v1 }
  0xf3   : > { %v1703_v39 = vpop.permute.xlu0 %1702  ;;  %v1717_v40 = vsel %vm1716_vm8, %v1699_v35, %v1701_v38  ;;  %v6804_v35 = vld [vmem:[%s8617_s0 + $0x10] sm:$0x3] }
  0xf4   : > { %v1718_v41 = vsel %vm1716_vm8, %v1701_v38, %v1703_v39  ;;  %3076 = vrot.lane.b32.xlu1 %v7164_v9, %s7074_s13  ;;  %v1729_v42 = vsel %vm377_vm1, %v1717_v40, 0 }
  0xf5   : > { %3078 = vrot.lane.b32.xlu0 %v7166_v10, %s7074_s13  ;;  %6785 = vmatmul.mubr.msk.bf16.vlgmr.msra.gmra.mrb[44].mxu1 %vm373_vm2, %v6777_v26 }
  0xf6   : > { %6787 = vmatprep.subr.msk.bf16.mxu0 %vm377_vm1, %v1718_v41  ;;  %v1705_v43 = vpop.permute.xlu1 %1704  ;;  %1825 = vmatprep.mubr.bf16.mxu1 %v7062_v1 }
  0xf7   : > { %1753 = vmatpush1.bf16.msra.mxu0 %v1729_v42  ;;  %v1707_v44 = vpop.permute.xlu0 %1706  ;;  %v1719_v46 = vsel %vm1716_vm8, %v1703_v39, %v1705_v43 }
  0xf8   : > { %v1720_v47 = vsel %vm1716_vm8, %v1705_v43, %v1707_v44  ;;  %3080 = vrot.lane.b32.xlu1 %v7170_v12, %s7074_s13  ;;  %v1735_v48 = vsel %vm377_vm1, %v1719_v46, 0 }
  0xf9   : > { %3082 = vrot.lane.b32.xlu0 %v7172_v13, %s7074_s13  ;;  %6789 = vmatprep.subr.msk.bf16.mxu1 %vm377_vm1, %v1720_v47  ;;  %s7087_s13 = smov 17  }
  0xfa   : > { %6788 = vmatmul.mubr.msk.bf16.vlgmr.msra.gmra.mrb[48].mxu0 %vm373_vm2, %v6786_v45  ;;  %1794 = vmatpush1.bf16.msra.mxu1 %v1735_v48  ;;  %v1709_v49 = vpop.permute.xlu1 %1708 }
  0xfb   : > { %v1711_v50 = vpop.permute.xlu0 %1710  ;;  %1866 = vmatprep.mubr.bf16.mxu0 %v7062_v1  ;;  %v1721_v51 = vsel %vm1716_vm8, %v1707_v44, %v1709_v49 }
  0xfc   : > { %v1722_v52 = vsel %vm1716_vm8, %v1709_v49, %v1711_v50  ;;  %3496 = vrot.lane.b32.xlu1 %v7154_v5, %s7075_s16  ;;  %v1741_v53 = vsel %vm377_vm1, %v1721_v51, 0 }
  0xfd   : > { %3498 = vrot.lane.b32.xlu0 %v7152_v4, %s7075_s16  ;;  %6790 = vmatmul.mubr.msk.bf16.vlgmr.msra.gmra.mrb[48].mxu1 %vm373_vm2, %v6786_v45 }
  0xfe   : > { %6791 = vmatprep.subr.msk.bf16.mxu0 %vm377_vm1, %v1722_v52  ;;  %v1713_v54 = vpop.permute.xlu1 %1712  ;;  %1907 = vmatprep.mubr.bf16.mxu1 %v7062_v1 }
  0xff   : > { %1835 = vmatpush1.bf16.msra.mxu0 %v1741_v53  ;;  %v1715_v55 = vpop.permute.xlu0 %1714  ;;  %v1723_v56 = vsel %vm1716_vm8, %v1711_v50, %v1713_v54 }
 0x100   : > { %v1724_v57 = vsel %vm1716_vm8, %v1713_v54, %v1715_v55  ;;  %3500 = vrot.lane.b32.xlu1 %v7158_v6, %s7075_s16  ;;  %v1747_v58 = vsel %vm377_vm1, %v1723_v56, 0  ;;  %vm5110_vm8 = vcmask 236544  }
 0x101   : > { %3502 = vrot.lane.b32.xlu0 %v7160_v7, %s7075_s16  ;;  %6793 = vmatprep.subr.msk.bf16.mxu1 %vm377_vm1, %v1724_v57 }
 0x102   : > { %6792 = vmatmul.mubr.msk.bf16.vlgmr.msra.gmra.mrb[52].mxu0 %vm373_vm2, %v6786_v45  ;;  %1876 = vmatpush1.bf16.msra.mxu1 %v1747_v58  ;;  %v1927_v59 = vpop.permute.xlu1 %1926 }
 0x103   : > { %v1929_v60 = vpop.permute.xlu0 %1928  ;;  %2012 = vmatprep.mubr.bf16.mxu0 %v7062_v1 }
 0x104   : > { %3504 = vrot.lane.b32.xlu1 %v7164_v9, %s7075_s16  ;;  %v1945_v61 = vsel %vm1944_vm9, %v1927_v59, %v1929_v60  ;;  %v6813_v59 = vld [vmem:[%s8617_s0 + $0x12] sm:$0x3] }
 0x105   : > { %3506 = vrot.lane.b32.xlu0 %v7166_v10, %s7075_s16  ;;  %6794 = vmatmul.mubr.msk.bf16.vlgmr.msra.gmra.mrb[52].mxu1 %vm373_vm2, %v6786_v45  ;;  %v1957_v3 = vsel %vm377_vm1, %v1945_v61, 0 }
 0x106   : > { %v1931_v62 = vpop.permute.xlu1 %1930  ;;  %2053 = vmatprep.mubr.bf16.mxu1 %v7062_v1 }
 0x107   : > { %v1933_v63 = vpop.permute.xlu0 %1932  ;;  %v1946_v2 = vsel %vm1944_vm9, %v1929_v60, %v1931_v62 }
 0x108   : > { %3508 = vrot.lane.b32.xlu1 %v7170_v12, %s7075_s16  ;;  %6796 = vmatprep.subr.msk.bf16.mxu0 %vm377_vm1, %v1946_v2  ;;  %v1947_v11 = vsel %vm1944_vm9, %v1931_v62, %v1933_v63 }
 0x109   : > { %3510 = vrot.lane.b32.xlu0 %v7172_v13, %s7075_s16  ;;  %1981 = vmatpush1.bf16.msra.mxu0 %v1957_v3  ;;  %v1963_v18 = vsel %vm377_vm1, %v1947_v11, 0 }
 0x10a   : > { %v1935_v14 = vpop.permute.xlu1 %1934 }
 0x10b   : > { %v1937_v15 = vpop.permute.xlu0 %1936  ;;  %v1948_v17 = vsel %vm1944_vm9, %v1933_v63, %v1935_v14 }
 0x10c   : > { %3512 = vrot.lane.b32.xlu1 %v7555_v8, %s7075_s16  ;;  %6797 = vmatmul.mubr.msk.bf16.vlgmr.msra.gmra.mrb[56].mxu0 %vm373_vm2, %v6795_v16  ;;  %v1949_v19 = vsel %vm1944_vm9, %v1935_v14, %v1937_v15 }
 0x10d   : > { %3724 = vrot.lane.b32.xlu0 %v7154_v5, %s7076_s20  ;;  %6798 = vmatprep.subr.msk.bf16.mxu1 %vm377_vm1, %v1948_v17  ;;  %v1969_v23 = vsel %vm377_vm1, %v1949_v19, 0 }
 0x10e   : > { %2022 = vmatpush1.bf16.msra.mxu1 %v1963_v18  ;;  %v1939_v20 = vpop.permute.xlu1 %1938  ;;  %2094 = vmatprep.mubr.bf16.mxu0 %v7062_v1 }
 0x10f   : > { %v1941_v21 = vpop.permute.xlu0 %1940  ;;  %v1950_v22 = vsel %vm1944_vm9, %v1937_v15, %v1939_v20 }
 0x110   : > { %3726 = vrot.lane.b32.xlu1 %v7152_v4, %s7076_s20  ;;  %6800 = vmatprep.subr.msk.bf16.mxu0 %vm377_vm1, %v1950_v22  ;;  %v1951_v24 = vsel %vm1944_vm9, %v1939_v20, %v1941_v21 }
 0x111   : > { %3728 = vrot.lane.b32.xlu0 %v7158_v6, %s7076_s20  ;;  %6799 = vmatmul.mubr.msk.bf16.vlgmr.msra.gmra.mrb[56].mxu1 %vm373_vm2, %v6795_v16  ;;  %v1975_v28 = vsel %vm377_vm1, %v1951_v24, 0 }
 0x112   : > { %2063 = vmatpush1.bf16.msra.mxu0 %v1969_v23  ;;  %v1943_v25 = vpop.permute.xlu1 %1942  ;;  %2135 = vmatprep.mubr.bf16.mxu1 %v7062_v1 }
 0x113   : > { %v2155_v26 = vpop.permute.xlu0 %2154  ;;  %v1952_v27 = vsel %vm1944_vm9, %v1941_v21, %v1943_v25  ;;  %vm5338_vm9 = vcmask 228352  }
 0x114   : > { %3730 = vrot.lane.b32.xlu1 %v7160_v7, %s7076_s20  ;;  %6802 = vmatprep.subr.msk.bf16.mxu1 %vm377_vm1, %v1952_v27 }
 0x115   : > { %3732 = vrot.lane.b32.xlu0 %v7164_v9, %s7076_s20  ;;  %6801 = vmatmul.mubr.msk.bf16.vlgmr.msra.gmra.mrb[60].mxu0 %vm373_vm2, %v6795_v16 }
 0x116   : > { %2104 = vmatpush1.bf16.msra.mxu1 %v1975_v28  ;;  %v2157_v29 = vpop.permute.xlu1 %2156  ;;  %2240 = vmatprep.mubr.bf16.mxu0 %v7062_v1 }
 0x117   : > { %v2159_v30 = vpop.permute.xlu0 %2158  ;;  %v2173_v31 = vsel %vm2172_vm10, %v2155_v26, %v2157_v29  ;;  %v6822_v26 = vld [vmem:[%s8617_s0 + $0x14] sm:$0x3] }
 0x118   : > { %v2174_v32 = vsel %vm2172_vm10, %v2157_v29, %v2159_v30  ;;  %3734 = vrot.lane.b32.xlu1 %v7166_v10, %s7076_s20  ;;  %v2185_v0 = vsel %vm377_vm1, %v2173_v31, 0 }
 0x119   : > { %3736 = vrot.lane.b32.xlu0 %v7170_v12, %s7076_s20  ;;  %6803 = vmatmul.mubr.msk.bf16.vlgmr.msra.gmra.mrb[60].mxu1 %vm373_vm2, %v6795_v16 }
 0x11a   : > { %6805 = vmatprep.subr.msk.bf16.mxu0 %vm377_vm1, %v2174_v32  ;;  %v2161_v33 = vpop.permute.xlu1 %2160  ;;  %2281 = vmatprep.mubr.bf16.mxu1 %v7062_v1 }
 0x11b   : > { %2209 = vmatpush1.bf16.msra.mxu0 %v2185_v0  ;;  %v2163_v34 = vpop.permute.xlu0 %2162  ;;  %v2175_v36 = vsel %vm2172_vm10, %v2159_v30, %v2161_v33 }
 0x11c   : > { %v2176_v37 = vsel %vm2172_vm10, %v2161_v33, %v2163_v34  ;;  %3738 = vrot.lane.b32.xlu1 %v7172_v13, %s7076_s20  ;;  %v2191_v38 = vsel %vm377_vm1, %v2175_v36, 0 }
 0x11d   : > { %3740 = vrot.lane.b32.xlu0 %v7555_v8, %s7076_s20  ;;  %6807 = vmatprep.subr.msk.bf16.mxu1 %vm377_vm1, %v2176_v37  ;;  %s7083_s20 = smov 28  }
 0x11e   : > { %6806 = vmatmul.mubr.msk.bf16.vlgmr.msra.gmra.mrb[64].mxu0 %vm373_vm2, %v6804_v35  ;;  %2250 = vmatpush1.bf16.msra.mxu1 %v2191_v38  ;;  %v2165_v39 = vpop.permute.xlu1 %2164 }
 0x11f   : > { %v2167_v40 = vpop.permute.xlu0 %2166  ;;  %2322 = vmatprep.mubr.bf16.mxu0 %v7062_v1  ;;  %v2177_v41 = vsel %vm2172_vm10, %v2163_v34, %v2165_v39 }
 0x120   : > { %v2178_v42 = vsel %vm2172_vm10, %v2165_v39, %v2167_v40  ;;  %3952 = vrot.lane.b32.xlu1 %v7154_v5, %s7077_s27  ;;  %v2197_v43 = vsel %vm377_vm1, %v2177_v41, 0 }
 0x121   : > { %3954 = vrot.lane.b32.xlu0 %v7152_v4, %s7077_s27  ;;  %6808 = vmatmul.mubr.msk.bf16.vlgmr.msra.gmra.mrb[64].mxu1 %vm373_vm2, %v6804_v35 }
 0x122   : > { %6809 = vmatprep.subr.msk.bf16.mxu0 %vm377_vm1, %v2178_v42  ;;  %v2169_v44 = vpop.permute.xlu1 %2168  ;;  %2363 = vmatprep.mubr.bf16.mxu1 %v7062_v1 }
 0x123   : > { %2291 = vmatpush1.bf16.msra.mxu0 %v2197_v43  ;;  %v2171_v45 = vpop.permute.xlu0 %2170  ;;  %v2179_v46 = vsel %vm2172_vm10, %v2167_v40, %v2169_v44 }
 0x124   : > { %v2180_v47 = vsel %vm2172_vm10, %v2169_v44, %v2171_v45  ;;  %3956 = vrot.lane.b32.xlu1 %v7158_v6, %s7077_s27  ;;  %v2203_v48 = vsel %vm377_vm1, %v2179_v46, 0  ;;  %vm5566_vm10 = vcmask 220160  }
 0x125   : > { %3958 = vrot.lane.b32.xlu0 %v7160_v7, %s7077_s27  ;;  %6811 = vmatprep.subr.msk.bf16.mxu1 %vm377_vm1, %v2180_v47 }
 0x126   : > { %6810 = vmatmul.mubr.msk.bf16.vlgmr.msra.gmra.mrb[68].mxu0 %vm373_vm2, %v6804_v35  ;;  %2332 = vmatpush1.bf16.msra.mxu1 %v2203_v48  ;;  %v2383_v49 = vpop.permute.xlu1 %2382 }
 0x127   : > { %v2385_v50 = vpop.permute.xlu0 %2384  ;;  %2468 = vmatprep.mubr.bf16.mxu0 %v7062_v1 }
 0x128   : > { %3960 = vrot.lane.b32.xlu1 %v7164_v9, %s7077_s27  ;;  %v2401_v51 = vsel %vm2400_vm11, %v2383_v49, %v2385_v50  ;;  %v6831_v49 = vld [vmem:[%s8617_s0 + $0x16] sm:$0x3] }
 0x129   : > { %3962 = vrot.lane.b32.xlu0 %v7166_v10, %s7077_s27  ;;  %6812 = vmatmul.mubr.msk.bf16.vlgmr.msra.gmra.mrb[68].mxu1 %vm373_vm2, %v6804_v35  ;;  %v2413_v55 = vsel %vm377_vm1, %v2401_v51, 0 }
 0x12a   : > { %v2387_v52 = vpop.permute.xlu1 %2386  ;;  %2509 = vmatprep.mubr.bf16.mxu1 %v7062_v1 }
 0x12b   : > { %v2389_v53 = vpop.permute.xlu0 %2388  ;;  %v2402_v54 = vsel %vm2400_vm11, %v2385_v50, %v2387_v52 }
 0x12c   : > { %3964 = vrot.lane.b32.xlu1 %v7170_v12, %s7077_s27  ;;  %6814 = vmatprep.subr.msk.bf16.mxu0 %vm377_vm1, %v2402_v54  ;;  %v2403_v56 = vsel %vm2400_vm11, %v2387_v52, %v2389_v53 }
 0x12d   : > { %3966 = vrot.lane.b32.xlu0 %v7172_v13, %s7077_s27  ;;  %2437 = vmatpush1.bf16.msra.mxu0 %v2413_v55  ;;  %v2419_v61 = vsel %vm377_vm1, %v2403_v56, 0 }
 0x12e   : > { %v2391_v57 = vpop.permute.xlu1 %2390 }
 0x12f   : > { %v2393_v58 = vpop.permute.xlu0 %2392  ;;  %v2404_v60 = vsel %vm2400_vm11, %v2389_v53, %v2391_v57 }
 0x130   : > { %3968 = vrot.lane.b32.xlu1 %v7555_v8, %s7077_s27  ;;  %6815 = vmatmul.mubr.msk.bf16.vlgmr.msra.gmra.mrb[72].mxu0 %vm373_vm2, %v6813_v59  ;;  %v2405_v62 = vsel %vm2400_vm11, %v2391_v57, %v2393_v58  ;;  %s7084_s27 = smov 27  }
 0x131   : > { %4180 = vrot.lane.b32.xlu0 %v7154_v5, %s7078_s30  ;;  %6816 = vmatprep.subr.msk.bf16.mxu1 %vm377_vm1, %v2404_v60  ;;  %v2425_v11 = vsel %vm377_vm1, %v2405_v62, 0 }
 0x132   : > { %2478 = vmatpush1.bf16.msra.mxu1 %v2419_v61  ;;  %v2395_v63 = vpop.permute.xlu1 %2394  ;;  %2550 = vmatprep.mubr.bf16.mxu0 %v7062_v1 }
 0x133   : > { %v2397_v2 = vpop.permute.xlu0 %2396  ;;  %v2406_v3 = vsel %vm2400_vm11, %v2393_v58, %v2395_v63 }
 0x134   : > { %4182 = vrot.lane.b32.xlu1 %v7152_v4, %s7078_s30  ;;  %6818 = vmatprep.subr.msk.bf16.mxu0 %vm377_vm1, %v2406_v3  ;;  %v2407_v14 = vsel %vm2400_vm11, %v2395_v63, %v2397_v2 }
 0x135   : > { %4184 = vrot.lane.b32.xlu0 %v7158_v6, %s7078_s30  ;;  %6817 = vmatmul.mubr.msk.bf16.vlgmr.msra.gmra.mrb[72].mxu1 %vm373_vm2, %v6813_v59  ;;  %v2431_v18 = vsel %vm377_vm1, %v2407_v14, 0 }
 0x136   : > { %2519 = vmatpush1.bf16.msra.mxu0 %v2425_v11  ;;  %v2399_v15 = vpop.permute.xlu1 %2398  ;;  %2591 = vmatprep.mubr.bf16.mxu1 %v7062_v1 }
 0x137   : > { %v2611_v16 = vpop.permute.xlu0 %2610  ;;  %v2408_v17 = vsel %vm2400_vm11, %v2397_v2, %v2399_v15  ;;  %vm5794_vm11 = vcmask 154624  }
 0x138   : > { %4186 = vrot.lane.b32.xlu1 %v7160_v7, %s7078_s30  ;;  %6820 = vmatprep.subr.msk.bf16.mxu1 %vm377_vm1, %v2408_v17 }
 0x139   : > { %4188 = vrot.lane.b32.xlu0 %v7164_v9, %s7078_s30  ;;  %6819 = vmatmul.mubr.msk.bf16.vlgmr.msra.gmra.mrb[76].mxu0 %vm373_vm2, %v6813_v59 }
 0x13a   : > { %2560 = vmatpush1.bf16.msra.mxu1 %v2431_v18  ;;  %v2613_v19 = vpop.permute.xlu1 %2612  ;;  %2696 = vmatprep.mubr.bf16.mxu0 %v7062_v1  ;;  %v6840_v18 = vld [vmem:[%s8617_s0 + $0x18] sm:$0x3] }
 0x13b   : > { %v2615_v20 = vpop.permute.xlu0 %2614  ;;  %v2629_v21 = vsel %vm2628_vm12, %v2611_v16, %v2613_v19 }
 0x13c   : > { %v2630_v22 = vsel %vm2628_vm12, %v2613_v19, %v2615_v20  ;;  %4190 = vrot.lane.b32.xlu1 %v7166_v10, %s7078_s30  ;;  %v2641_v23 = vsel %vm377_vm1, %v2629_v21, 0 }
 0x13d   : > { %4192 = vrot.lane.b32.xlu0 %v7170_v12, %s7078_s30  ;;  %6821 = vmatmul.mubr.msk.bf16.vlgmr.msra.gmra.mrb[76].mxu1 %vm373_vm2, %v6813_v59 }
 0x13e   : > { %6823 = vmatprep.subr.msk.bf16.mxu0 %vm377_vm1, %v2630_v22  ;;  %v2617_v24 = vpop.permute.xlu1 %2616  ;;  %2737 = vmatprep.mubr.bf16.mxu1 %v7062_v1 }
 0x13f   : > { %2665 = vmatpush1.bf16.msra.mxu0 %v2641_v23  ;;  %v2619_v25 = vpop.permute.xlu0 %2618  ;;  %v2631_v27 = vsel %vm2628_vm12, %v2615_v20, %v2617_v24 }
 0x140   : > { %v2632_v28 = vsel %vm2628_vm12, %v2617_v24, %v2619_v25  ;;  %4194 = vrot.lane.b32.xlu1 %v7172_v13, %s7078_s30  ;;  %v2647_v29 = vsel %vm377_vm1, %v2631_v27, 0 }
 0x141   : > { %4196 = vrot.lane.b32.xlu0 %v7555_v8, %s7078_s30  ;;  %6825 = vmatprep.subr.msk.bf16.mxu1 %vm377_vm1, %v2632_v28 }
 0x142   : > { %6824 = vmatmul.mubr.msk.bf16.vlgmr.msra.gmra.mrb[80].mxu0 %vm373_vm2, %v6822_v26  ;;  %2706 = vmatpush1.bf16.msra.mxu1 %v2647_v29  ;;  %v2621_v30 = vpop.permute.xlu1 %2620 }
 0x143   : > { %v2623_v31 = vpop.permute.xlu0 %2622  ;;  %2778 = vmatprep.mubr.bf16.mxu0 %v7062_v1  ;;  %v2633_v32 = vsel %vm2628_vm12, %v2619_v25, %v2621_v30 }
 0x144   : > { %v2634_v0 = vsel %vm2628_vm12, %v2621_v30, %v2623_v31  ;;  %4408 = vrot.lane.b32.xlu1 %v7154_v5, %s7079_s9  ;;  %v2653_v33 = vsel %vm377_vm1, %v2633_v32, 0 }
 0x145   : > { %4410 = vrot.lane.b32.xlu0 %v7152_v4, %s7079_s9  ;;  %6826 = vmatmul.mubr.msk.bf16.vlgmr.msra.gmra.mrb[80].mxu1 %vm373_vm2, %v6822_v26 }
 0x146   : > { %6827 = vmatprep.subr.msk.bf16.mxu0 %vm377_vm1, %v2634_v0  ;;  %v2625_v34 = vpop.permute.xlu1 %2624  ;;  %2819 = vmatprep.mubr.bf16.mxu1 %v7062_v1 }
 0x147   : > { %2747 = vmatpush1.bf16.msra.mxu0 %v2653_v33  ;;  %v2627_v35 = vpop.permute.xlu0 %2626  ;;  %v2635_v36 = vsel %vm2628_vm12, %v2623_v31, %v2625_v34 }
 0x148   : > { %v2636_v37 = vsel %vm2628_vm12, %v2625_v34, %v2627_v35  ;;  %4412 = vrot.lane.b32.xlu1 %v7158_v6, %s7079_s9  ;;  %v2659_v38 = vsel %vm377_vm1, %v2635_v36, 0  ;;  %vm6022_vm12 = vcmask 146432  }
 0x149   : > { %4414 = vrot.lane.b32.xlu0 %v7160_v7, %s7079_s9  ;;  %6829 = vmatprep.subr.msk.bf16.mxu1 %vm377_vm1, %v2636_v37 }
 0x14a   : > { %6828 = vmatmul.mubr.msk.bf16.vlgmr.msra.gmra.mrb[84].mxu0 %vm373_vm2, %v6822_v26  ;;  %2788 = vmatpush1.bf16.msra.mxu1 %v2659_v38  ;;  %v2839_v39 = vpop.permute.xlu1 %2838  ;;  %v3298_v38 = vsel %vm377_vm1, %v7154_v5, 0 }
 0x14b   : > { %v2841_v40 = vpop.permute.xlu0 %2840  ;;  %2924 = vmatprep.mubr.bf16.mxu0 %v7062_v1 }
 0x14c   : > { %4416 = vrot.lane.b32.xlu1 %v7164_v9, %s7079_s9  ;;  %v2857_v41 = vsel %vm2856_vm13, %v2839_v39, %v2841_v40 }
 0x14d   : > { %4418 = vrot.lane.b32.xlu0 %v7166_v10, %s7079_s9  ;;  %6830 = vmatmul.mubr.msk.bf16.vlgmr.msra.gmra.mrb[84].mxu1 %vm373_vm2, %v6822_v26  ;;  %v2869_v45 = vsel %vm377_vm1, %v2857_v41, 0 }
 0x14e   : > { %v2843_v42 = vpop.permute.xlu1 %2842  ;;  %2965 = vmatprep.mubr.bf16.mxu1 %v7062_v1 }
 0x14f   : > { %v2845_v43 = vpop.permute.xlu0 %2844  ;;  %v2858_v44 = vsel %vm2856_vm13, %v2841_v40, %v2843_v42 }
 0x150   : > { %4420 = vrot.lane.b32.xlu1 %v7170_v12, %s7079_s9  ;;  %6832 = vmatprep.subr.msk.bf16.mxu0 %vm377_vm1, %v2858_v44  ;;  %v2859_v46 = vsel %vm2856_vm13, %v2843_v42, %v2845_v43 }
 0x151   : > { %4422 = vrot.lane.b32.xlu0 %v7172_v13, %s7079_s9  ;;  %2893 = vmatpush1.bf16.msra.mxu0 %v2869_v45  ;;  %v2875_v51 = vsel %vm377_vm1, %v2859_v46, 0  ;;  %v3304_v46 = vsel %vm377_vm1, %v7158_v6, 0 }
 0x152   : > { %v2847_v47 = vpop.permute.xlu1 %2846 }
 0x153   : > { %v2849_v48 = vpop.permute.xlu0 %2848  ;;  %v2860_v50 = vsel %vm2856_vm13, %v2845_v43, %v2847_v47 }
 0x154   : > { %4424 = vrot.lane.b32.xlu1 %v7555_v8, %s7079_s9  ;;  %6833 = vmatmul.mubr.msk.bf16.vlgmr.msra.gmra.mrb[88].mxu0 %vm373_vm2, %v6831_v49  ;;  %v2861_v52 = vsel %vm2856_vm13, %v2847_v47, %v2849_v48 }
 0x155   : > { %4636 = vrot.lane.b32.xlu0 %v7154_v5, %s7080_s12  ;;  %6834 = vmatprep.subr.msk.bf16.mxu1 %vm377_vm1, %v2860_v50  ;;  %v2881_v56 = vsel %vm377_vm1, %v2861_v52, 0  ;;  %v3310_v52 = vsel %vm377_vm1, %v7164_v9, 0 }
 0x156   : > { %2934 = vmatpush1.bf16.msra.mxu1 %v2875_v51  ;;  %v2851_v53 = vpop.permute.xlu1 %2850  ;;  %3006 = vmatprep.mubr.bf16.mxu0 %v7062_v1  ;;  %v6849_v51 = vld [vmem:[%s8617_s0 + $0x1a] sm:$0x3] }
 0x157   : > { %v2853_v54 = vpop.permute.xlu0 %2852  ;;  %v2862_v55 = vsel %vm2856_vm13, %v2849_v48, %v2851_v53 }
 0x158   : > { %4638 = vrot.lane.b32.xlu1 %v7152_v4, %s7080_s12  ;;  %6836 = vmatprep.subr.msk.bf16.mxu0 %vm377_vm1, %v2862_v55  ;;  %v2863_v57 = vsel %vm2856_vm13, %v2851_v53, %v2853_v54 }
 0x159   : > { %4640 = vrot.lane.b32.xlu0 %v7158_v6, %s7080_s12  ;;  %6835 = vmatmul.mubr.msk.bf16.vlgmr.msra.gmra.mrb[88].mxu1 %vm373_vm2, %v6831_v49  ;;  %v2887_v61 = vsel %vm377_vm1, %v2863_v57, 0 }
 0x15a   : > { %2975 = vmatpush1.bf16.msra.mxu0 %v2881_v56  ;;  %v2855_v58 = vpop.permute.xlu1 %2854  ;;  %3047 = vmatprep.mubr.bf16.mxu1 %v7062_v1 }
 0x15b   : > { %v3067_v59 = vpop.permute.xlu0 %3066  ;;  %v2864_v60 = vsel %vm2856_vm13, %v2853_v54, %v2855_v58  ;;  %vm6250_vm13 = vcmask 138240  }
 0x15c   : > { %4642 = vrot.lane.b32.xlu1 %v7160_v7, %s7080_s12  ;;  %6838 = vmatprep.subr.msk.bf16.mxu1 %vm377_vm1, %v2864_v60  ;;  %v3316_v60 = vsel %vm377_vm1, %v7170_v12, 0 }
 0x15d   : > { %4644 = vrot.lane.b32.xlu0 %v7164_v9, %s7080_s12  ;;  %6837 = vmatmul.mubr.msk.bf16.vlgmr.msra.gmra.mrb[92].mxu0 %vm373_vm2, %v6831_v49 }
 0x15e   : > { %3016 = vmatpush1.bf16.msra.mxu1 %v2887_v61  ;;  %v3069_v62 = vpop.permute.xlu1 %3068  ;;  %3152 = vmatprep.mubr.bf16.mxu0 %v7062_v1 }
 0x15f   : > { %v3071_v63 = vpop.permute.xlu0 %3070  ;;  %v3085_v2 = vsel %vm3084_vm14, %v3067_v59, %v3069_v62 }
 0x160   : > { %v3086_v3 = vsel %vm3084_vm14, %v3069_v62, %v3071_v63  ;;  %4646 = vrot.lane.b32.xlu1 %v7166_v10, %s7080_s12  ;;  %v3097_v11 = vsel %vm377_vm1, %v3085_v2, 0 }
 0x161   : > { %4648 = vrot.lane.b32.xlu0 %v7170_v12, %s7080_s12  ;;  %v7777_v14 = vpop.f32.mrb[0].mxu0  ;;  %6839 = vmatmul.mubr.msk.bf16.vlgmr.msra.gmra.mrb[92].mxu1 %vm373_vm2, %v6831_v49 }
 0x162   : > { %6841 = vmatprep.subr.msk.bf16.mxu0 %vm377_vm1, %v3086_v3  ;;  %v7781_v15 = vpop.f32.mrb[1].mxu0  ;;  %v3073_v16 = vpop.permute.xlu1 %3072  ;;  %3193 = vmatprep.mubr.bf16.mxu1 %v7062_v1 }
 0x163   : > { %3121 = vmatpush1.bf16.msra.mxu0 %v3097_v11  ;;  %v3075_v17 = vpop.permute.xlu0 %3074  ;;  %v3087_v19 = vsel %vm3084_vm14, %v3071_v63, %v3073_v16  ;;  %v440_v21 = vpop.f32.mrb[2].mxu0 }
 0x164   : > { %v3088_v20 = vsel %vm3084_vm14, %v3073_v16, %v3075_v17  ;;  %4650 = vrot.lane.b32.xlu1 %v7172_v13, %s7080_s12  ;;  %v3103_v22 = vsel %vm377_vm1, %v3087_v19, 0  ;;  %v441_v24 = vpop.f32.mrb[3].mxu0 }
 0x165   : > { %4652 = vrot.lane.b32.xlu0 %v7555_v8, %s7080_s12  ;;  %v7794_v23 = vpop.f32.mrb[0].mxu1  ;;  %6843 = vmatprep.subr.msk.bf16.mxu1 %vm377_vm1, %v3088_v20 }
 0x166   : > { %6842 = vmatmul.mubr.msk.bf16.vlgmr.msra.gmra.mrb[96].mxu0 %vm373_vm2, %v6840_v18  ;;  %v7798_v25 = vpop.f32.mrb[1].mxu1  ;;  %3162 = vmatpush1.bf16.msra.mxu1 %v3103_v22  ;;  %v3077_v26 = vpop.permute.xlu1 %3076 }
 0x167   : > { %v3079_v27 = vpop.permute.xlu0 %3078  ;;  %3234 = vmatprep.mubr.bf16.mxu0 %v7062_v1  ;;  %v3089_v28 = vsel %vm3084_vm14, %v3075_v17, %v3077_v26  ;;  %v481_v30 = vpop.f32.mrb[2].mxu1 }
 0x168   : > { %v3090_v29 = vsel %vm3084_vm14, %v3077_v26, %v3079_v27  ;;  %4864 = vrot.lane.b32.xlu1 %v7154_v5, %s7081_s15  ;;  %v3109_v31 = vsel %vm377_vm1, %v3089_v28, 0  ;;  %v482_v32 = vpop.f32.mrb[3].mxu1 }
 0x169   : > { %4866 = vrot.lane.b32.xlu0 %v7152_v4, %s7081_s15  ;;  %v7808_v0 = vpop.f32.mrb[4].mxu0  ;;  %6844 = vmatmul.mubr.msk.bf16.vlgmr.msra.gmra.mrb[96].mxu1 %vm373_vm2, %v6840_v18 }
 0x16a   : > { %6845 = vmatprep.subr.msk.bf16.mxu0 %vm377_vm1, %v3090_v29  ;;  %v7812_v33 = vpop.f32.mrb[5].mxu0  ;;  %v3081_v34 = vpop.permute.xlu1 %3080  ;;  %3275 = vmatprep.mubr.bf16.mxu1 %v7062_v1 }
 0x16b   : > { %3203 = vmatpush1.bf16.msra.mxu0 %v3109_v31  ;;  %v3083_v35 = vpop.permute.xlu0 %3082  ;;  %v3091_v36 = vsel %vm3084_vm14, %v3079_v27, %v3081_v34  ;;  %v522_v39 = vpop.f32.mrb[6].mxu0 }
 0x16c   : > { %v3092_v37 = vsel %vm3084_vm14, %v3081_v34, %v3083_v35  ;;  %6850 = vmatprep.subr.msk.bf16.mxu0 %vm377_vm1, %v7152_v4  ;;  %4868 = vrot.lane.b32.xlu1 %v7158_v6, %s7081_s15  ;;  %v3115_v40 = vsel %vm377_vm1, %v3091_v36, 0  ;;  %v523_v42 = vpop.f32.mrb[7].mxu0 }
 0x16d   : > { %4870 = vrot.lane.b32.xlu0 %v7160_v7, %s7081_s15  ;;  %v7826_v41 = vpop.f32.mrb[4].mxu1  ;;  %6847 = vmatprep.subr.msk.bf16.mxu1 %vm377_vm1, %v3092_v37 }
 0x16e   : > { %6846 = vmatmul.mubr.msk.bf16.vlgmr.msra.gmra.mrb[100].mxu0 %vm373_vm2, %v6840_v18  ;;  %v7830_v43 = vpop.f32.mrb[5].mxu1  ;;  %3244 = vmatpush1.bf16.msra.mxu1 %v3115_v40  ;;  %v3497_v44 = vpop.permute.xlu1 %3496 }
 0x16f   : > { %v3499_v45 = vpop.permute.xlu0 %3498  ;;  %3322 = vmatpush1.bf16.msra.mxu0 %v3298_v38  ;;  %3353 = vmatprep.mubr.bf16.mxu0 %v7062_v1  ;;  %v563_v47 = vpop.f32.mrb[6].mxu1  ;;  %v6858_v38 = vld [vmem:[%s8617_s0 + $0x1c] sm:$0x3] }
 0x170   : > { %6852 = vmatprep.subr.msk.bf16.mxu1 %vm377_vm1, %v7160_v7  ;;  %4872 = vrot.lane.b32.xlu1 %v7164_v9, %s7081_s15  ;;  %v564_v48 = vpop.f32.mrb[7].mxu1 }
 0x171   : > { %4874 = vrot.lane.b32.xlu0 %v7166_v10, %s7081_s15  ;;  %6848 = vmatmul.mubr.msk.bf16.vlgmr.msra.gmra.mrb[100].mxu1 %vm373_vm2, %v6840_v18 }
 0x172   : > { %6854 = vmatprep.subr.msk.bf16.mxu0 %vm377_vm1, %v7166_v10  ;;  %v3501_v49 = vpop.permute.xlu1 %3500  ;;  %3363 = vmatpush1.bf16.msra.mxu1 %v3304_v46 }
 0x173   : > { %v3503_v50 = vpop.permute.xlu0 %3502  ;;  %3394 = vmatprep.mubr.bf16.mxu1 %v7062_v1  ;;  %6856 = vmatprep.subr.msk.bf16.mxu1 %vm377_vm1, %v7172_v13  ;;  %v3516_v53 = vsel %vm3514_vm15, %v3499_v45, %v3501_v49 }
 0x174   : > { %4876 = vrot.lane.b32.xlu1 %v7170_v12, %s7081_s15  ;;  %v654_v54 = vpop.f32.mrb[8].mxu0 }
 0x175   : > { %4878 = vrot.lane.b32.xlu0 %v7172_v13, %s7081_s15  ;;  %v7859_v55 = vadd.f32 %v654_v54, %v7777_v14  ;;  %v656_v56 = vpop.f32.mrb[9].mxu0  ;;  %v3515_v14 = vsel %vm3514_vm15, %v3497_v44, %v3499_v45 }
 0x176   : > { %6851 = vmatmul.mubr.msk.bf16.vlgmr.msra.gmra.mrb[104].mxu0 %vm373_vm2, %v6849_v51  ;;  %v3505_v57 = vpop.permute.xlu1 %3504  ;;  %v7863_v59 = vadd.f32 %v656_v56, %v7781_v15  ;;  %v658_v61 = vpop.f32.mrb[10].mxu0  ;;  %v3527_v22 = vsel %vm377_vm1, %v3515_v14, 0 }
 0x177   : > { %3404 = vmatpush1.bf16.msra.mxu0 %v3310_v52  ;;  %v3507_v58 = vpop.permute.xlu0 %3506  ;;  %3435 = vmatprep.mubr.bf16.mxu0 %v7062_v1  ;;  %v3518_v62 = vsel %vm3514_vm15, %v3503_v50, %v3505_v57  ;;  %v659_v2 = vpop.f32.mrb[11].mxu0 }
 0x178   : > { %6859 = vmatprep.subr.msk.bf16.mxu0 %vm377_vm1, %v3516_v53  ;;  %4880 = vrot.lane.b32.xlu1 %v7555_v8, %s7081_s15  ;;  %v695_v63 = vpop.f32.mrb[8].mxu1  ;;  %v3519_v35 = vsel %vm3514_vm15, %v3505_v57, %v3507_v58 }
 0x179   : > { %5092 = vrot.lane.b32.xlu0 %v7154_v5, %s7082_s18  ;;  %6853 = vmatmul.mubr.msk.bf16.vlgmr.msra.gmra.mrb[104].mxu1 %vm373_vm2, %v6849_v51  ;;  %v7875_v3 = vadd.f32 %v695_v63, %v7794_v23  ;;  %v697_v11 = vpop.f32.mrb[9].mxu1  ;;  %v3539_v45 = vsel %vm377_vm1, %v3519_v35, 0 }
 0x17a   : > { %3445 = vmatpush1.bf16.msra.mxu1 %v3316_v60  ;;  %v3509_v15 = vpop.permute.xlu1 %3508  ;;  %3476 = vmatprep.mubr.bf16.mxu1 %v7062_v1  ;;  %v7880_v17 = vadd.f32 %v697_v11, %v7798_v25  ;;  %v699_v18 = vpop.f32.mrb[10].mxu1  ;;  %v3517_v25 = vsel %vm3514_vm15, %v3501_v49, %v3503_v50 }
 0x17b   : > { %v3511_v16 = vpop.permute.xlu0 %3510  ;;  %6861 = vmatprep.subr.msk.bf16.mxu1 %vm377_vm1, %v3518_v62  ;;  %v3520_v19 = vsel %vm3514_vm15, %v3507_v58, %v3509_v15  ;;  %v700_v20 = vpop.f32.mrb[11].mxu1 }
 0x17c   : > { %5094 = vrot.lane.b32.xlu1 %v7152_v4, %s7082_s18  ;;  %v736_v21 = vpop.f32.mrb[12].mxu0  ;;  %v3521_v47 = vsel %vm3514_vm15, %v3509_v15, %v3511_v16 }
 0x17d   : > { %5096 = vrot.lane.b32.xlu0 %v7158_v6, %s7082_s18  ;;  %v7891_v23 = vadd.f32 %v736_v21, %v7808_v0  ;;  %v738_v24 = vpop.f32.mrb[13].mxu0  ;;  %v3533_v0 = vsel %vm377_vm1, %v3517_v25, 0 }
 0x17e   : > { %6855 = vmatmul.mubr.msk.bf16.vlgmr.msra.gmra.mrb[108].mxu0 %vm373_vm2, %v6849_v51  ;;  %v3513_v26 = vpop.permute.xlu1 %3512  ;;  %v7896_v28 = vadd.f32 %v738_v24, %v7812_v33  ;;  %v740_v29 = vpop.f32.mrb[14].mxu0 }
 0x17f   : > { %3551 = vmatpush1.bf16.msra.mxu0 %v3527_v22  ;;  %v3725_v27 = vpop.permute.xlu0 %3724  ;;  %3582 = vmatprep.mubr.bf16.mxu0 %v7062_v1  ;;  %v3522_v30 = vsel %vm3514_vm15, %v3511_v16, %v3513_v26  ;;  %v741_v32 = vpop.f32.mrb[15].mxu0 }
 0x180   : > { %6863 = vmatprep.subr.msk.bf16.mxu0 %vm377_vm1, %v3520_v19  ;;  %5098 = vrot.lane.b32.xlu1 %v7160_v7, %s7082_s18 }
 0x181   : > { %5100 = vrot.lane.b32.xlu0 %v7164_v9, %s7082_s18  ;;  %v777_v31 = vpop.f32.mrb[12].mxu1  ;;  %6857 = vmatmul.mubr.msk.bf16.vlgmr.msra.gmra.mrb[108].mxu1 %vm373_vm2, %v6849_v51 }
 0x182   : > { %v7907_v33 = vadd.f32 %v777_v31, %v7826_v41  ;;  %v779_v34 = vpop.f32.mrb[13].mxu1  ;;  %3592 = vmatpush1.bf16.msra.mxu1 %v3533_v0  ;;  %v3727_v36 = vpop.permute.xlu1 %3726  ;;  %3623 = vmatprep.mubr.bf16.mxu1 %v7062_v1 }
 0x183   : > { %v3729_v37 = vpop.permute.xlu0 %3728  ;;  %v7915_v39 = vadd.f32 %v779_v34, %v7830_v43  ;;  %6865 = vmatprep.subr.msk.bf16.mxu1 %vm377_vm1, %v3522_v30  ;;  %v781_v40 = vpop.f32.mrb[14].mxu1  ;;  %v3743_v58 = vsel %vm3742_vm0, %v3725_v27, %v3727_v36  ;;  %v6867_v30 = vld [vmem:[%s8617_s0 + $0x1e] sm:$0x3] }
 0x184   : > { %5102 = vrot.lane.b32.xlu1 %v7166_v10, %s7082_s18  ;;  %v3744_v41 = vsel %vm3742_vm0, %v3727_v36, %v3729_v37  ;;  %v782_v42 = vpop.f32.mrb[15].mxu1  ;;  %v3755_v11 = vsel %vm377_vm1, %v3743_v58, 0 }
 0x185   : > { %5104 = vrot.lane.b32.xlu0 %v7170_v12, %s7082_s18  ;;  %v874_v44 = vpop.f32.mrb[16].mxu0 }
 0x186   : > { %6860 = vmatmul.mubr.msk.bf16.vlgmr.msra.gmra.mrb[112].mxu0 %vm373_vm2, %v6858_v38  ;;  %v7926_v43 = vadd.f32 %v874_v44, %v7859_v55  ;;  %v876_v46 = vpop.f32.mrb[17].mxu0  ;;  %v3731_v48 = vpop.permute.xlu1 %3730  ;;  %v3545_v55 = vsel %vm377_vm1, %v3521_v47, 0 }
 0x187   : > { %3633 = vmatpush1.bf16.msra.mxu0 %v3539_v45  ;;  %v3733_v49 = vpop.permute.xlu0 %3732  ;;  %3664 = vmatprep.mubr.bf16.mxu0 %v7062_v1  ;;  %v7931_v50 = vadd.f32 %v876_v46, %v7863_v59  ;;  %v878_v51 = vpop.f32.mrb[18].mxu0  ;;  %v3745_v16 = vsel %vm3742_vm0, %v3729_v37, %v3731_v48 }
 0x188   : > { %6868 = vmatprep.subr.msk.bf16.mxu0 %vm377_vm1, %v3744_v41  ;;  %5106 = vrot.lane.b32.xlu1 %v7172_v13, %s7082_s18  ;;  %v3746_v52 = vsel %vm3742_vm0, %v3731_v48, %v3733_v49  ;;  %v879_v54 = vpop.f32.mrb[19].mxu0  ;;  %v3761_v24 = vsel %vm377_vm1, %v3745_v16, 0 }
 0x189   : > { %5108 = vrot.lane.b32.xlu0 %v7555_v8, %s7082_s18  ;;  %v915_v53 = vpop.f32.mrb[16].mxu1  ;;  %6862 = vmatmul.mubr.msk.bf16.vlgmr.msra.gmra.mrb[112].mxu1 %vm373_vm2, %v6858_v38 }
 0x18a   : > { %v7942_v56 = vadd.f32 %v915_v53, %v7875_v3  ;;  %v917_v57 = vpop.f32.mrb[17].mxu1  ;;  %3674 = vmatpush1.bf16.msra.mxu1 %v3545_v55  ;;  %v3735_v59 = vpop.permute.xlu1 %3734  ;;  %3705 = vmatprep.mubr.bf16.mxu1 %v7062_v1 }
 0x18b   : > { %v3737_v60 = vpop.permute.xlu0 %3736  ;;  %v7946_v61 = vadd.f32 %v917_v57, %v7880_v17  ;;  %6870 = vmatprep.subr.msk.bf16.mxu1 %vm377_vm1, %v3746_v52  ;;  %v919_v62 = vpop.f32.mrb[18].mxu1  ;;  %v3747_v27 = vsel %vm3742_vm0, %v3733_v49, %v3735_v59 }
 0x18c   : > { %5320 = vrot.lane.b32.xlu1 %v7154_v5, %s7083_s20  ;;  %v3748_v63 = vsel %vm3742_vm0, %v3735_v59, %v3737_v60  ;;  %v920_v3 = vpop.f32.mrb[19].mxu1 }
 0x18d   : > { %5322 = vrot.lane.b32.xlu0 %v7152_v4, %s7083_s20  ;;  %v956_v2 = vpop.f32.mrb[20].mxu0 }
 0x18e   : > { %6864 = vmatmul.mubr.msk.bf16.vlgmr.msra.gmra.mrb[116].mxu0 %vm373_vm2, %v6858_v38  ;;  %v7958_v14 = vadd.f32 %v956_v2, %v7891_v23  ;;  %v958_v15 = vpop.f32.mrb[21].mxu0  ;;  %v3739_v17 = vpop.permute.xlu1 %3738 }
 0x18f   : > { %3779 = vmatpush1.bf16.msra.mxu0 %v3755_v11  ;;  %v3741_v18 = vpop.permute.xlu0 %3740  ;;  %3810 = vmatprep.mubr.bf16.mxu0 %v7062_v1  ;;  %v7963_v19 = vadd.f32 %v958_v15, %v7896_v28  ;;  %v960_v20 = vpop.f32.mrb[22].mxu0  ;;  %v3749_v34 = vsel %vm3742_vm0, %v3737_v60, %v3739_v17  ;;  %v8043_v15 = vld [vmem:[%s8617_s0 + $0x20] sm:$0x3] }
 0x190   : > { %6872 = vmatprep.subr.msk.bf16.mxu0 %vm377_vm1, %v3748_v63  ;;  %v3750_v21 = vsel %vm3742_vm0, %v3739_v17, %v3741_v18  ;;  %5324 = vrot.lane.b32.xlu1 %v7158_v6, %s7083_s20  ;;  %v961_v23 = vpop.f32.mrb[23].mxu0  ;;  %v3773_v41 = vsel %vm377_vm1, %v3749_v34, 0 }
 0x191   : > { %5326 = vrot.lane.b32.xlu0 %v7160_v7, %s7083_s20  ;;  %v997_v22 = vpop.f32.mrb[20].mxu1  ;;  %6866 = vmatmul.mubr.msk.bf16.vlgmr.msra.gmra.mrb[116].mxu1 %vm373_vm2, %v6858_v38 }
 0x192   : > { %v7974_v25 = vadd.f32 %v997_v22, %v7907_v33  ;;  %v999_v26 = vpop.f32.mrb[21].mxu1  ;;  %3820 = vmatpush1.bf16.msra.mxu1 %v3761_v24  ;;  %v3953_v28 = vpop.permute.xlu1 %3952  ;;  %3851 = vmatprep.mubr.bf16.mxu1 %v7062_v1  ;;  %v3767_v33 = vsel %vm377_vm1, %v3747_v27, 0 }
 0x193   : > { %v3955_v29 = vpop.permute.xlu0 %3954  ;;  %v7981_v31 = vadd.f32 %v999_v26, %v7915_v39  ;;  %6874 = vmatprep.subr.msk.bf16.mxu1 %vm377_vm1, %v3750_v21  ;;  %v1001_v32 = vpop.f32.mrb[22].mxu1 }
 0x194   : > { %5328 = vrot.lane.b32.xlu1 %v7164_v9, %s7083_s20  ;;  %v1002_v0 = vpop.f32.mrb[23].mxu1  ;;  %v3971_v42 = vsel %vm3970_vm3, %v3953_v28, %v3955_v29 }
 0x195   : > { %5330 = vrot.lane.b32.xlu0 %v7166_v10, %s7083_s20  ;;  %v3983_v52 = vsel %vm377_vm1, %v3971_v42, 0 }
 0x196   : > { %6869 = vmatmul.mubr.msk.bf16.vlgmr.msra.gmra.mrb[120].mxu0 %vm373_vm2, %v6867_v30  ;;  %v3957_v35 = vpop.permute.xlu1 %3956 }
 0x197   : > { %3861 = vmatpush1.bf16.msra.mxu0 %v3767_v33  ;;  %v3959_v36 = vpop.permute.xlu0 %3958  ;;  %3892 = vmatprep.mubr.bf16.mxu0 %v7062_v1  ;;  %v3972_v37 = vsel %vm3970_vm3, %v3955_v29, %v3957_v35  ;;  %v1102_v38 = vpop.f32.mrb[24].mxu0 }
 0x198   : > { %5332 = vrot.lane.b32.xlu1 %v7170_v12, %s7083_s20  ;;  %v7999_v39 = vadd.f32 %v1102_v38, %v7926_v43  ;;  %v1104_v40 = vpop.f32.mrb[25].mxu0  ;;  %6877 = vmatprep.subr.msk.bf16.mxu0 %vm377_vm1, %v3972_v37  ;;  %v3973_v53 = vsel %vm3970_vm3, %v3957_v35, %v3959_v36 }
 0x199   : > { %5334 = vrot.lane.b32.xlu0 %v7172_v13, %s7083_s20  ;;  %6871 = vmatmul.mubr.msk.bf16.vlgmr.msra.gmra.mrb[120].mxu1 %vm373_vm2, %v6867_v30  ;;  %v8006_v44 = vadd.f32 %v1104_v40, %v7931_v50  ;;  %v1106_v47 = vpop.f32.mrb[26].mxu0  ;;  %v3989_v60 = vsel %vm377_vm1, %v3973_v53, 0 }
 0x19a   : > { %3902 = vmatpush1.bf16.msra.mxu1 %v3773_v41  ;;  %v3961_v45 = vpop.permute.xlu1 %3960  ;;  %3933 = vmatprep.mubr.bf16.mxu1 %v7062_v1  ;;  %v1107_v49 = vpop.f32.mrb[27].mxu0 }
 0x19b   : > { %v3963_v46 = vpop.permute.xlu0 %3962  ;;  %v3974_v43 = vsel %vm3970_vm3, %v3959_v36, %v3961_v45 }
 0x19c   : > { %v1143_v48 = vpop.f32.mrb[24].mxu1  ;;  %5336 = vrot.lane.b32.xlu1 %v7555_v8, %s7083_s20  ;;  %6879 = vmatprep.subr.msk.bf16.mxu1 %vm377_vm1, %v3974_v43  ;;  %v3975_v63 = vsel %vm3970_vm3, %v3961_v45, %v3963_v46 }
 0x19d   : > { %5548 = vrot.lane.b32.xlu0 %v7154_v5, %s7084_s27  ;;  %v8015_v50 = vadd.f32 %v1143_v48, %v7942_v56  ;;  %v1145_v51 = vpop.f32.mrb[25].mxu1 }
 0x19e   : > { %6873 = vmatmul.mubr.msk.bf16.vlgmr.msra.gmra.mrb[124].mxu0 %vm373_vm2, %v6867_v30  ;;  %v8022_v54 = vadd.f32 %v1145_v51, %v7946_v61  ;;  %v3965_v8 = vpop.permute.xlu1 %3964  ;;  %v1147_v57 = vpop.f32.mrb[26].mxu1 }
 0x19f   : > { %4007 = vmatpush1.bf16.msra.mxu0 %v3983_v52  ;;  %v3967_v55 = vpop.permute.xlu0 %3966  ;;  %4038 = vmatprep.mubr.bf16.mxu0 %v7062_v1  ;;  %v3976_v56 = vsel %vm3970_vm3, %v3963_v46, %v3965_v8  ;;  %v1148_v59 = vpop.f32.mrb[27].mxu1 }
 0x1a0   : > { %v1184_v58 = vpop.f32.mrb[28].mxu0  ;;  %5550 = vrot.lane.b32.xlu1 %v7152_v4, %s7084_s27  ;;  %6881 = vmatprep.subr.msk.bf16.mxu0 %vm377_vm1, %v3976_v56  ;;  %v3977_v22 = vsel %vm3970_vm3, %v3965_v8, %v3967_v55 }
 0x1a1   : > { %5552 = vrot.lane.b32.xlu0 %v7158_v6, %s7084_s27  ;;  %v8032_v61 = vadd.f32 %v1184_v58, %v7958_v14  ;;  %v1186_v62 = vpop.f32.mrb[29].mxu0  ;;  %6875 = vmatmul.mubr.msk.bf16.vlgmr.msra.gmra.mrb[124].mxu1 %vm373_vm2, %v6867_v30  ;;  %v4001_v30 = vsel %vm377_vm1, %v3977_v22, 0  ;;  %v6885_v58 = vld [vmem:[%s8617_s0 + $0x22] sm:$0x3] }
 0x1a2   : > { %v8038_v2 = vadd.f32 %v1186_v62, %v7963_v19  ;;  %4048 = vmatpush1.bf16.msra.mxu1 %v3989_v60  ;;  %v3969_v3 = vpop.permute.xlu1 %3968  ;;  %4079 = vmatprep.mubr.bf16.mxu1 %v7062_v1  ;;  %v1188_v16 = vpop.f32.mrb[30].mxu0  ;;  %v3995_v19 = vsel %vm377_vm1, %v3975_v63, 0 }
 0x1a3   : > { %v4181_v11 = vpop.permute.xlu0 %4180  ;;  %v3978_v14 = vsel %vm3970_vm3, %v3967_v55, %v3969_v3  ;;  %v1189_v18 = vpop.f32.mrb[31].mxu0 }
 0x1a4   : > { %v1225_v17 = vpop.f32.mrb[28].mxu1  ;;  %5554 = vrot.lane.b32.xlu1 %v7160_v7, %s7084_s27  ;;  %6883 = vmatprep.subr.msk.bf16.mxu1 %vm377_vm1, %v3978_v14 }
 0x1a5   : > { %5556 = vrot.lane.b32.xlu0 %v7164_v9, %s7084_s27  ;;  %v8053_v20 = vadd.f32 %v1225_v17, %v7974_v25  ;;  %v1227_v21 = vpop.f32.mrb[29].mxu1 }
 0x1a6   : > { %6878 = vmatmul.mubr.msk.bf16.vlgmr.msra.gmra.mrb[128].mxu0 %vm373_vm2, %v8043_v15  ;;  %v8060_v23 = vadd.f32 %v1227_v21, %v7981_v31  ;;  %v4183_v24 = vpop.permute.xlu1 %4182  ;;  %v1229_v25 = vpop.f32.mrb[30].mxu1 }
 0x1a7   : > { %4089 = vmatpush1.bf16.msra.mxu0 %v3995_v19  ;;  %v4185_v26 = vpop.permute.xlu0 %4184  ;;  %4120 = vmatprep.mubr.bf16.mxu0 %v7062_v1  ;;  %v1230_v29 = vpop.f32.mrb[31].mxu1  ;;  %v4199_v0 = vsel %vm4198_vm4, %v4181_v11, %v4183_v24 }
 0x1a8   : > { %v4200_v27 = vsel %vm4198_vm4, %v4183_v24, %v4185_v26  ;;  %5558 = vrot.lane.b32.xlu1 %v7166_v10, %s7084_s27  ;;  %v4211_v41 = vsel %vm377_vm1, %v4199_v0, 0 }
 0x1a9   : > { %v1330_v28 = vpop.f32.mrb[32].mxu0  ;;  %5560 = vrot.lane.b32.xlu0 %v7170_v12, %s7084_s27  ;;  %6880 = vmatmul.mubr.msk.bf16.vlgmr.msra.gmra.mrb[128].mxu1 %vm373_vm2, %v8043_v15 }
 0x1aa   : > { %v8070_v31 = vadd.f32 %v1330_v28, %v7999_v39  ;;  %v1332_v32 = vpop.f32.mrb[33].mxu0  ;;  %6886 = vmatprep.subr.msk.bf16.mxu0 %vm377_vm1, %v4200_v27  ;;  %4130 = vmatpush1.bf16.msra.mxu1 %v4001_v30  ;;  %v4187_v34 = vpop.permute.xlu1 %4186  ;;  %v8084_v39 = vld [vmem:[%s7544_s19] sm:$0xf]  ;;  %s7085_s19 = smov 19  }
 0x1ab   : > { %v8077_v33 = vadd.f32 %v1332_v32, %v8006_v44  ;;  %v4189_v35 = vpop.permute.xlu0 %4188  ;;  %4161 = vmatprep.mubr.bf16.mxu1 %v7062_v1  ;;  %v1334_v37 = vpop.f32.mrb[34].mxu0  ;;  %v4201_v45 = vsel %vm4198_vm4, %v4185_v26, %v4187_v34 }
 0x1ac   : > { %v4202_v36 = vsel %vm4198_vm4, %v4187_v34, %v4189_v35  ;;  %v1371_v38 = vpop.f32.mrb[32].mxu1  ;;  %5562 = vrot.lane.b32.xlu1 %v7172_v13, %s7084_s27  ;;  %v1335_v40 = vpop.f32.mrb[35].mxu0  ;;  %v4217_v52 = vsel %vm377_vm1, %v4201_v45, 0  ;;  %v8178_v45 = vld [vmem:[%s8617_s0 + $0x24] sm:$0x3] }
 0x1ad   : > { %5564 = vrot.lane.b32.xlu0 %v8084_v39, %s7084_s27  ;;  %v8090_v42 = vadd.f32 %v1371_v38, %v8015_v50  ;;  %v1373_v44 = vpop.f32.mrb[33].mxu1  ;;  %6888 = vmatprep.subr.msk.bf16.mxu1 %vm377_vm1, %v4202_v36 }
 0x1ae   : > { %6882 = vmatmul.mubr.msk.bf16.vlgmr.msra.gmra.mrb[132].mxu0 %vm373_vm2, %v8043_v15  ;;  %v8097_v46 = vadd.f32 %v1373_v44, %v8022_v54  ;;  %v4191_v43 = vpop.permute.xlu1 %4190  ;;  %v1375_v49 = vpop.f32.mrb[34].mxu1 }
 0x1af   : > { %4235 = vmatpush1.bf16.msra.mxu0 %v4211_v41  ;;  %v4193_v47 = vpop.permute.xlu0 %4192  ;;  %4266 = vmatprep.mubr.bf16.mxu0 %v7062_v1  ;;  %v1376_v51 = vpop.f32.mrb[35].mxu1  ;;  %v4203_v8 = vsel %vm4198_vm4, %v4189_v35, %v4191_v43 }
 0x1b0   : > { %v4204_v48 = vsel %vm4198_vm4, %v4191_v43, %v4193_v47  ;;  %5776 = vrot.lane.b32.xlu1 %v7154_v5, %s7085_s19  ;;  %v4223_v63 = vsel %vm377_vm1, %v4203_v8, 0 }
 0x1b1   : > { %v1412_v50 = vpop.f32.mrb[36].mxu0  ;;  %5778 = vrot.lane.b32.xlu0 %v7152_v4, %s7085_s19  ;;  %6884 = vmatmul.mubr.msk.bf16.vlgmr.msra.gmra.mrb[132].mxu1 %vm373_vm2, %v8043_v15 }
 0x1b2   : > { %v8107_v53 = vadd.f32 %v1412_v50, %v8032_v61  ;;  %v1414_v54 = vpop.f32.mrb[37].mxu0  ;;  %6890 = vmatprep.subr.msk.bf16.mxu0 %vm377_vm1, %v4204_v48  ;;  %4276 = vmatpush1.bf16.msra.mxu1 %v4217_v52  ;;  %v4195_v56 = vpop.permute.xlu1 %4194 }
 0x1b3   : > { %v8114_v55 = vadd.f32 %v1414_v54, %v8038_v2  ;;  %v4197_v57 = vpop.permute.xlu0 %4196  ;;  %4307 = vmatprep.mubr.bf16.mxu1 %v7062_v1  ;;  %v1416_v60 = vpop.f32.mrb[38].mxu0  ;;  %v4205_v11 = vsel %vm4198_vm4, %v4193_v47, %v4195_v56 }
 0x1b4   : > { %v4206_v59 = vsel %vm4198_vm4, %v4195_v56, %v4197_v57  ;;  %v1453_v61 = vpop.f32.mrb[36].mxu1  ;;  %5780 = vrot.lane.b32.xlu1 %v7158_v6, %s7085_s19  ;;  %v1417_v62 = vpop.f32.mrb[39].mxu0  ;;  %v4229_v19 = vsel %vm377_vm1, %v4205_v11, 0 }
 0x1b5   : > { %5782 = vrot.lane.b32.xlu0 %v7160_v7, %s7085_s19  ;;  %v8127_v2 = vadd.f32 %v1453_v61, %v8053_v20  ;;  %v1455_v3 = vpop.f32.mrb[37].mxu1  ;;  %6892 = vmatprep.subr.msk.bf16.mxu1 %vm377_vm1, %v4206_v59 }
 0x1b6   : > { %6887 = vmatmul.mubr.msk.bf16.vlgmr.msra.gmra.mrb[136].mxu0 %vm373_vm2, %v6885_v58  ;;  %v8133_v15 = vadd.f32 %v1455_v3, %v8060_v23  ;;  %v4409_v14 = vpop.permute.xlu1 %4408  ;;  %v1457_v17 = vpop.f32.mrb[38].mxu1 }
 0x1b7   : > { %4317 = vmatpush1.bf16.msra.mxu0 %v4223_v63  ;;  %v4411_v16 = vpop.permute.xlu0 %4410  ;;  %4348 = vmatprep.mubr.bf16.mxu0 %v7062_v1  ;;  %v1458_v18 = vpop.f32.mrb[39].mxu1 }
 0x1b8   : > { %5784 = vrot.lane.b32.xlu1 %v7164_v9, %s7085_s19  ;;  %v4427_v20 = vsel %vm4426_vm5, %v4409_v14, %v4411_v16 }
 0x1b9   : > { %5786 = vrot.lane.b32.xlu0 %v7166_v10, %s7085_s19  ;;  %6889 = vmatmul.mubr.msk.bf16.vlgmr.msra.gmra.mrb[136].mxu1 %vm373_vm2, %v6885_v58  ;;  %v4439_v26 = vsel %vm377_vm1, %v4427_v20, 0 }
 0x1ba   : > { %4358 = vmatpush1.bf16.msra.mxu1 %v4229_v19  ;;  %v4413_v21 = vpop.permute.xlu1 %4412  ;;  %4389 = vmatprep.mubr.bf16.mxu1 %v7062_v1 }
 0x1bb   : > { %v4415_v22 = vpop.permute.xlu0 %4414  ;;  %v4428_v23 = vsel %vm4426_vm5, %v4411_v16, %v4413_v21  ;;  %v1558_v24 = vpop.f32.mrb[40].mxu0 }
 0x1bc   : > { %5788 = vrot.lane.b32.xlu1 %v7170_v12, %s7085_s19  ;;  %v8151_v27 = vadd.f32 %v1558_v24, %v8070_v31  ;;  %v1560_v25 = vpop.f32.mrb[41].mxu0  ;;  %6895 = vmatprep.subr.msk.bf16.mxu0 %vm377_vm1, %v4428_v23  ;;  %v4429_v28 = vsel %vm4426_vm5, %v4413_v21, %v4415_v22 }
 0x1bd   : > { %5790 = vrot.lane.b32.xlu0 %v7172_v13, %s7085_s19  ;;  %v8157_v29 = vadd.f32 %v1560_v25, %v8077_v33  ;;  %v1562_v34 = vpop.f32.mrb[42].mxu0  ;;  %v4445_v33 = vsel %vm377_vm1, %v4429_v28, 0 }
 0x1be   : > { %6891 = vmatmul.mubr.msk.bf16.vlgmr.msra.gmra.mrb[140].mxu0 %vm373_vm2, %v6885_v58  ;;  %v4417_v30 = vpop.permute.xlu1 %4416  ;;  %v1563_v35 = vpop.f32.mrb[43].mxu0  ;;  %v6903_v34 = vld [vmem:[%s8617_s0 + $0x26] sm:$0x3] }
 0x1bf   : > { %4463 = vmatpush1.bf16.msra.mxu0 %v4439_v26  ;;  %v4419_v32 = vpop.permute.xlu0 %4418  ;;  %4494 = vmatprep.mubr.bf16.mxu0 %v7062_v1  ;;  %v4430_v0 = vsel %vm4426_vm5, %v4415_v22, %v4417_v30 }
 0x1c0   : > { %v1599_v31 = vpop.f32.mrb[40].mxu1  ;;  %5792 = vrot.lane.b32.xlu1 %v8084_v39, %s7085_s19  ;;  %6897 = vmatprep.subr.msk.bf16.mxu1 %vm377_vm1, %v4430_v0  ;;  %v4431_v38 = vsel %vm4426_vm5, %v4417_v30, %v4419_v32 }
 0x1c1   : > { %6004 = vrot.lane.b32.xlu0 %v7154_v5, %s7086_s8  ;;  %v8167_v36 = vadd.f32 %v1599_v31, %v8090_v42  ;;  %v1601_v37 = vpop.f32.mrb[41].mxu1  ;;  %6893 = vmatmul.mubr.msk.bf16.vlgmr.msra.gmra.mrb[140].mxu1 %vm373_vm2, %v6885_v58  ;;  %v4451_v48 = vsel %vm377_vm1, %v4431_v38, 0 }
 0x1c2   : > { %v8173_v40 = vadd.f32 %v1601_v37, %v8097_v46  ;;  %4504 = vmatpush1.bf16.msra.mxu1 %v4445_v33  ;;  %v4421_v41 = vpop.permute.xlu1 %4420  ;;  %4535 = vmatprep.mubr.bf16.mxu1 %v7062_v1  ;;  %v1603_v43 = vpop.f32.mrb[42].mxu1 }
 0x1c3   : > { %v4423_v44 = vpop.permute.xlu0 %4422  ;;  %v4432_v42 = vsel %vm4426_vm5, %v4419_v32, %v4421_v41  ;;  %v1604_v46 = vpop.f32.mrb[43].mxu1 }
 0x1c4   : > { %v1640_v47 = vpop.f32.mrb[44].mxu0  ;;  %6006 = vrot.lane.b32.xlu1 %v7152_v4, %s7086_s8  ;;  %6899 = vmatprep.subr.msk.bf16.mxu0 %vm377_vm1, %v4432_v42  ;;  %v4433_v51 = vsel %vm4426_vm5, %v4421_v41, %v4423_v44 }
 0x1c5   : > { %6008 = vrot.lane.b32.xlu0 %v7158_v6, %s7086_s8  ;;  %v8188_v49 = vadd.f32 %v1640_v47, %v8107_v53  ;;  %v1642_v50 = vpop.f32.mrb[45].mxu0 }
 0x1c6   : > { %6896 = vmatmul.mubr.msk.bf16.vlgmr.msra.gmra.mrb[144].mxu0 %vm373_vm2, %v8178_v45  ;;  %v8195_v52 = vadd.f32 %v1642_v50, %v8114_v55  ;;  %v4425_v54 = vpop.permute.xlu1 %4424  ;;  %v1644_v53 = vpop.f32.mrb[46].mxu0  ;;  %v4457_v55 = vsel %vm377_vm1, %v4433_v51, 0 }
 0x1c7   : > { %4545 = vmatpush1.bf16.msra.mxu0 %v4451_v48  ;;  %v4637_v8 = vpop.permute.xlu0 %4636  ;;  %4576 = vmatprep.mubr.bf16.mxu0 %v7062_v1  ;;  %v4434_v56 = vsel %vm4426_vm5, %v4423_v44, %v4425_v54  ;;  %v1645_v58 = vpop.f32.mrb[47].mxu0 }
 0x1c8   : > { %v1681_v57 = vpop.f32.mrb[44].mxu1  ;;  %6010 = vrot.lane.b32.xlu1 %v7160_v7, %s7086_s8  ;;  %6901 = vmatprep.subr.msk.bf16.mxu1 %vm377_vm1, %v4434_v56 }
 0x1c9   : > { %6012 = vrot.lane.b32.xlu0 %v7164_v9, %s7086_s8  ;;  %v8205_v59 = vadd.f32 %v1681_v57, %v8127_v2  ;;  %v1683_v60 = vpop.f32.mrb[45].mxu1  ;;  %6898 = vmatmul.mubr.msk.bf16.vlgmr.msra.gmra.mrb[144].mxu1 %vm373_vm2, %v8178_v45 }
 0x1ca   : > { %v8211_v61 = vadd.f32 %v1683_v60, %v8133_v15  ;;  %4586 = vmatpush1.bf16.msra.mxu1 %v4457_v55  ;;  %v4639_v62 = vpop.permute.xlu1 %4638  ;;  %4617 = vmatprep.mubr.bf16.mxu1 %v7062_v1  ;;  %v1685_v2 = vpop.f32.mrb[46].mxu1 }
 0x1cb   : > { %v4641_v63 = vpop.permute.xlu0 %4640  ;;  %v4655_v3 = vsel %vm4654_vm6, %v4637_v8, %v4639_v62  ;;  %v1686_v15 = vpop.f32.mrb[47].mxu1 }
 0x1cc   : > { %v4656_v11 = vsel %vm4654_vm6, %v4639_v62, %v4641_v63  ;;  %v4667_v14 = vsel %vm377_vm1, %v4655_v3, 0  ;;  %6014 = vrot.lane.b32.xlu1 %v7166_v10, %s7086_s8 }
 0x1cd   : > { %v1786_v16 = vpop.f32.mrb[48].mxu0  ;;  %6016 = vrot.lane.b32.xlu0 %v7170_v12, %s7086_s8  ;;  %6904 = vmatprep.subr.msk.bf16.mxu0 %vm377_vm1, %v4656_v11 }
 0x1ce   : > { %v8222_v17 = vadd.f32 %v1786_v16, %v8151_v27  ;;  %v1788_v18 = vpop.f32.mrb[49].mxu0  ;;  %6900 = vmatmul.mubr.msk.bf16.vlgmr.msra.gmra.mrb[148].mxu0 %vm373_vm2, %v8178_v45  ;;  %v4643_v20 = vpop.permute.xlu1 %4642 }
 0x1cf   : > { %v8228_v19 = vadd.f32 %v1788_v18, %v8157_v29  ;;  %4691 = vmatpush1.bf16.msra.mxu0 %v4667_v14  ;;  %v4645_v21 = vpop.permute.xlu0 %4644  ;;  %4722 = vmatprep.mubr.bf16.mxu0 %v7062_v1  ;;  %v4657_v22 = vsel %vm4654_vm6, %v4641_v63, %v4643_v20  ;;  %v1790_v24 = vpop.f32.mrb[50].mxu0 }
 0x1d0   : > { %v4658_v23 = vsel %vm4654_vm6, %v4643_v20, %v4645_v21  ;;  %v4673_v26 = vsel %vm377_vm1, %v4657_v22, 0  ;;  %v1827_v27 = vpop.f32.mrb[48].mxu1  ;;  %6018 = vrot.lane.b32.xlu1 %v7172_v13, %s7086_s8  ;;  %v1791_v25 = vpop.f32.mrb[51].mxu0 }
 0x1d1   : > { %6020 = vrot.lane.b32.xlu0 %v8084_v39, %s7086_s8  ;;  %v8239_v28 = vadd.f32 %v1827_v27, %v8167_v36  ;;  %v1829_v29 = vpop.f32.mrb[49].mxu1  ;;  %6902 = vmatmul.mubr.msk.bf16.vlgmr.msra.gmra.mrb[148].mxu1 %vm373_vm2, %v8178_v45 }
 0x1d2   : > { %6906 = vmatprep.subr.msk.bf16.mxu1 %vm377_vm1, %v4658_v23  ;;  %v8245_v30 = vadd.f32 %v1829_v29, %v8173_v40  ;;  %v4647_v32 = vpop.permute.xlu1 %4646  ;;  %4763 = vmatprep.mubr.bf16.mxu1 %v7062_v1  ;;  %v1831_v33 = vpop.f32.mrb[50].mxu1 }
 0x1d3   : > { %4732 = vmatpush1.bf16.msra.mxu1 %v4673_v26  ;;  %v4649_v0 = vpop.permute.xlu0 %4648  ;;  %v4659_v31 = vsel %vm4654_vm6, %v4645_v21, %v4647_v32  ;;  %v1832_v38 = vpop.f32.mrb[51].mxu1 }
 0x1d4   : > { %v4660_v35 = vsel %vm4654_vm6, %v4647_v32, %v4649_v0  ;;  %v4679_v36 = vsel %vm377_vm1, %v4659_v31, 0  ;;  %6232 = vrot.lane.b32.xlu1 %v7154_v5, %s7087_s13 }
 0x1d5   : > { %v1868_v37 = vpop.f32.mrb[52].mxu0  ;;  %6234 = vrot.lane.b32.xlu0 %v7152_v4, %s7087_s13  ;;  %6908 = vmatprep.subr.msk.bf16.mxu0 %vm377_vm1, %v4660_v35 }
 0x1d6   : > { %v8259_v40 = vadd.f32 %v1868_v37, %v8188_v49  ;;  %v1870_v41 = vpop.f32.mrb[53].mxu0  ;;  %6905 = vmatmul.mubr.msk.bf16.vlgmr.msra.gmra.mrb[152].mxu0 %vm373_vm2, %v6903_v34  ;;  %v4651_v45 = vpop.permute.xlu1 %4650 }
 0x1d7   : > { %v8264_v44 = vadd.f32 %v1870_v41, %v8195_v52  ;;  %4773 = vmatpush1.bf16.msra.mxu0 %v4679_v36  ;;  %v4653_v42 = vpop.permute.xlu0 %4652  ;;  %4804 = vmatprep.mubr.bf16.mxu0 %v7062_v1  ;;  %v4661_v5 = vsel %vm4654_vm6, %v4649_v0, %v4651_v45  ;;  %v1872_v43 = vpop.f32.mrb[54].mxu0 }
 0x1d8   : > { %v4662_v4 = vsel %vm4654_vm6, %v4651_v45, %v4653_v42  ;;  %v4685_v47 = vsel %vm377_vm1, %v4661_v5, 0  ;;  %v1909_v46 = vpop.f32.mrb[52].mxu1  ;;  %6236 = vrot.lane.b32.xlu1 %v7158_v6, %s7087_s13  ;;  %v1873_v48 = vpop.f32.mrb[55].mxu0 }
 0x1d9   : > { %6238 = vrot.lane.b32.xlu0 %v7160_v7, %s7087_s13  ;;  %v8275_v49 = vadd.f32 %v1909_v46, %v8205_v59  ;;  %v1911_v50 = vpop.f32.mrb[53].mxu1  ;;  %6907 = vmatmul.mubr.msk.bf16.vlgmr.msra.gmra.mrb[152].mxu1 %vm373_vm2, %v6903_v34 }
 0x1da   : > { %6910 = vmatprep.subr.msk.bf16.mxu1 %vm377_vm1, %v4662_v4  ;;  %v8280_v51 = vadd.f32 %v1911_v50, %v8211_v61  ;;  %v4865_v52 = vpop.permute.xlu1 %4864  ;;  %4845 = vmatprep.mubr.bf16.mxu1 %v7062_v1  ;;  %v1913_v6 = vpop.f32.mrb[54].mxu1 }
 0x1db   : > { %4814 = vmatpush1.bf16.msra.mxu1 %v4685_v47  ;;  %v4867_v54 = vpop.permute.xlu0 %4866  ;;  %v1914_v7 = vpop.f32.mrb[55].mxu1 }
 0x1dc   : > { %6240 = vrot.lane.b32.xlu1 %v7164_v9, %s7087_s13  ;;  %v4883_v8 = vsel %vm4882_vm7, %v4865_v52, %v4867_v54 }
 0x1dd   : > { %6242 = vrot.lane.b32.xlu0 %v7166_v10, %s7087_s13  ;;  %v4895_v9 = vsel %vm377_vm1, %v4883_v8, 0 }
 0x1de   : > { %6909 = vmatmul.mubr.msk.bf16.vlgmr.msra.gmra.mrb[156].mxu0 %vm373_vm2, %v6903_v34  ;;  %v4869_v56 = vpop.permute.xlu1 %4868 }
 0x1df   : > { %v4871_v53 = vpop.permute.xlu0 %4870  ;;  %4950 = vmatprep.mubr.bf16.mxu0 %v7062_v1  ;;  %v4884_v57 = vsel %vm4882_vm7, %v4867_v54, %v4869_v56  ;;  %v2014_v58 = vpop.f32.mrb[56].mxu0 }
 0x1e0   : > { %6244 = vrot.lane.b32.xlu1 %v7170_v12, %s7087_s13  ;;  %v4885_v10 = vsel %vm4882_vm7, %v4869_v56, %v4871_v53  ;;  %v8298_v55 = vadd.f32 %v2014_v58, %v8222_v17  ;;  %v2016_v59 = vpop.f32.mrb[57].mxu0  ;;  %6913 = vmatprep.subr.msk.bf16.mxu0 %vm377_vm1, %v4884_v57 }
 0x1e1   : > { %6246 = vrot.lane.b32.xlu0 %v7172_v13, %s7087_s13  ;;  %6911 = vmatmul.mubr.msk.bf16.vlgmr.msra.gmra.mrb[156].mxu1 %vm373_vm2, %v6903_v34  ;;  %v8303_v60 = vadd.f32 %v2016_v59, %v8228_v19  ;;  %v6912_v13 = vld [vmem:[%s8617_s0 + $0x28] sm:$0x3]  ;;  %v2018_v63 = vpop.f32.mrb[58].mxu0  ;;  %v4901_v3 = vsel %vm377_vm1, %v4885_v10, 0 }
 0x1e2   : > { %4919 = vmatpush1.bf16.msra.mxu0 %v4895_v9  ;;  %v4873_v12 = vpop.permute.xlu1 %4872  ;;  %4991 = vmatprep.mubr.bf16.mxu1 %v7062_v1  ;;  %v2019_v2 = vpop.f32.mrb[59].mxu0 }
 0x1e3   : > { %v4875_v61 = vpop.permute.xlu0 %4874  ;;  %v4886_v62 = vsel %vm4882_vm7, %v4871_v53, %v4873_v12 }
 0x1e4   : > { %v2055_v11 = vpop.f32.mrb[56].mxu1  ;;  %6248 = vrot.lane.b32.xlu1 %v8084_v39, %s7087_s13  ;;  %6915 = vmatprep.subr.msk.bf16.mxu1 %vm377_vm1, %v4886_v62  ;;  %v4887_v14 = vsel %vm4882_vm7, %v4873_v12, %v4875_v61 }
 0x1e5   : > { %v2146_v16 = vadd.f32 %v2055_v11, %v8239_v28  ;;  %v2057_v15 = vpop.f32.mrb[57].mxu1  ;;  %4960 = vmatpush1.bf16.msra.mxu1 %v4901_v3  ;;  %v4907_v21 = vsel %vm377_vm1, %v4887_v14, 0 }
 0x1e6   : > { %6914 = vmatmul.mubr.msk.bf16.vlgmr.msra.gmra.mrb[160].mxu0 %vm373_vm2, %v6912_v13  ;;  %v2147_v17 = vadd.f32 %v2057_v15, %v8245_v30  ;;  %v4877_v18 = vpop.permute.xlu1 %4876  ;;  %v2059_v39 = vpop.f32.mrb[58].mxu1 }
 0x1e7   : > { %v4879_v19 = vpop.permute.xlu0 %4878  ;;  %5032 = vmatprep.mubr.bf16.mxu0 %v7062_v1  ;;  %v4888_v20 = vsel %vm4882_vm7, %v4875_v61, %v4877_v18  ;;  %v2060_v23 = vpop.f32.mrb[59].mxu1 }
 0x1e8   : > { %v2096_v22 = vpop.f32.mrb[60].mxu0  ;;  %6917 = vmatprep.subr.msk.bf16.mxu0 %vm377_vm1, %v4888_v20  ;;  %v4889_v24 = vsel %vm4882_vm7, %v4877_v18, %v4879_v19 }
 0x1e9   : > { %v2148_v26 = vadd.f32 %v2096_v22, %v8259_v40  ;;  %v2098_v27 = vpop.f32.mrb[61].mxu0  ;;  %6916 = vmatmul.mubr.msk.bf16.vlgmr.msra.gmra.mrb[160].mxu1 %vm373_vm2, %v6912_v13  ;;  %5001 = vmatpush1.bf16.msra.mxu0 %v4907_v21  ;;  %v4913_v0 = vsel %vm377_vm1, %v4889_v24, 0 }
 0x1ea   : > { %v2149_v25 = vadd.f32 %v2098_v27, %v8264_v44  ;;  %v4881_v28 = vpop.permute.xlu1 %4880  ;;  %5073 = vmatprep.mubr.bf16.mxu1 %v7062_v1  ;;  %v2100_v32 = vpop.f32.mrb[62].mxu0 }
 0x1eb   : > { %v5093_v29 = vpop.permute.xlu0 %5092  ;;  %v4890_v30 = vsel %vm4882_vm7, %v4879_v19, %v4881_v28  ;;  %v2101_v31 = vpop.f32.mrb[63].mxu0 }
 0x1ec   : > { %v2137_v34 = vpop.f32.mrb[60].mxu1  ;;  %6919 = vmatprep.subr.msk.bf16.mxu1 %vm377_vm1, %v4890_v30 }
 0x1ed   : > { %v2150_v35 = vadd.f32 %v2137_v34, %v8275_v49  ;;  %v2139_v33 = vpop.f32.mrb[61].mxu1  ;;  %5042 = vmatpush1.bf16.msra.mxu1 %v4913_v0  ;;  %v6921_v49 = vld [vmem:[%s8617_s0 + $0x2a] sm:$0x3]  ;;  %v6930_v34 = vld [vmem:[%s8617_s0 + $0x2c] sm:$0x3] }
 0x1ee   : > { %6918 = vmatmul.mubr.msk.bf16.vlgmr.msra.gmra.mrb[164].mxu0 %vm373_vm2, %v6912_v13  ;;  %v2151_v36 = vadd.f32 %v2139_v33, %v8280_v51  ;;  %v5095_v37 = vpop.permute.xlu1 %5094  ;;  %v2141_v44 = vpop.f32.mrb[62].mxu1 }
 0x1ef   : > { %v5097_v38 = vpop.permute.xlu0 %5096  ;;  %5178 = vmatprep.mubr.bf16.mxu0 %v7062_v1  ;;  %v5111_v40 = vsel %vm5110_vm8, %v5093_v29, %v5095_v37  ;;  %v2142_v5 = vpop.f32.mrb[63].mxu1 }
 0x1f0   : > { %v5112_v41 = vsel %vm5110_vm8, %v5095_v37, %v5097_v38  ;;  %v5123_v45 = vsel %vm377_vm1, %v5111_v40, 0 }
 0x1f1   : > { %v2242_v42 = vpop.f32.mrb[64].mxu0  ;;  %6922 = vmatprep.subr.msk.bf16.mxu0 %vm377_vm1, %v5112_v41  ;;  %6920 = vmatmul.mubr.msk.bf16.vlgmr.msra.gmra.mrb[164].mxu1 %vm373_vm2, %v6912_v13 }
 0x1f2   : > { %v8339_v4 = vadd.f32 %v2242_v42, %v8298_v55  ;;  %v2244_v43 = vpop.f32.mrb[65].mxu0  ;;  %5147 = vmatpush1.bf16.msra.mxu0 %v5123_v45  ;;  %v5099_v46 = vpop.permute.xlu1 %5098  ;;  %5219 = vmatprep.mubr.bf16.mxu1 %v7062_v1 }
 0x1f3   : > { %v8343_v47 = vadd.f32 %v2244_v43, %v8303_v60  ;;  %v5101_v48 = vpop.permute.xlu0 %5100  ;;  %v5113_v50 = vsel %vm5110_vm8, %v5097_v38, %v5099_v46  ;;  %v2246_v52 = vpop.f32.mrb[66].mxu0 }
 0x1f4   : > { %v5114_v51 = vsel %vm5110_vm8, %v5099_v46, %v5101_v48  ;;  %v5129_v54 = vsel %vm377_vm1, %v5113_v50, 0  ;;  %v2283_v6 = vpop.f32.mrb[64].mxu1  ;;  %v2247_v7 = vpop.f32.mrb[67].mxu0 }
 0x1f5   : > { %6924 = vmatprep.subr.msk.bf16.mxu1 %vm377_vm1, %v5114_v51  ;;  %v8353_v8 = vadd.f32 %v2283_v6, %v2146_v16  ;;  %v2285_v56 = vpop.f32.mrb[65].mxu1 }
 0x1f6   : > { %6923 = vmatmul.mubr.msk.bf16.vlgmr.msra.gmra.mrb[168].mxu0 %vm373_vm2, %v6921_v49  ;;  %5188 = vmatpush1.bf16.msra.mxu1 %v5129_v54  ;;  %v8356_v53 = vadd.f32 %v2285_v56, %v2147_v17  ;;  %v5103_v57 = vpop.permute.xlu1 %5102  ;;  %v2287_v55 = vpop.f32.mrb[66].mxu1 }
 0x1f7   : > { %v5105_v58 = vpop.permute.xlu0 %5104  ;;  %5260 = vmatprep.mubr.bf16.mxu0 %v7062_v1  ;;  %v5115_v9 = vsel %vm5110_vm8, %v5101_v48, %v5103_v57  ;;  %v2288_v12 = vpop.f32.mrb[67].mxu1 }
 0x1f8   : > { %v5116_v10 = vsel %vm5110_vm8, %v5103_v57, %v5105_v58  ;;  %v5135_v59 = vsel %vm377_vm1, %v5115_v9, 0 }
 0x1f9   : > { %v2324_v60 = vpop.f32.mrb[68].mxu0  ;;  %6926 = vmatprep.subr.msk.bf16.mxu0 %vm377_vm1, %v5116_v10  ;;  %6925 = vmatmul.mubr.msk.bf16.vlgmr.msra.gmra.mrb[168].mxu1 %vm373_vm2, %v6921_v49 }
 0x1fa   : > { %v8363_v61 = vadd.f32 %v2324_v60, %v2148_v26  ;;  %v2326_v13 = vpop.f32.mrb[69].mxu0  ;;  %5229 = vmatpush1.bf16.msra.mxu0 %v5135_v59  ;;  %v5107_v63 = vpop.permute.xlu1 %5106  ;;  %5301 = vmatprep.mubr.bf16.mxu1 %v7062_v1 }
 0x1fb   : > { %v8366_v62 = vadd.f32 %v2326_v13, %v2149_v25  ;;  %v5109_v3 = vpop.permute.xlu0 %5108  ;;  %v5117_v11 = vsel %vm5110_vm8, %v5105_v58, %v5107_v63  ;;  %v2328_v14 = vpop.f32.mrb[70].mxu0 }
 0x1fc   : > { %v5118_v2 = vsel %vm5110_vm8, %v5107_v63, %v5109_v3  ;;  %v5141_v16 = vsel %vm377_vm1, %v5117_v11, 0  ;;  %v2365_v15 = vpop.f32.mrb[68].mxu1  ;;  %v2329_v17 = vpop.f32.mrb[71].mxu0 }
 0x1fd   : > { %6928 = vmatprep.subr.msk.bf16.mxu1 %vm377_vm1, %v5118_v2  ;;  %v8373_v18 = vadd.f32 %v2365_v15, %v2150_v35  ;;  %v2367_v19 = vpop.f32.mrb[69].mxu1 }
 0x1fe   : > { %6927 = vmatmul.mubr.msk.bf16.vlgmr.msra.gmra.mrb[172].mxu0 %vm373_vm2, %v6921_v49  ;;  %5270 = vmatpush1.bf16.msra.mxu1 %v5141_v16  ;;  %v8376_v20 = vadd.f32 %v2367_v19, %v2151_v36  ;;  %v5321_v39 = vpop.permute.xlu1 %5320  ;;  %v2369_v22 = vpop.f32.mrb[70].mxu1  ;;  %v6939_v16 = vld [vmem:[%s8617_s0 + $0x2e] sm:$0x3] }
 0x1ff   : > { %v5323_v21 = vpop.permute.xlu0 %5322  ;;  %5406 = vmatprep.mubr.bf16.mxu0 %v7062_v1  ;;  %v2370_v23 = vpop.f32.mrb[71].mxu1 }
 0x200   : > { %v5339_v24 = vsel %vm5338_vm9, %v5321_v39, %v5323_v21 }
 0x201   : > { %6929 = vmatmul.mubr.msk.bf16.vlgmr.msra.gmra.mrb[172].mxu1 %vm373_vm2, %v6921_v49  ;;  %v5351_v28 = vsel %vm377_vm1, %v5339_v24, 0 }
 0x202   : > { %v5325_v26 = vpop.permute.xlu1 %5324  ;;  %5447 = vmatprep.mubr.bf16.mxu1 %v7062_v1 }
 0x203   : > { %v5327_v27 = vpop.permute.xlu0 %5326  ;;  %v5340_v25 = vsel %vm5338_vm9, %v5323_v21, %v5325_v26  ;;  %v2470_v29 = vpop.f32.mrb[72].mxu0 }
 0x204   : > { %6931 = vmatprep.subr.msk.bf16.mxu0 %vm377_vm1, %v5340_v25  ;;  %v5341_v30 = vsel %vm5338_vm9, %v5325_v26, %v5327_v27  ;;  %v2600_v32 = vadd.f32 %v2470_v29, %v8339_v4  ;;  %v2472_v0 = vpop.f32.mrb[73].mxu0 }
 0x205   : > { %5375 = vmatpush1.bf16.msra.mxu0 %v5351_v28  ;;  %v2601_v31 = vadd.f32 %v2472_v0, %v8343_v47  ;;  %v2474_v37 = vpop.f32.mrb[74].mxu0  ;;  %v5357_v38 = vsel %vm377_vm1, %v5341_v30, 0 }
 0x206   : > { %v5329_v35 = vpop.permute.xlu1 %5328  ;;  %v2475_v41 = vpop.f32.mrb[75].mxu0 }
 0x207   : > { %v5331_v33 = vpop.permute.xlu0 %5330  ;;  %v5342_v36 = vsel %vm5338_vm9, %v5327_v27, %v5329_v35 }
 0x208   : > { %v2511_v40 = vpop.f32.mrb[72].mxu1  ;;  %6932 = vmatmul.mubr.msk.bf16.vlgmr.msra.gmra.mrb[176].mxu0 %vm373_vm2, %v6930_v34  ;;  %6933 = vmatprep.subr.msk.bf16.mxu1 %vm377_vm1, %v5342_v36  ;;  %v5343_v44 = vsel %vm5338_vm9, %v5329_v35, %v5331_v33 }
 0x209   : > { %v2602_v45 = vadd.f32 %v2511_v40, %v8353_v8  ;;  %v2513_v42 = vpop.f32.mrb[73].mxu1  ;;  %5416 = vmatpush1.bf16.msra.mxu1 %v5357_v38  ;;  %5488 = vmatprep.mubr.bf16.mxu0 %v7062_v1  ;;  %v5363_v48 = vsel %vm377_vm1, %v5343_v44, 0 }
 0x20a   : > { %v2603_v5 = vadd.f32 %v2513_v42, %v8356_v53  ;;  %v5333_v4 = vpop.permute.xlu1 %5332  ;;  %v2515_v46 = vpop.f32.mrb[74].mxu1 }
 0x20b   : > { %v5335_v43 = vpop.permute.xlu0 %5334  ;;  %v5344_v47 = vsel %vm5338_vm9, %v5331_v33, %v5333_v4  ;;  %v2516_v50 = vpop.f32.mrb[75].mxu1 }
 0x20c   : > { %v2552_v49 = vpop.f32.mrb[76].mxu0  ;;  %6934 = vmatmul.mubr.msk.bf16.vlgmr.msra.gmra.mrb[176].mxu1 %vm373_vm2, %v6930_v34  ;;  %6935 = vmatprep.subr.msk.bf16.mxu0 %vm377_vm1, %v5344_v47  ;;  %v5345_v51 = vsel %vm5338_vm9, %v5333_v4, %v5335_v43 }
 0x20d   : > { %v2604_v52 = vadd.f32 %v2552_v49, %v8363_v61  ;;  %v2554_v54 = vpop.f32.mrb[77].mxu0  ;;  %5457 = vmatpush1.bf16.msra.mxu0 %v5363_v48  ;;  %5529 = vmatprep.mubr.bf16.mxu1 %v7062_v1  ;;  %v5369_v57 = vsel %vm377_vm1, %v5345_v51, 0 }
 0x20e   : > { %v2605_v6 = vadd.f32 %v2554_v54, %v8366_v62  ;;  %v5337_v7 = vpop.permute.xlu1 %5336  ;;  %v2556_v53 = vpop.f32.mrb[78].mxu0 }
 0x20f   : > { %v5549_v8 = vpop.permute.xlu0 %5548  ;;  %v5346_v56 = vsel %vm5338_vm9, %v5335_v43, %v5337_v7  ;;  %v2557_v9 = vpop.f32.mrb[79].mxu0 }
 0x210   : > { %v2593_v58 = vpop.f32.mrb[76].mxu1  ;;  %6936 = vmatmul.mubr.msk.bf16.vlgmr.msra.gmra.mrb[180].mxu0 %vm373_vm2, %v6930_v34  ;;  %6937 = vmatprep.subr.msk.bf16.mxu1 %vm377_vm1, %v5346_v56  ;;  %v6948_v9 = vld [vmem:[%s8617_s0 + $0x30] sm:$0x3] }
 0x211   : > { %v2606_v10 = vadd.f32 %v2593_v58, %v8373_v18  ;;  %v2595_v55 = vpop.f32.mrb[77].mxu1  ;;  %5498 = vmatpush1.bf16.msra.mxu1 %v5369_v57  ;;  %5634 = vmatprep.mubr.bf16.mxu0 %v7062_v1 }
 0x212   : > { %v2607_v59 = vadd.f32 %v2595_v55, %v8376_v20  ;;  %v5551_v60 = vpop.permute.xlu1 %5550  ;;  %v2597_v62 = vpop.f32.mrb[78].mxu1 }
 0x213   : > { %v5553_v12 = vpop.permute.xlu0 %5552  ;;  %v5567_v61 = vsel %vm5566_vm10, %v5549_v8, %v5551_v60  ;;  %v2598_v11 = vpop.f32.mrb[79].mxu1 }
 0x214   : > { %v5568_v13 = vsel %vm5566_vm10, %v5551_v60, %v5553_v12  ;;  %v5579_v63 = vsel %vm377_vm1, %v5567_v61, 0  ;;  %6938 = vmatmul.mubr.msk.bf16.vlgmr.msra.gmra.mrb[180].mxu1 %vm373_vm2, %v6930_v34 }
 0x215   : > { %v2698_v3 = vpop.f32.mrb[80].mxu0  ;;  %6940 = vmatprep.subr.msk.bf16.mxu0 %vm377_vm1, %v5568_v13  ;;  %5675 = vmatprep.mubr.bf16.mxu1 %v7062_v1 }
 0x216   : > { %v8419_v2 = vadd.f32 %v2698_v3, %v2600_v32  ;;  %v2700_v14 = vpop.f32.mrb[81].mxu0  ;;  %5603 = vmatpush1.bf16.msra.mxu0 %v5579_v63  ;;  %v5555_v17 = vpop.permute.xlu1 %5554 }
 0x217   : > { %v8425_v15 = vadd.f32 %v2700_v14, %v2601_v31  ;;  %v5557_v18 = vpop.permute.xlu0 %5556  ;;  %v5569_v19 = vsel %vm5566_vm10, %v5553_v12, %v5555_v17  ;;  %v2702_v39 = vpop.f32.mrb[82].mxu0 }
 0x218   : > { %v5570_v20 = vsel %vm5566_vm10, %v5555_v17, %v5557_v18  ;;  %v5585_v21 = vsel %vm377_vm1, %v5569_v19, 0  ;;  %v2739_v22 = vpop.f32.mrb[80].mxu1  ;;  %v2703_v23 = vpop.f32.mrb[83].mxu0 }
 0x219   : > { %6941 = vmatmul.mubr.msk.bf16.vlgmr.msra.gmra.mrb[184].mxu0 %vm373_vm2, %v6939_v16  ;;  %6942 = vmatprep.subr.msk.bf16.mxu1 %vm377_vm1, %v5570_v20  ;;  %v8432_v24 = vadd.f32 %v2739_v22, %v2602_v45  ;;  %v2741_v26 = vpop.f32.mrb[81].mxu1 }
 0x21a   : > { %5644 = vmatpush1.bf16.msra.mxu1 %v5585_v21  ;;  %5716 = vmatprep.mubr.bf16.mxu0 %v7062_v1  ;;  %v8435_v27 = vadd.f32 %v2741_v26, %v2603_v5  ;;  %v5559_v25 = vpop.permute.xlu1 %5558  ;;  %v2743_v32 = vpop.f32.mrb[82].mxu1 }
 0x21b   : > { %v5561_v28 = vpop.permute.xlu0 %5560  ;;  %v5571_v29 = vsel %vm5566_vm10, %v5557_v18, %v5559_v25  ;;  %v2744_v31 = vpop.f32.mrb[83].mxu1 }
 0x21c   : > { %v5572_v30 = vsel %vm5566_vm10, %v5559_v25, %v5561_v28  ;;  %v5591_v0 = vsel %vm377_vm1, %v5571_v29, 0 }
 0x21d   : > { %v2780_v34 = vpop.f32.mrb[84].mxu0  ;;  %6943 = vmatmul.mubr.msk.bf16.vlgmr.msra.gmra.mrb[184].mxu1 %vm373_vm2, %v6939_v16  ;;  %6944 = vmatprep.subr.msk.bf16.mxu0 %vm377_vm1, %v5572_v30 }
 0x21e   : > { %v8442_v35 = vadd.f32 %v2780_v34, %v2604_v52  ;;  %v2782_v33 = vpop.f32.mrb[85].mxu0  ;;  %5685 = vmatpush1.bf16.msra.mxu0 %v5591_v0  ;;  %5757 = vmatprep.mubr.bf16.mxu1 %v7062_v1  ;;  %v5563_v37 = vpop.permute.xlu1 %5562 }
 0x21f   : > { %v8445_v36 = vadd.f32 %v2782_v33, %v2605_v6  ;;  %v5565_v38 = vpop.permute.xlu0 %5564  ;;  %v5573_v40 = vsel %vm5566_vm10, %v5561_v28, %v5563_v37  ;;  %v2784_v44 = vpop.f32.mrb[86].mxu0  ;;  %v6458_v6 = vld [vmem:[%s8618_s1] sm:$0xf] }
 0x220   : > { %v5574_v41 = vsel %vm5566_vm10, %v5563_v37, %v5565_v38  ;;  %v5597_v45 = vsel %vm377_vm1, %v5573_v40, 0  ;;  %v2821_v42 = vpop.f32.mrb[84].mxu1  ;;  %v2785_v5 = vpop.f32.mrb[87].mxu0  ;;  %6461 = vperm.xlu0 %7027, %v6458_v6  }
 0x221   : > { %6945 = vmatmul.mubr.msk.bf16.vlgmr.msra.gmra.mrb[188].mxu0 %vm373_vm2, %v6939_v16  ;;  %6946 = vmatprep.subr.msk.bf16.mxu1 %vm377_vm1, %v5574_v41  ;;  %v8452_v4 = vadd.f32 %v2821_v42, %v2606_v10  ;;  %v2823_v43 = vpop.f32.mrb[85].mxu1  ;;  %v6957_v42 = vld [vmem:[%s8617_s0 + $0x32] sm:$0x3] }
 0x222   : > { %5726 = vmatpush1.bf16.msra.mxu1 %v5597_v45  ;;  %5862 = vmatprep.mubr.bf16.mxu0 %v7062_v1  ;;  %v8455_v47 = vadd.f32 %v2823_v43, %v2607_v59  ;;  %v5777_v46 = vpop.permute.xlu1 %5776  ;;  %v2825_v49 = vpop.f32.mrb[86].mxu1 }
 0x223   : > { %v5779_v48 = vpop.permute.xlu0 %5778  ;;  %v2826_v50 = vpop.f32.mrb[87].mxu1 }
 0x224   : > { %v5795_v51 = vsel %vm5794_vm11, %v5777_v46, %v5779_v48 }
 0x225   : > { %6947 = vmatmul.mubr.msk.bf16.vlgmr.msra.gmra.mrb[188].mxu1 %vm373_vm2, %v6939_v16  ;;  %v5807_v8 = vsel %vm377_vm1, %v5795_v51, 0 }
 0x226   : > { %5903 = vmatprep.mubr.bf16.mxu1 %v7062_v1  ;;  %v5781_v52 = vpop.permute.xlu1 %5780 }
 0x227   : > { %v5783_v54 = vpop.permute.xlu0 %5782  ;;  %v5796_v7 = vsel %vm5794_vm11, %v5779_v48, %v5781_v52  ;;  %v2926_v56 = vpop.f32.mrb[88].mxu0 }
 0x228   : > { %6949 = vmatprep.subr.msk.bf16.mxu0 %vm377_vm1, %v5796_v7  ;;  %v5797_v53 = vsel %vm5794_vm11, %v5781_v52, %v5783_v54  ;;  %v3056_v57 = vadd.f32 %v2926_v56, %v8419_v2  ;;  %v2928_v58 = vpop.f32.mrb[89].mxu0 }
 0x229   : > { %5831 = vmatpush1.bf16.msra.mxu0 %v5807_v8  ;;  %v3057_v10 = vadd.f32 %v2928_v58, %v8425_v15  ;;  %v2930_v12 = vpop.f32.mrb[90].mxu0  ;;  %v5813_v61 = vsel %vm377_vm1, %v5797_v53, 0 }
 0x22a   : > { %v5785_v55 = vpop.permute.xlu1 %5784  ;;  %v2931_v62 = vpop.f32.mrb[91].mxu0 }
 0x22b   : > { %v5787_v59 = vpop.permute.xlu0 %5786  ;;  %v5798_v60 = vsel %vm5794_vm11, %v5783_v54, %v5785_v55 }
 0x22c   : > { %v2967_v13 = vpop.f32.mrb[88].mxu1  ;;  %6950 = vmatmul.mubr.msk.bf16.vlgmr.msra.gmra.mrb[192].mxu0 %vm373_vm2, %v6948_v9  ;;  %6951 = vmatprep.subr.msk.bf16.mxu1 %vm377_vm1, %v5798_v60  ;;  %v5799_v63 = vsel %vm5794_vm11, %v5785_v55, %v5787_v59 }
 0x22d   : > { %v3058_v3 = vadd.f32 %v2967_v13, %v8432_v24  ;;  %v2969_v11 = vpop.f32.mrb[89].mxu1  ;;  %5872 = vmatpush1.bf16.msra.mxu1 %v5813_v61  ;;  %5944 = vmatprep.mubr.bf16.mxu0 %v7062_v1  ;;  %v5819_v18 = vsel %vm377_vm1, %v5799_v63, 0 }
 0x22e   : > { %v3059_v2 = vadd.f32 %v2969_v11, %v8435_v27  ;;  %v5789_v14 = vpop.permute.xlu1 %5788  ;;  %v2971_v17 = vpop.f32.mrb[90].mxu1 }
 0x22f   : > { %v5791_v16 = vpop.permute.xlu0 %5790  ;;  %v5800_v15 = vsel %vm5794_vm11, %v5787_v59, %v5789_v14  ;;  %v2972_v20 = vpop.f32.mrb[91].mxu1 }
 0x230   : > { %v3008_v19 = vpop.f32.mrb[92].mxu0  ;;  %6952 = vmatmul.mubr.msk.bf16.vlgmr.msra.gmra.mrb[192].mxu1 %vm373_vm2, %v6948_v9  ;;  %6953 = vmatprep.subr.msk.bf16.mxu0 %vm377_vm1, %v5800_v15  ;;  %v5801_v39 = vsel %vm5794_vm11, %v5789_v14, %v5791_v16 }
 0x231   : > { %v3060_v21 = vadd.f32 %v3008_v19, %v8442_v35  ;;  %v3010_v22 = vpop.f32.mrb[93].mxu0  ;;  %5913 = vmatpush1.bf16.msra.mxu0 %v5819_v18  ;;  %5985 = vmatprep.mubr.bf16.mxu1 %v7062_v1  ;;  %v5825_v28 = vsel %vm377_vm1, %v5801_v39, 0 }
 0x232   : > { %v3061_v23 = vadd.f32 %v3010_v22, %v8445_v36  ;;  %v5793_v24 = vpop.permute.xlu1 %5792  ;;  %v3012_v25 = vpop.f32.mrb[94].mxu0 }
 0x233   : > { %v6005_v26 = vpop.permute.xlu0 %6004  ;;  %v5802_v27 = vsel %vm5794_vm11, %v5791_v16, %v5793_v24  ;;  %v3013_v30 = vpop.f32.mrb[95].mxu0 }
 0x234   : > { %v3049_v29 = vpop.f32.mrb[92].mxu1  ;;  %6954 = vmatmul.mubr.msk.bf16.vlgmr.msra.gmra.mrb[196].mxu0 %vm373_vm2, %v6948_v9  ;;  %6955 = vmatprep.subr.msk.bf16.mxu1 %vm377_vm1, %v5802_v27 }
 0x235   : > { %v3062_v32 = vadd.f32 %v3049_v29, %v8452_v4  ;;  %v3051_v0 = vpop.f32.mrb[93].mxu1  ;;  %5954 = vmatpush1.bf16.msra.mxu1 %v5825_v28  ;;  %6090 = vmatprep.mubr.bf16.mxu0 %v7062_v1 }
 0x236   : > { %v3063_v34 = vadd.f32 %v3051_v0, %v8455_v47  ;;  %v6007_v31 = vpop.permute.xlu1 %6006  ;;  %v3053_v37 = vpop.f32.mrb[94].mxu1 }
 0x237   : > { %v6009_v35 = vpop.permute.xlu0 %6008  ;;  %v6023_v33 = vsel %vm6022_vm12, %v6005_v26, %v6007_v31  ;;  %v3054_v41 = vpop.f32.mrb[95].mxu1 }
 0x238   : > { %v6024_v36 = vsel %vm6022_vm12, %v6007_v31, %v6009_v35  ;;  %v6035_v38 = vsel %vm377_vm1, %v6023_v33, 0  ;;  %6956 = vmatmul.mubr.msk.bf16.vlgmr.msra.gmra.mrb[196].mxu1 %vm373_vm2, %v6948_v9 }
 0x239   : > { %v3154_v40 = vpop.f32.mrb[96].mxu0  ;;  %6958 = vmatprep.subr.msk.bf16.mxu0 %vm377_vm1, %v6024_v36  ;;  %6131 = vmatprep.mubr.bf16.mxu1 %v7062_v1 }
 0x23a   : > { %v3284_v44 = vadd.f32 %v3154_v40, %v3056_v57  ;;  %v3156_v45 = vpop.f32.mrb[97].mxu0  ;;  %6059 = vmatpush1.bf16.msra.mxu0 %v6035_v38  ;;  %v6011_v4 = vpop.permute.xlu1 %6010 }
 0x23b   : > { %v3285_v5 = vadd.f32 %v3156_v45, %v3057_v10  ;;  %v6013_v43 = vpop.permute.xlu0 %6012  ;;  %v6025_v47 = vsel %vm6022_vm12, %v6009_v35, %v6011_v4  ;;  %v3158_v48 = vpop.f32.mrb[98].mxu0  ;;  %v6966_v35 = vld [vmem:[%s8617_s0 + $0x34] sm:$0x3] }
 0x23c   : > { %v6026_v46 = vsel %vm6022_vm12, %v6011_v4, %v6013_v43  ;;  %v6041_v49 = vsel %vm377_vm1, %v6025_v47, 0  ;;  %v3195_v50 = vpop.f32.mrb[96].mxu1  ;;  %v3159_v51 = vpop.f32.mrb[99].mxu0 }
 0x23d   : > { %6959 = vmatmul.mubr.msk.bf16.vlgmr.msra.gmra.mrb[200].mxu0 %vm373_vm2, %v6957_v42  ;;  %6960 = vmatprep.subr.msk.bf16.mxu1 %vm377_vm1, %v6026_v46  ;;  %v3286_v52 = vadd.f32 %v3195_v50, %v3058_v3  ;;  %v3197_v54 = vpop.f32.mrb[97].mxu1 }
 0x23e   : > { %6100 = vmatpush1.bf16.msra.mxu1 %v6041_v49  ;;  %6172 = vmatprep.mubr.bf16.mxu0 %v7062_v1  ;;  %v3287_v6 = vadd.f32 %v3197_v54, %v3059_v2  ;;  %v6015_v7 = vpop.permute.xlu1 %6014  ;;  %v3199_v57 = vpop.f32.mrb[98].mxu1 }
 0x23f   : > { %v6017_v8 = vpop.permute.xlu0 %6016  ;;  %v6027_v56 = vsel %vm6022_vm12, %v6013_v43, %v6015_v7  ;;  %v3200_v10 = vpop.f32.mrb[99].mxu1 }
 0x240   : > { %v6028_v53 = vsel %vm6022_vm12, %v6015_v7, %v6017_v8  ;;  %v6047_v58 = vsel %vm377_vm1, %v6027_v56, 0 }
 0x241   : > { %v3236_v9 = vpop.f32.mrb[100].mxu0  ;;  %6961 = vmatmul.mubr.msk.bf16.vlgmr.msra.gmra.mrb[200].mxu1 %vm373_vm2, %v6957_v42  ;;  %6962 = vmatprep.subr.msk.bf16.mxu0 %vm377_vm1, %v6028_v53 }
 0x242   : > { %v3288_v55 = vadd.f32 %v3236_v9, %v3060_v21  ;;  %v3238_v59 = vpop.f32.mrb[101].mxu0  ;;  %6141 = vmatpush1.bf16.msra.mxu0 %v6047_v58  ;;  %6213 = vmatprep.mubr.bf16.mxu1 %v7062_v1  ;;  %v6019_v12 = vpop.permute.xlu1 %6018 }
 0x243   : > { %v3289_v60 = vadd.f32 %v3238_v59, %v3061_v23  ;;  %v6021_v61 = vpop.permute.xlu0 %6020  ;;  %v6029_v13 = vsel %vm6022_vm12, %v6017_v8, %v6019_v12  ;;  %v3240_v63 = vpop.f32.mrb[102].mxu0 }
 0x244   : > { %v6030_v62 = vsel %vm6022_vm12, %v6019_v12, %v6021_v61  ;;  %v6053_v3 = vsel %vm377_vm1, %v6029_v13, 0  ;;  %v3277_v11 = vpop.f32.mrb[100].mxu1  ;;  %v3241_v2 = vpop.f32.mrb[103].mxu0 }
 0x245   : > { %6963 = vmatmul.mubr.msk.bf16.vlgmr.msra.gmra.mrb[204].mxu0 %vm373_vm2, %v6957_v42  ;;  %6964 = vmatprep.subr.msk.bf16.mxu1 %vm377_vm1, %v6030_v62  ;;  %v3290_v14 = vadd.f32 %v3277_v11, %v3062_v32  ;;  %v3279_v16 = vpop.f32.mrb[101].mxu1 }
 0x246   : > { %6182 = vmatpush1.bf16.msra.mxu1 %v6053_v3  ;;  %6318 = vmatprep.mubr.bf16.mxu0 %v7062_v1  ;;  %v3291_v15 = vadd.f32 %v3279_v16, %v3063_v34  ;;  %v6233_v17 = vpop.permute.xlu1 %6232  ;;  %v3281_v19 = vpop.f32.mrb[102].mxu1 }
 0x247   : > { %v6235_v18 = vpop.permute.xlu0 %6234  ;;  %v3282_v39 = vpop.f32.mrb[103].mxu1 }
 0x248   : > { %v6251_v21 = vsel %vm6250_vm13, %v6233_v17, %v6235_v18 }
 0x249   : > { %v3355_v20 = vpop.f32.mrb[104].mxu0  ;;  %6965 = vmatmul.mubr.msk.bf16.vlgmr.msra.gmra.mrb[204].mxu1 %vm373_vm2, %v6957_v42  ;;  %v6263_v29 = vsel %vm377_vm1, %v6251_v21, 0 }
 0x24a   : > { %v3485_v22 = vadd.f32 %v3355_v20, %v3284_v44  ;;  %v3357_v23 = vpop.f32.mrb[105].mxu0  ;;  %6359 = vmatprep.mubr.bf16.mxu1 %v7062_v1  ;;  %v6237_v26 = vpop.permute.xlu1 %6236 }
 0x24b   : > { %v3486_v24 = vadd.f32 %v3357_v23, %v3285_v5  ;;  %v6239_v27 = vpop.permute.xlu0 %6238  ;;  %v6252_v25 = vsel %vm6250_vm13, %v6235_v18, %v6237_v26  ;;  %v3359_v28 = vpop.f32.mrb[106].mxu0 }
 0x24c   : > { %v3396_v30 = vpop.f32.mrb[104].mxu1  ;;  %6967 = vmatprep.subr.msk.bf16.mxu0 %vm377_vm1, %v6252_v25  ;;  %v3360_v32 = vpop.f32.mrb[107].mxu0  ;;  %v6253_v0 = vsel %vm6250_vm13, %v6237_v26, %v6239_v27 }
 0x24d   : > { %v3487_v34 = vadd.f32 %v3396_v30, %v3286_v52  ;;  %v3398_v31 = vpop.f32.mrb[105].mxu1  ;;  %6287 = vmatpush1.bf16.msra.mxu0 %v6263_v29  ;;  %v6269_v41 = vsel %vm377_vm1, %v6253_v0, 0 }
 0x24e   : > { %v3488_v33 = vadd.f32 %v3398_v31, %v3287_v6  ;;  %v6241_v36 = vpop.permute.xlu1 %6240  ;;  %v3400_v40 = vpop.f32.mrb[106].mxu1 }
 0x24f   : > { %v6243_v37 = vpop.permute.xlu0 %6242  ;;  %v6254_v38 = vsel %vm6250_vm13, %v6239_v27, %v6241_v36  ;;  %v3401_v45 = vpop.f32.mrb[107].mxu1 }
 0x250   : > { %6968 = vmatmul.mubr.msk.bf16.vlgmr.msra.gmra.mrb[208].mxu0 %vm373_vm2, %v6966_v35  ;;  %6969 = vmatprep.subr.msk.bf16.mxu1 %vm377_vm1, %v6254_v38  ;;  %v6255_v42 = vsel %vm6250_vm13, %v6241_v36, %v6243_v37 }
 0x251   : > { %v3437_v44 = vpop.f32.mrb[108].mxu0  ;;  %6328 = vmatpush1.bf16.msra.mxu1 %v6269_v41  ;;  %6400 = vmatprep.mubr.bf16.mxu0 %v7062_v1  ;;  %v6275_v50 = vsel %vm377_vm1, %v6255_v42, 0 }
 0x252   : > { %v3489_v5 = vadd.f32 %v3437_v44, %v3288_v55  ;;  %v3439_v4 = vpop.f32.mrb[109].mxu0  ;;  %v6245_v47 = vpop.permute.xlu1 %6244 }
 0x253   : > { %v3490_v43 = vadd.f32 %v3439_v4, %v3289_v60  ;;  %v6247_v46 = vpop.permute.xlu0 %6246  ;;  %v6256_v48 = vsel %vm6250_vm13, %v6243_v37, %v6245_v47  ;;  %v3441_v49 = vpop.f32.mrb[110].mxu0 }
 0x254   : > { %v3478_v51 = vpop.f32.mrb[108].mxu1  ;;  %6970 = vmatmul.mubr.msk.bf16.vlgmr.msra.gmra.mrb[208].mxu1 %vm373_vm2, %v6966_v35  ;;  %6971 = vmatprep.subr.msk.bf16.mxu0 %vm377_vm1, %v6256_v48  ;;  %v3442_v52 = vpop.f32.mrb[111].mxu0  ;;  %v6257_v54 = vsel %vm6250_vm13, %v6245_v47, %v6247_v46 }
 0x255   : > { %v3491_v6 = vadd.f32 %v3478_v51, %v3290_v14  ;;  %v3480_v7 = vpop.f32.mrb[109].mxu1  ;;  %6369 = vmatpush1.bf16.msra.mxu0 %v6275_v50  ;;  %6441 = vmatprep.mubr.bf16.mxu1 %v7062_v1  ;;  %v6281_v9 = vsel %vm377_vm1, %v6257_v54, 0 }
 0x256   : > { %v3492_v8 = vadd.f32 %v3480_v7, %v3291_v15  ;;  %v6249_v56 = vpop.permute.xlu1 %6248  ;;  %v3482_v53 = vpop.f32.mrb[110].mxu1 }
 0x257   : > { %v6258_v57 = vsel %vm6250_vm13, %v6247_v46, %v6249_v56  ;;  %v3483_v58 = vpop.f32.mrb[111].mxu1 }
 0x258   : > { %6972 = vmatmul.mubr.msk.bf16.vlgmr.msra.gmra.mrb[212].mxu0 %vm373_vm2, %v6966_v35  ;;  %6973 = vmatprep.subr.msk.bf16.mxu1 %vm377_vm1, %v6258_v57 }
 0x259   : > { %v3584_v10 = vpop.f32.mrb[112].mxu0  ;;  %6410 = vmatpush1.bf16.msra.mxu1 %v6281_v9 }
 0x25a   : > { %v3714_v55 = vadd.f32 %v3584_v10, %v3485_v22  ;;  %v3586_v59 = vpop.f32.mrb[113].mxu0 }
 0x25b   : > { %v3715_v60 = vadd.f32 %v3586_v59, %v3486_v24  ;;  %v3588_v12 = vpop.f32.mrb[114].mxu0 }
 0x25c   : > { %v3589_v61 = vpop.f32.mrb[115].mxu0  ;;  %v3625_v1 = vpop.f32.mrb[112].mxu1  ;;  %6974 = vmatmul.mubr.msk.bf16.vlgmr.msra.gmra.mrb[212].mxu1 %vm373_vm2, %v6966_v35 }
 0x25d   : > { %v3716_v13 = vadd.f32 %v3625_v1, %v3487_v34  ;;  %v3627_v62 = vpop.f32.mrb[113].mxu1 }
 0x25e   : > { %v3717_v63 = vadd.f32 %v3627_v62, %v3488_v33  ;;  %v3629_v3 = vpop.f32.mrb[114].mxu1 }
 0x25f   : > { %v3630_v11 = vpop.f32.mrb[115].mxu1 }
 0x261   : > { %v3666_v2 = vpop.f32.mrb[116].mxu0 }
 0x262   : > { %v3718_v14 = vadd.f32 %v3666_v2, %v3489_v5  ;;  %v3668_v16 = vpop.f32.mrb[117].mxu0 }
 0x263   : > { %v3719_v15 = vadd.f32 %v3668_v16, %v3490_v43  ;;  %v3670_v17 = vpop.f32.mrb[118].mxu0 }
 0x264   : > { %v3671_v18 = vpop.f32.mrb[119].mxu0  ;;  %v3707_v19 = vpop.f32.mrb[116].mxu1 }
 0x265   : > { %v3720_v20 = vadd.f32 %v3707_v19, %v3491_v6  ;;  %v3709_v39 = vpop.f32.mrb[117].mxu1 }
 0x266   : > { %v3721_v21 = vadd.f32 %v3709_v39, %v3492_v8  ;;  %v3711_v22 = vpop.f32.mrb[118].mxu1 }
 0x267   : > { %v3712_v23 = vpop.f32.mrb[119].mxu1 }
 0x269   : > { %v3812_v24 = vpop.f32.mrb[120].mxu0 }
 0x26a   : > { %v3942_v26 = vadd.f32 %v3812_v24, %v3714_v55  ;;  %v3814_v27 = vpop.f32.mrb[121].mxu0 }
 0x26b   : > { %v3943_v25 = vadd.f32 %v3814_v27, %v3715_v60  ;;  %v3816_v28 = vpop.f32.mrb[122].mxu0 }
 0x26c   : > { %v3817_v29 = vpop.f32.mrb[123].mxu0  ;;  %v3853_v30 = vpop.f32.mrb[120].mxu1 }
 0x26d   : > { %v3944_v32 = vadd.f32 %v3853_v30, %v3716_v13  ;;  %v3855_v0 = vpop.f32.mrb[121].mxu1 }
 0x26e   : > { %v3945_v34 = vadd.f32 %v3855_v0, %v3717_v63  ;;  %v3857_v31 = vpop.f32.mrb[122].mxu1 }
 0x26f   : > { %v3858_v35 = vpop.f32.mrb[123].mxu1 }
 0x271   : > { %v3894_v33 = vpop.f32.mrb[124].mxu0 }
 0x272   : > { %v3946_v36 = vadd.f32 %v3894_v33, %v3718_v14  ;;  %v3896_v37 = vpop.f32.mrb[125].mxu0 }
 0x273   : > { %v3947_v38 = vadd.f32 %v3896_v37, %v3719_v15  ;;  %v3898_v40 = vpop.f32.mrb[126].mxu0 }
 0x274   : > { %v3899_v41 = vpop.f32.mrb[127].mxu0  ;;  %v3935_v44 = vpop.f32.mrb[124].mxu1 }
 0x275   : > { %v3948_v45 = vadd.f32 %v3935_v44, %v3720_v20  ;;  %v3937_v42 = vpop.f32.mrb[125].mxu1 }
 0x276   : > { %v3949_v5 = vadd.f32 %v3937_v42, %v3721_v21  ;;  %v3939_v4 = vpop.f32.mrb[126].mxu1 }
 0x277   : > { %v3940_v43 = vpop.f32.mrb[127].mxu1 }
 0x279   : > { %v4040_v47 = vpop.f32.mrb[128].mxu0 }
 0x27a   : > { %v4170_v46 = vadd.f32 %v4040_v47, %v3942_v26  ;;  %v4042_v48 = vpop.f32.mrb[129].mxu0 }
 0x27b   : > { %v4171_v49 = vadd.f32 %v4042_v48, %v3943_v25  ;;  %v4044_v50 = vpop.f32.mrb[130].mxu0 }
 0x27c   : > { %v4045_v51 = vpop.f32.mrb[131].mxu0  ;;  %v4081_v52 = vpop.f32.mrb[128].mxu1 }
 0x27d   : > { %v4172_v54 = vadd.f32 %v4081_v52, %v3944_v32  ;;  %v4083_v6 = vpop.f32.mrb[129].mxu1 }
 0x27e   : > { %v4173_v7 = vadd.f32 %v4083_v6, %v3945_v34  ;;  %v4085_v8 = vpop.f32.mrb[130].mxu1 }
 0x27f   : > { %v4086_v56 = vpop.f32.mrb[131].mxu1 }
 0x281   : > { %v4122_v53 = vpop.f32.mrb[132].mxu0 }
 0x282   : > { %v4174_v57 = vadd.f32 %v4122_v53, %v3946_v36  ;;  %v4124_v58 = vpop.f32.mrb[133].mxu0 }
 0x283   : > { %v4175_v9 = vadd.f32 %v4124_v58, %v3947_v38  ;;  %v4126_v10 = vpop.f32.mrb[134].mxu0 }
 0x284   : > { %v4127_v55 = vpop.f32.mrb[135].mxu0  ;;  %v4163_v59 = vpop.f32.mrb[132].mxu1 }
 0x285   : > { %v4176_v60 = vadd.f32 %v4163_v59, %v3948_v45  ;;  %v4165_v12 = vpop.f32.mrb[133].mxu1 }
 0x286   : > { %v4177_v61 = vadd.f32 %v4165_v12, %v3949_v5  ;;  %v4167_v1 = vpop.f32.mrb[134].mxu1 }
 0x287   : > { %v4168_v13 = vpop.f32.mrb[135].mxu1 }
 0x289   : > { %v4268_v62 = vpop.f32.mrb[136].mxu0 }
 0x28a   : > { %v4398_v63 = vadd.f32 %v4268_v62, %v4170_v46  ;;  %v4270_v3 = vpop.f32.mrb[137].mxu0 }
 0x28b   : > { %v4399_v11 = vadd.f32 %v4270_v3, %v4171_v49  ;;  %v4272_v2 = vpop.f32.mrb[138].mxu0 }
 0x28c   : > { %v4273_v14 = vpop.f32.mrb[139].mxu0  ;;  %v4309_v16 = vpop.f32.mrb[136].mxu1 }
 0x28d   : > { %v4400_v15 = vadd.f32 %v4309_v16, %v4172_v54  ;;  %v4311_v17 = vpop.f32.mrb[137].mxu1 }
 0x28e   : > { %v4401_v18 = vadd.f32 %v4311_v17, %v4173_v7  ;;  %v4313_v19 = vpop.f32.mrb[138].mxu1 }
 0x28f   : > { %v4314_v20 = vpop.f32.mrb[139].mxu1 }
 0x291   : > { %v4350_v39 = vpop.f32.mrb[140].mxu0 }
 0x292   : > { %v4402_v21 = vadd.f32 %v4350_v39, %v4174_v57  ;;  %v4352_v22 = vpop.f32.mrb[141].mxu0 }
 0x293   : > { %v4403_v23 = vadd.f32 %v4352_v22, %v4175_v9  ;;  %v4354_v24 = vpop.f32.mrb[142].mxu0 }
 0x294   : > { %v4355_v26 = vpop.f32.mrb[143].mxu0  ;;  %v4391_v27 = vpop.f32.mrb[140].mxu1 }
 0x295   : > { %v4404_v25 = vadd.f32 %v4391_v27, %v4176_v60  ;;  %v4393_v28 = vpop.f32.mrb[141].mxu1 }
 0x296   : > { %v4405_v29 = vadd.f32 %v4393_v28, %v4177_v61  ;;  %v4395_v30 = vpop.f32.mrb[142].mxu1 }
 0x297   : > { %v4396_v32 = vpop.f32.mrb[143].mxu1 }
 0x299   : > { %v4496_v0 = vpop.f32.mrb[144].mxu0 }
 0x29a   : > { %v4626_v34 = vadd.f32 %v4496_v0, %v4398_v63  ;;  %v4498_v31 = vpop.f32.mrb[145].mxu0 }
 0x29b   : > { %v4627_v35 = vadd.f32 %v4498_v31, %v4399_v11  ;;  %v4500_v33 = vpop.f32.mrb[146].mxu0 }
 0x29c   : > { %v4501_v36 = vpop.f32.mrb[147].mxu0  ;;  %v4537_v37 = vpop.f32.mrb[144].mxu1 }
 0x29d   : > { %v4628_v38 = vadd.f32 %v4537_v37, %v4400_v15  ;;  %v4539_v40 = vpop.f32.mrb[145].mxu1 }
 0x29e   : > { %v4629_v41 = vadd.f32 %v4539_v40, %v4401_v18  ;;  %v4541_v44 = vpop.f32.mrb[146].mxu1 }
 0x29f   : > { %v4542_v45 = vpop.f32.mrb[147].mxu1 }
 0x2a1   : > { %v4578_v42 = vpop.f32.mrb[148].mxu0 }
 0x2a2   : > { %v4630_v5 = vadd.f32 %v4578_v42, %v4402_v21  ;;  %v4580_v4 = vpop.f32.mrb[149].mxu0 }
 0x2a3   : > { %v4631_v43 = vadd.f32 %v4580_v4, %v4403_v23  ;;  %v4582_v47 = vpop.f32.mrb[150].mxu0 }
 0x2a4   : > { %v4583_v46 = vpop.f32.mrb[151].mxu0  ;;  %v4619_v48 = vpop.f32.mrb[148].mxu1 }
 0x2a5   : > { %v4632_v49 = vadd.f32 %v4619_v48, %v4404_v25  ;;  %v4621_v50 = vpop.f32.mrb[149].mxu1 }
 0x2a6   : > { %v4633_v51 = vadd.f32 %v4621_v50, %v4405_v29  ;;  %v4623_v52 = vpop.f32.mrb[150].mxu1 }
 0x2a7   : > { %v4624_v54 = vpop.f32.mrb[151].mxu1 }
 0x2a9   : > { %v4724_v6 = vpop.f32.mrb[152].mxu0 }
 0x2aa   : > { %v4854_v7 = vadd.f32 %v4724_v6, %v4626_v34  ;;  %v4726_v8 = vpop.f32.mrb[153].mxu0 }
 0x2ab   : > { %v4855_v56 = vadd.f32 %v4726_v8, %v4627_v35  ;;  %v4728_v53 = vpop.f32.mrb[154].mxu0 }
 0x2ac   : > { %v4729_v57 = vpop.f32.mrb[155].mxu0  ;;  %v4765_v58 = vpop.f32.mrb[152].mxu1 }
 0x2ad   : > { %v4856_v9 = vadd.f32 %v4765_v58, %v4628_v38  ;;  %v4767_v10 = vpop.f32.mrb[153].mxu1 }
 0x2ae   : > { %v4857_v55 = vadd.f32 %v4767_v10, %v4629_v41  ;;  %v4769_v59 = vpop.f32.mrb[154].mxu1 }
 0x2af   : > { %v4770_v60 = vpop.f32.mrb[155].mxu1 }
 0x2b1   : > { %v4806_v12 = vpop.f32.mrb[156].mxu0 }
 0x2b2   : > { %v4858_v61 = vadd.f32 %v4806_v12, %v4630_v5  ;;  %v4808_v1 = vpop.f32.mrb[157].mxu0 }
 0x2b3   : > { %v4859_v13 = vadd.f32 %v4808_v1, %v4631_v43  ;;  %v4810_v62 = vpop.f32.mrb[158].mxu0 }
 0x2b4   : > { %v4811_v63 = vpop.f32.mrb[159].mxu0  ;;  %v4847_v3 = vpop.f32.mrb[156].mxu1 }
 0x2b5   : > { %v4860_v11 = vadd.f32 %v4847_v3, %v4632_v49  ;;  %v4849_v2 = vpop.f32.mrb[157].mxu1 }
 0x2b6   : > { %v4861_v14 = vadd.f32 %v4849_v2, %v4633_v51  ;;  %v4851_v16 = vpop.f32.mrb[158].mxu1 }
 0x2b7   : > { %v4852_v15 = vpop.f32.mrb[159].mxu1 }
 0x2b9   : > { %v4952_v17 = vpop.f32.mrb[160].mxu0 }
 0x2ba   : > { %v5082_v18 = vadd.f32 %v4952_v17, %v4854_v7  ;;  %v4954_v19 = vpop.f32.mrb[161].mxu0 }
 0x2bb   : > { %v5083_v20 = vadd.f32 %v4954_v19, %v4855_v56  ;;  %v4956_v39 = vpop.f32.mrb[162].mxu0 }
 0x2bc   : > { %v4957_v21 = vpop.f32.mrb[163].mxu0  ;;  %v4993_v22 = vpop.f32.mrb[160].mxu1 }
 0x2bd   : > { %v5084_v23 = vadd.f32 %v4993_v22, %v4856_v9  ;;  %v4995_v24 = vpop.f32.mrb[161].mxu1 }
 0x2be   : > { %v5085_v26 = vadd.f32 %v4995_v24, %v4857_v55  ;;  %v4997_v27 = vpop.f32.mrb[162].mxu1 }
 0x2bf   : > { %v4998_v25 = vpop.f32.mrb[163].mxu1 }
 0x2c1   : > { %v5034_v28 = vpop.f32.mrb[164].mxu0 }
 0x2c2   : > { %v5086_v29 = vadd.f32 %v5034_v28, %v4858_v61  ;;  %v5036_v30 = vpop.f32.mrb[165].mxu0 }
 0x2c3   : > { %v5087_v32 = vadd.f32 %v5036_v30, %v4859_v13  ;;  %v5038_v0 = vpop.f32.mrb[166].mxu0 }
 0x2c4   : > { %v5039_v34 = vpop.f32.mrb[167].mxu0  ;;  %v5075_v31 = vpop.f32.mrb[164].mxu1 }
 0x2c5   : > { %v5088_v35 = vadd.f32 %v5075_v31, %v4860_v11  ;;  %v5077_v33 = vpop.f32.mrb[165].mxu1 }
 0x2c6   : > { %v5089_v36 = vadd.f32 %v5077_v33, %v4861_v14  ;;  %v5079_v37 = vpop.f32.mrb[166].mxu1 }
 0x2c7   : > { %v5080_v38 = vpop.f32.mrb[167].mxu1 }
 0x2c9   : > { %v5180_v40 = vpop.f32.mrb[168].mxu0 }
 0x2ca   : > { %v5310_v41 = vadd.f32 %v5180_v40, %v5082_v18  ;;  %v5182_v44 = vpop.f32.mrb[169].mxu0 }
 0x2cb   : > { %v5311_v45 = vadd.f32 %v5182_v44, %v5083_v20  ;;  %v5184_v42 = vpop.f32.mrb[170].mxu0 }
 0x2cc   : > { %v5185_v5 = vpop.f32.mrb[171].mxu0  ;;  %v5221_v4 = vpop.f32.mrb[168].mxu1 }
 0x2cd   : > { %v5312_v43 = vadd.f32 %v5221_v4, %v5084_v23  ;;  %v5223_v47 = vpop.f32.mrb[169].mxu1 }
 0x2ce   : > { %v5313_v46 = vadd.f32 %v5223_v47, %v5085_v26  ;;  %v5225_v48 = vpop.f32.mrb[170].mxu1 }
 0x2cf   : > { %v5226_v49 = vpop.f32.mrb[171].mxu1 }
 0x2d1   : > { %v5262_v50 = vpop.f32.mrb[172].mxu0 }
 0x2d2   : > { %v5314_v51 = vadd.f32 %v5262_v50, %v5086_v29  ;;  %v5264_v52 = vpop.f32.mrb[173].mxu0 }
 0x2d3   : > { %v5315_v54 = vadd.f32 %v5264_v52, %v5087_v32  ;;  %v5266_v6 = vpop.f32.mrb[174].mxu0 }
 0x2d4   : > { %v5267_v7 = vpop.f32.mrb[175].mxu0  ;;  %v5303_v8 = vpop.f32.mrb[172].mxu1 }
 0x2d5   : > { %v5316_v56 = vadd.f32 %v5303_v8, %v5088_v35  ;;  %v5305_v53 = vpop.f32.mrb[173].mxu1 }
 0x2d6   : > { %v5317_v57 = vadd.f32 %v5305_v53, %v5089_v36  ;;  %v5307_v58 = vpop.f32.mrb[174].mxu1 }
 0x2d7   : > { %v5308_v9 = vpop.f32.mrb[175].mxu1 }
 0x2db   : > { %v5408_v10 = vpop.f32.mrb[176].mxu0 }
 0x2dc   : > { %v5538_v55 = vadd.f32 %v5408_v10, %v5310_v41  ;;  %v5410_v59 = vpop.f32.mrb[177].mxu0 }
 0x2dd   : > { %v5539_v60 = vadd.f32 %v5410_v59, %v5311_v45  ;;  %v5412_v12 = vpop.f32.mrb[178].mxu0 }
 0x2de   : > { %v5413_v61 = vpop.f32.mrb[179].mxu0 }
 0x2df   : > { %v5449_v1 = vpop.f32.mrb[176].mxu1 }
 0x2e0   : > { %v5540_v13 = vadd.f32 %v5449_v1, %v5312_v43  ;;  %v5451_v62 = vpop.f32.mrb[177].mxu1 }
 0x2e1   : > { %v5541_v63 = vadd.f32 %v5451_v62, %v5313_v46  ;;  %v5453_v3 = vpop.f32.mrb[178].mxu1 }
 0x2e2   : > { %v5454_v11 = vpop.f32.mrb[179].mxu1 }
 0x2e3   : > { %v5490_v2 = vpop.f32.mrb[180].mxu0 }
 0x2e4   : > { %v5542_v14 = vadd.f32 %v5490_v2, %v5314_v51  ;;  %v5492_v16 = vpop.f32.mrb[181].mxu0 }
 0x2e5   : > { %v5543_v15 = vadd.f32 %v5492_v16, %v5315_v54  ;;  %v5494_v17 = vpop.f32.mrb[182].mxu0 }
 0x2e6   : > { %v5495_v18 = vpop.f32.mrb[183].mxu0 }
 0x2e7   : > { %v5531_v19 = vpop.f32.mrb[180].mxu1 }
 0x2e8   : > { %v5544_v20 = vadd.f32 %v5531_v19, %v5316_v56  ;;  %v5533_v39 = vpop.f32.mrb[181].mxu1 }
 0x2e9   : > { %v5545_v21 = vadd.f32 %v5533_v39, %v5317_v57  ;;  %v5535_v22 = vpop.f32.mrb[182].mxu1 }
 0x2ea   : > { %v5536_v23 = vpop.f32.mrb[183].mxu1 }
 0x2ec   : > { %v5636_v24 = vpop.f32.mrb[184].mxu0 }
 0x2ed   : > { %v5766_v26 = vadd.f32 %v5636_v24, %v5538_v55  ;;  %v5638_v27 = vpop.f32.mrb[185].mxu0 }
 0x2ee   : > { %v5767_v25 = vadd.f32 %v5638_v27, %v5539_v60  ;;  %v5640_v28 = vpop.f32.mrb[186].mxu0 }
 0x2ef   : > { %v5641_v29 = vpop.f32.mrb[187].mxu0 }
 0x2f0   : > { %v5677_v30 = vpop.f32.mrb[184].mxu1 }
 0x2f1   : > { %v5768_v32 = vadd.f32 %v5677_v30, %v5540_v13  ;;  %v5679_v0 = vpop.f32.mrb[185].mxu1 }
 0x2f2   : > { %v5769_v34 = vadd.f32 %v5679_v0, %v5541_v63  ;;  %v5681_v31 = vpop.f32.mrb[186].mxu1 }
 0x2f3   : > { %v5682_v35 = vpop.f32.mrb[187].mxu1 }
 0x2f4   : > { %v5718_v33 = vpop.f32.mrb[188].mxu0 }
 0x2f5   : > { %v5770_v36 = vadd.f32 %v5718_v33, %v5542_v14  ;;  %v5720_v37 = vpop.f32.mrb[189].mxu0 }
 0x2f6   : > { %v5771_v38 = vadd.f32 %v5720_v37, %v5543_v15  ;;  %v5722_v40 = vpop.f32.mrb[190].mxu0 }
 0x2f7   : > { %v5723_v41 = vpop.f32.mrb[191].mxu0 }
 0x2f8   : > { %v5759_v44 = vpop.f32.mrb[188].mxu1 }
 0x2f9   : > { %v5772_v45 = vadd.f32 %v5759_v44, %v5544_v20  ;;  %v5761_v42 = vpop.f32.mrb[189].mxu1 }
 0x2fa   : > { %v5773_v5 = vadd.f32 %v5761_v42, %v5545_v21  ;;  %v5763_v4 = vpop.f32.mrb[190].mxu1 }
 0x2fb   : > { %v5764_v43 = vpop.f32.mrb[191].mxu1 }
 0x2ff   : > { %v5864_v47 = vpop.f32.mrb[192].mxu0 }
 0x300   : > { %v5994_v46 = vadd.f32 %v5864_v47, %v5766_v26  ;;  %v5866_v48 = vpop.f32.mrb[193].mxu0 }
 0x301   : > { %v5995_v49 = vadd.f32 %v5866_v48, %v5767_v25  ;;  %v5868_v50 = vpop.f32.mrb[194].mxu0  ;;  %v6522_v48 = vlaneseq }
 0x302   : > { %v5869_v51 = vpop.f32.mrb[195].mxu0 }
 0x303   : > { %v5905_v52 = vpop.f32.mrb[192].mxu1 }
 0x304   : > { %v5996_v54 = vadd.f32 %v5905_v52, %v5768_v32  ;;  %v5907_v6 = vpop.f32.mrb[193].mxu1 }
 0x305   : > { %v5997_v7 = vadd.f32 %v5907_v6, %v5769_v34  ;;  %v5909_v8 = vpop.f32.mrb[194].mxu1  ;;  %v6462_v34 = vpop.permute.xlu0 %6461 }
 0x306   : > { %v5910_v56 = vpop.f32.mrb[195].mxu1 }
 0x307   : > { %v5946_v53 = vpop.f32.mrb[196].mxu0 }
 0x308   : > { %v5998_v57 = vadd.f32 %v5946_v53, %v5770_v36  ;;  %v5948_v58 = vpop.f32.mrb[197].mxu0 }
 0x309   : > { %v5999_v9 = vadd.f32 %v5948_v58, %v5771_v38  ;;  %v5950_v10 = vpop.f32.mrb[198].mxu0  ;;  %v8567_v58 = vshrl.u32 %v6522_v48, 7 }
 0x30a   : > { %v5951_v55 = vpop.f32.mrb[199].mxu0 }
 0x30b   : > { %v5987_v59 = vpop.f32.mrb[196].mxu1 }
 0x30c   : > { %v6000_v60 = vadd.f32 %v5987_v59, %v5772_v45  ;;  %v5989_v12 = vpop.f32.mrb[197].mxu1 }
 0x30d   : > { %v6001_v61 = vadd.f32 %v5989_v12, %v5773_v5  ;;  %v5991_v1 = vpop.f32.mrb[198].mxu1 }
 0x30e   : > { %v5992_v13 = vpop.f32.mrb[199].mxu1 }
 0x310   : > { %v6092_v62 = vpop.f32.mrb[200].mxu0 }
 0x311   : > { %v6222_v63 = vadd.f32 %v6092_v62, %v5994_v46  ;;  %v6094_v3 = vpop.f32.mrb[201].mxu0 }
 0x312   : > { %v6223_v11 = vadd.f32 %v6094_v3, %v5995_v49  ;;  %v6096_v2 = vpop.f32.mrb[202].mxu0  ;;  %v6524_v3 = vsub.s32 0, %v8567_v58 }
 0x313   : > { %v6097_v14 = vpop.f32.mrb[203].mxu0 }
 0x314   : > { %v6133_v16 = vpop.f32.mrb[200].mxu1 }
 0x315   : > { %v6224_v15 = vadd.f32 %v6133_v16, %v5996_v54  ;;  %v6135_v17 = vpop.f32.mrb[201].mxu1  ;;  %v6520_v16 = vld [vmem:[%s307_s10] sm:$0xff] }
 0x316   : > { %v6225_v18 = vadd.f32 %v6135_v17, %v5997_v7  ;;  %v6137_v19 = vpop.f32.mrb[202].mxu1 }
 0x317   : > { %v6138_v20 = vpop.f32.mrb[203].mxu1 }
 0x318   : > { %v6174_v39 = vpop.f32.mrb[204].mxu0 }
 0x319   : > { %v6226_v21 = vadd.f32 %v6174_v39, %v5998_v57  ;;  %v6176_v22 = vpop.f32.mrb[205].mxu0 }
 0x31a   : > { %v6227_v23 = vadd.f32 %v6176_v22, %v5999_v9  ;;  %v6178_v24 = vpop.f32.mrb[206].mxu0  ;;  %v6525_v22 = vrot.slane %v6520_v16, %v6524_v3 }
 0x31b   : > { %v6179_v26 = vpop.f32.mrb[207].mxu0 }
 0x31c   : > { %v6215_v27 = vpop.f32.mrb[204].mxu1 }
 0x31d   : > { %v6228_v25 = vadd.f32 %v6215_v27, %v6000_v60  ;;  %v6217_v28 = vpop.f32.mrb[205].mxu1 }
 0x31e   : > { %v6229_v29 = vadd.f32 %v6217_v28, %v6001_v61  ;;  %v6219_v30 = vpop.f32.mrb[206].mxu1 }
 0x31f   : > { %v6220_v32 = vpop.f32.mrb[207].mxu1 }
 0x323   : > { %v6320_v0 = vpop.f32.mrb[208].mxu0 }
 0x324   : > { %v6450_v31 = vadd.f32 %v6320_v0, %v6222_v63  ;;  %v6322_v35 = vpop.f32.mrb[209].mxu0 }
 0x325   : > { %v6451_v33 = vadd.f32 %v6322_v35, %v6223_v11  ;;  %v6324_v36 = vpop.f32.mrb[210].mxu0 }
 0x326   : > { %v8549_v37 = vadd.f32 %v6462_v34, %v6450_v31  ;;  %v6325_v38 = vpop.f32.mrb[211].mxu0 }
 0x327   : > { %v8551_v40 = vadd.f32 %v6462_v34, %v6451_v33  ;;  %v6361_v41 = vpop.f32.mrb[208].mxu1 }
 0x328   : > { %v6480_v44 = vmin.f32 %v8549_v37, 0.0  ;;  %v6452_v45 = vadd.f32 %v6361_v41, %v6224_v15  ;;  %v6363_v42 = vpop.f32.mrb[209].mxu1  ;;  %v6528_v15 = vsub.s32 1, %v8567_v58  ;;  %vm6472_vm1 = vcmp.gt.f32.partialorder %v8549_v37, 0.0 }
 0x329   : > { %v6481_v5 = vmin.f32 %v8551_v40, 0.0  ;;  %v6453_v4 = vadd.f32 %v6363_v42, %v6225_v18  ;;  %v6365_v43 = vpop.f32.mrb[210].mxu1  ;;  %vm6473_vm2 = vcmp.gt.f32.partialorder %v8551_v40, 0.0 }
 0x32a   : > { %v6488_v47 = vmul.f32 1.442695, %v6480_v44  ;;  %v8556_v46 = vadd.f32 %v6462_v34, %v6452_v45  ;;  %v6366_v49 = vpop.f32.mrb[211].mxu1  ;;  %v6529_v28 = vrot.slane %v6520_v16, %v6528_v15 }
 0x32b   : > { %v6490_v50 = vmul.f32 1.442695, %v6481_v5  ;;  %v8558_v51 = vadd.f32 %v6462_v34, %v6453_v4  ;;  %v6402_v52 = vpop.f32.mrb[212].mxu0  ;;  %v6544_v5 = vsub.s32 5, %v8567_v58 }
 0x32c   : > { %7036 = vpow2.f32 %v6488_v47  ;;  %v6482_v54 = vmin.f32 %v8556_v46, 0.0  ;;  %v6454_v6 = vadd.f32 %v6402_v52, %v6226_v21  ;;  %v6404_v7 = vpop.f32.mrb[213].mxu0  ;;  %v6532_v21 = vsub.s32 2, %v8567_v58 }
 0x32d   : > { %7038 = vpow2.f32 %v6490_v50  ;;  %v6483_v8 = vmin.f32 %v8558_v51, 0.0  ;;  %v6455_v56 = vadd.f32 %v6404_v7, %v6227_v23  ;;  %v6406_v53 = vpop.f32.mrb[214].mxu0  ;;  %v7088_v23 = vmov 1983009808  }
 0x32e   : > { %v6492_v57 = vmul.f32 1.442695, %v6482_v54  ;;  %v8569_v9 = vadd.f32 %v6462_v34, %v6454_v6  ;;  %v6407_v10 = vpop.f32.mrb[215].mxu0  ;;  %v6589_v24 = vunpack.c.l.s4 %v7088_v23  ;;  %v6533_v33 = vrot.slane %v6520_v16, %v6532_v21 }
 0x32f   : > { %v6494_v55 = vmul.f32 1.442695, %v6483_v8  ;;  %v8571_v59 = vadd.f32 %v6462_v34, %v6455_v56  ;;  %v6443_v60 = vpop.f32.mrb[212].mxu1  ;;  %vm6474_vm14 = vcmp.gt.f32.partialorder %v8556_v46, 0.0  ;;  %vm6475_vm15 = vcmp.gt.f32.partialorder %v8558_v51, 0.0 }
 0x330   : > { %7040 = vpow2.f32 %v6492_v57  ;;  %v6484_v12 = vmin.f32 %v8569_v9, 0.0  ;;  %v6456_v61 = vadd.f32 %v6443_v60, %v6228_v25  ;;  %v6445_v1 = vpop.f32.mrb[213].mxu1  ;;  %v6590_v38 = vunpack.c.0.s8 %v6589_v24 }
 0x331   : > { %7042 = vpow2.f32 %v6494_v55  ;;  %v6485_v13 = vmin.f32 %v8571_v59, 0.0  ;;  %v6457_v62 = vadd.f32 %v6445_v1, %v6229_v29  ;;  %v6447_v63 = vpop.f32.mrb[214].mxu1  ;;  %v6536_v29 = vsub.s32 3, %v8567_v58 }
 0x332   : > { %v6496_v11 = vmul.f32 1.442695, %v6484_v12  ;;  %v8580_v2 = vadd.f32 %v6462_v34, %v6456_v61  ;;  %v6448_v14 = vpop.f32.mrb[215].mxu1  ;;  %v6548_v50 = vsub.s32 6, %v8567_v58  ;;  %v6552_v52 = vsub.s32 7, %v8567_v58 }
 0x333   : > { %v6498_v17 = vmul.f32 1.442695, %v6485_v13  ;;  %v8583_v18 = vadd.f32 %v6462_v34, %v6457_v62  ;;  %v6540_v34 = vsub.s32 4, %v8567_v58  ;;  %v6537_v45 = vrot.slane %v6520_v16, %v6536_v29 }
 0x334   : > { %7044 = vpow2.f32 %v6496_v11  ;;  %v6486_v19 = vmin.f32 %v8580_v2, 0.0  ;;  %v6593_v7 = vsub.s32 %v6590_v38, %v8567_v58  ;;  %v6545_v56 = vrot.slane %v6520_v16, %v6544_v5 }
 0x335   : > { %7046 = vpow2.f32 %v6498_v17  ;;  %v6487_v20 = vmin.f32 %v8583_v18, 0.0  ;;  %v6541_v47 = vrot.slane %v6520_v16, %v6540_v34  ;;  %vm6476_vm0 = vcmp.gt.f32.partialorder %v8569_v9, 0.0 }
 0x336   : > { %v7037_v39 = vpop.eup %7036  ;;  %v6500_v26 = vmul.f32 1.442695, %v6486_v19  ;;  %vm6477_vm3 = vcmp.gt.f32.partialorder %v8571_v59, 0.0  ;;  %v6549_v60 = vrot.slane %v6520_v16, %v6548_v50  ;;  %v6553_v12 = vrot.slane %v6520_v16, %v6552_v52 }
 0x337   : > { %v7039_v27 = vpop.eup %7038  ;;  %v6975_v25 = vadd.f32 -1.0, %v7037_v39  ;;  %v6502_v30 = vmul.f32 1.442695, %v6487_v20  ;;  %vm6478_vm4 = vcmp.gt.f32.partialorder %v8580_v2, 0.0  ;;  %vm6479_vm5 = vcmp.gt.f32.partialorder %v8583_v18, 0.0 }
 0x338   : > { %v6976_v32 = vadd.f32 -1.0, %v7039_v27  ;;  %7048 = vpow2.f32 %v6500_v26 }
 0x339   : > { %v6512_v0 = vsel %vm6472_vm1, %v8549_v37, %v6975_v25  ;;  %7050 = vpow2.f32 %v6502_v30 }
 0x33a   : > { %v7041_v31 = vpop.eup %7040  ;;  %v6513_v35 = vsel %vm6473_vm2, %v8551_v40, %v6976_v32  ;;  %v6562_v36 = vmul.f32 %v6525_v22, %v6512_v0 }
 0x33b   : > { %v7043_v41 = vpop.eup %7042  ;;  %v6977_v44 = vadd.f32 -1.0, %v7041_v31  ;;  %v6563_v42 = vmul.f32 %v6529_v28, %v6513_v35 }
 0x33c   : > { %v6978_v4 = vadd.f32 -1.0, %v7043_v41 }
 0x33d   : > { %v6514_v37 = vsel %vm6474_vm14, %v8556_v46, %v6977_v44  ;;  %v6983_v43 = vpack.c.bf16 %v6563_v42, %v6562_v36 }
 0x33e   : > { %v7045_v40 = vpop.eup %7044  ;;  %v6564_v48 = vmul.f32 %v6533_v33, %v6514_v37  ;;  %v6515_v49 = vsel %vm6475_vm15, %v8558_v51, %v6978_v4 }
 0x33f   : > { %v7047_v54 = vpop.eup %7046  ;;  %v6565_v6 = vmul.f32 %v6537_v45, %v6515_v49  ;;  %v6979_v8 = vadd.f32 -1.0, %v7045_v40  ;;  %v6594_v1 = vrot.slane %v6983_v43, %v6593_v7 }
 0x340   : > { %v6980_v46 = vadd.f32 -1.0, %v7047_v54 }
 0x341   : > { %v6984_v53 = vpack.c.bf16 %v6565_v6, %v6564_v48  ;;  %v6516_v57 = vsel %vm6476_vm0, %v8569_v9, %v6979_v8 }
 0x342   : > { %v7049_v51 = vpop.eup %7048  ;;  %v6566_v10 = vmul.f32 %v6541_v47, %v6516_v57  ;;  %v6517_v55 = vsel %vm6477_vm3, %v8571_v59, %v6980_v46 }
 0x343   : > { %v7051_v61 = vpop.eup %7050  ;;  %v6601_v58 = vrot.slane %v6984_v53, %v6593_v7  ;;  %v6567_v13 = vmul.f32 %v6545_v56, %v6517_v55  ;;  %v6981_v62 = vadd.f32 -1.0, %v7049_v51 }
 0x344   : > { %v6982_v9 = vadd.f32 -1.0, %v7051_v61 }
 0x345   : > { %v6602_v63 = vcombine.low %v6594_v1, %v6601_v58  ;;  %v6985_v3 = vpack.c.bf16 %v6567_v13, %v6566_v10  ;;  %v6518_v11 = vsel %vm6478_vm4, %v8580_v2, %v6981_v62 }
 0x346   : > { %v6568_v59 = vmul.f32 %v6549_v60, %v6518_v11  ;;  %v6519_v14 = vsel %vm6479_vm5, %v8583_v18, %v6982_v9 }
 0x347   : > { %6622 = vst [vmem:[%s313_s23] sm:$0xff] %v6602_v63  ;;  %v6569_v16 = vmul.f32 %v6553_v12, %v6519_v14  ;;  %v6611_v17 = vrot.slane %v6985_v3, %v6593_v7 }
 0x349   : > { %v6986_v15 = vpack.c.bf16 %v6569_v16, %v6568_v59 }
 0x34b   : > { %v6618_v19 = vrot.slane %v6986_v15, %v6593_v7 }
 0x34d   : > { %v6619_v20 = vcombine.low %v6611_v17, %v6618_v19 }
 0x34f   : > { %6623 = vst [vmem:[%s313_s23 + $0x8] sm:$0xff] %v6619_v20 }
 0x350 PF: > { %s16_s21 = sadd.s32 1, %s7059_s21  }
 0x351   : > { %p13_p6 = scmp.ge.s32.totalorder %s16_s21, 4  }
 0x353   :  { %15 = sbr.rel (!%p13_p6) target bundleno = 1 (0x1), region = 109 }

// kernel: last_conv_block_elu.5
= control target key start
LH: loop header
LB: loop body
LE: loop exit
PB: predicated region body
PF: predicated region fallthrough
CT: control target
= control target key end

     0   :  { %s7404_s26 = smov 0   ;;  %s8886_s0 = inlined_call_operand.vmem [shape: bf16[27,4,4], index: 0, kind: input, shape index: {}]   ;;  %s8887_s1 = inlined_call_operand.vmem [shape: f32[4,1], index: 1, kind: input, shape index: {}]   ;;  %s8888_s2 = inlined_call_operand.vmem [shape: bf16[4,4096], index: 2, kind: input, shape index: {}]   ;;  %s8889_s3 = inlined_call_operand.vmem [shape: bf16[4,256], index: 3, kind: input, shape index: {}]   ;;  %s8890_s4 = inlined_call_operand.vmem [shape: bf16[4,256], index: 4, kind: input, shape index: {}]   ;;  %s8891_s5 = inlined_call_operand.vmem [shape: f32[1,4], index: 5, kind: input, shape index: {}]   ;;  %s8892_s6 = inlined_call_operand.<no memory space> [shape: f32[1], index: 6, kind: input, shape index: {}]   ;;  %s8893_s7 = inlined_call_operand.vmem [shape: f32[1,2048], index: 7, kind: output, shape index: {}]  }
   0x1   :  { %12 = sst [smem:[#allocation2]] %s8892_s6 }
   0x2 LB: > { %s6989_s27 = sadd.s32 4294967295, %s7329_s26   ;;  %p6993_p0 = scmp.ge.s32.totalorder %s7329_s26, 1  ;;  %s7329_s26 = sphi %s7404_s26, %s18_s26  }
   0x3   : > { %p261_p1 = scmp.lt.s32.totalorder %s7329_s26, 3 }
   0x5   : > { %p262_p2 = pnand %p6993_p0, %p261_p1 }
   0x6   : > { %p309_p3 = scmp.lt.s32.totalorder (!%p262_p2), %s6989_s27, 1  ;;  %v333_v0 = vlaneseq (!%p262_p2)  ;;  %s7412_s28 = sshll.u32 (!%p262_p2), %s6989_s27, 3  ;;  %v7331_v1 = vmov (!%p262_p2), 1983009808   ;;  %v7333_v7 = vmov (!%p262_p2), 0   ;;  %vm385_vm0 = vcmask (!%p262_p2), 900096  }
   0x7   : > { %265 = sbr.rel (%p262_p2) target bundleno = 1068 (0x42c), region = 48  ;;  %v331_v2 = vunpack.c.l.s4 (!%p262_p2), %v7331_v1  ;;  %s7264_s6 = sadd.s32 (!%p262_p2), 8, %s7412_s28  ;;  %455 = vmatprep.mubr.bf16.mxu0 (!%p262_p2), %v7333_v7  ;;  %496 = vmatprep.mubr.bf16.mxu1 (!%p262_p2), %v7333_v7  ;;  %vm398_vm1 = vcmask (!%p262_p2), 1041408   ;;  %v6999_v31 = vld [vmem:[%s8886_s0 + $0x2] sm:$0x3] (!%p262_p2)  ;;  %vm394_vm2 = vcmask (!%p262_p2), 31744  }
   0x8   : > { %v7417_v4 = vshrl.u32 (!%p262_p2), %v333_v0, 7  ;;  %p303_p4 = scmp.lt.s32.totalorder (!%p262_p2), %s7264_s6, 31  ;;  %s7332_s10 = smov (!%p262_p2), 110   ;;  %7303 = vset.pattern.permute.xlu0 (!%p262_p2), %v7333_v7  ;;  %vm605_vm3 = vcmask (!%p262_p2), 908288   ;;  %v363_v53 = vld [vmem:[%s8886_s0] sm:$0x3] (!%p262_p2) }
   0x9   : > { %v332_v3 = vunpack.c.0.s8 (!%p262_p2), %v331_v2  ;;  %s7334_s15 = smov (!%p262_p2), 111   ;;  %s7335_s16 = smov (!%p262_p2), 109   ;;  %vm825_vm4 = vcmask (!%p262_p2), 891904   ;;  %vm1053_vm5 = vcmask (!%p262_p2), 826368   ;;  %vm1281_vm6 = vcmask (!%p262_p2), 818176  }
   0xa   : > { %s7336_s17 = smov (!%p262_p2), 101   ;;  %s7337_s18 = smov (!%p262_p2), 100   ;;  %vm1509_vm7 = vcmask (!%p262_p2), 809984   ;;  %vm1737_vm8 = vcmask (!%p262_p2), 744448   ;;  %vm1965_vm9 = vcmask (!%p262_p2), 736256   ;;  %vm2193_vm10 = vcmask (!%p262_p2), 728064  }
   0xb   : > { %v335_v6 = vsub.s32 (!%p262_p2), %v332_v3, %v7417_v4  ;;  %s7338_s19 = smov (!%p262_p2), 99   ;;  %s7339_s20 = smov (!%p262_p2), 91   ;;  %vm2421_vm11 = vcmask (!%p262_p2), 89088   ;;  %vm2649_vm12 = vcmask (!%p262_p2), 80896   ;;  %vm2877_vm13 = vcmask (!%p262_p2), 72704  }
   0xc   : > { %s7340_s23 = smov (!%p262_p2), 90   ;;  %s7343_s12 = smov (!%p262_p2), 10   ;;  %vm3105_vm14 = vcmask (!%p262_p2), 7168   ;;  %vm3535_vm15 = vcmask (!%p262_p2), 1039360  }
   0xd   : > { %s7346_s21 = smov (!%p262_p2), 127   ;;  %s7347_s25 = smov (!%p262_p2), 119  }
   0xe   : > { %s8895_s27 = smov (!%p309_p3, %s6989_s27), 1  ;;  %s8897_s6 = smov (!%p303_p4, %s7264_s6), 31 }
   0xf   : > { %s6996_s29 = sshll.u32 %s8895_s27, 1  ;;  %s6995_s11 = sshll.u32 %s8897_s6, 1 }
  0x10   : > { %s312_s9 = scalar_lea.vmem %s8889_s3, %s6996_s29  ;;  %s306_s14 = scalar_lea.vmem %s8888_s2, %s6995_s11 }
  0x11   : > { %v7425_v5 = vld [vmem:[%s312_s9] sm:$0x3]  ;;  %v325_v8 = vld [vmem:[%s306_s14 + $0x8] sm:$0xff]  ;;  %s7341_s6 = smov 89   ;;  %s7342_s9 = smov 11  }
  0x12   : > { %367 = vrot.lane.b32.xlu0 %v7425_v5, %s7332_s10  ;;  %v324_v9 = vld [vmem:[%s306_s14] sm:$0xff]  ;;  %v7435_v10 = vrot.slane %v325_v8, %v335_v6  ;;  %v346_v13 = vcombine.high %v325_v8, %v325_v8  ;;  %s7835_s24 = scalar_lea.vmem %s8890_s4, %s6996_s29  ;;  %s7348_s8 = smov 118  }
  0x13   : > { %v7437_v11 = vrot.slane %v324_v9, %v335_v6  ;;  %v329_v12 = vcombine.high %v324_v9, %v324_v9  ;;  %s7349_s11 = smov 117   ;;  %s7350_s14 = smov 39  }
  0x14   : > { %377 = vrot.lane.b32.xlu1 %v7435_v10, %s7332_s10  ;;  %v7443_v14 = vcombine.high %v7435_v10, %v7435_v10  ;;  %v7457_v18 = vrot.slane %v346_v13, %v335_v6  ;;  %s7357_s13 = smov 18   ;;  %p318_p5 = scmp.lt.s32.totalorder %s7412_s28, 15 }
  0x15   : > { %v7447_v15 = vcombine.high %v7437_v11, %v7437_v11  ;;  %v7449_v16 = vrot.slane %v329_v12, %v335_v6 }
  0x16   : > { %369 = vrot.lane.b32.xlu0 %v7437_v11, %s7332_s10  ;;  %v7463_v19 = vcombine.high %v7457_v18, %v7457_v18  ;;  %s8899_s28 = smov (!%p318_p5, %s7412_s28), 15 }
  0x17   : > { %v7455_v17 = vcombine.high %v7449_v16, %v7449_v16 }
  0x18   : > { %371 = vrot.lane.b32.xlu1 %v7447_v15, %s7332_s10 }
  0x1a   : > { %379 = vrot.lane.b32.xlu0 %v7443_v14, %s7332_s10 }
  0x1c   : > { %373 = vrot.lane.b32.xlu1 %v7449_v16, %s7332_s10 }
  0x1e   : > { %375 = vrot.lane.b32.xlu0 %v7455_v17, %s7332_s10 }
  0x20   : > { %381 = vrot.lane.b32.xlu1 %v7457_v18, %s7332_s10 }
  0x22   : > { %383 = vrot.lane.b32.xlu0 %v7463_v19, %s7332_s10 }
  0x24   : > { %587 = vrot.lane.b32.xlu1 %v7425_v5, %s7334_s15 }
  0x26   : > { %589 = vrot.lane.b32.xlu0 %v7437_v11, %s7334_s15 }
  0x28   : > { %591 = vrot.lane.b32.xlu1 %v7447_v15, %s7334_s15 }
  0x2a   : > { %593 = vrot.lane.b32.xlu0 %v7449_v16, %s7334_s15 }
  0x2c   : > { %595 = vrot.lane.b32.xlu1 %v7455_v17, %s7334_s15 }
  0x2e   : > { %597 = vrot.lane.b32.xlu0 %v7435_v10, %s7334_s15 }
  0x30   : > { %599 = vrot.lane.b32.xlu1 %v7443_v14, %s7334_s15 }
  0x32   : > { %601 = vrot.lane.b32.xlu0 %v7457_v18, %s7334_s15 }
  0x34   : > { %603 = vrot.lane.b32.xlu1 %v7463_v19, %s7334_s15  ;;  %s7344_s15 = smov 9  }
  0x36   : > { %807 = vrot.lane.b32.xlu0 %v7425_v5, %s7335_s16 }
  0x38   : > { %809 = vrot.lane.b32.xlu1 %v7437_v11, %s7335_s16 }
  0x3a   : > { %811 = vrot.lane.b32.xlu0 %v7447_v15, %s7335_s16 }
  0x3c   : > { %813 = vrot.lane.b32.xlu1 %v7449_v16, %s7335_s16 }
  0x3e   : > { %815 = vrot.lane.b32.xlu0 %v7455_v17, %s7335_s16 }
  0x40   : > { %817 = vrot.lane.b32.xlu1 %v7435_v10, %s7335_s16 }
  0x42   : > { %819 = vrot.lane.b32.xlu0 %v7443_v14, %s7335_s16 }
  0x44   : > { %821 = vrot.lane.b32.xlu1 %v7457_v18, %s7335_s16 }
  0x46   : > { %823 = vrot.lane.b32.xlu0 %v7463_v19, %s7335_s16 }
  0x48   : > { %1035 = vrot.lane.b32.xlu1 %v7425_v5, %s7336_s17 }
  0x4a   : > { %1037 = vrot.lane.b32.xlu0 %v7437_v11, %s7336_s17 }
  0x4c   : > { %1039 = vrot.lane.b32.xlu1 %v7447_v15, %s7336_s17 }
  0x4e   : > { %1041 = vrot.lane.b32.xlu0 %v7449_v16, %s7336_s17 }
  0x50   : > { %1043 = vrot.lane.b32.xlu1 %v7455_v17, %s7336_s17 }
  0x52   : > { %1045 = vrot.lane.b32.xlu0 %v7435_v10, %s7336_s17 }
  0x54   : > { %1047 = vrot.lane.b32.xlu1 %v7443_v14, %s7336_s17 }
  0x56   : > { %1049 = vrot.lane.b32.xlu0 %v7457_v18, %s7336_s17 }
  0x58   : > { %1051 = vrot.lane.b32.xlu1 %v7463_v19, %s7336_s17  ;;  %s7351_s17 = smov 38  }
  0x5a   : > { %1263 = vrot.lane.b32.xlu0 %v7425_v5, %s7337_s18 }
  0x5c   : > { %1265 = vrot.lane.b32.xlu1 %v7437_v11, %s7337_s18 }
  0x5e   : > { %1267 = vrot.lane.b32.xlu0 %v7447_v15, %s7337_s18 }
  0x60   : > { %1269 = vrot.lane.b32.xlu1 %v7449_v16, %s7337_s18 }
  0x62   : > { %1271 = vrot.lane.b32.xlu0 %v7455_v17, %s7337_s18 }
  0x64   : > { %1273 = vrot.lane.b32.xlu1 %v7435_v10, %s7337_s18 }
  0x66   : > { %1275 = vrot.lane.b32.xlu0 %v7443_v14, %s7337_s18 }
  0x68   : > { %1277 = vrot.lane.b32.xlu1 %v7457_v18, %s7337_s18 }
  0x6a   : > { %1279 = vrot.lane.b32.xlu0 %v7463_v19, %s7337_s18  ;;  %s7345_s18 = smov 1  }
  0x6c   : > { %1491 = vrot.lane.b32.xlu1 %v7425_v5, %s7338_s19 }
  0x6e   : > { %1493 = vrot.lane.b32.xlu0 %v7437_v11, %s7338_s19 }
  0x70   : > { %1495 = vrot.lane.b32.xlu1 %v7447_v15, %s7338_s19 }
  0x72   : > { %1497 = vrot.lane.b32.xlu0 %v7449_v16, %s7338_s19 }
  0x74   : > { %1499 = vrot.lane.b32.xlu1 %v7455_v17, %s7338_s19 }
  0x76   : > { %1501 = vrot.lane.b32.xlu0 %v7435_v10, %s7338_s19 }
  0x78   : > { %1503 = vrot.lane.b32.xlu1 %v7443_v14, %s7338_s19 }
  0x7a   : > { %1505 = vrot.lane.b32.xlu0 %v7457_v18, %s7338_s19 }
  0x7c   : > { %1507 = vrot.lane.b32.xlu1 %v7463_v19, %s7338_s19 }
  0x7e   : > { %1719 = vrot.lane.b32.xlu0 %v7425_v5, %s7339_s20 }
  0x80   : > { %1721 = vrot.lane.b32.xlu1 %v7437_v11, %s7339_s20 }
  0x82   : > { %1723 = vrot.lane.b32.xlu0 %v7447_v15, %s7339_s20 }
  0x84   : > { %v368_v20 = vpop.permute.xlu0 %367  ;;  %1725 = vrot.lane.b32.xlu1 %v7449_v16, %s7339_s20 }
  0x86   : > { %1727 = vrot.lane.b32.xlu0 %v7455_v17, %s7339_s20  ;;  %v378_v21 = vpop.permute.xlu1 %377 }
  0x88   : > { %v370_v22 = vpop.permute.xlu0 %369  ;;  %1729 = vrot.lane.b32.xlu1 %v7435_v10, %s7339_s20 }
  0x89   : > { %v386_v23 = vsel %vm385_vm0, %v368_v20, %v370_v22 }
  0x8a   : > { %1731 = vrot.lane.b32.xlu0 %v7443_v14, %s7339_s20  ;;  %v372_v25 = vpop.permute.xlu1 %371  ;;  %v400_v27 = vsel %vm398_vm1, %v386_v23, 0 }
  0x8b   : > { %v387_v26 = vsel %vm385_vm0, %v370_v22, %v372_v25 }
  0x8c   : > { %v380_v24 = vpop.permute.xlu0 %379  ;;  %7000 = vmatprep.subr.msk.bf16.mxu0 %vm398_vm1, %v387_v26  ;;  %1733 = vrot.lane.b32.xlu1 %v7457_v18, %s7339_s20 }
  0x8d   : > { %424 = vmatpush1.bf16.msra.mxu0 %v400_v27  ;;  %v391_v28 = vsel %vm385_vm0, %v378_v21, %v380_v24 }
  0x8e   : > { %1735 = vrot.lane.b32.xlu0 %v7463_v19, %s7339_s20  ;;  %7004 = vmatprep.subr.msk.bf16.mxu0 %vm398_vm1, %v391_v28  ;;  %v374_v29 = vpop.permute.xlu1 %373  ;;  %s7352_s20 = smov 37  }
  0x8f   : > { %v388_v34 = vsel %vm385_vm0, %v372_v25, %v374_v29 }
  0x90   : > { %v376_v30 = vpop.permute.xlu0 %375  ;;  %1947 = vrot.lane.b32.xlu1 %v7425_v5, %s7340_s23  ;;  %v406_v35 = vsel %vm398_vm1, %v388_v34, 0  ;;  %7001 = vmatmul.mubr.msk.bf16.vlgmr.msra.gmra.mrb[0].mxu0 %vm394_vm2, %v6999_v31 }
  0x91   : > { %v390_v32 = vsel %vm385_vm0, %v376_v30, %v378_v21  ;;  %v389_v33 = vsel %vm385_vm0, %v374_v29, %v376_v30  ;;  %537 = vmatprep.mubr.bf16.mxu0 %v7333_v7  ;;  %v7016_v21 = vld [vmem:[%s8886_s0 + $0x4] sm:$0x3] }
  0x92   : > { %7002 = vmatprep.subr.msk.bf16.mxu1 %vm398_vm1, %v389_v33  ;;  %v412_v36 = vsel %vm398_vm1, %v390_v32, 0  ;;  %1949 = vrot.lane.b32.xlu0 %v7437_v11, %s7340_s23  ;;  %v382_v37 = vpop.permute.xlu1 %381 }
  0x93   : > { %465 = vmatpush1.bf16.msra.mxu1 %v406_v35  ;;  %506 = vmatpush1.bf16.msra.mxu0 %v412_v36  ;;  %v392_v39 = vsel %vm385_vm0, %v380_v24, %v382_v37 }
  0x94   : > { %v384_v38 = vpop.permute.xlu0 %383  ;;  %1951 = vrot.lane.b32.xlu1 %v7447_v15, %s7340_s23  ;;  %v418_v41 = vsel %vm398_vm1, %v392_v39, 0 }
  0x95   : > { %v393_v40 = vsel %vm385_vm0, %v382_v37, %v384_v38  ;;  %vm3763_vm0 = vcmask 973824  }
  0x96   : > { %7006 = vmatprep.subr.msk.bf16.mxu1 %vm398_vm1, %v393_v40  ;;  %1953 = vrot.lane.b32.xlu0 %v7449_v16, %s7340_s23  ;;  %v588_v42 = vpop.permute.xlu1 %587  ;;  %v7025_v40 = vld [vmem:[%s8886_s0 + $0x6] sm:$0x3] }
  0x97   : > { %7003 = vmatmul.mubr.msk.bf16.vlgmr.msra.gmra.mrb[0].mxu1 %vm394_vm2, %v6999_v31 }
  0x98   : > { %547 = vmatpush1.bf16.msra.mxu1 %v418_v41  ;;  %v590_v43 = vpop.permute.xlu0 %589  ;;  %578 = vmatprep.mubr.bf16.mxu1 %v7333_v7 }
  0x99   : > { %1955 = vrot.lane.b32.xlu1 %v7455_v17, %s7340_s23  ;;  %v606_v44 = vsel %vm605_vm3, %v588_v42, %v590_v43  ;;  %7005 = vmatmul.mubr.msk.bf16.vlgmr.msra.gmra.mrb[4].mxu0 %vm394_vm2, %v6999_v31 }
  0x9a   : > { %1957 = vrot.lane.b32.xlu0 %v7435_v10, %s7340_s23  ;;  %v592_v45 = vpop.permute.xlu1 %591  ;;  %673 = vmatprep.mubr.bf16.mxu0 %v7333_v7  ;;  %v618_v48 = vsel %vm398_vm1, %v606_v44, 0 }
  0x9b   : > { %v607_v47 = vsel %vm605_vm3, %v590_v43, %v592_v45 }
  0x9c   : > { %v594_v46 = vpop.permute.xlu0 %593  ;;  %7008 = vmatprep.subr.msk.bf16.mxu0 %vm398_vm1, %v607_v47 }
  0x9d   : > { %1959 = vrot.lane.b32.xlu1 %v7443_v14, %s7340_s23  ;;  %v608_v49 = vsel %vm605_vm3, %v592_v45, %v594_v46  ;;  %642 = vmatpush1.bf16.msra.mxu0 %v618_v48 }
  0x9e   : > { %1961 = vrot.lane.b32.xlu0 %v7457_v18, %s7340_s23  ;;  %v596_v50 = vpop.permute.xlu1 %595  ;;  %v624_v54 = vsel %vm398_vm1, %v608_v49, 0 }
  0x9f   : > { %7007 = vmatmul.mubr.msk.bf16.vlgmr.msra.gmra.mrb[4].mxu1 %vm394_vm2, %v6999_v31  ;;  %v609_v52 = vsel %vm605_vm3, %v594_v46, %v596_v50 }
  0xa0   : > { %v598_v51 = vpop.permute.xlu0 %597  ;;  %714 = vmatprep.mubr.bf16.mxu1 %v7333_v7  ;;  %7010 = vmatprep.subr.msk.bf16.mxu1 %vm398_vm1, %v609_v52 }
  0xa1   : > { %1963 = vrot.lane.b32.xlu1 %v7463_v19, %s7340_s23  ;;  %v610_v55 = vsel %vm605_vm3, %v596_v50, %v598_v51  ;;  %683 = vmatpush1.bf16.msra.mxu1 %v624_v54  ;;  %s7353_s23 = smov 29  }
  0xa2   : > { %2175 = vrot.lane.b32.xlu0 %v7425_v5, %s7341_s6  ;;  %v600_v56 = vpop.permute.xlu1 %599  ;;  %7009 = vmatmul.mubr.msk.bf16.vlgmr.msra.gmra.mrb[8].mxu0 %vm394_vm2, %v363_v53  ;;  %v630_v59 = vsel %vm398_vm1, %v610_v55, 0 }
  0xa3   : > { %v611_v58 = vsel %vm605_vm3, %v598_v51, %v600_v56  ;;  %755 = vmatprep.mubr.bf16.mxu0 %v7333_v7 }
  0xa4   : > { %v602_v57 = vpop.permute.xlu0 %601  ;;  %7012 = vmatprep.subr.msk.bf16.mxu0 %vm398_vm1, %v611_v58 }
  0xa5   : > { %2177 = vrot.lane.b32.xlu1 %v7437_v11, %s7341_s6  ;;  %v612_v60 = vsel %vm605_vm3, %v600_v56, %v602_v57  ;;  %724 = vmatpush1.bf16.msra.mxu0 %v630_v59 }
  0xa6   : > { %2179 = vrot.lane.b32.xlu0 %v7447_v15, %s7341_s6  ;;  %v604_v61 = vpop.permute.xlu1 %603  ;;  %v636_v0 = vsel %vm398_vm1, %v612_v60, 0 }
  0xa7   : > { %7011 = vmatmul.mubr.msk.bf16.vlgmr.msra.gmra.mrb[8].mxu1 %vm394_vm2, %v363_v53  ;;  %v613_v63 = vsel %vm605_vm3, %v602_v57, %v604_v61  ;;  %vm3991_vm3 = vcmask 965632  }
  0xa8   : > { %v808_v62 = vpop.permute.xlu0 %807  ;;  %796 = vmatprep.mubr.bf16.mxu1 %v7333_v7  ;;  %7014 = vmatprep.subr.msk.bf16.mxu1 %vm398_vm1, %v613_v63  ;;  %v7034_v63 = vld [vmem:[%s8886_s0 + $0x8] sm:$0x3] }
  0xa9   : > { %2181 = vrot.lane.b32.xlu1 %v7449_v16, %s7341_s6  ;;  %765 = vmatpush1.bf16.msra.mxu1 %v636_v0 }
  0xaa   : > { %2183 = vrot.lane.b32.xlu0 %v7455_v17, %s7341_s6  ;;  %v810_v1 = vpop.permute.xlu1 %809  ;;  %7013 = vmatmul.mubr.msk.bf16.vlgmr.msra.gmra.mrb[12].mxu0 %vm394_vm2, %v363_v53 }
  0xab   : > { %v826_v3 = vsel %vm825_vm4, %v808_v62, %v810_v1  ;;  %893 = vmatprep.mubr.bf16.mxu0 %v7333_v7 }
  0xac   : > { %v812_v2 = vpop.permute.xlu0 %811  ;;  %v838_v8 = vsel %vm398_vm1, %v826_v3, 0 }
  0xad   : > { %v827_v6 = vsel %vm825_vm4, %v810_v1, %v812_v2  ;;  %2185 = vrot.lane.b32.xlu1 %v7435_v10, %s7341_s6 }
  0xae   : > { %7017 = vmatprep.subr.msk.bf16.mxu0 %vm398_vm1, %v827_v6  ;;  %2187 = vrot.lane.b32.xlu0 %v7443_v14, %s7341_s6  ;;  %v814_v9 = vpop.permute.xlu1 %813 }
  0xaf   : > { %862 = vmatpush1.bf16.msra.mxu0 %v838_v8  ;;  %7015 = vmatmul.mubr.msk.bf16.vlgmr.msra.gmra.mrb[12].mxu1 %vm394_vm2, %v363_v53  ;;  %v828_v13 = vsel %vm825_vm4, %v812_v2, %v814_v9 }
  0xb0   : > { %v816_v12 = vpop.permute.xlu0 %815  ;;  %934 = vmatprep.mubr.bf16.mxu1 %v7333_v7  ;;  %v844_v22 = vsel %vm398_vm1, %v828_v13, 0 }
  0xb1   : > { %v829_v20 = vsel %vm825_vm4, %v814_v9, %v816_v12  ;;  %2189 = vrot.lane.b32.xlu1 %v7457_v18, %s7341_s6 }
  0xb2   : > { %7019 = vmatprep.subr.msk.bf16.mxu1 %vm398_vm1, %v829_v20  ;;  %2191 = vrot.lane.b32.xlu0 %v7463_v19, %s7341_s6  ;;  %v818_v23 = vpop.permute.xlu1 %817 }
  0xb3   : > { %903 = vmatpush1.bf16.msra.mxu1 %v844_v22  ;;  %7018 = vmatmul.mubr.msk.bf16.vlgmr.msra.gmra.mrb[16].mxu0 %vm394_vm2, %v7016_v21  ;;  %v830_v25 = vsel %vm825_vm4, %v816_v12, %v818_v23 }
  0xb4   : > { %v820_v24 = vpop.permute.xlu0 %819  ;;  %975 = vmatprep.mubr.bf16.mxu0 %v7333_v7  ;;  %v850_v27 = vsel %vm398_vm1, %v830_v25, 0 }
  0xb5   : > { %v831_v26 = vsel %vm825_vm4, %v818_v23, %v820_v24  ;;  %2403 = vrot.lane.b32.xlu1 %v7425_v5, %s7342_s9 }
  0xb6   : > { %7021 = vmatprep.subr.msk.bf16.mxu0 %vm398_vm1, %v831_v26  ;;  %2405 = vrot.lane.b32.xlu0 %v7437_v11, %s7342_s9  ;;  %v822_v28 = vpop.permute.xlu1 %821 }
  0xb7   : > { %944 = vmatpush1.bf16.msra.mxu0 %v850_v27  ;;  %7020 = vmatmul.mubr.msk.bf16.vlgmr.msra.gmra.mrb[16].mxu1 %vm394_vm2, %v7016_v21  ;;  %v832_v30 = vsel %vm825_vm4, %v820_v24, %v822_v28 }
  0xb8   : > { %v824_v29 = vpop.permute.xlu0 %823  ;;  %1016 = vmatprep.mubr.bf16.mxu1 %v7333_v7  ;;  %v856_v32 = vsel %vm398_vm1, %v832_v30, 0 }
  0xb9   : > { %v833_v31 = vsel %vm825_vm4, %v822_v28, %v824_v29  ;;  %2407 = vrot.lane.b32.xlu1 %v7447_v15, %s7342_s9  ;;  %vm4219_vm4 = vcmask 957440  }
  0xba   : > { %7023 = vmatprep.subr.msk.bf16.mxu1 %vm398_vm1, %v833_v31  ;;  %2409 = vrot.lane.b32.xlu0 %v7449_v16, %s7342_s9  ;;  %v1036_v33 = vpop.permute.xlu1 %1035  ;;  %v7043_v31 = vld [vmem:[%s8886_s0 + $0xa] sm:$0x3] }
  0xbb   : > { %985 = vmatpush1.bf16.msra.mxu1 %v856_v32  ;;  %7022 = vmatmul.mubr.msk.bf16.vlgmr.msra.gmra.mrb[20].mxu0 %vm394_vm2, %v7016_v21 }
  0xbc   : > { %v1038_v34 = vpop.permute.xlu0 %1037  ;;  %1121 = vmatprep.mubr.bf16.mxu0 %v7333_v7 }
  0xbd   : > { %2411 = vrot.lane.b32.xlu1 %v7455_v17, %s7342_s9  ;;  %v1054_v35 = vsel %vm1053_vm5, %v1036_v33, %v1038_v34 }
  0xbe   : > { %2413 = vrot.lane.b32.xlu0 %v7435_v10, %s7342_s9  ;;  %v1040_v36 = vpop.permute.xlu1 %1039  ;;  %v1066_v39 = vsel %vm398_vm1, %v1054_v35, 0 }
  0xbf   : > { %7024 = vmatmul.mubr.msk.bf16.vlgmr.msra.gmra.mrb[20].mxu1 %vm394_vm2, %v7016_v21  ;;  %v1055_v38 = vsel %vm1053_vm5, %v1038_v34, %v1040_v36 }
  0xc0   : > { %v1042_v37 = vpop.permute.xlu0 %1041  ;;  %1162 = vmatprep.mubr.bf16.mxu1 %v7333_v7  ;;  %7026 = vmatprep.subr.msk.bf16.mxu0 %vm398_vm1, %v1055_v38 }
  0xc1   : > { %2415 = vrot.lane.b32.xlu1 %v7443_v14, %s7342_s9  ;;  %1090 = vmatpush1.bf16.msra.mxu0 %v1066_v39  ;;  %v1056_v41 = vsel %vm1053_vm5, %v1040_v36, %v1042_v37 }
  0xc2   : > { %2417 = vrot.lane.b32.xlu0 %v7457_v18, %s7342_s9  ;;  %v1044_v42 = vpop.permute.xlu1 %1043  ;;  %v1072_v45 = vsel %vm398_vm1, %v1056_v41, 0 }
  0xc3   : > { %v1057_v44 = vsel %vm1053_vm5, %v1042_v37, %v1044_v42 }
  0xc4   : > { %v1046_v43 = vpop.permute.xlu0 %1045  ;;  %7027 = vmatmul.mubr.msk.bf16.vlgmr.msra.gmra.mrb[24].mxu0 %vm394_vm2, %v7025_v40  ;;  %7028 = vmatprep.subr.msk.bf16.mxu1 %vm398_vm1, %v1057_v44 }
  0xc5   : > { %2419 = vrot.lane.b32.xlu1 %v7463_v19, %s7342_s9  ;;  %v1058_v46 = vsel %vm1053_vm5, %v1044_v42, %v1046_v43  ;;  %1131 = vmatpush1.bf16.msra.mxu1 %v1072_v45 }
  0xc6   : > { %2631 = vrot.lane.b32.xlu0 %v7425_v5, %s7343_s12  ;;  %v1048_v47 = vpop.permute.xlu1 %1047  ;;  %1203 = vmatprep.mubr.bf16.mxu0 %v7333_v7  ;;  %v1078_v50 = vsel %vm398_vm1, %v1058_v46, 0 }
  0xc7   : > { %v1059_v49 = vsel %vm1053_vm5, %v1046_v43, %v1048_v47 }
  0xc8   : > { %v1050_v48 = vpop.permute.xlu0 %1049  ;;  %7030 = vmatprep.subr.msk.bf16.mxu0 %vm398_vm1, %v1059_v49  ;;  %7029 = vmatmul.mubr.msk.bf16.vlgmr.msra.gmra.mrb[24].mxu1 %vm394_vm2, %v7025_v40 }
  0xc9   : > { %2633 = vrot.lane.b32.xlu1 %v7437_v11, %s7343_s12  ;;  %v1060_v51 = vsel %vm1053_vm5, %v1048_v47, %v1050_v48  ;;  %1172 = vmatpush1.bf16.msra.mxu0 %v1078_v50 }
  0xca   : > { %2635 = vrot.lane.b32.xlu0 %v7447_v15, %s7343_s12  ;;  %v1052_v52 = vpop.permute.xlu1 %1051  ;;  %1244 = vmatprep.mubr.bf16.mxu1 %v7333_v7  ;;  %v1084_v55 = vsel %vm398_vm1, %v1060_v51, 0 }
  0xcb   : > { %v1061_v54 = vsel %vm1053_vm5, %v1050_v48, %v1052_v52  ;;  %vm4447_vm5 = vcmask 318464  }
  0xcc   : > { %v1264_v53 = vpop.permute.xlu0 %1263  ;;  %7032 = vmatprep.subr.msk.bf16.mxu1 %vm398_vm1, %v1061_v54  ;;  %7031 = vmatmul.mubr.msk.bf16.vlgmr.msra.gmra.mrb[28].mxu0 %vm394_vm2, %v7025_v40 }
  0xcd   : > { %2637 = vrot.lane.b32.xlu1 %v7449_v16, %s7343_s12  ;;  %1213 = vmatpush1.bf16.msra.mxu1 %v1084_v55 }
  0xce   : > { %2639 = vrot.lane.b32.xlu0 %v7455_v17, %s7343_s12  ;;  %v1266_v56 = vpop.permute.xlu1 %1265  ;;  %1349 = vmatprep.mubr.bf16.mxu0 %v7333_v7 }
  0xcf   : > { %v1282_v58 = vsel %vm1281_vm6, %v1264_v53, %v1266_v56  ;;  %v7052_v53 = vld [vmem:[%s8886_s0 + $0xc] sm:$0x3] }
  0xd0   : > { %v1268_v57 = vpop.permute.xlu0 %1267  ;;  %v1294_v60 = vsel %vm398_vm1, %v1282_v58, 0  ;;  %7033 = vmatmul.mubr.msk.bf16.vlgmr.msra.gmra.mrb[28].mxu1 %vm394_vm2, %v7025_v40 }
  0xd1   : > { %v1283_v59 = vsel %vm1281_vm6, %v1266_v56, %v1268_v57  ;;  %2641 = vrot.lane.b32.xlu1 %v7435_v10, %s7343_s12  ;;  %1390 = vmatprep.mubr.bf16.mxu1 %v7333_v7 }
  0xd2   : > { %7035 = vmatprep.subr.msk.bf16.mxu0 %vm398_vm1, %v1283_v59  ;;  %2643 = vrot.lane.b32.xlu0 %v7443_v14, %s7343_s12  ;;  %v1270_v61 = vpop.permute.xlu1 %1269 }
  0xd3   : > { %1318 = vmatpush1.bf16.msra.mxu0 %v1294_v60  ;;  %v1284_v0 = vsel %vm1281_vm6, %v1268_v57, %v1270_v61 }
  0xd4   : > { %v1272_v62 = vpop.permute.xlu0 %1271  ;;  %v1300_v2 = vsel %vm398_vm1, %v1284_v0, 0 }
  0xd5   : > { %v1285_v1 = vsel %vm1281_vm6, %v1270_v61, %v1272_v62  ;;  %2645 = vrot.lane.b32.xlu1 %v7457_v18, %s7343_s12 }
  0xd6   : > { %7037 = vmatprep.subr.msk.bf16.mxu1 %vm398_vm1, %v1285_v1  ;;  %2647 = vrot.lane.b32.xlu0 %v7463_v19, %s7343_s12  ;;  %v1274_v3 = vpop.permute.xlu1 %1273 }
  0xd7   : > { %7036 = vmatmul.mubr.msk.bf16.vlgmr.msra.gmra.mrb[32].mxu0 %vm394_vm2, %v7034_v63  ;;  %1359 = vmatpush1.bf16.msra.mxu1 %v1300_v2  ;;  %v1286_v8 = vsel %vm1281_vm6, %v1272_v62, %v1274_v3 }
  0xd8   : > { %v1276_v6 = vpop.permute.xlu0 %1275  ;;  %1431 = vmatprep.mubr.bf16.mxu0 %v7333_v7  ;;  %v1306_v12 = vsel %vm398_vm1, %v1286_v8, 0 }
  0xd9   : > { %v1287_v9 = vsel %vm1281_vm6, %v1274_v3, %v1276_v6  ;;  %2859 = vrot.lane.b32.xlu1 %v7425_v5, %s7344_s15 }
  0xda   : > { %7039 = vmatprep.subr.msk.bf16.mxu0 %vm398_vm1, %v1287_v9  ;;  %2861 = vrot.lane.b32.xlu0 %v7437_v11, %s7344_s15  ;;  %v1278_v13 = vpop.permute.xlu1 %1277 }
  0xdb   : > { %7038 = vmatmul.mubr.msk.bf16.vlgmr.msra.gmra.mrb[32].mxu1 %vm394_vm2, %v7034_v63  ;;  %1400 = vmatpush1.bf16.msra.mxu0 %v1306_v12  ;;  %v1288_v21 = vsel %vm1281_vm6, %v1276_v6, %v1278_v13 }
  0xdc   : > { %v1280_v20 = vpop.permute.xlu0 %1279  ;;  %1472 = vmatprep.mubr.bf16.mxu1 %v7333_v7  ;;  %v1312_v23 = vsel %vm398_vm1, %v1288_v21, 0  ;;  %v7846_v21 = vld [vmem:[%s7835_s24] sm:$0x3] }
  0xdd   : > { %v1289_v22 = vsel %vm1281_vm6, %v1278_v13, %v1280_v20  ;;  %2863 = vrot.lane.b32.xlu1 %v7447_v15, %s7344_s15  ;;  %vm4675_vm6 = vcmask 310272  }
  0xde   : > { %7041 = vmatprep.subr.msk.bf16.mxu1 %vm398_vm1, %v1289_v22  ;;  %2865 = vrot.lane.b32.xlu0 %v7449_v16, %s7344_s15  ;;  %v1492_v24 = vpop.permute.xlu1 %1491  ;;  %v7061_v22 = vld [vmem:[%s8886_s0 + $0xe] sm:$0x3] }
  0xdf   : > { %7040 = vmatmul.mubr.msk.bf16.vlgmr.msra.gmra.mrb[36].mxu0 %vm394_vm2, %v7034_v63  ;;  %1441 = vmatpush1.bf16.msra.mxu1 %v1312_v23 }
  0xe0   : > { %v1494_v25 = vpop.permute.xlu0 %1493  ;;  %1577 = vmatprep.mubr.bf16.mxu0 %v7333_v7 }
  0xe1   : > { %2867 = vrot.lane.b32.xlu1 %v7455_v17, %s7344_s15  ;;  %v1510_v26 = vsel %vm1509_vm7, %v1492_v24, %v1494_v25 }
  0xe2   : > { %2869 = vrot.lane.b32.xlu0 %v7435_v10, %s7344_s15  ;;  %v1496_v27 = vpop.permute.xlu1 %1495  ;;  %v1522_v30 = vsel %vm398_vm1, %v1510_v26, 0 }
  0xe3   : > { %7042 = vmatmul.mubr.msk.bf16.vlgmr.msra.gmra.mrb[36].mxu1 %vm394_vm2, %v7034_v63  ;;  %v1511_v29 = vsel %vm1509_vm7, %v1494_v25, %v1496_v27 }
  0xe4   : > { %v1498_v28 = vpop.permute.xlu0 %1497  ;;  %1618 = vmatprep.mubr.bf16.mxu1 %v7333_v7  ;;  %7044 = vmatprep.subr.msk.bf16.mxu0 %vm398_vm1, %v1511_v29 }
  0xe5   : > { %2871 = vrot.lane.b32.xlu1 %v7443_v14, %s7344_s15  ;;  %1546 = vmatpush1.bf16.msra.mxu0 %v1522_v30  ;;  %v1512_v32 = vsel %vm1509_vm7, %v1496_v27, %v1498_v28 }
  0xe6   : > { %2873 = vrot.lane.b32.xlu0 %v7457_v18, %s7344_s15  ;;  %v1500_v33 = vpop.permute.xlu1 %1499  ;;  %v1528_v36 = vsel %vm398_vm1, %v1512_v32, 0 }
  0xe7   : > { %v1513_v35 = vsel %vm1509_vm7, %v1498_v28, %v1500_v33 }
  0xe8   : > { %v1502_v34 = vpop.permute.xlu0 %1501  ;;  %7045 = vmatmul.mubr.msk.bf16.vlgmr.msra.gmra.mrb[40].mxu0 %vm394_vm2, %v7043_v31  ;;  %7046 = vmatprep.subr.msk.bf16.mxu1 %vm398_vm1, %v1513_v35 }
  0xe9   : > { %2875 = vrot.lane.b32.xlu1 %v7463_v19, %s7344_s15  ;;  %v1514_v37 = vsel %vm1509_vm7, %v1500_v33, %v1502_v34  ;;  %1587 = vmatpush1.bf16.msra.mxu1 %v1528_v36  ;;  %s6542_s15 = sld [smem:[#allocation2]] }
  0xea   : > { %3087 = vrot.lane.b32.xlu0 %v7425_v5, %s7345_s18  ;;  %v1504_v38 = vpop.permute.xlu1 %1503  ;;  %1659 = vmatprep.mubr.bf16.mxu0 %v7333_v7  ;;  %v1534_v5 = vsel %vm398_vm1, %v1514_v37, 0 }
  0xeb   : > { %v1515_v40 = vsel %vm1509_vm7, %v1502_v34, %v1504_v38 }
  0xec   : > { %v1506_v39 = vpop.permute.xlu0 %1505  ;;  %7048 = vmatprep.subr.msk.bf16.mxu0 %vm398_vm1, %v1515_v40  ;;  %7047 = vmatmul.mubr.msk.bf16.vlgmr.msra.gmra.mrb[40].mxu1 %vm394_vm2, %v7043_v31 }
  0xed   : > { %3089 = vrot.lane.b32.xlu1 %v7437_v11, %s7345_s18  ;;  %v1516_v41 = vsel %vm1509_vm7, %v1504_v38, %v1506_v39  ;;  %1628 = vmatpush1.bf16.msra.mxu0 %v1534_v5 }
  0xee   : > { %3091 = vrot.lane.b32.xlu0 %v7447_v15, %s7345_s18  ;;  %v1508_v42 = vpop.permute.xlu1 %1507  ;;  %1700 = vmatprep.mubr.bf16.mxu1 %v7333_v7  ;;  %v1540_v45 = vsel %vm398_vm1, %v1516_v41, 0 }
  0xef   : > { %v1517_v44 = vsel %vm1509_vm7, %v1506_v39, %v1508_v42  ;;  %vm4903_vm7 = vcmask 302080  }
  0xf0   : > { %v1720_v43 = vpop.permute.xlu0 %1719  ;;  %7050 = vmatprep.subr.msk.bf16.mxu1 %vm398_vm1, %v1517_v44  ;;  %7049 = vmatmul.mubr.msk.bf16.vlgmr.msra.gmra.mrb[44].mxu0 %vm394_vm2, %v7043_v31 }
  0xf1   : > { %3093 = vrot.lane.b32.xlu1 %v7449_v16, %s7345_s18  ;;  %1669 = vmatpush1.bf16.msra.mxu1 %v1540_v45  ;;  %v7070_v45 = vld [vmem:[%s8886_s0 + $0x10] sm:$0x3] }
  0xf2   : > { %3095 = vrot.lane.b32.xlu0 %v7455_v17, %s7345_s18  ;;  %v1722_v46 = vpop.permute.xlu1 %1721  ;;  %1805 = vmatprep.mubr.bf16.mxu0 %v7333_v7 }
  0xf3   : > { %v1738_v48 = vsel %vm1737_vm8, %v1720_v43, %v1722_v46 }
  0xf4   : > { %v1724_v47 = vpop.permute.xlu0 %1723  ;;  %v1750_v50 = vsel %vm398_vm1, %v1738_v48, 0  ;;  %7051 = vmatmul.mubr.msk.bf16.vlgmr.msra.gmra.mrb[44].mxu1 %vm394_vm2, %v7043_v31 }
  0xf5   : > { %v1739_v49 = vsel %vm1737_vm8, %v1722_v46, %v1724_v47  ;;  %3097 = vrot.lane.b32.xlu1 %v7435_v10, %s7345_s18  ;;  %1846 = vmatprep.mubr.bf16.mxu1 %v7333_v7 }
  0xf6   : > { %7053 = vmatprep.subr.msk.bf16.mxu0 %vm398_vm1, %v1739_v49  ;;  %3099 = vrot.lane.b32.xlu0 %v7443_v14, %s7345_s18  ;;  %v1726_v51 = vpop.permute.xlu1 %1725 }
  0xf7   : > { %1774 = vmatpush1.bf16.msra.mxu0 %v1750_v50  ;;  %v1740_v54 = vsel %vm1737_vm8, %v1724_v47, %v1726_v51 }
  0xf8   : > { %v1728_v52 = vpop.permute.xlu0 %1727  ;;  %v1756_v56 = vsel %vm398_vm1, %v1740_v54, 0 }
  0xf9   : > { %v1741_v55 = vsel %vm1737_vm8, %v1726_v51, %v1728_v52  ;;  %3101 = vrot.lane.b32.xlu1 %v7457_v18, %s7345_s18 }
  0xfa   : > { %7055 = vmatprep.subr.msk.bf16.mxu1 %vm398_vm1, %v1741_v55  ;;  %3103 = vrot.lane.b32.xlu0 %v7463_v19, %s7345_s18  ;;  %v1730_v57 = vpop.permute.xlu1 %1729  ;;  %s7358_s18 = smov 17  }
  0xfb   : > { %7054 = vmatmul.mubr.msk.bf16.vlgmr.msra.gmra.mrb[48].mxu0 %vm394_vm2, %v7052_v53  ;;  %1815 = vmatpush1.bf16.msra.mxu1 %v1756_v56  ;;  %v1742_v59 = vsel %vm1737_vm8, %v1728_v52, %v1730_v57 }
  0xfc   : > { %v1732_v58 = vpop.permute.xlu0 %1731  ;;  %1887 = vmatprep.mubr.bf16.mxu0 %v7333_v7  ;;  %v1762_v61 = vsel %vm398_vm1, %v1742_v59, 0 }
  0xfd   : > { %v1743_v60 = vsel %vm1737_vm8, %v1730_v57, %v1732_v58  ;;  %3517 = vrot.lane.b32.xlu1 %v7437_v11, %s7346_s21 }
  0xfe   : > { %7057 = vmatprep.subr.msk.bf16.mxu0 %vm398_vm1, %v1743_v60  ;;  %3519 = vrot.lane.b32.xlu0 %v7447_v15, %s7346_s21  ;;  %v1734_v62 = vpop.permute.xlu1 %1733 }
  0xff   : > { %7056 = vmatmul.mubr.msk.bf16.vlgmr.msra.gmra.mrb[48].mxu1 %vm394_vm2, %v7052_v53  ;;  %1856 = vmatpush1.bf16.msra.mxu0 %v1762_v61  ;;  %v1744_v63 = vsel %vm1737_vm8, %v1732_v58, %v1734_v62 }
 0x100   : > { %1928 = vmatprep.mubr.bf16.mxu1 %v7333_v7  ;;  %v1736_v0 = vpop.permute.xlu0 %1735  ;;  %v1768_v2 = vsel %vm398_vm1, %v1744_v63, 0 }
 0x101   : > { %v1745_v1 = vsel %vm1737_vm8, %v1734_v62, %v1736_v0  ;;  %3521 = vrot.lane.b32.xlu1 %v7449_v16, %s7346_s21  ;;  %vm5131_vm8 = vcmask 236544  }
 0x102   : > { %3523 = vrot.lane.b32.xlu0 %v7455_v17, %s7346_s21  ;;  %7059 = vmatprep.subr.msk.bf16.mxu1 %vm398_vm1, %v1745_v1  ;;  %v1948_v3 = vpop.permute.xlu1 %1947  ;;  %v7079_v1 = vld [vmem:[%s8886_s0 + $0x12] sm:$0x3] }
 0x103   : > { %7058 = vmatmul.mubr.msk.bf16.vlgmr.msra.gmra.mrb[52].mxu0 %vm394_vm2, %v7052_v53  ;;  %1897 = vmatpush1.bf16.msra.mxu1 %v1768_v2 }
 0x104   : > { %2033 = vmatprep.mubr.bf16.mxu0 %v7333_v7  ;;  %v1950_v6 = vpop.permute.xlu0 %1949 }
 0x105   : > { %3525 = vrot.lane.b32.xlu1 %v7435_v10, %s7346_s21  ;;  %v1966_v8 = vsel %vm1965_vm9, %v1948_v3, %v1950_v6 }
 0x106   : > { %3527 = vrot.lane.b32.xlu0 %v7443_v14, %s7346_s21  ;;  %v1952_v9 = vpop.permute.xlu1 %1951  ;;  %v1978_v20 = vsel %vm398_vm1, %v1966_v8, 0 }
 0x107   : > { %7060 = vmatmul.mubr.msk.bf16.vlgmr.msra.gmra.mrb[52].mxu1 %vm394_vm2, %v7052_v53  ;;  %v1967_v13 = vsel %vm1965_vm9, %v1950_v6, %v1952_v9 }
 0x108   : > { %v1954_v12 = vpop.permute.xlu0 %1953  ;;  %2074 = vmatprep.mubr.bf16.mxu1 %v7333_v7  ;;  %7062 = vmatprep.subr.msk.bf16.mxu0 %vm398_vm1, %v1967_v13 }
 0x109   : > { %3529 = vrot.lane.b32.xlu1 %v7457_v18, %s7346_s21  ;;  %2002 = vmatpush1.bf16.msra.mxu0 %v1978_v20  ;;  %v1968_v23 = vsel %vm1965_vm9, %v1952_v9, %v1954_v12 }
 0x10a   : > { %3531 = vrot.lane.b32.xlu0 %v7463_v19, %s7346_s21  ;;  %v1984_v27 = vsel %vm398_vm1, %v1968_v23, 0 }
 0x10b   : > { %v1956_v24 = vpop.permute.xlu1 %1955 }
 0x10c   : > { %v1958_v25 = vpop.permute.xlu0 %1957  ;;  %v1969_v26 = vsel %vm1965_vm9, %v1954_v12, %v1956_v24  ;;  %7063 = vmatmul.mubr.msk.bf16.vlgmr.msra.gmra.mrb[56].mxu0 %vm394_vm2, %v7061_v22 }
 0x10d   : > { %3533 = vrot.lane.b32.xlu1 %v7846_v21, %s7346_s21  ;;  %7064 = vmatprep.subr.msk.bf16.mxu1 %vm398_vm1, %v1969_v26  ;;  %v1970_v28 = vsel %vm1965_vm9, %v1956_v24, %v1958_v25 }
 0x10e   : > { %3745 = vrot.lane.b32.xlu0 %v7437_v11, %s7347_s25  ;;  %2043 = vmatpush1.bf16.msra.mxu1 %v1984_v27  ;;  %v1990_v32 = vsel %vm398_vm1, %v1970_v28, 0 }
 0x10f   : > { %v1960_v29 = vpop.permute.xlu1 %1959  ;;  %2115 = vmatprep.mubr.bf16.mxu0 %v7333_v7 }
 0x110   : > { %v1962_v30 = vpop.permute.xlu0 %1961  ;;  %v1971_v31 = vsel %vm1965_vm9, %v1958_v25, %v1960_v29 }
 0x111   : > { %3747 = vrot.lane.b32.xlu1 %v7447_v15, %s7347_s25  ;;  %7066 = vmatprep.subr.msk.bf16.mxu0 %vm398_vm1, %v1971_v31  ;;  %v1972_v33 = vsel %vm1965_vm9, %v1960_v29, %v1962_v30 }
 0x112   : > { %3749 = vrot.lane.b32.xlu0 %v7449_v16, %s7347_s25  ;;  %7065 = vmatmul.mubr.msk.bf16.vlgmr.msra.gmra.mrb[56].mxu1 %vm394_vm2, %v7061_v22  ;;  %v1996_v37 = vsel %vm398_vm1, %v1972_v33, 0 }
 0x113   : > { %2084 = vmatpush1.bf16.msra.mxu0 %v1990_v32  ;;  %v1964_v34 = vpop.permute.xlu1 %1963  ;;  %2156 = vmatprep.mubr.bf16.mxu1 %v7333_v7 }
 0x114   : > { %v1973_v35 = vsel %vm1965_vm9, %v1962_v30, %v1964_v34  ;;  %v2176_v36 = vpop.permute.xlu0 %2175  ;;  %vm5359_vm9 = vcmask 228352  }
 0x115   : > { %3751 = vrot.lane.b32.xlu1 %v7455_v17, %s7347_s25  ;;  %7068 = vmatprep.subr.msk.bf16.mxu1 %vm398_vm1, %v1973_v35 }
 0x116   : > { %3753 = vrot.lane.b32.xlu0 %v7435_v10, %s7347_s25  ;;  %7067 = vmatmul.mubr.msk.bf16.vlgmr.msra.gmra.mrb[60].mxu0 %vm394_vm2, %v7061_v22 }
 0x117   : > { %2125 = vmatpush1.bf16.msra.mxu1 %v1996_v37  ;;  %v2178_v38 = vpop.permute.xlu1 %2177  ;;  %2261 = vmatprep.mubr.bf16.mxu0 %v7333_v7  ;;  %v7088_v37 = vld [vmem:[%s8886_s0 + $0x14] sm:$0x3] }
 0x118   : > { %v2194_v39 = vsel %vm2193_vm10, %v2176_v36, %v2178_v38  ;;  %v2180_v40 = vpop.permute.xlu0 %2179 }
 0x119   : > { %3755 = vrot.lane.b32.xlu1 %v7443_v14, %s7347_s25  ;;  %v2195_v5 = vsel %vm2193_vm10, %v2178_v38, %v2180_v40  ;;  %v2206_v41 = vsel %vm398_vm1, %v2194_v39, 0 }
 0x11a   : > { %3757 = vrot.lane.b32.xlu0 %v7457_v18, %s7347_s25  ;;  %7069 = vmatmul.mubr.msk.bf16.vlgmr.msra.gmra.mrb[60].mxu1 %vm394_vm2, %v7061_v22 }
 0x11b   : > { %7071 = vmatprep.subr.msk.bf16.mxu0 %vm398_vm1, %v2195_v5  ;;  %v2182_v42 = vpop.permute.xlu1 %2181  ;;  %2302 = vmatprep.mubr.bf16.mxu1 %v7333_v7 }
 0x11c   : > { %2230 = vmatpush1.bf16.msra.mxu0 %v2206_v41  ;;  %v2196_v43 = vsel %vm2193_vm10, %v2180_v40, %v2182_v42  ;;  %v2184_v44 = vpop.permute.xlu0 %2183 }
 0x11d   : > { %3759 = vrot.lane.b32.xlu1 %v7463_v19, %s7347_s25  ;;  %v2197_v46 = vsel %vm2193_vm10, %v2182_v42, %v2184_v44  ;;  %v2212_v47 = vsel %vm398_vm1, %v2196_v43, 0 }
 0x11e   : > { %3761 = vrot.lane.b32.xlu0 %v7846_v21, %s7347_s25  ;;  %7073 = vmatprep.subr.msk.bf16.mxu1 %vm398_vm1, %v2197_v46  ;;  %s7354_s25 = smov 28  }
 0x11f   : > { %7072 = vmatmul.mubr.msk.bf16.vlgmr.msra.gmra.mrb[64].mxu0 %vm394_vm2, %v7070_v45  ;;  %2271 = vmatpush1.bf16.msra.mxu1 %v2212_v47  ;;  %v2186_v48 = vpop.permute.xlu1 %2185 }
 0x120   : > { %v2198_v49 = vsel %vm2193_vm10, %v2184_v44, %v2186_v48  ;;  %v2188_v50 = vpop.permute.xlu0 %2187  ;;  %2343 = vmatprep.mubr.bf16.mxu0 %v7333_v7 }
 0x121   : > { %3973 = vrot.lane.b32.xlu1 %v7437_v11, %s7348_s8  ;;  %v2199_v51 = vsel %vm2193_vm10, %v2186_v48, %v2188_v50  ;;  %v2218_v52 = vsel %vm398_vm1, %v2198_v49, 0 }
 0x122   : > { %3975 = vrot.lane.b32.xlu0 %v7447_v15, %s7348_s8  ;;  %7074 = vmatmul.mubr.msk.bf16.vlgmr.msra.gmra.mrb[64].mxu1 %vm394_vm2, %v7070_v45 }
 0x123   : > { %7075 = vmatprep.subr.msk.bf16.mxu0 %vm398_vm1, %v2199_v51  ;;  %v2190_v53 = vpop.permute.xlu1 %2189  ;;  %2384 = vmatprep.mubr.bf16.mxu1 %v7333_v7 }
 0x124   : > { %2312 = vmatpush1.bf16.msra.mxu0 %v2218_v52  ;;  %v2200_v54 = vsel %vm2193_vm10, %v2188_v50, %v2190_v53  ;;  %v2192_v55 = vpop.permute.xlu0 %2191 }
 0x125   : > { %v2201_v56 = vsel %vm2193_vm10, %v2190_v53, %v2192_v55  ;;  %3977 = vrot.lane.b32.xlu1 %v7449_v16, %s7348_s8  ;;  %v2224_v57 = vsel %vm398_vm1, %v2200_v54, 0  ;;  %vm5587_vm10 = vcmask 220160  }
 0x126   : > { %3979 = vrot.lane.b32.xlu0 %v7455_v17, %s7348_s8  ;;  %7077 = vmatprep.subr.msk.bf16.mxu1 %vm398_vm1, %v2201_v56  ;;  %v7097_v56 = vld [vmem:[%s8886_s0 + $0x16] sm:$0x3] }
 0x127   : > { %7076 = vmatmul.mubr.msk.bf16.vlgmr.msra.gmra.mrb[68].mxu0 %vm394_vm2, %v7070_v45  ;;  %2353 = vmatpush1.bf16.msra.mxu1 %v2224_v57  ;;  %v2404_v58 = vpop.permute.xlu1 %2403 }
 0x128   : > { %v2406_v59 = vpop.permute.xlu0 %2405  ;;  %2489 = vmatprep.mubr.bf16.mxu0 %v7333_v7 }
 0x129   : > { %3981 = vrot.lane.b32.xlu1 %v7435_v10, %s7348_s8  ;;  %v2422_v60 = vsel %vm2421_vm11, %v2404_v58, %v2406_v59 }
 0x12a   : > { %3983 = vrot.lane.b32.xlu0 %v7443_v14, %s7348_s8  ;;  %7078 = vmatmul.mubr.msk.bf16.vlgmr.msra.gmra.mrb[68].mxu1 %vm394_vm2, %v7070_v45  ;;  %v2434_v0 = vsel %vm398_vm1, %v2422_v60, 0 }
 0x12b   : > { %v2408_v61 = vpop.permute.xlu1 %2407  ;;  %2530 = vmatprep.mubr.bf16.mxu1 %v7333_v7 }
 0x12c   : > { %v2410_v62 = vpop.permute.xlu0 %2409  ;;  %v2423_v63 = vsel %vm2421_vm11, %v2406_v59, %v2408_v61 }
 0x12d   : > { %3985 = vrot.lane.b32.xlu1 %v7457_v18, %s7348_s8  ;;  %7080 = vmatprep.subr.msk.bf16.mxu0 %vm398_vm1, %v2423_v63  ;;  %v2424_v2 = vsel %vm2421_vm11, %v2408_v61, %v2410_v62 }
 0x12e   : > { %3987 = vrot.lane.b32.xlu0 %v7463_v19, %s7348_s8  ;;  %2458 = vmatpush1.bf16.msra.mxu0 %v2434_v0  ;;  %v2440_v9 = vsel %vm398_vm1, %v2424_v2, 0 }
 0x12f   : > { %v2412_v3 = vpop.permute.xlu1 %2411 }
 0x130   : > { %v2414_v6 = vpop.permute.xlu0 %2413  ;;  %v2425_v8 = vsel %vm2421_vm11, %v2410_v62, %v2412_v3 }
 0x131   : > { %3989 = vrot.lane.b32.xlu1 %v7846_v21, %s7348_s8  ;;  %7081 = vmatmul.mubr.msk.bf16.vlgmr.msra.gmra.mrb[72].mxu0 %vm394_vm2, %v7079_v1  ;;  %v2426_v12 = vsel %vm2421_vm11, %v2412_v3, %v2414_v6  ;;  %s7355_s8 = smov 27  }
 0x132   : > { %4201 = vrot.lane.b32.xlu0 %v7437_v11, %s7349_s11  ;;  %7082 = vmatprep.subr.msk.bf16.mxu1 %vm398_vm1, %v2425_v8  ;;  %v2446_v23 = vsel %vm398_vm1, %v2426_v12, 0 }
 0x133   : > { %2499 = vmatpush1.bf16.msra.mxu1 %v2440_v9  ;;  %v2416_v13 = vpop.permute.xlu1 %2415  ;;  %2571 = vmatprep.mubr.bf16.mxu0 %v7333_v7 }
 0x134   : > { %v2418_v20 = vpop.permute.xlu0 %2417  ;;  %v2427_v22 = vsel %vm2421_vm11, %v2414_v6, %v2416_v13 }
 0x135   : > { %4203 = vrot.lane.b32.xlu1 %v7447_v15, %s7349_s11  ;;  %7084 = vmatprep.subr.msk.bf16.mxu0 %vm398_vm1, %v2427_v22  ;;  %v2428_v24 = vsel %vm2421_vm11, %v2416_v13, %v2418_v20 }
 0x136   : > { %4205 = vrot.lane.b32.xlu0 %v7449_v16, %s7349_s11  ;;  %7083 = vmatmul.mubr.msk.bf16.vlgmr.msra.gmra.mrb[72].mxu1 %vm394_vm2, %v7079_v1  ;;  %v2452_v28 = vsel %vm398_vm1, %v2428_v24, 0 }
 0x137   : > { %2540 = vmatpush1.bf16.msra.mxu0 %v2446_v23  ;;  %v2420_v25 = vpop.permute.xlu1 %2419  ;;  %2612 = vmatprep.mubr.bf16.mxu1 %v7333_v7 }
 0x138   : > { %v2429_v26 = vsel %vm2421_vm11, %v2418_v20, %v2420_v25  ;;  %v2632_v27 = vpop.permute.xlu0 %2631  ;;  %vm5815_vm11 = vcmask 154624  }
 0x139   : > { %4207 = vrot.lane.b32.xlu1 %v7455_v17, %s7349_s11  ;;  %7086 = vmatprep.subr.msk.bf16.mxu1 %vm398_vm1, %v2429_v26 }
 0x13a   : > { %4209 = vrot.lane.b32.xlu0 %v7435_v10, %s7349_s11  ;;  %7085 = vmatmul.mubr.msk.bf16.vlgmr.msra.gmra.mrb[76].mxu0 %vm394_vm2, %v7079_v1 }
 0x13b   : > { %2581 = vmatpush1.bf16.msra.mxu1 %v2452_v28  ;;  %v2634_v29 = vpop.permute.xlu1 %2633  ;;  %2717 = vmatprep.mubr.bf16.mxu0 %v7333_v7  ;;  %v7106_v28 = vld [vmem:[%s8886_s0 + $0x18] sm:$0x3] }
 0x13c   : > { %v2650_v30 = vsel %vm2649_vm12, %v2632_v27, %v2634_v29  ;;  %v2636_v31 = vpop.permute.xlu0 %2635 }
 0x13d   : > { %4211 = vrot.lane.b32.xlu1 %v7443_v14, %s7349_s11  ;;  %v2651_v32 = vsel %vm2649_vm12, %v2634_v29, %v2636_v31  ;;  %v2662_v33 = vsel %vm398_vm1, %v2650_v30, 0 }
 0x13e   : > { %4213 = vrot.lane.b32.xlu0 %v7457_v18, %s7349_s11  ;;  %7087 = vmatmul.mubr.msk.bf16.vlgmr.msra.gmra.mrb[76].mxu1 %vm394_vm2, %v7079_v1 }
 0x13f   : > { %7089 = vmatprep.subr.msk.bf16.mxu0 %vm398_vm1, %v2651_v32  ;;  %v2638_v34 = vpop.permute.xlu1 %2637  ;;  %2758 = vmatprep.mubr.bf16.mxu1 %v7333_v7 }
 0x140   : > { %2686 = vmatpush1.bf16.msra.mxu0 %v2662_v33  ;;  %v2652_v35 = vsel %vm2649_vm12, %v2636_v31, %v2638_v34  ;;  %v2640_v36 = vpop.permute.xlu0 %2639 }
 0x141   : > { %4215 = vrot.lane.b32.xlu1 %v7463_v19, %s7349_s11  ;;  %v2653_v38 = vsel %vm2649_vm12, %v2638_v34, %v2640_v36  ;;  %v2668_v39 = vsel %vm398_vm1, %v2652_v35, 0 }
 0x142   : > { %4217 = vrot.lane.b32.xlu0 %v7846_v21, %s7349_s11  ;;  %7091 = vmatprep.subr.msk.bf16.mxu1 %vm398_vm1, %v2653_v38 }
 0x143   : > { %7090 = vmatmul.mubr.msk.bf16.vlgmr.msra.gmra.mrb[80].mxu0 %vm394_vm2, %v7088_v37  ;;  %2727 = vmatpush1.bf16.msra.mxu1 %v2668_v39  ;;  %v2642_v40 = vpop.permute.xlu1 %2641 }
 0x144   : > { %v2654_v5 = vsel %vm2649_vm12, %v2640_v36, %v2642_v40  ;;  %v2644_v41 = vpop.permute.xlu0 %2643  ;;  %2799 = vmatprep.mubr.bf16.mxu0 %v7333_v7 }
 0x145   : > { %4429 = vrot.lane.b32.xlu1 %v7437_v11, %s7350_s14  ;;  %v2655_v42 = vsel %vm2649_vm12, %v2642_v40, %v2644_v41  ;;  %v2674_v43 = vsel %vm398_vm1, %v2654_v5, 0 }
 0x146   : > { %4431 = vrot.lane.b32.xlu0 %v7447_v15, %s7350_s14  ;;  %7092 = vmatmul.mubr.msk.bf16.vlgmr.msra.gmra.mrb[80].mxu1 %vm394_vm2, %v7088_v37 }
 0x147   : > { %7093 = vmatprep.subr.msk.bf16.mxu0 %vm398_vm1, %v2655_v42  ;;  %v2646_v44 = vpop.permute.xlu1 %2645  ;;  %2840 = vmatprep.mubr.bf16.mxu1 %v7333_v7 }
 0x148   : > { %2768 = vmatpush1.bf16.msra.mxu0 %v2674_v43  ;;  %v2656_v45 = vsel %vm2649_vm12, %v2644_v41, %v2646_v44  ;;  %v2648_v46 = vpop.permute.xlu0 %2647 }
 0x149   : > { %v2657_v47 = vsel %vm2649_vm12, %v2646_v44, %v2648_v46  ;;  %4433 = vrot.lane.b32.xlu1 %v7449_v16, %s7350_s14  ;;  %v2680_v48 = vsel %vm398_vm1, %v2656_v45, 0  ;;  %vm6043_vm12 = vcmask 146432  }
 0x14a   : > { %4435 = vrot.lane.b32.xlu0 %v7455_v17, %s7350_s14  ;;  %7095 = vmatprep.subr.msk.bf16.mxu1 %vm398_vm1, %v2657_v47 }
 0x14b   : > { %7094 = vmatmul.mubr.msk.bf16.vlgmr.msra.gmra.mrb[84].mxu0 %vm394_vm2, %v7088_v37  ;;  %2809 = vmatpush1.bf16.msra.mxu1 %v2680_v48  ;;  %v2860_v49 = vpop.permute.xlu1 %2859  ;;  %v3319_v48 = vsel %vm398_vm1, %v7437_v11, 0 }
 0x14c   : > { %v2862_v50 = vpop.permute.xlu0 %2861  ;;  %2945 = vmatprep.mubr.bf16.mxu0 %v7333_v7 }
 0x14d   : > { %4437 = vrot.lane.b32.xlu1 %v7435_v10, %s7350_s14  ;;  %v2878_v51 = vsel %vm2877_vm13, %v2860_v49, %v2862_v50 }
 0x14e   : > { %4439 = vrot.lane.b32.xlu0 %v7443_v14, %s7350_s14  ;;  %7096 = vmatmul.mubr.msk.bf16.vlgmr.msra.gmra.mrb[84].mxu1 %vm394_vm2, %v7088_v37  ;;  %v2890_v55 = vsel %vm398_vm1, %v2878_v51, 0 }
 0x14f   : > { %v2864_v52 = vpop.permute.xlu1 %2863  ;;  %2986 = vmatprep.mubr.bf16.mxu1 %v7333_v7 }
 0x150   : > { %v2866_v53 = vpop.permute.xlu0 %2865  ;;  %v2879_v54 = vsel %vm2877_vm13, %v2862_v50, %v2864_v52 }
 0x151   : > { %4441 = vrot.lane.b32.xlu1 %v7457_v18, %s7350_s14  ;;  %7098 = vmatprep.subr.msk.bf16.mxu0 %vm398_vm1, %v2879_v54  ;;  %v2880_v57 = vsel %vm2877_vm13, %v2864_v52, %v2866_v53  ;;  %v3325_v54 = vsel %vm398_vm1, %v7449_v16, 0 }
 0x152   : > { %4443 = vrot.lane.b32.xlu0 %v7463_v19, %s7350_s14  ;;  %2914 = vmatpush1.bf16.msra.mxu0 %v2890_v55  ;;  %v2896_v61 = vsel %vm398_vm1, %v2880_v57, 0 }
 0x153   : > { %v2868_v58 = vpop.permute.xlu1 %2867 }
 0x154   : > { %v2870_v59 = vpop.permute.xlu0 %2869  ;;  %v2881_v60 = vsel %vm2877_vm13, %v2866_v53, %v2868_v58 }
 0x155   : > { %4445 = vrot.lane.b32.xlu1 %v7846_v21, %s7350_s14  ;;  %7099 = vmatmul.mubr.msk.bf16.vlgmr.msra.gmra.mrb[88].mxu0 %vm394_vm2, %v7097_v56  ;;  %v2882_v62 = vsel %vm2877_vm13, %v2868_v58, %v2870_v59 }
 0x156   : > { %4657 = vrot.lane.b32.xlu0 %v7437_v11, %s7351_s17  ;;  %7100 = vmatprep.subr.msk.bf16.mxu1 %vm398_vm1, %v2881_v60  ;;  %v2902_v2 = vsel %vm398_vm1, %v2882_v62, 0  ;;  %v7115_v60 = vld [vmem:[%s8886_s0 + $0x1a] sm:$0x3]  ;;  %v3331_v62 = vsel %vm398_vm1, %v7435_v10, 0 }
 0x157   : > { %2955 = vmatpush1.bf16.msra.mxu1 %v2896_v61  ;;  %v2872_v63 = vpop.permute.xlu1 %2871  ;;  %3027 = vmatprep.mubr.bf16.mxu0 %v7333_v7 }
 0x158   : > { %v2874_v0 = vpop.permute.xlu0 %2873  ;;  %v2883_v1 = vsel %vm2877_vm13, %v2870_v59, %v2872_v63 }
 0x159   : > { %4659 = vrot.lane.b32.xlu1 %v7447_v15, %s7351_s17  ;;  %7102 = vmatprep.subr.msk.bf16.mxu0 %vm398_vm1, %v2883_v1  ;;  %v2884_v3 = vsel %vm2877_vm13, %v2872_v63, %v2874_v0 }
 0x15a   : > { %4661 = vrot.lane.b32.xlu0 %v7449_v16, %s7351_s17  ;;  %7101 = vmatmul.mubr.msk.bf16.vlgmr.msra.gmra.mrb[88].mxu1 %vm394_vm2, %v7097_v56  ;;  %v2908_v12 = vsel %vm398_vm1, %v2884_v3, 0 }
 0x15b   : > { %2996 = vmatpush1.bf16.msra.mxu0 %v2902_v2  ;;  %v2876_v6 = vpop.permute.xlu1 %2875  ;;  %3068 = vmatprep.mubr.bf16.mxu1 %v7333_v7 }
 0x15c   : > { %v2885_v8 = vsel %vm2877_vm13, %v2874_v0, %v2876_v6  ;;  %v3088_v9 = vpop.permute.xlu0 %3087  ;;  %vm6271_vm13 = vcmask 138240  }
 0x15d   : > { %4663 = vrot.lane.b32.xlu1 %v7455_v17, %s7351_s17  ;;  %7104 = vmatprep.subr.msk.bf16.mxu1 %vm398_vm1, %v2885_v8 }
 0x15e   : > { %4665 = vrot.lane.b32.xlu0 %v7435_v10, %s7351_s17  ;;  %7103 = vmatmul.mubr.msk.bf16.vlgmr.msra.gmra.mrb[92].mxu0 %vm394_vm2, %v7097_v56 }
 0x15f   : > { %3037 = vmatpush1.bf16.msra.mxu1 %v2908_v12  ;;  %v3090_v13 = vpop.permute.xlu1 %3089  ;;  %3173 = vmatprep.mubr.bf16.mxu0 %v7333_v7 }
 0x160   : > { %v3106_v20 = vsel %vm3105_vm14, %v3088_v9, %v3090_v13  ;;  %v3092_v22 = vpop.permute.xlu0 %3091  ;;  %v3337_v9 = vsel %vm398_vm1, %v7457_v18, 0 }
 0x161   : > { %4667 = vrot.lane.b32.xlu1 %v7443_v14, %s7351_s17  ;;  %v3107_v23 = vsel %vm3105_vm14, %v3090_v13, %v3092_v22  ;;  %v3118_v24 = vsel %vm398_vm1, %v3106_v20, 0 }
 0x162   : > { %4669 = vrot.lane.b32.xlu0 %v7457_v18, %s7351_s17  ;;  %7105 = vmatmul.mubr.msk.bf16.vlgmr.msra.gmra.mrb[92].mxu1 %vm394_vm2, %v7097_v56 }
 0x163   : > { %7107 = vmatprep.subr.msk.bf16.mxu0 %vm398_vm1, %v3107_v23  ;;  %v3094_v25 = vpop.permute.xlu1 %3093  ;;  %3214 = vmatprep.mubr.bf16.mxu1 %v7333_v7  ;;  %v8079_v31 = vpop.f32.mrb[0].mxu0 }
 0x164   : > { %3142 = vmatpush1.bf16.msra.mxu0 %v3118_v24  ;;  %v3108_v26 = vsel %vm3105_vm14, %v3092_v22, %v3094_v25  ;;  %v3096_v27 = vpop.permute.xlu0 %3095  ;;  %v8084_v32 = vpop.f32.mrb[1].mxu0 }
 0x165   : > { %4671 = vrot.lane.b32.xlu1 %v7463_v19, %s7351_s17  ;;  %v3109_v29 = vsel %vm3105_vm14, %v3094_v25, %v3096_v27  ;;  %v3124_v30 = vsel %vm398_vm1, %v3108_v26, 0  ;;  %v461_v34 = vpop.f32.mrb[2].mxu0 }
 0x166   : > { %4673 = vrot.lane.b32.xlu0 %v7846_v21, %s7351_s17  ;;  %7109 = vmatprep.subr.msk.bf16.mxu1 %vm398_vm1, %v3109_v29  ;;  %v462_v37 = vpop.f32.mrb[3].mxu0 }
 0x167   : > { %7108 = vmatmul.mubr.msk.bf16.vlgmr.msra.gmra.mrb[96].mxu0 %vm394_vm2, %v7106_v28  ;;  %3183 = vmatpush1.bf16.msra.mxu1 %v3124_v30  ;;  %v3098_v33 = vpop.permute.xlu1 %3097 }
 0x168   : > { %v3110_v35 = vsel %vm3105_vm14, %v3096_v27, %v3098_v33  ;;  %v3100_v36 = vpop.permute.xlu0 %3099  ;;  %3255 = vmatprep.mubr.bf16.mxu0 %v7333_v7 }
 0x169   : > { %4885 = vrot.lane.b32.xlu1 %v7437_v11, %s7352_s20  ;;  %v3111_v38 = vsel %vm3105_vm14, %v3098_v33, %v3100_v36  ;;  %v3130_v39 = vsel %vm398_vm1, %v3110_v35, 0 }
 0x16a   : > { %v8093_v40 = vpop.f32.mrb[0].mxu1  ;;  %4887 = vrot.lane.b32.xlu0 %v7447_v15, %s7352_s20  ;;  %7110 = vmatmul.mubr.msk.bf16.vlgmr.msra.gmra.mrb[96].mxu1 %vm394_vm2, %v7106_v28 }
 0x16b   : > { %v8098_v5 = vpop.f32.mrb[1].mxu1  ;;  %7111 = vmatprep.subr.msk.bf16.mxu0 %vm398_vm1, %v3111_v38  ;;  %v3102_v41 = vpop.permute.xlu1 %3101  ;;  %3296 = vmatprep.mubr.bf16.mxu1 %v7333_v7 }
 0x16c   : > { %v502_v42 = vpop.f32.mrb[2].mxu1  ;;  %3224 = vmatpush1.bf16.msra.mxu0 %v3130_v39  ;;  %v3112_v43 = vsel %vm3105_vm14, %v3100_v36, %v3102_v41  ;;  %v3104_v44 = vpop.permute.xlu0 %3103 }
 0x16d   : > { %v503_v45 = vpop.f32.mrb[3].mxu1  ;;  %v3113_v46 = vsel %vm3105_vm14, %v3102_v41, %v3104_v44  ;;  %4889 = vrot.lane.b32.xlu1 %v7449_v16, %s7352_s20  ;;  %v3136_v47 = vsel %vm398_vm1, %v3112_v43, 0  ;;  %7116 = vmatprep.subr.msk.bf16.mxu0 %vm398_vm1, %v7447_v15  ;;  %v8111_v49 = vpop.f32.mrb[4].mxu0 }
 0x16e   : > { %4891 = vrot.lane.b32.xlu0 %v7455_v17, %s7352_s20  ;;  %7113 = vmatprep.subr.msk.bf16.mxu1 %vm398_vm1, %v3113_v46  ;;  %v8116_v50 = vpop.f32.mrb[5].mxu0 }
 0x16f   : > { %7112 = vmatmul.mubr.msk.bf16.vlgmr.msra.gmra.mrb[100].mxu0 %vm394_vm2, %v7106_v28  ;;  %3265 = vmatpush1.bf16.msra.mxu1 %v3136_v47  ;;  %v3518_v51 = vpop.permute.xlu1 %3517  ;;  %v543_v52 = vpop.f32.mrb[6].mxu0 }
 0x170   : > { %v3520_v53 = vpop.permute.xlu0 %3519  ;;  %3343 = vmatpush1.bf16.msra.mxu0 %v3319_v48  ;;  %3374 = vmatprep.mubr.bf16.mxu0 %v7333_v7  ;;  %v544_v55 = vpop.f32.mrb[7].mxu0 }
 0x171   : > { %4893 = vrot.lane.b32.xlu1 %v7435_v10, %s7352_s20  ;;  %7118 = vmatprep.subr.msk.bf16.mxu1 %vm398_vm1, %v7455_v17  ;;  %v3536_v27 = vsel %vm3535_vm15, %v3518_v51, %v3520_v53 }
 0x172   : > { %4895 = vrot.lane.b32.xlu0 %v7443_v14, %s7352_s20  ;;  %7114 = vmatmul.mubr.msk.bf16.vlgmr.msra.gmra.mrb[100].mxu1 %vm394_vm2, %v7106_v28  ;;  %v8129_v56 = vpop.f32.mrb[4].mxu1  ;;  %v3548_v35 = vsel %vm398_vm1, %v3536_v27, 0 }
 0x173   : > { %v3522_v57 = vpop.permute.xlu1 %3521  ;;  %7120 = vmatprep.subr.msk.bf16.mxu0 %vm398_vm1, %v7443_v14  ;;  %3384 = vmatpush1.bf16.msra.mxu1 %v3325_v54  ;;  %v8133_v58 = vpop.f32.mrb[5].mxu1 }
 0x174   : > { %v3524_v59 = vpop.permute.xlu0 %3523  ;;  %3415 = vmatprep.mubr.bf16.mxu1 %v7333_v7  ;;  %7122 = vmatprep.subr.msk.bf16.mxu1 %vm398_vm1, %v7463_v19  ;;  %v584_v61 = vpop.f32.mrb[6].mxu1  ;;  %v3537_v0 = vsel %vm3535_vm15, %v3520_v53, %v3522_v57 }
 0x175   : > { %4897 = vrot.lane.b32.xlu1 %v7457_v18, %s7352_s20  ;;  %v585_v63 = vpop.f32.mrb[7].mxu1  ;;  %v675_v1 = vpop.f32.mrb[8].mxu0  ;;  %v3538_v34 = vsel %vm3535_vm15, %v3522_v57, %v3524_v59 }
 0x176   : > { %4899 = vrot.lane.b32.xlu0 %v7463_v19, %s7352_s20  ;;  %v8150_v3 = vadd.f32 %v675_v1, %v8079_v31  ;;  %v677_v6 = vpop.f32.mrb[9].mxu0  ;;  %v3554_v43 = vsel %vm398_vm1, %v3538_v34, 0 }
 0x177   : > { %7117 = vmatmul.mubr.msk.bf16.vlgmr.msra.gmra.mrb[104].mxu0 %vm394_vm2, %v7115_v60  ;;  %v3526_v2 = vpop.permute.xlu1 %3525  ;;  %v8156_v12 = vadd.f32 %v677_v6, %v8084_v32  ;;  %v679_v13 = vpop.f32.mrb[10].mxu0 }
 0x178   : > { %3425 = vmatpush1.bf16.msra.mxu0 %v3331_v62  ;;  %v3528_v8 = vpop.permute.xlu0 %3527  ;;  %3456 = vmatprep.mubr.bf16.mxu0 %v7333_v7  ;;  %v3539_v20 = vsel %vm3535_vm15, %v3524_v59, %v3526_v2  ;;  %v680_v22 = vpop.f32.mrb[11].mxu0 }
 0x179   : > { %7125 = vmatprep.subr.msk.bf16.mxu0 %vm398_vm1, %v3537_v0  ;;  %4901 = vrot.lane.b32.xlu1 %v7846_v21, %s7352_s20  ;;  %v3540_v48 = vsel %vm3535_vm15, %v3526_v2, %v3528_v8 }
 0x17a   : > { %5113 = vrot.lane.b32.xlu0 %v7437_v11, %s7353_s23  ;;  %7119 = vmatmul.mubr.msk.bf16.vlgmr.msra.gmra.mrb[104].mxu1 %vm394_vm2, %v7115_v60  ;;  %v716_v23 = vpop.f32.mrb[8].mxu1  ;;  %v3560_v57 = vsel %vm398_vm1, %v3540_v48, 0 }
 0x17b   : > { %3466 = vmatpush1.bf16.msra.mxu1 %v3337_v9  ;;  %v3530_v24 = vpop.permute.xlu1 %3529  ;;  %3497 = vmatprep.mubr.bf16.mxu1 %v7333_v7  ;;  %v8167_v25 = vadd.f32 %v716_v23, %v8093_v40  ;;  %v718_v26 = vpop.f32.mrb[9].mxu1 }
 0x17c   : > { %7127 = vmatprep.subr.msk.bf16.mxu1 %vm398_vm1, %v3539_v20  ;;  %v3532_v28 = vpop.permute.xlu0 %3531  ;;  %v8172_v29 = vadd.f32 %v718_v26, %v8098_v5  ;;  %v720_v30 = vpop.f32.mrb[10].mxu1  ;;  %v3541_v32 = vsel %vm3535_vm15, %v3528_v8, %v3530_v24 }
 0x17d   : > { %5115 = vrot.lane.b32.xlu1 %v7447_v15, %s7353_s23  ;;  %v721_v31 = vpop.f32.mrb[11].mxu1  ;;  %v757_v33 = vpop.f32.mrb[12].mxu0 }
 0x17e   : > { %5117 = vrot.lane.b32.xlu0 %v7449_v16, %s7353_s23  ;;  %v8183_v37 = vadd.f32 %v757_v33, %v8111_v49  ;;  %v759_v38 = vpop.f32.mrb[13].mxu0 }
 0x17f   : > { %7121 = vmatmul.mubr.msk.bf16.vlgmr.msra.gmra.mrb[108].mxu0 %vm394_vm2, %v7115_v60  ;;  %v3534_v36 = vpop.permute.xlu1 %3533  ;;  %v8187_v40 = vadd.f32 %v759_v38, %v8116_v50  ;;  %v761_v5 = vpop.f32.mrb[14].mxu0  ;;  %v7124_v50 = vld [vmem:[%s8886_s0 + $0x1c] sm:$0x3] }
 0x180   : > { %3572 = vmatpush1.bf16.msra.mxu0 %v3548_v35  ;;  %v3746_v39 = vpop.permute.xlu0 %3745  ;;  %3603 = vmatprep.mubr.bf16.mxu0 %v7333_v7  ;;  %v3543_v41 = vsel %vm3535_vm15, %v3532_v28, %v3534_v36  ;;  %v762_v42 = vpop.f32.mrb[15].mxu0 }
 0x181   : > { %7129 = vmatprep.subr.msk.bf16.mxu0 %vm398_vm1, %v3541_v32  ;;  %5119 = vrot.lane.b32.xlu1 %v7455_v17, %s7353_s23 }
 0x182   : > { %5121 = vrot.lane.b32.xlu0 %v7435_v10, %s7353_s23  ;;  %7123 = vmatmul.mubr.msk.bf16.vlgmr.msra.gmra.mrb[108].mxu1 %vm394_vm2, %v7115_v60  ;;  %v798_v44 = vpop.f32.mrb[12].mxu1 }
 0x183   : > { %3613 = vmatpush1.bf16.msra.mxu1 %v3554_v43  ;;  %v3748_v45 = vpop.permute.xlu1 %3747  ;;  %v8198_v46 = vadd.f32 %v798_v44, %v8129_v56  ;;  %v800_v47 = vpop.f32.mrb[13].mxu1  ;;  %3644 = vmatprep.mubr.bf16.mxu1 %v7333_v7  ;;  %v3542_v56 = vsel %vm3535_vm15, %v3530_v24, %v3532_v28  ;;  %v7133_v43 = vld [vmem:[%s8886_s0 + $0x1e] sm:$0x3] }
 0x184   : > { %7131 = vmatprep.subr.msk.bf16.mxu1 %vm398_vm1, %v3543_v41  ;;  %v3750_v49 = vpop.permute.xlu0 %3749  ;;  %v8207_v51 = vadd.f32 %v800_v47, %v8133_v58  ;;  %v802_v52 = vpop.f32.mrb[14].mxu1  ;;  %v3566_v2 = vsel %vm398_vm1, %v3542_v56, 0 }
 0x185   : > { %5123 = vrot.lane.b32.xlu1 %v7443_v14, %s7353_s23  ;;  %v803_v53 = vpop.f32.mrb[15].mxu1  ;;  %v3765_v54 = vsel %vm3763_vm0, %v3748_v45, %v3750_v49 }
 0x186   : > { %5125 = vrot.lane.b32.xlu0 %v7457_v18, %s7353_s23  ;;  %v895_v55 = vpop.f32.mrb[16].mxu0 }
 0x187   : > { %7126 = vmatmul.mubr.msk.bf16.vlgmr.msra.gmra.mrb[112].mxu0 %vm394_vm2, %v7124_v50  ;;  %v3752_v59 = vpop.permute.xlu1 %3751  ;;  %v8218_v58 = vadd.f32 %v895_v55, %v8150_v3  ;;  %v897_v60 = vpop.f32.mrb[17].mxu0 }
 0x188   : > { %3654 = vmatpush1.bf16.msra.mxu0 %v3560_v57  ;;  %v3754_v61 = vpop.permute.xlu0 %3753  ;;  %v8221_v62 = vadd.f32 %v897_v60, %v8156_v12  ;;  %3685 = vmatprep.mubr.bf16.mxu0 %v7333_v7  ;;  %v899_v63 = vpop.f32.mrb[18].mxu0  ;;  %v3764_v12 = vsel %vm3763_vm0, %v3746_v39, %v3748_v45  ;;  %v3766_v26 = vsel %vm3763_vm0, %v3750_v49, %v3752_v59 }
 0x189   : > { %7134 = vmatprep.subr.msk.bf16.mxu0 %vm398_vm1, %v3765_v54  ;;  %5127 = vrot.lane.b32.xlu1 %v7463_v19, %s7353_s23  ;;  %v3767_v0 = vsel %vm3763_vm0, %v3752_v59, %v3754_v61  ;;  %v900_v1 = vpop.f32.mrb[19].mxu0  ;;  %v3776_v27 = vsel %vm398_vm1, %v3764_v12, 0  ;;  %v3782_v36 = vsel %vm398_vm1, %v3766_v26, 0 }
 0x18a   : > { %5129 = vrot.lane.b32.xlu0 %v7846_v21, %s7353_s23  ;;  %7128 = vmatmul.mubr.msk.bf16.vlgmr.msra.gmra.mrb[112].mxu1 %vm394_vm2, %v7124_v50  ;;  %v936_v3 = vpop.f32.mrb[16].mxu1 }
 0x18b   : > { %3695 = vmatpush1.bf16.msra.mxu1 %v3566_v2  ;;  %v3756_v6 = vpop.permute.xlu1 %3755  ;;  %v8233_v8 = vadd.f32 %v936_v3, %v8167_v25  ;;  %v938_v9 = vpop.f32.mrb[17].mxu1  ;;  %3726 = vmatprep.mubr.bf16.mxu1 %v7333_v7 }
 0x18c   : > { %7136 = vmatprep.subr.msk.bf16.mxu1 %vm398_vm1, %v3767_v0  ;;  %v3758_v13 = vpop.permute.xlu0 %3757  ;;  %v8239_v20 = vadd.f32 %v938_v9, %v8172_v29  ;;  %v940_v22 = vpop.f32.mrb[18].mxu1  ;;  %v3768_v5 = vsel %vm3763_vm0, %v3754_v61, %v3756_v6 }
 0x18d   : > { %5341 = vrot.lane.b32.xlu1 %v7437_v11, %s7354_s25  ;;  %v941_v23 = vpop.f32.mrb[19].mxu1  ;;  %v3769_v24 = vsel %vm3763_vm0, %v3756_v6, %v3758_v13  ;;  %v3788_v47 = vsel %vm398_vm1, %v3768_v5, 0 }
 0x18e   : > { %5343 = vrot.lane.b32.xlu0 %v7447_v15, %s7354_s25  ;;  %v977_v25 = vpop.f32.mrb[20].mxu0 }
 0x18f   : > { %7130 = vmatmul.mubr.msk.bf16.vlgmr.msra.gmra.mrb[116].mxu0 %vm394_vm2, %v7124_v50  ;;  %v3760_v28 = vpop.permute.xlu1 %3759  ;;  %v8250_v29 = vadd.f32 %v977_v25, %v8183_v37  ;;  %v979_v30 = vpop.f32.mrb[21].mxu0 }
 0x190   : > { %3800 = vmatpush1.bf16.msra.mxu0 %v3776_v27  ;;  %v3762_v31 = vpop.permute.xlu0 %3761  ;;  %v8253_v32 = vadd.f32 %v979_v30, %v8187_v40  ;;  %3831 = vmatprep.mubr.bf16.mxu0 %v7333_v7  ;;  %v981_v33 = vpop.f32.mrb[22].mxu0  ;;  %v7142_v30 = vld [vmem:[%s8886_s0 + $0x20] sm:$0x3] }
 0x191   : > { %7138 = vmatprep.subr.msk.bf16.mxu0 %vm398_vm1, %v3769_v24  ;;  %v3771_v34 = vsel %vm3763_vm0, %v3760_v28, %v3762_v31  ;;  %5345 = vrot.lane.b32.xlu1 %v7449_v16, %s7354_s25  ;;  %v982_v35 = vpop.f32.mrb[23].mxu0 }
 0x192   : > { %5347 = vrot.lane.b32.xlu0 %v7455_v17, %s7354_s25  ;;  %7132 = vmatmul.mubr.msk.bf16.vlgmr.msra.gmra.mrb[116].mxu1 %vm394_vm2, %v7124_v50  ;;  %v1018_v37 = vpop.f32.mrb[20].mxu1 }
 0x193   : > { %3841 = vmatpush1.bf16.msra.mxu1 %v3782_v36  ;;  %v3974_v38 = vpop.permute.xlu1 %3973  ;;  %v8265_v39 = vadd.f32 %v1018_v37, %v8198_v46  ;;  %v1020_v40 = vpop.f32.mrb[21].mxu1  ;;  %3872 = vmatprep.mubr.bf16.mxu1 %v7333_v7  ;;  %v3770_v46 = vsel %vm3763_vm0, %v3758_v13, %v3760_v28 }
 0x194   : > { %7140 = vmatprep.subr.msk.bf16.mxu1 %vm398_vm1, %v3771_v34  ;;  %v3976_v41 = vpop.permute.xlu0 %3975  ;;  %v8271_v42 = vadd.f32 %v1020_v40, %v8207_v51  ;;  %v1022_v44 = vpop.f32.mrb[22].mxu1  ;;  %v3794_v55 = vsel %vm398_vm1, %v3770_v46, 0 }
 0x195   : > { %5349 = vrot.lane.b32.xlu1 %v7435_v10, %s7354_s25  ;;  %v1023_v45 = vpop.f32.mrb[23].mxu1 }
 0x196   : > { %5351 = vrot.lane.b32.xlu0 %v7443_v14, %s7354_s25 }
 0x197   : > { %7135 = vmatmul.mubr.msk.bf16.vlgmr.msra.gmra.mrb[120].mxu0 %vm394_vm2, %v7133_v43  ;;  %v3978_v48 = vpop.permute.xlu1 %3977  ;;  %v1123_v51 = vpop.f32.mrb[24].mxu0 }
 0x198   : > { %3882 = vmatpush1.bf16.msra.mxu0 %v3788_v47  ;;  %v3993_v49 = vsel %vm3991_vm3, %v3976_v41, %v3978_v48  ;;  %v3980_v50 = vpop.permute.xlu0 %3979  ;;  %3913 = vmatprep.mubr.bf16.mxu0 %v7333_v7  ;;  %v8286_v52 = vadd.f32 %v1123_v51, %v8218_v58  ;;  %v1125_v53 = vpop.f32.mrb[25].mxu0  ;;  %v3992_v58 = vsel %vm3991_vm3, %v3974_v38, %v3976_v41 }
 0x199   : > { %5353 = vrot.lane.b32.xlu1 %v7457_v18, %s7354_s25  ;;  %7143 = vmatprep.subr.msk.bf16.mxu0 %vm398_vm1, %v3993_v49  ;;  %v8292_v54 = vadd.f32 %v1125_v53, %v8221_v62  ;;  %v1127_v56 = vpop.f32.mrb[26].mxu0  ;;  %v3994_v1 = vsel %vm3991_vm3, %v3978_v48, %v3980_v50  ;;  %v4004_v3 = vsel %vm398_vm1, %v3992_v58, 0 }
 0x19a   : > { %5355 = vrot.lane.b32.xlu0 %v7463_v19, %s7354_s25  ;;  %7137 = vmatmul.mubr.msk.bf16.vlgmr.msra.gmra.mrb[120].mxu1 %vm394_vm2, %v7133_v43  ;;  %v1128_v59 = vpop.f32.mrb[27].mxu0  ;;  %v8374_v56 = vld [vmem:[%s7835_s24] sm:$0x3]  ;;  %s7356_s24 = smov 19  }
 0x19b   : > { %3923 = vmatpush1.bf16.msra.mxu1 %v3794_v55  ;;  %v3982_v57 = vpop.permute.xlu1 %3981  ;;  %3954 = vmatprep.mubr.bf16.mxu1 %v7333_v7  ;;  %v1164_v62 = vpop.f32.mrb[24].mxu1 }
 0x19c   : > { %v3995_v60 = vsel %vm3991_vm3, %v3980_v50, %v3982_v57  ;;  %v3984_v61 = vpop.permute.xlu0 %3983  ;;  %v8305_v63 = vadd.f32 %v1164_v62, %v8233_v8  ;;  %v1166_v0 = vpop.f32.mrb[25].mxu1 }
 0x19d   : > { %5357 = vrot.lane.b32.xlu1 %v7846_v21, %s7354_s25  ;;  %7145 = vmatprep.subr.msk.bf16.mxu1 %vm398_vm1, %v3995_v60  ;;  %v8311_v2 = vadd.f32 %v1166_v0, %v8239_v20  ;;  %v1168_v6 = vpop.f32.mrb[26].mxu1  ;;  %v4010_v20 = vsel %vm398_vm1, %v3994_v1, 0  ;;  %v3996_v27 = vsel %vm3991_vm3, %v3982_v57, %v3984_v61 }
 0x19e   : > { %5569 = vrot.lane.b32.xlu0 %v7437_v11, %s7355_s8  ;;  %v1169_v12 = vpop.f32.mrb[27].mxu1  ;;  %v4016_v35 = vsel %vm398_vm1, %v3996_v27, 0 }
 0x19f   : > { %7139 = vmatmul.mubr.msk.bf16.vlgmr.msra.gmra.mrb[124].mxu0 %vm394_vm2, %v7133_v43  ;;  %v3986_v21 = vpop.permute.xlu1 %3985  ;;  %v1205_v13 = vpop.f32.mrb[28].mxu0 }
 0x1a0   : > { %4028 = vmatpush1.bf16.msra.mxu0 %v4004_v3  ;;  %v3997_v8 = vsel %vm3991_vm3, %v3984_v61, %v3986_v21  ;;  %v3988_v9 = vpop.permute.xlu0 %3987  ;;  %4059 = vmatprep.mubr.bf16.mxu0 %v7333_v7  ;;  %v8322_v22 = vadd.f32 %v1205_v13, %v8250_v29  ;;  %v1207_v23 = vpop.f32.mrb[29].mxu0 }
 0x1a1   : > { %5571 = vrot.lane.b32.xlu1 %v7447_v15, %s7355_s8  ;;  %7147 = vmatprep.subr.msk.bf16.mxu0 %vm398_vm1, %v3997_v8  ;;  %v8328_v24 = vadd.f32 %v1207_v23, %v8253_v32  ;;  %v1209_v26 = vpop.f32.mrb[30].mxu0  ;;  %v3998_v36 = vsel %vm3991_vm3, %v3986_v21, %v3988_v9 }
 0x1a2   : > { %5573 = vrot.lane.b32.xlu0 %v7449_v16, %s7355_s8  ;;  %7141 = vmatmul.mubr.msk.bf16.vlgmr.msra.gmra.mrb[124].mxu1 %vm394_vm2, %v7133_v43  ;;  %v1210_v31 = vpop.f32.mrb[31].mxu0  ;;  %v4022_v44 = vsel %vm398_vm1, %v3998_v36, 0 }
 0x1a3   : > { %4069 = vmatpush1.bf16.msra.mxu1 %v4010_v20  ;;  %v3990_v25 = vpop.permute.xlu1 %3989  ;;  %4100 = vmatprep.mubr.bf16.mxu1 %v7333_v7  ;;  %v1246_v33 = vpop.f32.mrb[28].mxu1  ;;  %v7151_v20 = vld [vmem:[%s8886_s0 + $0x22] sm:$0x3] }
 0x1a4   : > { %v3999_v28 = vsel %vm3991_vm3, %v3988_v9, %v3990_v25  ;;  %v4202_v29 = vpop.permute.xlu0 %4201  ;;  %v8340_v32 = vadd.f32 %v1246_v33, %v8265_v39  ;;  %v1248_v34 = vpop.f32.mrb[29].mxu1 }
 0x1a5   : > { %5575 = vrot.lane.b32.xlu1 %v7455_v17, %s7355_s8  ;;  %7149 = vmatprep.subr.msk.bf16.mxu1 %vm398_vm1, %v3999_v28  ;;  %v8347_v37 = vadd.f32 %v1248_v34, %v8271_v42  ;;  %v1250_v40 = vpop.f32.mrb[30].mxu1 }
 0x1a6   : > { %5577 = vrot.lane.b32.xlu0 %v7435_v10, %s7355_s8  ;;  %v1251_v39 = vpop.f32.mrb[31].mxu1 }
 0x1a7   : > { %7144 = vmatmul.mubr.msk.bf16.vlgmr.msra.gmra.mrb[128].mxu0 %vm394_vm2, %v7142_v30  ;;  %v4204_v38 = vpop.permute.xlu1 %4203 }
 0x1a8   : > { %4110 = vmatpush1.bf16.msra.mxu0 %v4016_v35  ;;  %v4206_v5 = vpop.permute.xlu0 %4205  ;;  %4141 = vmatprep.mubr.bf16.mxu0 %v7333_v7  ;;  %v4220_v49 = vsel %vm4219_vm4, %v4202_v29, %v4204_v38 }
 0x1a9   : > { %v4221_v41 = vsel %vm4219_vm4, %v4204_v38, %v4206_v5  ;;  %5579 = vrot.lane.b32.xlu1 %v7443_v14, %s7355_s8  ;;  %v4232_v57 = vsel %vm398_vm1, %v4220_v49, 0 }
 0x1aa   : > { %v1351_v43 = vpop.f32.mrb[32].mxu0  ;;  %5581 = vrot.lane.b32.xlu0 %v7457_v18, %s7355_s8  ;;  %7146 = vmatmul.mubr.msk.bf16.vlgmr.msra.gmra.mrb[128].mxu1 %vm394_vm2, %v7142_v30 }
 0x1ab   : > { %v8356_v42 = vadd.f32 %v1351_v43, %v8286_v52  ;;  %v1353_v45 = vpop.f32.mrb[33].mxu0  ;;  %4151 = vmatpush1.bf16.msra.mxu1 %v4022_v44  ;;  %7152 = vmatprep.subr.msk.bf16.mxu0 %vm398_vm1, %v4221_v41  ;;  %v4208_v47 = vpop.permute.xlu1 %4207 }
 0x1ac   : > { %v8362_v46 = vadd.f32 %v1353_v45, %v8292_v54  ;;  %v1355_v48 = vpop.f32.mrb[34].mxu0  ;;  %v4210_v50 = vpop.permute.xlu0 %4209  ;;  %4182 = vmatprep.mubr.bf16.mxu1 %v7333_v7  ;;  %v4222_v59 = vsel %vm4219_vm4, %v4206_v5, %v4208_v47 }
 0x1ad   : > { %v1356_v51 = vpop.f32.mrb[35].mxu0  ;;  %v4223_v52 = vsel %vm4219_vm4, %v4208_v47, %v4210_v50  ;;  %5583 = vrot.lane.b32.xlu1 %v7463_v19, %s7355_s8  ;;  %v4238_v3 = vsel %vm398_vm1, %v4222_v59, 0 }
 0x1ae   : > { %v1392_v53 = vpop.f32.mrb[32].mxu1  ;;  %5585 = vrot.lane.b32.xlu0 %v8374_v56, %s7355_s8  ;;  %7154 = vmatprep.subr.msk.bf16.mxu1 %vm398_vm1, %v4223_v52 }
 0x1af   : > { %v8371_v54 = vadd.f32 %v1392_v53, %v8305_v63  ;;  %v1394_v55 = vpop.f32.mrb[33].mxu1  ;;  %7148 = vmatmul.mubr.msk.bf16.vlgmr.msra.gmra.mrb[132].mxu0 %vm394_vm2, %v7142_v30  ;;  %v4212_v60 = vpop.permute.xlu1 %4211 }
 0x1b0   : > { %v8382_v58 = vadd.f32 %v1394_v55, %v8311_v2  ;;  %v1396_v61 = vpop.f32.mrb[34].mxu1  ;;  %4256 = vmatpush1.bf16.msra.mxu0 %v4232_v57  ;;  %v4214_v62 = vpop.permute.xlu0 %4213  ;;  %4287 = vmatprep.mubr.bf16.mxu0 %v7333_v7  ;;  %v4224_v12 = vsel %vm4219_vm4, %v4210_v50, %v4212_v60 }
 0x1b1   : > { %v1397_v63 = vpop.f32.mrb[35].mxu1  ;;  %v4225_v0 = vsel %vm4219_vm4, %v4212_v60, %v4214_v62  ;;  %5797 = vrot.lane.b32.xlu1 %v7437_v11, %s7356_s24  ;;  %v4244_v27 = vsel %vm398_vm1, %v4224_v12, 0  ;;  %v7160_v61 = vld [vmem:[%s8886_s0 + $0x24] sm:$0x3] }
 0x1b2   : > { %v1433_v1 = vpop.f32.mrb[36].mxu0  ;;  %5799 = vrot.lane.b32.xlu0 %v7447_v15, %s7356_s24  ;;  %7150 = vmatmul.mubr.msk.bf16.vlgmr.msra.gmra.mrb[132].mxu1 %vm394_vm2, %v7142_v30 }
 0x1b3   : > { %v8391_v2 = vadd.f32 %v1433_v1, %v8322_v22  ;;  %v1435_v21 = vpop.f32.mrb[37].mxu0  ;;  %4297 = vmatpush1.bf16.msra.mxu1 %v4238_v3  ;;  %7156 = vmatprep.subr.msk.bf16.mxu0 %vm398_vm1, %v4225_v0  ;;  %v4216_v8 = vpop.permute.xlu1 %4215 }
 0x1b4   : > { %v8397_v6 = vadd.f32 %v1435_v21, %v8328_v24  ;;  %v1437_v9 = vpop.f32.mrb[38].mxu0  ;;  %v4218_v13 = vpop.permute.xlu0 %4217  ;;  %4328 = vmatprep.mubr.bf16.mxu1 %v7333_v7  ;;  %v4226_v28 = vsel %vm4219_vm4, %v4214_v62, %v4216_v8 }
 0x1b5   : > { %v1438_v22 = vpop.f32.mrb[39].mxu0  ;;  %v4227_v23 = vsel %vm4219_vm4, %v4216_v8, %v4218_v13  ;;  %5801 = vrot.lane.b32.xlu1 %v7449_v16, %s7356_s24  ;;  %v4250_v34 = vsel %vm398_vm1, %v4226_v28, 0 }
 0x1b6   : > { %v1474_v25 = vpop.f32.mrb[36].mxu1  ;;  %5803 = vrot.lane.b32.xlu0 %v7455_v17, %s7356_s24  ;;  %7158 = vmatprep.subr.msk.bf16.mxu1 %vm398_vm1, %v4227_v23 }
 0x1b7   : > { %v8409_v24 = vadd.f32 %v1474_v25, %v8340_v32  ;;  %v1476_v26 = vpop.f32.mrb[37].mxu1  ;;  %7153 = vmatmul.mubr.msk.bf16.vlgmr.msra.gmra.mrb[136].mxu0 %vm394_vm2, %v7151_v20  ;;  %v4430_v30 = vpop.permute.xlu1 %4429 }
 0x1b8   : > { %v8417_v29 = vadd.f32 %v1476_v26, %v8347_v37  ;;  %v1478_v31 = vpop.f32.mrb[38].mxu1  ;;  %4338 = vmatpush1.bf16.msra.mxu0 %v4244_v27  ;;  %v4432_v33 = vpop.permute.xlu0 %4431  ;;  %4369 = vmatprep.mubr.bf16.mxu0 %v7333_v7 }
 0x1b9   : > { %v1479_v32 = vpop.f32.mrb[39].mxu1  ;;  %5805 = vrot.lane.b32.xlu1 %v7435_v10, %s7356_s24  ;;  %v4448_v36 = vsel %vm4447_vm5, %v4430_v30, %v4432_v33 }
 0x1ba   : > { %5807 = vrot.lane.b32.xlu0 %v7443_v14, %s7356_s24  ;;  %7155 = vmatmul.mubr.msk.bf16.vlgmr.msra.gmra.mrb[136].mxu1 %vm394_vm2, %v7151_v20  ;;  %v4460_v44 = vsel %vm398_vm1, %v4448_v36, 0 }
 0x1bb   : > { %4379 = vmatpush1.bf16.msra.mxu1 %v4250_v34  ;;  %v4434_v35 = vpop.permute.xlu1 %4433  ;;  %4410 = vmatprep.mubr.bf16.mxu1 %v7333_v7  ;;  %v1579_v40 = vpop.f32.mrb[40].mxu0 }
 0x1bc   : > { %v4449_v37 = vsel %vm4447_vm5, %v4432_v33, %v4434_v35  ;;  %v4436_v38 = vpop.permute.xlu0 %4435  ;;  %v8431_v5 = vadd.f32 %v1579_v40, %v8356_v42  ;;  %v1581_v39 = vpop.f32.mrb[41].mxu0 }
 0x1bd   : > { %5809 = vrot.lane.b32.xlu1 %v7457_v18, %s7356_s24  ;;  %7161 = vmatprep.subr.msk.bf16.mxu0 %vm398_vm1, %v4449_v37  ;;  %v8437_v41 = vadd.f32 %v1581_v39, %v8362_v46  ;;  %v1583_v43 = vpop.f32.mrb[42].mxu0  ;;  %v4450_v45 = vsel %vm4447_vm5, %v4434_v35, %v4436_v38 }
 0x1be   : > { %5811 = vrot.lane.b32.xlu0 %v7463_v19, %s7356_s24  ;;  %v1584_v47 = vpop.f32.mrb[43].mxu0  ;;  %v4466_v50 = vsel %vm398_vm1, %v4450_v45, 0 }
 0x1bf   : > { %7157 = vmatmul.mubr.msk.bf16.vlgmr.msra.gmra.mrb[140].mxu0 %vm394_vm2, %v7151_v20  ;;  %v4438_v42 = vpop.permute.xlu1 %4437  ;;  %v1620_v46 = vpop.f32.mrb[40].mxu1 }
 0x1c0   : > { %4484 = vmatpush1.bf16.msra.mxu0 %v4460_v44  ;;  %v4451_v48 = vsel %vm4447_vm5, %v4436_v38, %v4438_v42  ;;  %v4440_v49 = vpop.permute.xlu0 %4439  ;;  %4515 = vmatprep.mubr.bf16.mxu0 %v7333_v7  ;;  %v8451_v51 = vadd.f32 %v1620_v46, %v8371_v54  ;;  %v1622_v52 = vpop.f32.mrb[41].mxu1 }
 0x1c1   : > { %5813 = vrot.lane.b32.xlu1 %v8374_v56, %s7356_s24  ;;  %7163 = vmatprep.subr.msk.bf16.mxu1 %vm398_vm1, %v4451_v48  ;;  %v8457_v53 = vadd.f32 %v1622_v52, %v8382_v58  ;;  %v1624_v57 = vpop.f32.mrb[42].mxu1  ;;  %v4452_v59 = vsel %vm4447_vm5, %v4438_v42, %v4440_v49 }
 0x1c2   : > { %6025 = vrot.lane.b32.xlu0 %v7437_v11, %s7357_s13  ;;  %7159 = vmatmul.mubr.msk.bf16.vlgmr.msra.gmra.mrb[140].mxu1 %vm394_vm2, %v7151_v20  ;;  %v1625_v62 = vpop.f32.mrb[43].mxu1  ;;  %v4472_v1 = vsel %vm398_vm1, %v4452_v59, 0 }
 0x1c3   : > { %4525 = vmatpush1.bf16.msra.mxu1 %v4466_v50  ;;  %v4442_v55 = vpop.permute.xlu1 %4441  ;;  %4556 = vmatprep.mubr.bf16.mxu1 %v7333_v7  ;;  %v1661_v63 = vpop.f32.mrb[44].mxu0  ;;  %v7169_v50 = vld [vmem:[%s8886_s0 + $0x26] sm:$0x3] }
 0x1c4   : > { %v4453_v54 = vsel %vm4447_vm5, %v4440_v49, %v4442_v55  ;;  %v4444_v60 = vpop.permute.xlu0 %4443  ;;  %v8469_v58 = vadd.f32 %v1661_v63, %v8391_v2  ;;  %v1663_v0 = vpop.f32.mrb[45].mxu0 }
 0x1c5   : > { %6027 = vrot.lane.b32.xlu1 %v7447_v15, %s7357_s13  ;;  %7165 = vmatprep.subr.msk.bf16.mxu0 %vm398_vm1, %v4453_v54  ;;  %v4454_v3 = vsel %vm4447_vm5, %v4442_v55, %v4444_v60  ;;  %v8476_v21 = vadd.f32 %v1663_v0, %v8397_v6  ;;  %v1665_v9 = vpop.f32.mrb[46].mxu0 }
 0x1c6   : > { %6029 = vrot.lane.b32.xlu0 %v7449_v16, %s7357_s13  ;;  %v1666_v13 = vpop.f32.mrb[47].mxu0  ;;  %v4478_v6 = vsel %vm398_vm1, %v4454_v3, 0 }
 0x1c7   : > { %7162 = vmatmul.mubr.msk.bf16.vlgmr.msra.gmra.mrb[144].mxu0 %vm394_vm2, %v7160_v61  ;;  %v4446_v8 = vpop.permute.xlu1 %4445  ;;  %v1702_v20 = vpop.f32.mrb[44].mxu1 }
 0x1c8   : > { %4566 = vmatpush1.bf16.msra.mxu0 %v4472_v1  ;;  %v4455_v12 = vsel %vm4447_vm5, %v4444_v60, %v4446_v8  ;;  %v4658_v2 = vpop.permute.xlu0 %4657  ;;  %4597 = vmatprep.mubr.bf16.mxu0 %v7333_v7  ;;  %v8486_v22 = vadd.f32 %v1702_v20, %v8409_v24  ;;  %v1704_v23 = vpop.f32.mrb[45].mxu1 }
 0x1c9   : > { %6031 = vrot.lane.b32.xlu1 %v7455_v17, %s7357_s13  ;;  %7167 = vmatprep.subr.msk.bf16.mxu1 %vm398_vm1, %v4455_v12  ;;  %v8492_v25 = vadd.f32 %v1704_v23, %v8417_v29  ;;  %v1706_v27 = vpop.f32.mrb[46].mxu1 }
 0x1ca   : > { %6033 = vrot.lane.b32.xlu0 %v7435_v10, %s7357_s13  ;;  %7164 = vmatmul.mubr.msk.bf16.vlgmr.msra.gmra.mrb[144].mxu1 %vm394_vm2, %v7160_v61  ;;  %v1707_v31 = vpop.f32.mrb[47].mxu1 }
 0x1cb   : > { %4607 = vmatpush1.bf16.msra.mxu1 %v4478_v6  ;;  %v4660_v26 = vpop.permute.xlu1 %4659  ;;  %4638 = vmatprep.mubr.bf16.mxu1 %v7333_v7  ;;  %v7178_v31 = vld [vmem:[%s8886_s0 + $0x28] sm:$0x3] }
 0x1cc   : > { %v4676_v28 = vsel %vm4675_vm6, %v4658_v2, %v4660_v26  ;;  %v4662_v30 = vpop.permute.xlu0 %4661 }
 0x1cd   : > { %v4688_v24 = vsel %vm398_vm1, %v4676_v28, 0  ;;  %v4677_v33 = vsel %vm4675_vm6, %v4660_v26, %v4662_v30  ;;  %6035 = vrot.lane.b32.xlu1 %v7443_v14, %s7357_s13 }
 0x1ce   : > { %v1807_v32 = vpop.f32.mrb[48].mxu0  ;;  %6037 = vrot.lane.b32.xlu0 %v7457_v18, %s7357_s13  ;;  %7170 = vmatprep.subr.msk.bf16.mxu0 %vm398_vm1, %v4677_v33 }
 0x1cf   : > { %v8501_v29 = vadd.f32 %v1807_v32, %v8431_v5  ;;  %v1809_v34 = vpop.f32.mrb[49].mxu0  ;;  %7166 = vmatmul.mubr.msk.bf16.vlgmr.msra.gmra.mrb[148].mxu0 %vm394_vm2, %v7160_v61  ;;  %v4664_v36 = vpop.permute.xlu1 %4663 }
 0x1d0   : > { %v8507_v35 = vadd.f32 %v1809_v34, %v8437_v41  ;;  %v1811_v37 = vpop.f32.mrb[50].mxu0  ;;  %4712 = vmatpush1.bf16.msra.mxu0 %v4688_v24  ;;  %v4678_v38 = vsel %vm4675_vm6, %v4662_v30, %v4664_v36  ;;  %v4666_v40 = vpop.permute.xlu0 %4665  ;;  %4743 = vmatprep.mubr.bf16.mxu0 %v7333_v7 }
 0x1d1   : > { %v1812_v39 = vpop.f32.mrb[51].mxu0  ;;  %v4694_v5 = vsel %vm398_vm1, %v4678_v38, 0  ;;  %v4679_v43 = vsel %vm4675_vm6, %v4664_v36, %v4666_v40  ;;  %6039 = vrot.lane.b32.xlu1 %v7463_v19, %s7357_s13 }
 0x1d2   : > { %v1848_v44 = vpop.f32.mrb[48].mxu1  ;;  %6041 = vrot.lane.b32.xlu0 %v8374_v56, %s7357_s13  ;;  %7168 = vmatmul.mubr.msk.bf16.vlgmr.msra.gmra.mrb[148].mxu1 %vm394_vm2, %v7160_v61 }
 0x1d3   : > { %v8517_v41 = vadd.f32 %v1848_v44, %v8451_v51  ;;  %v1850_v45 = vpop.f32.mrb[49].mxu1  ;;  %7172 = vmatprep.subr.msk.bf16.mxu1 %vm398_vm1, %v4679_v43  ;;  %v4668_v47 = vpop.permute.xlu1 %4667  ;;  %4784 = vmatprep.mubr.bf16.mxu1 %v7333_v7 }
 0x1d4   : > { %v8523_v42 = vadd.f32 %v1850_v45, %v8457_v53  ;;  %v1852_v48 = vpop.f32.mrb[50].mxu1  ;;  %4753 = vmatpush1.bf16.msra.mxu1 %v4694_v5  ;;  %v4680_v49 = vsel %vm4675_vm6, %v4666_v40, %v4668_v47  ;;  %v4670_v46 = vpop.permute.xlu0 %4669 }
 0x1d5   : > { %v1853_v51 = vpop.f32.mrb[51].mxu1  ;;  %v4700_v52 = vsel %vm398_vm1, %v4680_v49, 0  ;;  %v4681_v53 = vsel %vm4675_vm6, %v4668_v47, %v4670_v46  ;;  %6253 = vrot.lane.b32.xlu1 %v7437_v11, %s7358_s18 }
 0x1d6   : > { %v1889_v55 = vpop.f32.mrb[52].mxu0  ;;  %6255 = vrot.lane.b32.xlu0 %v7447_v15, %s7358_s18  ;;  %7174 = vmatprep.subr.msk.bf16.mxu0 %vm398_vm1, %v4681_v53 }
 0x1d7   : > { %v8536_v57 = vadd.f32 %v1889_v55, %v8469_v58  ;;  %v1891_v59 = vpop.f32.mrb[53].mxu0  ;;  %7171 = vmatmul.mubr.msk.bf16.vlgmr.msra.gmra.mrb[152].mxu0 %vm394_vm2, %v7169_v50  ;;  %v4672_v60 = vpop.permute.xlu1 %4671 }
 0x1d8   : > { %v8542_v54 = vadd.f32 %v1891_v59, %v8476_v21  ;;  %v1893_v61 = vpop.f32.mrb[54].mxu0  ;;  %4794 = vmatpush1.bf16.msra.mxu0 %v4700_v52  ;;  %v4682_v62 = vsel %vm4675_vm6, %v4670_v46, %v4672_v60  ;;  %v4674_v11 = vpop.permute.xlu0 %4673  ;;  %4825 = vmatprep.mubr.bf16.mxu0 %v7333_v7 }
 0x1d9   : > { %v1894_v63 = vpop.f32.mrb[55].mxu0  ;;  %v4706_v58 = vsel %vm398_vm1, %v4682_v62, 0  ;;  %v4683_v15 = vsel %vm4675_vm6, %v4672_v60, %v4674_v11  ;;  %6257 = vrot.lane.b32.xlu1 %v7449_v16, %s7358_s18 }
 0x1da   : > { %v1930_v0 = vpop.f32.mrb[52].mxu1  ;;  %6259 = vrot.lane.b32.xlu0 %v7455_v17, %s7358_s18  ;;  %7173 = vmatmul.mubr.msk.bf16.vlgmr.msra.gmra.mrb[152].mxu1 %vm394_vm2, %v7169_v50 }
 0x1db   : > { %v8555_v1 = vadd.f32 %v1930_v0, %v8486_v22  ;;  %v1932_v3 = vpop.f32.mrb[53].mxu1  ;;  %7176 = vmatprep.subr.msk.bf16.mxu1 %vm398_vm1, %v4683_v15  ;;  %v4886_v21 = vpop.permute.xlu1 %4885  ;;  %4866 = vmatprep.mubr.bf16.mxu1 %v7333_v7 }
 0x1dc   : > { %v8560_v8 = vadd.f32 %v1932_v3, %v8492_v25  ;;  %4835 = vmatpush1.bf16.msra.mxu1 %v4706_v58  ;;  %v4888_v16 = vpop.permute.xlu0 %4887  ;;  %v1934_v9 = vpop.f32.mrb[54].mxu1 }
 0x1dd   : > { %6261 = vrot.lane.b32.xlu1 %v7435_v10, %s7358_s18  ;;  %v1935_v17 = vpop.f32.mrb[55].mxu1  ;;  %v4904_v12 = vsel %vm4903_vm7, %v4886_v21, %v4888_v16  ;;  %v7187_v21 = vld [vmem:[%s8886_s0 + $0x2a] sm:$0x3] }
 0x1de   : > { %6263 = vrot.lane.b32.xlu0 %v7443_v14, %s7358_s18  ;;  %v4916_v14 = vsel %vm398_vm1, %v4904_v12, 0 }
 0x1df   : > { %7175 = vmatmul.mubr.msk.bf16.vlgmr.msra.gmra.mrb[156].mxu0 %vm394_vm2, %v7169_v50  ;;  %v4890_v2 = vpop.permute.xlu1 %4889  ;;  %v2035_v6 = vpop.f32.mrb[56].mxu0 }
 0x1e0   : > { %v4905_v13 = vsel %vm4903_vm7, %v4888_v16, %v4890_v2  ;;  %v4892_v20 = vpop.permute.xlu0 %4891  ;;  %4971 = vmatprep.mubr.bf16.mxu0 %v7333_v7  ;;  %v8571_v22 = vadd.f32 %v2035_v6, %v8501_v29  ;;  %v2037_v10 = vpop.f32.mrb[57].mxu0 }
 0x1e1   : > { %6265 = vrot.lane.b32.xlu1 %v7457_v18, %s7358_s18  ;;  %7179 = vmatprep.subr.msk.bf16.mxu0 %vm398_vm1, %v4905_v13  ;;  %v4906_v23 = vsel %vm4903_vm7, %v4890_v2, %v4892_v20  ;;  %v8579_v25 = vadd.f32 %v2037_v10, %v8507_v35  ;;  %v2039_v26 = vpop.f32.mrb[58].mxu0 }
 0x1e2   : > { %6267 = vrot.lane.b32.xlu0 %v7463_v19, %s7358_s18  ;;  %7177 = vmatmul.mubr.msk.bf16.vlgmr.msra.gmra.mrb[156].mxu1 %vm394_vm2, %v7169_v50  ;;  %v2040_v28 = vpop.f32.mrb[59].mxu0  ;;  %v4922_v24 = vsel %vm398_vm1, %v4906_v23, 0 }
 0x1e3   : > { %4940 = vmatpush1.bf16.msra.mxu0 %v4916_v14  ;;  %v4894_v27 = vpop.permute.xlu1 %4893  ;;  %5012 = vmatprep.mubr.bf16.mxu1 %v7333_v7 }
 0x1e4   : > { %v4907_v18 = vsel %vm4903_vm7, %v4892_v20, %v4894_v27  ;;  %v4896_v30 = vpop.permute.xlu0 %4895 }
 0x1e5   : > { %v2076_v33 = vpop.f32.mrb[56].mxu1  ;;  %6269 = vrot.lane.b32.xlu1 %v8374_v56, %s7358_s18  ;;  %7181 = vmatprep.subr.msk.bf16.mxu1 %vm398_vm1, %v4907_v18  ;;  %v4908_v19 = vsel %vm4903_vm7, %v4894_v27, %v4896_v30  ;;  %s320_s18 = scalar_lea.vmem %s8893_s7, %s8899_s28 }
 0x1e6   : > { %v2167_v32 = vadd.f32 %v2076_v33, %v8517_v41  ;;  %v2078_v29 = vpop.f32.mrb[57].mxu1  ;;  %4981 = vmatpush1.bf16.msra.mxu1 %v4922_v24  ;;  %v4928_v56 = vsel %vm398_vm1, %v4908_v19, 0 }
 0x1e7   : > { %v2168_v34 = vadd.f32 %v2078_v29, %v8523_v42  ;;  %7180 = vmatmul.mubr.msk.bf16.vlgmr.msra.gmra.mrb[160].mxu0 %vm394_vm2, %v7178_v31  ;;  %v4898_v35 = vpop.permute.xlu1 %4897  ;;  %v2080_v36 = vpop.f32.mrb[58].mxu1 }
 0x1e8   : > { %v4909_v37 = vsel %vm4903_vm7, %v4896_v30, %v4898_v35  ;;  %v4900_v38 = vpop.permute.xlu0 %4899  ;;  %v2081_v40 = vpop.f32.mrb[59].mxu1  ;;  %5053 = vmatprep.mubr.bf16.mxu0 %v7333_v7 }
 0x1e9   : > { %v2117_v39 = vpop.f32.mrb[60].mxu0  ;;  %7183 = vmatprep.subr.msk.bf16.mxu0 %vm398_vm1, %v4909_v37  ;;  %v4910_v5 = vsel %vm4903_vm7, %v4898_v35, %v4900_v38 }
 0x1ea   : > { %v2169_v43 = vadd.f32 %v2117_v39, %v8536_v57  ;;  %v2119_v44 = vpop.f32.mrb[61].mxu0  ;;  %7182 = vmatmul.mubr.msk.bf16.vlgmr.msra.gmra.mrb[160].mxu1 %vm394_vm2, %v7178_v31  ;;  %5022 = vmatpush1.bf16.msra.mxu0 %v4928_v56  ;;  %v4934_v46 = vsel %vm398_vm1, %v4910_v5, 0 }
 0x1eb   : > { %v8605_v41 = vadd.f32 %v2119_v44, %v8542_v54  ;;  %v4902_v45 = vpop.permute.xlu1 %4901  ;;  %v2121_v42 = vpop.f32.mrb[62].mxu0  ;;  %5094 = vmatprep.mubr.bf16.mxu1 %v7333_v7 }
 0x1ec   : > { %v4911_v47 = vsel %vm4903_vm7, %v4900_v38, %v4902_v45  ;;  %v5114_v48 = vpop.permute.xlu0 %5113  ;;  %v2122_v49 = vpop.f32.mrb[63].mxu0 }
 0x1ed   : > { %v2158_v50 = vpop.f32.mrb[60].mxu1  ;;  %7185 = vmatprep.subr.msk.bf16.mxu1 %vm398_vm1, %v4911_v47 }
 0x1ee   : > { %v2171_v51 = vadd.f32 %v2158_v50, %v8555_v1  ;;  %v2160_v52 = vpop.f32.mrb[61].mxu1  ;;  %5063 = vmatpush1.bf16.msra.mxu1 %v4934_v46 }
 0x1ef   : > { %v2172_v53 = vadd.f32 %v2160_v52, %v8560_v8  ;;  %7184 = vmatmul.mubr.msk.bf16.vlgmr.msra.gmra.mrb[164].mxu0 %vm394_vm2, %v7178_v31  ;;  %v5116_v55 = vpop.permute.xlu1 %5115  ;;  %v2162_v57 = vpop.f32.mrb[62].mxu1 }
 0x1f0   : > { %v5132_v59 = vsel %vm5131_vm8, %v5114_v48, %v5116_v55  ;;  %v5118_v54 = vpop.permute.xlu0 %5117  ;;  %v2163_v60 = vpop.f32.mrb[63].mxu1  ;;  %5199 = vmatprep.mubr.bf16.mxu0 %v7333_v7 }
 0x1f1   : > { %v5144_v61 = vsel %vm398_vm1, %v5132_v59, 0  ;;  %v5133_v62 = vsel %vm5131_vm8, %v5116_v55, %v5118_v54 }
 0x1f2   : > { %v2263_v11 = vpop.f32.mrb[64].mxu0  ;;  %7186 = vmatmul.mubr.msk.bf16.vlgmr.msra.gmra.mrb[164].mxu1 %vm394_vm2, %v7178_v31  ;;  %7188 = vmatprep.subr.msk.bf16.mxu0 %vm398_vm1, %v5133_v62 }
 0x1f3   : > { %v8621_v63 = vadd.f32 %v2263_v11, %v8571_v22  ;;  %v2265_v58 = vpop.f32.mrb[65].mxu0  ;;  %5168 = vmatpush1.bf16.msra.mxu0 %v5144_v61  ;;  %v5120_v15 = vpop.permute.xlu1 %5119  ;;  %5240 = vmatprep.mubr.bf16.mxu1 %v7333_v7 }
 0x1f4   : > { %v8625_v0 = vadd.f32 %v2265_v58, %v8579_v25  ;;  %v5134_v1 = vsel %vm5131_vm8, %v5118_v54, %v5120_v15  ;;  %v5122_v3 = vpop.permute.xlu0 %5121  ;;  %v2267_v8 = vpop.f32.mrb[66].mxu0 }
 0x1f5   : > { %v5150_v16 = vsel %vm398_vm1, %v5134_v1, 0  ;;  %v5135_v9 = vsel %vm5131_vm8, %v5120_v15, %v5122_v3  ;;  %v2304_v17 = vpop.f32.mrb[64].mxu1  ;;  %v2268_v12 = vpop.f32.mrb[67].mxu0 }
 0x1f6   : > { %v8633_v2 = vadd.f32 %v2304_v17, %v2167_v32  ;;  %v2306_v13 = vpop.f32.mrb[65].mxu1  ;;  %7190 = vmatprep.subr.msk.bf16.mxu1 %vm398_vm1, %v5135_v9 }
 0x1f7   : > { %v8636_v20 = vadd.f32 %v2306_v13, %v2168_v34  ;;  %7189 = vmatmul.mubr.msk.bf16.vlgmr.msra.gmra.mrb[168].mxu0 %vm394_vm2, %v7187_v21  ;;  %5209 = vmatpush1.bf16.msra.mxu1 %v5150_v16  ;;  %v5124_v6 = vpop.permute.xlu1 %5123  ;;  %v2308_v22 = vpop.f32.mrb[66].mxu1 }
 0x1f8   : > { %v5136_v10 = vsel %vm5131_vm8, %v5122_v3, %v5124_v6  ;;  %v5126_v14 = vpop.permute.xlu0 %5125  ;;  %v2309_v23 = vpop.f32.mrb[67].mxu1  ;;  %5281 = vmatprep.mubr.bf16.mxu0 %v7333_v7 }
 0x1f9   : > { %v5156_v25 = vsel %vm398_vm1, %v5136_v10, 0  ;;  %v5137_v26 = vsel %vm5131_vm8, %v5124_v6, %v5126_v14 }
 0x1fa   : > { %v2345_v27 = vpop.f32.mrb[68].mxu0  ;;  %7191 = vmatmul.mubr.msk.bf16.vlgmr.msra.gmra.mrb[168].mxu1 %vm394_vm2, %v7187_v21  ;;  %7192 = vmatprep.subr.msk.bf16.mxu0 %vm398_vm1, %v5137_v26 }
 0x1fb   : > { %v8645_v28 = vadd.f32 %v2345_v27, %v2169_v43  ;;  %v2347_v18 = vpop.f32.mrb[69].mxu0  ;;  %5250 = vmatpush1.bf16.msra.mxu0 %v5156_v25  ;;  %v5128_v30 = vpop.permute.xlu1 %5127  ;;  %5322 = vmatprep.mubr.bf16.mxu1 %v7333_v7 }
 0x1fc   : > { %v8649_v31 = vadd.f32 %v2347_v18, %v8605_v41  ;;  %v5138_v24 = vsel %vm5131_vm8, %v5126_v14, %v5128_v30  ;;  %v5130_v33 = vpop.permute.xlu0 %5129  ;;  %v2349_v19 = vpop.f32.mrb[70].mxu0 }
 0x1fd   : > { %v5162_v32 = vsel %vm398_vm1, %v5138_v24, 0  ;;  %v5139_v29 = vsel %vm5131_vm8, %v5128_v30, %v5130_v33  ;;  %v2386_v34 = vpop.f32.mrb[68].mxu1  ;;  %v2350_v35 = vpop.f32.mrb[71].mxu0 }
 0x1fe   : > { %v8654_v36 = vadd.f32 %v2386_v34, %v2171_v51  ;;  %v2388_v37 = vpop.f32.mrb[69].mxu1  ;;  %7194 = vmatprep.subr.msk.bf16.mxu1 %vm398_vm1, %v5139_v29  ;;  %v7196_v51 = vld [vmem:[%s8886_s0 + $0x2c] sm:$0x3]  ;;  %v7205_v35 = vld [vmem:[%s8886_s0 + $0x2e] sm:$0x3] }
 0x1ff   : > { %v8657_v38 = vadd.f32 %v2388_v37, %v2172_v53  ;;  %7193 = vmatmul.mubr.msk.bf16.vlgmr.msra.gmra.mrb[172].mxu0 %vm394_vm2, %v7187_v21  ;;  %5291 = vmatpush1.bf16.msra.mxu1 %v5162_v32  ;;  %v5342_v40 = vpop.permute.xlu1 %5341  ;;  %v2390_v56 = vpop.f32.mrb[70].mxu1 }
 0x200   : > { %v5344_v39 = vpop.permute.xlu0 %5343  ;;  %v2391_v5 = vpop.f32.mrb[71].mxu1  ;;  %5427 = vmatprep.mubr.bf16.mxu0 %v7333_v7 }
 0x201   : > { %v5360_v43 = vsel %vm5359_vm9, %v5342_v40, %v5344_v39 }
 0x202   : > { %7195 = vmatmul.mubr.msk.bf16.vlgmr.msra.gmra.mrb[172].mxu1 %vm394_vm2, %v7187_v21  ;;  %v5372_v47 = vsel %vm398_vm1, %v5360_v43, 0 }
 0x203   : > { %v5346_v44 = vpop.permute.xlu1 %5345  ;;  %5468 = vmatprep.mubr.bf16.mxu1 %v7333_v7 }
 0x204   : > { %v5361_v41 = vsel %vm5359_vm9, %v5344_v39, %v5346_v44  ;;  %v5348_v45 = vpop.permute.xlu0 %5347  ;;  %v2491_v42 = vpop.f32.mrb[72].mxu0 }
 0x205   : > { %v8667_v48 = vadd.f32 %v2491_v42, %v8621_v63  ;;  %v2493_v49 = vpop.f32.mrb[73].mxu0  ;;  %7197 = vmatprep.subr.msk.bf16.mxu0 %vm398_vm1, %v5361_v41  ;;  %v5362_v46 = vsel %vm5359_vm9, %v5346_v44, %v5348_v45 }
 0x206   : > { %v8672_v50 = vadd.f32 %v2493_v49, %v8625_v0  ;;  %5396 = vmatpush1.bf16.msra.mxu0 %v5372_v47  ;;  %v2495_v52 = vpop.f32.mrb[74].mxu0  ;;  %v5378_v54 = vsel %vm398_vm1, %v5362_v46, 0 }
 0x207   : > { %v5350_v53 = vpop.permute.xlu1 %5349  ;;  %v2496_v55 = vpop.f32.mrb[75].mxu0 }
 0x208   : > { %v5363_v57 = vsel %vm5359_vm9, %v5348_v45, %v5350_v53  ;;  %v5352_v59 = vpop.permute.xlu0 %5351 }
 0x209   : > { %v2532_v60 = vpop.f32.mrb[72].mxu1  ;;  %7198 = vmatmul.mubr.msk.bf16.vlgmr.msra.gmra.mrb[176].mxu0 %vm394_vm2, %v7196_v51  ;;  %7199 = vmatprep.subr.msk.bf16.mxu1 %vm398_vm1, %v5363_v57  ;;  %v5364_v61 = vsel %vm5359_vm9, %v5350_v53, %v5352_v59 }
 0x20a   : > { %v2623_v62 = vadd.f32 %v2532_v60, %v8633_v2  ;;  %v2534_v11 = vpop.f32.mrb[73].mxu1  ;;  %5437 = vmatpush1.bf16.msra.mxu1 %v5378_v54  ;;  %5509 = vmatprep.mubr.bf16.mxu0 %v7333_v7  ;;  %v5384_v21 = vsel %vm398_vm1, %v5364_v61, 0 }
 0x20b   : > { %v2624_v63 = vadd.f32 %v2534_v11, %v8636_v20  ;;  %v5354_v58 = vpop.permute.xlu1 %5353  ;;  %v2536_v15 = vpop.f32.mrb[74].mxu1 }
 0x20c   : > { %v5365_v0 = vsel %vm5359_vm9, %v5352_v59, %v5354_v58  ;;  %v5356_v1 = vpop.permute.xlu0 %5355  ;;  %v2537_v3 = vpop.f32.mrb[75].mxu1 }
 0x20d   : > { %v2573_v8 = vpop.f32.mrb[76].mxu0  ;;  %7200 = vmatmul.mubr.msk.bf16.vlgmr.msra.gmra.mrb[176].mxu1 %vm394_vm2, %v7196_v51  ;;  %7201 = vmatprep.subr.msk.bf16.mxu0 %vm398_vm1, %v5365_v0  ;;  %v5366_v16 = vsel %vm5359_vm9, %v5354_v58, %v5356_v1 }
 0x20e   : > { %v2625_v9 = vadd.f32 %v2573_v8, %v8645_v28  ;;  %v2575_v17 = vpop.f32.mrb[77].mxu0  ;;  %5478 = vmatpush1.bf16.msra.mxu0 %v5384_v21  ;;  %5550 = vmatprep.mubr.bf16.mxu1 %v7333_v7  ;;  %v5390_v10 = vsel %vm398_vm1, %v5366_v16, 0 }
 0x20f   : > { %v2626_v12 = vadd.f32 %v2575_v17, %v8649_v31  ;;  %v5358_v2 = vpop.permute.xlu1 %5357  ;;  %v2577_v13 = vpop.f32.mrb[78].mxu0 }
 0x210   : > { %v5367_v20 = vsel %vm5359_vm9, %v5356_v1, %v5358_v2  ;;  %v5570_v6 = vpop.permute.xlu0 %5569  ;;  %v2578_v22 = vpop.f32.mrb[79].mxu0 }
 0x211   : > { %v2614_v14 = vpop.f32.mrb[76].mxu1  ;;  %7202 = vmatmul.mubr.msk.bf16.vlgmr.msra.gmra.mrb[180].mxu0 %vm394_vm2, %v7196_v51  ;;  %7203 = vmatprep.subr.msk.bf16.mxu1 %vm398_vm1, %v5367_v20 }
 0x212   : > { %v2627_v23 = vadd.f32 %v2614_v14, %v8654_v36  ;;  %v2616_v25 = vpop.f32.mrb[77].mxu1  ;;  %5519 = vmatpush1.bf16.msra.mxu1 %v5390_v10  ;;  %5655 = vmatprep.mubr.bf16.mxu0 %v7333_v7 }
 0x213   : > { %v2628_v26 = vadd.f32 %v2616_v25, %v8657_v38  ;;  %v5572_v27 = vpop.permute.xlu1 %5571  ;;  %v2618_v28 = vpop.f32.mrb[78].mxu1  ;;  %v7214_v25 = vld [vmem:[%s8886_s0 + $0x30] sm:$0x3] }
 0x214   : > { %v5588_v18 = vsel %vm5587_vm10, %v5570_v6, %v5572_v27  ;;  %v5574_v30 = vpop.permute.xlu0 %5573  ;;  %v2619_v31 = vpop.f32.mrb[79].mxu1 }
 0x215   : > { %v5600_v24 = vsel %vm398_vm1, %v5588_v18, 0  ;;  %v5589_v33 = vsel %vm5587_vm10, %v5572_v27, %v5574_v30  ;;  %7204 = vmatmul.mubr.msk.bf16.vlgmr.msra.gmra.mrb[180].mxu1 %vm394_vm2, %v7196_v51 }
 0x216   : > { %v2719_v19 = vpop.f32.mrb[80].mxu0  ;;  %7206 = vmatprep.subr.msk.bf16.mxu0 %vm398_vm1, %v5589_v33  ;;  %5696 = vmatprep.mubr.bf16.mxu1 %v7333_v7 }
 0x217   : > { %v8707_v32 = vadd.f32 %v2719_v19, %v8667_v48  ;;  %v2721_v29 = vpop.f32.mrb[81].mxu0  ;;  %5624 = vmatpush1.bf16.msra.mxu0 %v5600_v24  ;;  %v5576_v34 = vpop.permute.xlu1 %5575 }
 0x218   : > { %v8713_v36 = vadd.f32 %v2721_v29, %v8672_v50  ;;  %v5590_v37 = vsel %vm5587_vm10, %v5574_v30, %v5576_v34  ;;  %v5578_v38 = vpop.permute.xlu0 %5577  ;;  %v2723_v40 = vpop.f32.mrb[82].mxu0 }
 0x219   : > { %v5606_v56 = vsel %vm398_vm1, %v5590_v37, 0  ;;  %v5591_v39 = vsel %vm5587_vm10, %v5576_v34, %v5578_v38  ;;  %v2760_v5 = vpop.f32.mrb[80].mxu1  ;;  %v2724_v43 = vpop.f32.mrb[83].mxu0 }
 0x21a   : > { %v8718_v44 = vadd.f32 %v2760_v5, %v2623_v62  ;;  %v2762_v41 = vpop.f32.mrb[81].mxu1  ;;  %7207 = vmatmul.mubr.msk.bf16.vlgmr.msra.gmra.mrb[184].mxu0 %vm394_vm2, %v7205_v35  ;;  %7208 = vmatprep.subr.msk.bf16.mxu1 %vm398_vm1, %v5591_v39 }
 0x21b   : > { %v8722_v45 = vadd.f32 %v2762_v41, %v2624_v63  ;;  %5665 = vmatpush1.bf16.msra.mxu1 %v5606_v56  ;;  %v5580_v42 = vpop.permute.xlu1 %5579  ;;  %v2764_v47 = vpop.f32.mrb[82].mxu1  ;;  %5737 = vmatprep.mubr.bf16.mxu0 %v7333_v7 }
 0x21c   : > { %v5592_v48 = vsel %vm5587_vm10, %v5578_v38, %v5580_v42  ;;  %v5582_v49 = vpop.permute.xlu0 %5581  ;;  %v2765_v46 = vpop.f32.mrb[83].mxu1 }
 0x21d   : > { %v5612_v50 = vsel %vm398_vm1, %v5592_v48, 0  ;;  %v5593_v51 = vsel %vm5587_vm10, %v5580_v42, %v5582_v49 }
 0x21e   : > { %v2801_v52 = vpop.f32.mrb[84].mxu0  ;;  %7209 = vmatmul.mubr.msk.bf16.vlgmr.msra.gmra.mrb[184].mxu1 %vm394_vm2, %v7205_v35  ;;  %7210 = vmatprep.subr.msk.bf16.mxu0 %vm398_vm1, %v5593_v51 }
 0x21f   : > { %v8730_v53 = vadd.f32 %v2801_v52, %v2625_v9  ;;  %v2803_v55 = vpop.f32.mrb[85].mxu0  ;;  %5706 = vmatpush1.bf16.msra.mxu0 %v5612_v50  ;;  %v5584_v57 = vpop.permute.xlu1 %5583  ;;  %5778 = vmatprep.mubr.bf16.mxu1 %v7333_v7 }
 0x220   : > { %v8733_v59 = vadd.f32 %v2803_v55, %v2626_v12  ;;  %v5594_v54 = vsel %vm5587_vm10, %v5582_v49, %v5584_v57  ;;  %v5586_v60 = vpop.permute.xlu0 %5585  ;;  %v2805_v61 = vpop.f32.mrb[86].mxu0  ;;  %v6479_v12 = vld [vmem:[%s8887_s1] sm:$0xf] }
 0x221   : > { %v5618_v62 = vsel %vm398_vm1, %v5594_v54, 0  ;;  %v5595_v11 = vsel %vm5587_vm10, %v5584_v57, %v5586_v60  ;;  %v2842_v63 = vpop.f32.mrb[84].mxu1  ;;  %v2806_v58 = vpop.f32.mrb[87].mxu0  ;;  %6482 = vperm.xlu0 %7303, %v6479_v12  }
 0x222   : > { %v8738_v15 = vadd.f32 %v2842_v63, %v2627_v23  ;;  %v2844_v0 = vpop.f32.mrb[85].mxu1  ;;  %7211 = vmatmul.mubr.msk.bf16.vlgmr.msra.gmra.mrb[188].mxu0 %vm394_vm2, %v7205_v35  ;;  %7212 = vmatprep.subr.msk.bf16.mxu1 %vm398_vm1, %v5595_v11 }
 0x223   : > { %v8742_v1 = vadd.f32 %v2844_v0, %v2628_v26  ;;  %5747 = vmatpush1.bf16.msra.mxu1 %v5618_v62  ;;  %v5798_v3 = vpop.permute.xlu1 %5797  ;;  %v2846_v21 = vpop.f32.mrb[86].mxu1  ;;  %5883 = vmatprep.mubr.bf16.mxu0 %v7333_v7 }
 0x224   : > { %v5800_v8 = vpop.permute.xlu0 %5799  ;;  %v2847_v16 = vpop.f32.mrb[87].mxu1 }
 0x225   : > { %v5816_v9 = vsel %vm5815_vm11, %v5798_v3, %v5800_v8 }
 0x226   : > { %7213 = vmatmul.mubr.msk.bf16.vlgmr.msra.gmra.mrb[188].mxu1 %vm394_vm2, %v7205_v35  ;;  %v5828_v6 = vsel %vm398_vm1, %v5816_v9, 0 }
 0x227   : > { %v5802_v17 = vpop.permute.xlu1 %5801  ;;  %5924 = vmatprep.mubr.bf16.mxu1 %v7333_v7 }
 0x228   : > { %v5817_v2 = vsel %vm5815_vm11, %v5800_v8, %v5802_v17  ;;  %v5804_v13 = vpop.permute.xlu0 %5803  ;;  %v2947_v20 = vpop.f32.mrb[88].mxu0 }
 0x229   : > { %v8754_v22 = vadd.f32 %v2947_v20, %v8707_v32  ;;  %v2949_v10 = vpop.f32.mrb[89].mxu0  ;;  %7215 = vmatprep.subr.msk.bf16.mxu0 %vm398_vm1, %v5817_v2  ;;  %v5818_v14 = vsel %vm5815_vm11, %v5802_v17, %v5804_v13 }
 0x22a   : > { %v8759_v23 = vadd.f32 %v2949_v10, %v8713_v36  ;;  %5852 = vmatpush1.bf16.msra.mxu0 %v5828_v6  ;;  %v2951_v26 = vpop.f32.mrb[90].mxu0  ;;  %v5834_v31 = vsel %vm398_vm1, %v5818_v14, 0 }
 0x22b   : > { %v5806_v27 = vpop.permute.xlu1 %5805  ;;  %v2952_v28 = vpop.f32.mrb[91].mxu0 }
 0x22c   : > { %v5819_v18 = vsel %vm5815_vm11, %v5804_v13, %v5806_v27  ;;  %v5808_v30 = vpop.permute.xlu0 %5807 }
 0x22d   : > { %v2988_v24 = vpop.f32.mrb[88].mxu1  ;;  %7216 = vmatmul.mubr.msk.bf16.vlgmr.msra.gmra.mrb[192].mxu0 %vm394_vm2, %v7214_v25  ;;  %7217 = vmatprep.subr.msk.bf16.mxu1 %vm398_vm1, %v5819_v18  ;;  %v5820_v33 = vsel %vm5815_vm11, %v5806_v27, %v5808_v30 }
 0x22e   : > { %v3079_v19 = vadd.f32 %v2988_v24, %v8718_v44  ;;  %v2990_v32 = vpop.f32.mrb[89].mxu1  ;;  %5893 = vmatpush1.bf16.msra.mxu1 %v5834_v31  ;;  %5965 = vmatprep.mubr.bf16.mxu0 %v7333_v7  ;;  %v5840_v40 = vsel %vm398_vm1, %v5820_v33, 0 }
 0x22f   : > { %v3080_v29 = vadd.f32 %v2990_v32, %v8722_v45  ;;  %v5810_v34 = vpop.permute.xlu1 %5809  ;;  %v2992_v35 = vpop.f32.mrb[90].mxu1 }
 0x230   : > { %v5821_v36 = vsel %vm5815_vm11, %v5808_v30, %v5810_v34  ;;  %v5812_v37 = vpop.permute.xlu0 %5811  ;;  %v2993_v38 = vpop.f32.mrb[91].mxu1 }
 0x231   : > { %v3029_v56 = vpop.f32.mrb[92].mxu0  ;;  %7218 = vmatmul.mubr.msk.bf16.vlgmr.msra.gmra.mrb[192].mxu1 %vm394_vm2, %v7214_v25  ;;  %7219 = vmatprep.subr.msk.bf16.mxu0 %vm398_vm1, %v5821_v36  ;;  %v5822_v39 = vsel %vm5815_vm11, %v5810_v34, %v5812_v37 }
 0x232   : > { %v3081_v5 = vadd.f32 %v3029_v56, %v8730_v53  ;;  %v3031_v43 = vpop.f32.mrb[93].mxu0  ;;  %5934 = vmatpush1.bf16.msra.mxu0 %v5840_v40  ;;  %6006 = vmatprep.mubr.bf16.mxu1 %v7333_v7  ;;  %v5846_v49 = vsel %vm398_vm1, %v5822_v39, 0 }
 0x233   : > { %v3082_v44 = vadd.f32 %v3031_v43, %v8733_v59  ;;  %v5814_v41 = vpop.permute.xlu1 %5813  ;;  %v3033_v45 = vpop.f32.mrb[94].mxu0 }
 0x234   : > { %v5823_v42 = vsel %vm5815_vm11, %v5812_v37, %v5814_v41  ;;  %v6026_v47 = vpop.permute.xlu0 %6025  ;;  %v3034_v48 = vpop.f32.mrb[95].mxu0 }
 0x235   : > { %v3070_v46 = vpop.f32.mrb[92].mxu1  ;;  %7220 = vmatmul.mubr.msk.bf16.vlgmr.msra.gmra.mrb[196].mxu0 %vm394_vm2, %v7214_v25  ;;  %7221 = vmatprep.subr.msk.bf16.mxu1 %vm398_vm1, %v5823_v42 }
 0x236   : > { %v3083_v50 = vadd.f32 %v3070_v46, %v8738_v15  ;;  %v3072_v51 = vpop.f32.mrb[93].mxu1  ;;  %5975 = vmatpush1.bf16.msra.mxu1 %v5846_v49  ;;  %6111 = vmatprep.mubr.bf16.mxu0 %v7333_v7  ;;  %v7223_v15 = vld [vmem:[%s8886_s0 + $0x32] sm:$0x3] }
 0x237   : > { %v3084_v52 = vadd.f32 %v3072_v51, %v8742_v1  ;;  %v6028_v53 = vpop.permute.xlu1 %6027  ;;  %v3074_v55 = vpop.f32.mrb[94].mxu1 }
 0x238   : > { %v6044_v57 = vsel %vm6043_vm12, %v6026_v47, %v6028_v53  ;;  %v6030_v59 = vpop.permute.xlu0 %6029  ;;  %v3075_v54 = vpop.f32.mrb[95].mxu1 }
 0x239   : > { %v6056_v60 = vsel %vm398_vm1, %v6044_v57, 0  ;;  %v6045_v61 = vsel %vm6043_vm12, %v6028_v53, %v6030_v59  ;;  %7222 = vmatmul.mubr.msk.bf16.vlgmr.msra.gmra.mrb[196].mxu1 %vm394_vm2, %v7214_v25  ;;  %v7232_v57 = vld [vmem:[%s8886_s0 + $0x34] sm:$0x3] }
 0x23a   : > { %v3175_v62 = vpop.f32.mrb[96].mxu0  ;;  %7224 = vmatprep.subr.msk.bf16.mxu0 %vm398_vm1, %v6045_v61  ;;  %6152 = vmatprep.mubr.bf16.mxu1 %v7333_v7 }
 0x23b   : > { %v3305_v11 = vadd.f32 %v3175_v62, %v8754_v22  ;;  %v3177_v63 = vpop.f32.mrb[97].mxu0  ;;  %6080 = vmatpush1.bf16.msra.mxu0 %v6056_v60  ;;  %v6032_v58 = vpop.permute.xlu1 %6031 }
 0x23c   : > { %v3306_v0 = vadd.f32 %v3177_v63, %v8759_v23  ;;  %v6046_v1 = vsel %vm6043_vm12, %v6030_v59, %v6032_v58  ;;  %v6034_v3 = vpop.permute.xlu0 %6033  ;;  %v3179_v21 = vpop.f32.mrb[98].mxu0 }
 0x23d   : > { %v6062_v8 = vsel %vm398_vm1, %v6046_v1, 0  ;;  %v6047_v16 = vsel %vm6043_vm12, %v6032_v58, %v6034_v3  ;;  %v3216_v9 = vpop.f32.mrb[96].mxu1  ;;  %v3180_v17 = vpop.f32.mrb[99].mxu0 }
 0x23e   : > { %v3307_v12 = vadd.f32 %v3216_v9, %v3079_v19  ;;  %v3218_v2 = vpop.f32.mrb[97].mxu1  ;;  %7225 = vmatmul.mubr.msk.bf16.vlgmr.msra.gmra.mrb[200].mxu0 %vm394_vm2, %v7223_v15  ;;  %7226 = vmatprep.subr.msk.bf16.mxu1 %vm398_vm1, %v6047_v16 }
 0x23f   : > { %v3308_v13 = vadd.f32 %v3218_v2, %v3080_v29  ;;  %6121 = vmatpush1.bf16.msra.mxu1 %v6062_v8  ;;  %v6036_v20 = vpop.permute.xlu1 %6035  ;;  %v3220_v6 = vpop.f32.mrb[98].mxu1  ;;  %6193 = vmatprep.mubr.bf16.mxu0 %v7333_v7 }
 0x240   : > { %v6048_v22 = vsel %vm6043_vm12, %v6034_v3, %v6036_v20  ;;  %v6038_v10 = vpop.permute.xlu0 %6037  ;;  %v3221_v14 = vpop.f32.mrb[99].mxu1 }
 0x241   : > { %v6068_v23 = vsel %vm398_vm1, %v6048_v22, 0  ;;  %v6049_v25 = vsel %vm6043_vm12, %v6036_v20, %v6038_v10 }
 0x242   : > { %v3257_v26 = vpop.f32.mrb[100].mxu0  ;;  %7227 = vmatmul.mubr.msk.bf16.vlgmr.msra.gmra.mrb[200].mxu1 %vm394_vm2, %v7223_v15  ;;  %7228 = vmatprep.subr.msk.bf16.mxu0 %vm398_vm1, %v6049_v25 }
 0x243   : > { %v3309_v27 = vadd.f32 %v3257_v26, %v3081_v5  ;;  %v3259_v28 = vpop.f32.mrb[101].mxu0  ;;  %6162 = vmatpush1.bf16.msra.mxu0 %v6068_v23  ;;  %v6040_v18 = vpop.permute.xlu1 %6039  ;;  %6234 = vmatprep.mubr.bf16.mxu1 %v7333_v7 }
 0x244   : > { %v3310_v30 = vadd.f32 %v3259_v28, %v3082_v44  ;;  %v6050_v31 = vsel %vm6043_vm12, %v6038_v10, %v6040_v18  ;;  %v6042_v24 = vpop.permute.xlu0 %6041  ;;  %v3261_v33 = vpop.f32.mrb[102].mxu0 }
 0x245   : > { %v6074_v19 = vsel %vm398_vm1, %v6050_v31, 0  ;;  %v6051_v32 = vsel %vm6043_vm12, %v6040_v18, %v6042_v24  ;;  %v3298_v29 = vpop.f32.mrb[100].mxu1  ;;  %v3262_v34 = vpop.f32.mrb[103].mxu0 }
 0x246   : > { %v3311_v35 = vadd.f32 %v3298_v29, %v3083_v50  ;;  %v3300_v36 = vpop.f32.mrb[101].mxu1  ;;  %7229 = vmatmul.mubr.msk.bf16.vlgmr.msra.gmra.mrb[204].mxu0 %vm394_vm2, %v7223_v15  ;;  %7230 = vmatprep.subr.msk.bf16.mxu1 %vm398_vm1, %v6051_v32 }
 0x247   : > { %v3312_v37 = vadd.f32 %v3300_v36, %v3084_v52  ;;  %6203 = vmatpush1.bf16.msra.mxu1 %v6074_v19  ;;  %v6254_v38 = vpop.permute.xlu1 %6253  ;;  %v3302_v40 = vpop.f32.mrb[102].mxu1  ;;  %6339 = vmatprep.mubr.bf16.mxu0 %v7333_v7 }
 0x248   : > { %v6256_v56 = vpop.permute.xlu0 %6255  ;;  %v3303_v39 = vpop.f32.mrb[103].mxu1 }
 0x249   : > { %v6272_v5 = vsel %vm6271_vm13, %v6254_v38, %v6256_v56 }
 0x24a   : > { %v3376_v43 = vpop.f32.mrb[104].mxu0  ;;  %7231 = vmatmul.mubr.msk.bf16.vlgmr.msra.gmra.mrb[204].mxu1 %vm394_vm2, %v7223_v15  ;;  %v6284_v46 = vsel %vm398_vm1, %v6272_v5, 0 }
 0x24b   : > { %v3506_v44 = vadd.f32 %v3376_v43, %v3305_v11  ;;  %v3378_v41 = vpop.f32.mrb[105].mxu0  ;;  %v6258_v45 = vpop.permute.xlu1 %6257  ;;  %6380 = vmatprep.mubr.bf16.mxu1 %v7333_v7 }
 0x24c   : > { %v3507_v42 = vadd.f32 %v3378_v41, %v3306_v0  ;;  %v6273_v47 = vsel %vm6271_vm13, %v6256_v56, %v6258_v45  ;;  %v6260_v48 = vpop.permute.xlu0 %6259  ;;  %v3380_v49 = vpop.f32.mrb[106].mxu0 }
 0x24d   : > { %v3417_v50 = vpop.f32.mrb[104].mxu1  ;;  %7233 = vmatprep.subr.msk.bf16.mxu0 %vm398_vm1, %v6273_v47  ;;  %v3381_v51 = vpop.f32.mrb[107].mxu0  ;;  %v6274_v52 = vsel %vm6271_vm13, %v6258_v45, %v6260_v48 }
 0x24e   : > { %v3508_v53 = vadd.f32 %v3417_v50, %v3307_v12  ;;  %v3419_v55 = vpop.f32.mrb[105].mxu1  ;;  %6308 = vmatpush1.bf16.msra.mxu0 %v6284_v46  ;;  %v6290_v63 = vsel %vm398_vm1, %v6274_v52, 0 }
 0x24f   : > { %v3509_v59 = vadd.f32 %v3419_v55, %v3308_v13  ;;  %v6262_v54 = vpop.permute.xlu1 %6261  ;;  %v3421_v60 = vpop.f32.mrb[106].mxu1 }
 0x250   : > { %v6275_v61 = vsel %vm6271_vm13, %v6260_v48, %v6262_v54  ;;  %v6264_v62 = vpop.permute.xlu0 %6263  ;;  %v3422_v11 = vpop.f32.mrb[107].mxu1 }
 0x251   : > { %7234 = vmatmul.mubr.msk.bf16.vlgmr.msra.gmra.mrb[208].mxu0 %vm394_vm2, %v7232_v57  ;;  %7235 = vmatprep.subr.msk.bf16.mxu1 %vm398_vm1, %v6275_v61  ;;  %v6276_v58 = vsel %vm6271_vm13, %v6262_v54, %v6264_v62 }
 0x252   : > { %v3458_v15 = vpop.f32.mrb[108].mxu0  ;;  %6349 = vmatpush1.bf16.msra.mxu1 %v6290_v63  ;;  %6421 = vmatprep.mubr.bf16.mxu0 %v7333_v7  ;;  %v6296_v17 = vsel %vm398_vm1, %v6276_v58, 0 }
 0x253   : > { %v3510_v0 = vadd.f32 %v3458_v15, %v3309_v27  ;;  %v3460_v1 = vpop.f32.mrb[109].mxu0  ;;  %v6266_v3 = vpop.permute.xlu1 %6265 }
 0x254   : > { %v3511_v21 = vadd.f32 %v3460_v1, %v3310_v30  ;;  %v6277_v8 = vsel %vm6271_vm13, %v6264_v62, %v6266_v3  ;;  %v6268_v16 = vpop.permute.xlu0 %6267  ;;  %v3462_v9 = vpop.f32.mrb[110].mxu0 }
 0x255   : > { %v3499_v12 = vpop.f32.mrb[108].mxu1  ;;  %7236 = vmatmul.mubr.msk.bf16.vlgmr.msra.gmra.mrb[208].mxu1 %vm394_vm2, %v7232_v57  ;;  %7237 = vmatprep.subr.msk.bf16.mxu0 %vm398_vm1, %v6277_v8  ;;  %v3463_v2 = vpop.f32.mrb[111].mxu0  ;;  %v6278_v13 = vsel %vm6271_vm13, %v6266_v3, %v6268_v16 }
 0x256   : > { %v3512_v20 = vadd.f32 %v3499_v12, %v3311_v35  ;;  %v3501_v6 = vpop.f32.mrb[109].mxu1  ;;  %6390 = vmatpush1.bf16.msra.mxu0 %v6296_v17  ;;  %6462 = vmatprep.mubr.bf16.mxu1 %v7333_v7  ;;  %v6302_v26 = vsel %vm398_vm1, %v6278_v13, 0 }
 0x257   : > { %v3513_v22 = vadd.f32 %v3501_v6, %v3312_v37  ;;  %v6270_v10 = vpop.permute.xlu1 %6269  ;;  %v3503_v14 = vpop.f32.mrb[110].mxu1 }
 0x258   : > { %v6279_v23 = vsel %vm6271_vm13, %v6268_v16, %v6270_v10  ;;  %v3504_v25 = vpop.f32.mrb[111].mxu1 }
 0x259   : > { %7238 = vmatmul.mubr.msk.bf16.vlgmr.msra.gmra.mrb[212].mxu0 %vm394_vm2, %v7232_v57  ;;  %7239 = vmatprep.subr.msk.bf16.mxu1 %vm398_vm1, %v6279_v23  ;;  %vm6547_vm1 = vcmask 1043456  }
 0x25a   : > { %v3605_v27 = vpop.f32.mrb[112].mxu0  ;;  %6431 = vmatpush1.bf16.msra.mxu1 %v6302_v26 }
 0x25b   : > { %v3735_v28 = vadd.f32 %v3605_v27, %v3506_v44  ;;  %v3607_v18 = vpop.f32.mrb[113].mxu0 }
 0x25c   : > { %v3736_v30 = vadd.f32 %v3607_v18, %v3507_v42  ;;  %v3609_v31 = vpop.f32.mrb[114].mxu0 }
 0x25d   : > { %v3646_v24 = vpop.f32.mrb[112].mxu1  ;;  %7240 = vmatmul.mubr.msk.bf16.vlgmr.msra.gmra.mrb[212].mxu1 %vm394_vm2, %v7232_v57  ;;  %v3610_v7 = vpop.f32.mrb[115].mxu0 }
 0x25e   : > { %v3737_v33 = vadd.f32 %v3646_v24, %v3508_v53  ;;  %v3648_v19 = vpop.f32.mrb[113].mxu1 }
 0x25f   : > { %v3738_v32 = vadd.f32 %v3648_v19, %v3509_v59  ;;  %v3650_v29 = vpop.f32.mrb[114].mxu1 }
 0x260   : > { %v3651_v34 = vpop.f32.mrb[115].mxu1 }
 0x262   : > { %v3687_v35 = vpop.f32.mrb[116].mxu0 }
 0x263   : > { %v3739_v36 = vadd.f32 %v3687_v35, %v3510_v0  ;;  %v3689_v37 = vpop.f32.mrb[117].mxu0 }
 0x264   : > { %v3740_v38 = vadd.f32 %v3689_v37, %v3511_v21  ;;  %v3691_v40 = vpop.f32.mrb[118].mxu0 }
 0x265   : > { %v3728_v56 = vpop.f32.mrb[116].mxu1  ;;  %v3692_v39 = vpop.f32.mrb[119].mxu0 }
 0x266   : > { %v3741_v5 = vadd.f32 %v3728_v56, %v3512_v20  ;;  %v3730_v43 = vpop.f32.mrb[117].mxu1 }
 0x267   : > { %v3742_v44 = vadd.f32 %v3730_v43, %v3513_v22  ;;  %v3732_v41 = vpop.f32.mrb[118].mxu1 }
 0x268   : > { %v3733_v45 = vpop.f32.mrb[119].mxu1 }
 0x26a   : > { %v3833_v42 = vpop.f32.mrb[120].mxu0 }
 0x26b   : > { %v3963_v47 = vadd.f32 %v3833_v42, %v3735_v28  ;;  %v3835_v48 = vpop.f32.mrb[121].mxu0 }
 0x26c   : > { %v3964_v49 = vadd.f32 %v3835_v48, %v3736_v30  ;;  %v3837_v46 = vpop.f32.mrb[122].mxu0 }
 0x26d   : > { %v3874_v50 = vpop.f32.mrb[120].mxu1  ;;  %v3838_v51 = vpop.f32.mrb[123].mxu0 }
 0x26e   : > { %v3965_v52 = vadd.f32 %v3874_v50, %v3737_v33  ;;  %v3876_v53 = vpop.f32.mrb[121].mxu1 }
 0x26f   : > { %v3966_v55 = vadd.f32 %v3876_v53, %v3738_v32  ;;  %v3878_v57 = vpop.f32.mrb[122].mxu1 }
 0x270   : > { %v3879_v59 = vpop.f32.mrb[123].mxu1 }
 0x272   : > { %v3915_v54 = vpop.f32.mrb[124].mxu0 }
 0x273   : > { %v3967_v60 = vadd.f32 %v3915_v54, %v3739_v36  ;;  %v3917_v61 = vpop.f32.mrb[125].mxu0 }
 0x274   : > { %v3968_v62 = vadd.f32 %v3917_v61, %v3740_v38  ;;  %v3919_v11 = vpop.f32.mrb[126].mxu0 }
 0x275   : > { %v3956_v63 = vpop.f32.mrb[124].mxu1  ;;  %v3920_v58 = vpop.f32.mrb[127].mxu0 }
 0x276   : > { %v3969_v15 = vadd.f32 %v3956_v63, %v3741_v5  ;;  %v3958_v0 = vpop.f32.mrb[125].mxu1 }
 0x277   : > { %v3970_v1 = vadd.f32 %v3958_v0, %v3742_v44  ;;  %v3960_v3 = vpop.f32.mrb[126].mxu1 }
 0x278   : > { %v3961_v21 = vpop.f32.mrb[127].mxu1 }
 0x27a   : > { %v4061_v8 = vpop.f32.mrb[128].mxu0 }
 0x27b   : > { %v4191_v16 = vadd.f32 %v4061_v8, %v3963_v47  ;;  %v4063_v9 = vpop.f32.mrb[129].mxu0 }
 0x27c   : > { %v4192_v17 = vadd.f32 %v4063_v9, %v3964_v49  ;;  %v4065_v12 = vpop.f32.mrb[130].mxu0 }
 0x27d   : > { %v4102_v2 = vpop.f32.mrb[128].mxu1  ;;  %v4066_v13 = vpop.f32.mrb[131].mxu0 }
 0x27e   : > { %v4193_v20 = vadd.f32 %v4102_v2, %v3965_v52  ;;  %v4104_v6 = vpop.f32.mrb[129].mxu1 }
 0x27f   : > { %v4194_v22 = vadd.f32 %v4104_v6, %v3966_v55  ;;  %v4106_v10 = vpop.f32.mrb[130].mxu1 }
 0x280   : > { %v4107_v14 = vpop.f32.mrb[131].mxu1 }
 0x282   : > { %v4143_v23 = vpop.f32.mrb[132].mxu0 }
 0x283   : > { %v4195_v25 = vadd.f32 %v4143_v23, %v3967_v60  ;;  %v4145_v26 = vpop.f32.mrb[133].mxu0 }
 0x284   : > { %v4196_v27 = vadd.f32 %v4145_v26, %v3968_v62  ;;  %v4147_v28 = vpop.f32.mrb[134].mxu0 }
 0x285   : > { %v4184_v18 = vpop.f32.mrb[132].mxu1  ;;  %v4148_v30 = vpop.f32.mrb[135].mxu0 }
 0x286   : > { %v4197_v31 = vadd.f32 %v4184_v18, %v3969_v15  ;;  %v4186_v24 = vpop.f32.mrb[133].mxu1 }
 0x287   : > { %v4198_v7 = vadd.f32 %v4186_v24, %v3970_v1  ;;  %v4188_v33 = vpop.f32.mrb[134].mxu1 }
 0x288   : > { %v4189_v19 = vpop.f32.mrb[135].mxu1 }
 0x28a   : > { %v4289_v32 = vpop.f32.mrb[136].mxu0 }
 0x28b   : > { %v4419_v29 = vadd.f32 %v4289_v32, %v4191_v16  ;;  %v4291_v34 = vpop.f32.mrb[137].mxu0 }
 0x28c   : > { %v4420_v35 = vadd.f32 %v4291_v34, %v4192_v17  ;;  %v4293_v36 = vpop.f32.mrb[138].mxu0 }
 0x28d   : > { %v4330_v37 = vpop.f32.mrb[136].mxu1  ;;  %v4294_v38 = vpop.f32.mrb[139].mxu0 }
 0x28e   : > { %v4421_v40 = vadd.f32 %v4330_v37, %v4193_v20  ;;  %v4332_v56 = vpop.f32.mrb[137].mxu1 }
 0x28f   : > { %v4422_v39 = vadd.f32 %v4332_v56, %v4194_v22  ;;  %v4334_v5 = vpop.f32.mrb[138].mxu1 }
 0x290   : > { %v4335_v43 = vpop.f32.mrb[139].mxu1 }
 0x292   : > { %v4371_v44 = vpop.f32.mrb[140].mxu0 }
 0x293   : > { %v4423_v41 = vadd.f32 %v4371_v44, %v4195_v25  ;;  %v4373_v45 = vpop.f32.mrb[141].mxu0 }
 0x294   : > { %v4424_v42 = vadd.f32 %v4373_v45, %v4196_v27  ;;  %v4375_v47 = vpop.f32.mrb[142].mxu0 }
 0x295   : > { %v4412_v48 = vpop.f32.mrb[140].mxu1  ;;  %v4376_v49 = vpop.f32.mrb[143].mxu0 }
 0x296   : > { %v4425_v46 = vadd.f32 %v4412_v48, %v4197_v31  ;;  %v4414_v50 = vpop.f32.mrb[141].mxu1 }
 0x297   : > { %v4426_v51 = vadd.f32 %v4414_v50, %v4198_v7  ;;  %v4416_v52 = vpop.f32.mrb[142].mxu1 }
 0x298   : > { %v4417_v53 = vpop.f32.mrb[143].mxu1  ;;  %v7359_v52 = vmov 0.0  }
 0x299   : > { %6636 = vmatprep.mubr.f32.mxu0 %v7359_v52  ;;  %6707 = vmatprep.mubr.f32.mxu1 %v7359_v52 }
 0x29a   : > { %v4517_v55 = vpop.f32.mrb[144].mxu0 }
 0x29b   : > { %v4647_v57 = vadd.f32 %v4517_v55, %v4419_v29  ;;  %v4519_v59 = vpop.f32.mrb[145].mxu0 }
 0x29c   : > { %v4648_v54 = vadd.f32 %v4519_v59, %v4420_v35  ;;  %v4521_v60 = vpop.f32.mrb[146].mxu0 }
 0x29d   : > { %v4558_v61 = vpop.f32.mrb[144].mxu1  ;;  %v4522_v62 = vpop.f32.mrb[147].mxu0 }
 0x29e   : > { %v4649_v11 = vadd.f32 %v4558_v61, %v4421_v40  ;;  %v4560_v63 = vpop.f32.mrb[145].mxu1 }
 0x29f   : > { %v4650_v58 = vadd.f32 %v4560_v63, %v4422_v39  ;;  %v4562_v15 = vpop.f32.mrb[146].mxu1 }
 0x2a0   : > { %v4563_v0 = vpop.f32.mrb[147].mxu1 }
 0x2a2   : > { %v4599_v1 = vpop.f32.mrb[148].mxu0 }
 0x2a3   : > { %v4651_v3 = vadd.f32 %v4599_v1, %v4423_v41  ;;  %v4601_v21 = vpop.f32.mrb[149].mxu0 }
 0x2a4   : > { %v4652_v8 = vadd.f32 %v4601_v21, %v4424_v42  ;;  %v4603_v16 = vpop.f32.mrb[150].mxu0 }
 0x2a5   : > { %v4640_v9 = vpop.f32.mrb[148].mxu1  ;;  %v4604_v17 = vpop.f32.mrb[151].mxu0 }
 0x2a6   : > { %v4653_v12 = vadd.f32 %v4640_v9, %v4425_v46  ;;  %v4642_v2 = vpop.f32.mrb[149].mxu1 }
 0x2a7   : > { %v4654_v13 = vadd.f32 %v4642_v2, %v4426_v51  ;;  %v4644_v20 = vpop.f32.mrb[150].mxu1 }
 0x2a8   : > { %v4645_v6 = vpop.f32.mrb[151].mxu1 }
 0x2aa   : > { %v4745_v22 = vpop.f32.mrb[152].mxu0 }
 0x2ab   : > { %v4875_v10 = vadd.f32 %v4745_v22, %v4647_v57  ;;  %v4747_v14 = vpop.f32.mrb[153].mxu0 }
 0x2ac   : > { %v4876_v23 = vadd.f32 %v4747_v14, %v4648_v54  ;;  %v4749_v25 = vpop.f32.mrb[154].mxu0 }
 0x2ad   : > { %v4786_v26 = vpop.f32.mrb[152].mxu1  ;;  %v4750_v27 = vpop.f32.mrb[155].mxu0 }
 0x2ae   : > { %v4877_v28 = vadd.f32 %v4786_v26, %v4649_v11  ;;  %v4788_v18 = vpop.f32.mrb[153].mxu1 }
 0x2af   : > { %v4878_v30 = vadd.f32 %v4788_v18, %v4650_v58  ;;  %v4790_v31 = vpop.f32.mrb[154].mxu1 }
 0x2b0   : > { %v4791_v24 = vpop.f32.mrb[155].mxu1 }
 0x2b2   : > { %v4827_v7 = vpop.f32.mrb[156].mxu0 }
 0x2b3   : > { %v4879_v33 = vadd.f32 %v4827_v7, %v4651_v3  ;;  %v4829_v19 = vpop.f32.mrb[157].mxu0 }
 0x2b4   : > { %v4880_v32 = vadd.f32 %v4829_v19, %v4652_v8  ;;  %v4831_v29 = vpop.f32.mrb[158].mxu0 }
 0x2b5   : > { %v4868_v34 = vpop.f32.mrb[156].mxu1  ;;  %v4832_v35 = vpop.f32.mrb[159].mxu0 }
 0x2b6   : > { %v4881_v36 = vadd.f32 %v4868_v34, %v4653_v12  ;;  %v4870_v37 = vpop.f32.mrb[157].mxu1 }
 0x2b7   : > { %v4882_v38 = vadd.f32 %v4870_v37, %v4654_v13  ;;  %v4872_v40 = vpop.f32.mrb[158].mxu1 }
 0x2b8   : > { %v4873_v56 = vpop.f32.mrb[159].mxu1 }
 0x2ba   : > { %v4973_v39 = vpop.f32.mrb[160].mxu0 }
 0x2bb   : > { %v5103_v5 = vadd.f32 %v4973_v39, %v4875_v10  ;;  %v4975_v43 = vpop.f32.mrb[161].mxu0 }
 0x2bc   : > { %v5104_v44 = vadd.f32 %v4975_v43, %v4876_v23  ;;  %v4977_v41 = vpop.f32.mrb[162].mxu0 }
 0x2bd   : > { %v5014_v45 = vpop.f32.mrb[160].mxu1  ;;  %v4978_v42 = vpop.f32.mrb[163].mxu0 }
 0x2be   : > { %v5105_v47 = vadd.f32 %v5014_v45, %v4877_v28  ;;  %v5016_v48 = vpop.f32.mrb[161].mxu1 }
 0x2bf   : > { %v5106_v49 = vadd.f32 %v5016_v48, %v4878_v30  ;;  %v5018_v46 = vpop.f32.mrb[162].mxu1 }
 0x2c0   : > { %v5019_v50 = vpop.f32.mrb[163].mxu1 }
 0x2c2   : > { %v5055_v51 = vpop.f32.mrb[164].mxu0 }
 0x2c3   : > { %v5107_v53 = vadd.f32 %v5055_v51, %v4879_v33  ;;  %v5057_v55 = vpop.f32.mrb[165].mxu0 }
 0x2c4   : > { %v5108_v57 = vadd.f32 %v5057_v55, %v4880_v32  ;;  %v5059_v59 = vpop.f32.mrb[166].mxu0 }
 0x2c5   : > { %v5096_v54 = vpop.f32.mrb[164].mxu1  ;;  %v5060_v60 = vpop.f32.mrb[167].mxu0 }
 0x2c6   : > { %v5109_v61 = vadd.f32 %v5096_v54, %v4881_v36  ;;  %v5098_v62 = vpop.f32.mrb[165].mxu1 }
 0x2c7   : > { %v5110_v11 = vadd.f32 %v5098_v62, %v4882_v38  ;;  %v5100_v63 = vpop.f32.mrb[166].mxu1 }
 0x2c8   : > { %v5101_v58 = vpop.f32.mrb[167].mxu1 }
 0x2ca   : > { %v5201_v15 = vpop.f32.mrb[168].mxu0 }
 0x2cb   : > { %v5331_v0 = vadd.f32 %v5201_v15, %v5103_v5  ;;  %v5203_v1 = vpop.f32.mrb[169].mxu0 }
 0x2cc   : > { %v5332_v3 = vadd.f32 %v5203_v1, %v5104_v44  ;;  %v5205_v21 = vpop.f32.mrb[170].mxu0 }
 0x2cd   : > { %v5242_v8 = vpop.f32.mrb[168].mxu1  ;;  %v5206_v16 = vpop.f32.mrb[171].mxu0 }
 0x2ce   : > { %v5333_v9 = vadd.f32 %v5242_v8, %v5105_v47  ;;  %v5244_v17 = vpop.f32.mrb[169].mxu1 }
 0x2cf   : > { %v5334_v12 = vadd.f32 %v5244_v17, %v5106_v49  ;;  %v5246_v2 = vpop.f32.mrb[170].mxu1 }
 0x2d0   : > { %v5247_v13 = vpop.f32.mrb[171].mxu1 }
 0x2d2   : > { %v5283_v20 = vpop.f32.mrb[172].mxu0 }
 0x2d3   : > { %v5335_v6 = vadd.f32 %v5283_v20, %v5107_v53  ;;  %v5285_v22 = vpop.f32.mrb[173].mxu0 }
 0x2d4   : > { %v5336_v10 = vadd.f32 %v5285_v22, %v5108_v57  ;;  %v5287_v14 = vpop.f32.mrb[174].mxu0 }
 0x2d5   : > { %v5324_v23 = vpop.f32.mrb[172].mxu1  ;;  %v5288_v25 = vpop.f32.mrb[175].mxu0 }
 0x2d6   : > { %v5337_v26 = vadd.f32 %v5324_v23, %v5109_v61  ;;  %v5326_v27 = vpop.f32.mrb[173].mxu1 }
 0x2d7   : > { %v5338_v28 = vadd.f32 %v5326_v27, %v5110_v11  ;;  %v5328_v18 = vpop.f32.mrb[174].mxu1 }
 0x2d8   : > { %v5329_v30 = vpop.f32.mrb[175].mxu1 }
 0x2dc   : > { %v5429_v31 = vpop.f32.mrb[176].mxu0 }
 0x2dd   : > { %v5559_v24 = vadd.f32 %v5429_v31, %v5331_v0  ;;  %v5431_v7 = vpop.f32.mrb[177].mxu0 }
 0x2de   : > { %v5560_v33 = vadd.f32 %v5431_v7, %v5332_v3  ;;  %v5433_v19 = vpop.f32.mrb[178].mxu0 }
 0x2df   : > { %v5434_v32 = vpop.f32.mrb[179].mxu0 }
 0x2e0   : > { %v5470_v29 = vpop.f32.mrb[176].mxu1 }
 0x2e1   : > { %v5561_v34 = vadd.f32 %v5470_v29, %v5333_v9  ;;  %v5472_v35 = vpop.f32.mrb[177].mxu1 }
 0x2e2   : > { %v5562_v36 = vadd.f32 %v5472_v35, %v5334_v12  ;;  %v5474_v37 = vpop.f32.mrb[178].mxu1 }
 0x2e3   : > { %v5475_v38 = vpop.f32.mrb[179].mxu1 }
 0x2e4   : > { %v5511_v40 = vpop.f32.mrb[180].mxu0 }
 0x2e5   : > { %v5563_v56 = vadd.f32 %v5511_v40, %v5335_v6  ;;  %v5513_v39 = vpop.f32.mrb[181].mxu0 }
 0x2e6   : > { %v5564_v5 = vadd.f32 %v5513_v39, %v5336_v10  ;;  %v5515_v43 = vpop.f32.mrb[182].mxu0 }
 0x2e7   : > { %v5516_v44 = vpop.f32.mrb[183].mxu0 }
 0x2e8   : > { %v5552_v41 = vpop.f32.mrb[180].mxu1 }
 0x2e9   : > { %v5565_v45 = vadd.f32 %v5552_v41, %v5337_v26  ;;  %v5554_v42 = vpop.f32.mrb[181].mxu1 }
 0x2ea   : > { %v5566_v47 = vadd.f32 %v5554_v42, %v5338_v28  ;;  %v5556_v48 = vpop.f32.mrb[182].mxu1 }
 0x2eb   : > { %v5557_v49 = vpop.f32.mrb[183].mxu1 }
 0x2ed   : > { %v5657_v46 = vpop.f32.mrb[184].mxu0 }
 0x2ee   : > { %v5787_v50 = vadd.f32 %v5657_v46, %v5559_v24  ;;  %v5659_v51 = vpop.f32.mrb[185].mxu0 }
 0x2ef   : > { %v5788_v53 = vadd.f32 %v5659_v51, %v5560_v33  ;;  %v5661_v55 = vpop.f32.mrb[186].mxu0 }
 0x2f0   : > { %v5662_v57 = vpop.f32.mrb[187].mxu0 }
 0x2f1   : > { %v5698_v59 = vpop.f32.mrb[184].mxu1 }
 0x2f2   : > { %v5789_v54 = vadd.f32 %v5698_v59, %v5561_v34  ;;  %v5700_v60 = vpop.f32.mrb[185].mxu1 }
 0x2f3   : > { %v5790_v61 = vadd.f32 %v5700_v60, %v5562_v36  ;;  %v5702_v62 = vpop.f32.mrb[186].mxu1 }
 0x2f4   : > { %v5703_v11 = vpop.f32.mrb[187].mxu1 }
 0x2f5   : > { %v5739_v63 = vpop.f32.mrb[188].mxu0  ;;  %v6483_v11 = vpop.permute.xlu0 %6482 }
 0x2f6   : > { %v5791_v58 = vadd.f32 %v5739_v63, %v5563_v56  ;;  %v5741_v15 = vpop.f32.mrb[189].mxu0 }
 0x2f7   : > { %v5792_v0 = vadd.f32 %v5741_v15, %v5564_v5  ;;  %v5743_v1 = vpop.f32.mrb[190].mxu0 }
 0x2f8   : > { %v5744_v3 = vpop.f32.mrb[191].mxu0 }
 0x2f9   : > { %v5780_v21 = vpop.f32.mrb[188].mxu1 }
 0x2fa   : > { %v5793_v8 = vadd.f32 %v5780_v21, %v5565_v45  ;;  %v5782_v16 = vpop.f32.mrb[189].mxu1 }
 0x2fb   : > { %v5794_v9 = vadd.f32 %v5782_v16, %v5566_v47  ;;  %v5784_v17 = vpop.f32.mrb[190].mxu1 }
 0x2fc   : > { %v5785_v12 = vpop.f32.mrb[191].mxu1 }
 0x300   : > { %v5885_v2 = vpop.f32.mrb[192].mxu0 }
 0x301   : > { %v6015_v13 = vadd.f32 %v5885_v2, %v5787_v50  ;;  %v5887_v20 = vpop.f32.mrb[193].mxu0 }
 0x302   : > { %v6016_v6 = vadd.f32 %v5887_v20, %v5788_v53  ;;  %v5889_v22 = vpop.f32.mrb[194].mxu0 }
 0x303   : > { %v5890_v10 = vpop.f32.mrb[195].mxu0 }
 0x304   : > { %v5926_v14 = vpop.f32.mrb[192].mxu1 }
 0x305   : > { %v6017_v23 = vadd.f32 %v5926_v14, %v5789_v54  ;;  %v5928_v25 = vpop.f32.mrb[193].mxu1 }
 0x306   : > { %v6018_v26 = vadd.f32 %v5928_v25, %v5790_v61  ;;  %v5930_v27 = vpop.f32.mrb[194].mxu1 }
 0x307   : > { %v5931_v28 = vpop.f32.mrb[195].mxu1 }
 0x308   : > { %v5967_v18 = vpop.f32.mrb[196].mxu0 }
 0x309   : > { %v6019_v30 = vadd.f32 %v5967_v18, %v5791_v58  ;;  %v5969_v31 = vpop.f32.mrb[197].mxu0 }
 0x30a   : > { %v6020_v24 = vadd.f32 %v5969_v31, %v5792_v0  ;;  %v5971_v7 = vpop.f32.mrb[198].mxu0 }
 0x30b   : > { %v5972_v33 = vpop.f32.mrb[199].mxu0 }
 0x30c   : > { %v6008_v19 = vpop.f32.mrb[196].mxu1 }
 0x30d   : > { %v6021_v32 = vadd.f32 %v6008_v19, %v5793_v8  ;;  %v6010_v29 = vpop.f32.mrb[197].mxu1 }
 0x30e   : > { %v6022_v34 = vadd.f32 %v6010_v29, %v5794_v9  ;;  %v6012_v35 = vpop.f32.mrb[198].mxu1 }
 0x30f   : > { %v6013_v36 = vpop.f32.mrb[199].mxu1 }
 0x311   : > { %v6113_v37 = vpop.f32.mrb[200].mxu0 }
 0x312   : > { %v6243_v38 = vadd.f32 %v6113_v37, %v6015_v13  ;;  %v6115_v40 = vpop.f32.mrb[201].mxu0 }
 0x313   : > { %v6244_v56 = vadd.f32 %v6115_v40, %v6016_v6  ;;  %v6117_v39 = vpop.f32.mrb[202].mxu0 }
 0x314   : > { %v6118_v5 = vpop.f32.mrb[203].mxu0 }
 0x315   : > { %v6154_v43 = vpop.f32.mrb[200].mxu1 }
 0x316   : > { %v6245_v44 = vadd.f32 %v6154_v43, %v6017_v23  ;;  %v6156_v41 = vpop.f32.mrb[201].mxu1 }
 0x317   : > { %v6246_v45 = vadd.f32 %v6156_v41, %v6018_v26  ;;  %v6158_v42 = vpop.f32.mrb[202].mxu1 }
 0x318   : > { %v6159_v47 = vpop.f32.mrb[203].mxu1 }
 0x319   : > { %v6195_v48 = vpop.f32.mrb[204].mxu0 }
 0x31a   : > { %v6247_v49 = vadd.f32 %v6195_v48, %v6019_v30  ;;  %v6197_v46 = vpop.f32.mrb[205].mxu0 }
 0x31b   : > { %v6248_v50 = vadd.f32 %v6197_v46, %v6020_v24  ;;  %v6199_v51 = vpop.f32.mrb[206].mxu0 }
 0x31c   : > { %v6200_v53 = vpop.f32.mrb[207].mxu0 }
 0x31d   : > { %v6236_v55 = vpop.f32.mrb[204].mxu1  ;;  %v6541_v53 = vld [vmem:[%s8891_s5] sm:$0x1] }
 0x31e   : > { %v6249_v57 = vadd.f32 %v6236_v55, %v6021_v32  ;;  %v6238_v59 = vpop.f32.mrb[205].mxu1 }
 0x31f   : > { %v6250_v54 = vadd.f32 %v6238_v59, %v6022_v34  ;;  %v6240_v60 = vpop.f32.mrb[206].mxu1 }
 0x320   : > { %v6241_v61 = vpop.f32.mrb[207].mxu1 }
 0x324   : > { %v6341_v62 = vpop.f32.mrb[208].mxu0 }
 0x325   : > { %v6471_v63 = vadd.f32 %v6341_v62, %v6243_v38  ;;  %v6343_v58 = vpop.f32.mrb[209].mxu0 }
 0x326   : > { %v6472_v15 = vadd.f32 %v6343_v58, %v6244_v56  ;;  %v6345_v0 = vpop.f32.mrb[210].mxu0 }
 0x327   : > { %v6346_v1 = vpop.f32.mrb[211].mxu0  ;;  %v8845_v3 = vadd.f32 %v6483_v11, %v6471_v63 }
 0x328   : > { %v6382_v21 = vpop.f32.mrb[208].mxu1  ;;  %v6486_v8 = vadd.f32 %v6483_v11, %v6472_v15 }
 0x329   : > { %v6473_v16 = vadd.f32 %v6382_v21, %v6245_v44  ;;  %v6384_v9 = vpop.f32.mrb[209].mxu1  ;;  %v6501_v17 = vmin.f32 %v8845_v3, 0.0  ;;  %vm6493_vm15 = vcmp.gt.f32.partialorder %v8845_v3, 0.0 }
 0x32a   : > { %v6474_v12 = vadd.f32 %v6384_v9, %v6246_v45  ;;  %v6386_v2 = vpop.f32.mrb[210].mxu1  ;;  %v6502_v13 = vmin.f32 %v6486_v8, 0.0  ;;  %vm6494_vm14 = vcmp.gt.f32.partialorder %v6486_v8, 0.0 }
 0x32b   : > { %v8848_v20 = vadd.f32 %v6483_v11, %v6473_v16  ;;  %v6387_v6 = vpop.f32.mrb[211].mxu1  ;;  %v6509_v22 = vmul.f32 1.442695, %v6501_v17 }
 0x32c   : > { %v6488_v10 = vadd.f32 %v6483_v11, %v6474_v12  ;;  %v6423_v14 = vpop.f32.mrb[212].mxu0  ;;  %v6511_v23 = vmul.f32 1.442695, %v6502_v13  ;;  %v6543_v12 = vstv %s6542_s15 }
 0x32d   : > { %v6503_v25 = vmin.f32 %v8848_v20, 0.0  ;;  %v6475_v26 = vadd.f32 %v6423_v14, %v6247_v49  ;;  %v6425_v27 = vpop.f32.mrb[213].mxu0  ;;  %7306 = vpow2.f32 %v6509_v22  ;;  %vm6495_vm3 = vcmp.gt.f32.partialorder %v8848_v20, 0.0 }
 0x32e   : > { %v6504_v28 = vmin.f32 %v6488_v10, 0.0  ;;  %v6476_v18 = vadd.f32 %v6425_v27, %v6248_v50  ;;  %v6427_v30 = vpop.f32.mrb[214].mxu0  ;;  %7308 = vpow2.f32 %v6511_v23  ;;  %vm6496_vm0 = vcmp.gt.f32.partialorder %v6488_v10, 0.0 }
 0x32f   : > { %v6513_v31 = vmul.f32 1.442695, %v6503_v25  ;;  %v8851_v24 = vadd.f32 %v6483_v11, %v6475_v26  ;;  %v6428_v7 = vpop.f32.mrb[215].mxu0 }
 0x330   : > { %v6515_v33 = vmul.f32 1.442695, %v6504_v28  ;;  %v6490_v19 = vadd.f32 %v6483_v11, %v6476_v18  ;;  %v6464_v32 = vpop.f32.mrb[212].mxu1 }
 0x331   : > { %7310 = vpow2.f32 %v6513_v31  ;;  %v6505_v29 = vmin.f32 %v8851_v24, 0.0  ;;  %v6477_v34 = vadd.f32 %v6464_v32, %v6249_v57  ;;  %v6466_v35 = vpop.f32.mrb[213].mxu1  ;;  %vm6497_vm5 = vcmp.gt.f32.partialorder %v8851_v24, 0.0 }
 0x332   : > { %7312 = vpow2.f32 %v6515_v33  ;;  %v6506_v36 = vmin.f32 %v6490_v19, 0.0  ;;  %v6478_v37 = vadd.f32 %v6466_v35, %v6250_v54  ;;  %v6468_v38 = vpop.f32.mrb[214].mxu1  ;;  %vm6498_vm4 = vcmp.gt.f32.partialorder %v6490_v19, 0.0 }
 0x333   : > { %v6517_v40 = vmul.f32 1.442695, %v6505_v29  ;;  %v6491_v56 = vadd.f32 %v6483_v11, %v6477_v34  ;;  %v6469_v39 = vpop.f32.mrb[215].mxu1 }
 0x334   : > { %v6519_v5 = vmul.f32 1.442695, %v6506_v36  ;;  %v6492_v43 = vadd.f32 %v6483_v11, %v6478_v37 }
 0x335   : > { %7314 = vpow2.f32 %v6517_v40  ;;  %v6507_v44 = vmin.f32 %v6491_v56, 0.0  ;;  %vm6499_vm7 = vcmp.gt.f32.partialorder %v6491_v56, 0.0 }
 0x336   : > { %7316 = vpow2.f32 %v6519_v5  ;;  %v6508_v41 = vmin.f32 %v6492_v43, 0.0  ;;  %vm6500_vm6 = vcmp.gt.f32.partialorder %v6492_v43, 0.0 }
 0x337   : > { %v7307_v45 = vpop.eup %7306  ;;  %v6521_v42 = vmul.f32 1.442695, %v6507_v44 }
 0x338   : > { %v7309_v47 = vpop.eup %7308  ;;  %v6523_v48 = vmul.f32 1.442695, %v6508_v41  ;;  %v7241_v49 = vadd.f32 -1.0, %v7307_v45 }
 0x339   : > { %7318 = vpow2.f32 %v6521_v42  ;;  %v7242_v46 = vadd.f32 -1.0, %v7309_v47 }
 0x33a   : > { %7320 = vpow2.f32 %v6523_v48  ;;  %v6533_v57 = vsel %vm6493_vm15, %v8845_v3, %v7241_v49 }
 0x33b   : > { %v7311_v50 = vpop.eup %7310  ;;  %v6534_v51 = vsel %vm6494_vm14, %v6486_v8, %v7242_v46 }
 0x33c   : > { %v7313_v55 = vpop.eup %7312  ;;  %7249 = vmatprep.subr.msk.mxu0 %vm6547_vm1, %v6534_v51  ;;  %v7243_v59 = vadd.f32 -1.0, %v7311_v50 }
 0x33d   : > { %7250 = vmatpush1.msk.msra.mxu0 %vm6547_vm1, %v6533_v57  ;;  %v7244_v54 = vadd.f32 -1.0, %v7313_v55 }
 0x33e   : > { %7251 = vmatmul.mubr.msk.f32.vlgmr.msra.gmra.mrb[216].mxu0 %vm394_vm2, %v6541_v53  ;;  %v6535_v11 = vsel %vm6495_vm3, %v8848_v20, %v7243_v59 }
 0x33f   : > { %v7315_v60 = vpop.eup %7314  ;;  %v6536_v61 = vsel %vm6496_vm0, %v6488_v10, %v7244_v54  ;;  %6778 = vmatprep.mubr.f32.mxu0 %v7359_v52 }
 0x340   : > { %v7317_v62 = vpop.eup %7316  ;;  %7252 = vmatprep.subr.msk.mxu1 %vm6547_vm1, %v6536_v61  ;;  %v7245_v63 = vadd.f32 -1.0, %v7315_v60 }
 0x341   : > { %7253 = vmatpush1.msk.msra.mxu1 %vm6547_vm1, %v6535_v11  ;;  %v7246_v58 = vadd.f32 -1.0, %v7317_v62 }
 0x342   : > { %7254 = vmatmul.mubr.msk.f32.vlgmr.msra.gmra.mrb[216].mxu1 %vm394_vm2, %v6541_v53  ;;  %v6537_v3 = vsel %vm6497_vm5, %v8851_v24, %v7245_v63 }
 0x343   : > { %v7319_v15 = vpop.eup %7318  ;;  %v6538_v0 = vsel %vm6498_vm4, %v6490_v19, %v7246_v58  ;;  %6849 = vmatprep.mubr.f32.mxu1 %v7359_v52  ;;  %v7360_v52 = vmov 1966171168  }
 0x344   : > { %v7321_v1 = vpop.eup %7320  ;;  %7255 = vmatprep.subr.msk.mxu0 %vm6547_vm1, %v6538_v0  ;;  %v7247_v21 = vadd.f32 -1.0, %v7319_v15  ;;  %v6869_v17 = vunpack.c.l.s4 %v7360_v52 }
 0x345   : > { %7256 = vmatpush1.msk.msra.mxu0 %vm6547_vm1, %v6537_v3  ;;  %v7248_v8 = vadd.f32 -1.0, %v7321_v1 }
 0x346   : > { %7257 = vmatmul.mubr.msk.f32.vlgmr.msra.gmra.mrb[218].mxu0 %vm394_vm2, %v6541_v53  ;;  %v6539_v9 = vsel %vm6499_vm7, %v6491_v56, %v7247_v21  ;;  %v6870_v13 = vunpack.c.0.s8 %v6869_v17 }
 0x347   : > { %v6540_v16 = vsel %vm6500_vm6, %v6492_v43, %v7248_v8 }
 0x348   : > { %7258 = vmatprep.subr.msk.mxu1 %vm6547_vm1, %v6540_v16  ;;  %v6873_v23 = vsub.s32 %v6870_v13, %v7417_v4 }
 0x349   : > { %7259 = vmatpush1.msk.msra.mxu1 %vm6547_vm1, %v6539_v9 }
 0x34a   : > { %7260 = vmatmul.mubr.msk.f32.vlgmr.msra.gmra.mrb[218].mxu1 %vm394_vm2, %v6541_v53 }
 0x411   : > { %v6638_v2 = vpop.f32.mrb[216].mxu0 }
 0x412   : > { %v6639_v20 = vadd.f32 %v6638_v2, %v6543_v12  ;;  %v6640_v6 = vpop.f32.mrb[217].mxu0 }
 0x413   : > { %v6641_v22 = vadd.f32 %v6640_v6, %v6543_v12 }
 0x415   : > { %v6709_v10 = vpop.f32.mrb[216].mxu1  ;;  %v6864_v14 = vcombine.low %v6639_v20, %v6641_v22 }
 0x416   : > { %v6710_v25 = vadd.f32 %v6709_v10, %v6543_v12  ;;  %v6711_v26 = vpop.f32.mrb[217].mxu1 }
 0x417   : > { %v6712_v27 = vadd.f32 %v6711_v26, %v6543_v12  ;;  %v6874_v28 = vrot.slane %v6864_v14, %v6873_v23 }
 0x419   : > { %v6865_v18 = vcombine.low %v6710_v25, %v6712_v27  ;;  %v6780_v30 = vpop.f32.mrb[218].mxu0 }
 0x41a   : > { %v6781_v31 = vadd.f32 %v6780_v30, %v6543_v12  ;;  %v6782_v24 = vpop.f32.mrb[219].mxu0 }
 0x41b   : > { %v6881_v7 = vrot.slane %v6865_v18, %v6873_v23  ;;  %v6783_v33 = vadd.f32 %v6782_v24, %v6543_v12 }
 0x41d   : > { %v6896_v19 = vcombine.low %v6874_v28, %v6881_v7  ;;  %v6851_v32 = vpop.f32.mrb[218].mxu1  ;;  %v6866_v29 = vcombine.low %v6781_v31, %v6783_v33 }
 0x41e   : > { %v6852_v34 = vadd.f32 %v6851_v32, %v6543_v12  ;;  %v6853_v35 = vpop.f32.mrb[219].mxu1 }
 0x41f   : > { %v6854_v36 = vadd.f32 %v6853_v35, %v6543_v12  ;;  %v6888_v4 = vrot.slane %v6866_v29, %v6873_v23  ;;  %v6904_v56 = vrot.slane %v6896_v19, %v6873_v23 }
 0x421   : > { %v6867_v37 = vcombine.low %v6852_v34, %v6854_v36 }
 0x423   : > { %v6895_v38 = vrot.slane %v6867_v37, %v6873_v23 }
 0x425   : > { %v6897_v40 = vcombine.low %v6888_v4, %v6895_v38 }
 0x427   : > { %v6911_v39 = vrot.slane %v6897_v40, %v6873_v23 }
 0x429   : > { %v6912_v5 = vcombine.low %v6904_v56, %v6911_v39 }
 0x42b   : > { %6914 = vst [vmem:[%s320_s18] sm:$0xff] %v6912_v5 }
 0x42c PF: > { %s18_s26 = sadd.s32 1, %s7329_s26  }
 0x42d   : > { %p15_p6 = scmp.ge.s32.totalorder %s18_s26, 4  }
 0x42f   :  { %17 = sbr.rel (!%p15_p6) target bundleno = 2 (0x2), region = 110 }

</bundles_post_ra>
